<compile_context>
chip_gen: v5e
topology: v5e:2x2
jax: 0.10.0
libtpu: 0.0.40
codegen_flags: <defaults>
</compile_context>

<pallas_src>
import functools
import math

import jax
import jax.numpy as jnp
from jax.experimental import pallas as pl
from jax.experimental.pallas import tpu as pltpu

_MAX_SINGLE_K = 4096            # whole-K-resident GEMM threshold
_VMEM_LIMIT = 48 * 1024 * 1024  # safe under v7x's 64 MiB physical VMEM


def _apply_act(y, act):
    if act == "relu":
        return jnp.maximum(y, 0.0)
    if act == "sigmoid":
        return jax.nn.sigmoid(y)
    if act == "leaky_relu":
        return jnp.where(y > 0, y, 0.01 * y)
    return y


def _round_up(x, m):
    return (x + m - 1) // m * m


# -----------------------------------------------------------------------------
# Pallas GEMM:  y = act((x @ w) + bias)     (BN scale pre-folded into w)
# -----------------------------------------------------------------------------

def _mm_kernel_single_k(x_ref, w_ref, b_ref, o_ref, *, act):
    # Whole K resident: one MXU pass per output tile, epilogue in f32.
    y = jnp.dot(x_ref[...], w_ref[...], preferred_element_type=jnp.float32)
    y = y + b_ref[...]
    o_ref[...] = _apply_act(y, act).astype(o_ref.dtype)


def _mm_kernel_acc(x_ref, w_ref, b_ref, o_ref, acc_ref, *, act):
    # Fallback for very large K: accumulate over the innermost axis.
    @pl.when(pl.program_id(2) == 0)
    def _():
        acc_ref[...] = jnp.zeros_like(acc_ref)

    acc_ref[...] += jnp.dot(x_ref[...], w_ref[...],
                            preferred_element_type=jnp.float32)

    @pl.when(pl.program_id(2) == pl.num_programs(2) - 1)
    def _():
        y = acc_ref[...] + b_ref[...]
        o_ref[...] = _apply_act(y, act).astype(o_ref.dtype)


def _pick_tm(mp):
    # Bigger tiles, but keep >= 2 M blocks when possible (v7x has 2 TCs).
    if mp >= 512 and mp % 256 == 0:
        return 256
    return 128


def _pick_tn(np_):
    if np_ >= 512 and np_ % 256 == 0:
        return 256
    return 128


def matmul_bias_act(x, w, bias, act="none", out_dtype=jnp.float32):
    """y = act(x @ w + bias).  x:(M,K), w:(K,N) (BN scale already folded in)."""
    M, K = x.shape
    K2, N = w.shape
    assert K == K2
    Mp, Np = _round_up(M, 128), _round_up(N, 128)
    tm, tn = _pick_tm(Mp), _pick_tn(Np)
    Mp, Np = _round_up(Mp, tm), _round_up(Np, tn)

    xb = x.astype(jnp.bfloat16)
    wb = w.astype(jnp.bfloat16)
    bp = jnp.pad(bias.astype(jnp.float32), (0, Np - N)).reshape(1, Np)
    out_bytes = Mp * Np * jnp.dtype(out_dtype).itemsize

    if K <= _MAX_SINGLE_K:
        # K kept unpadded: full-extent block dims are exempt from the (8,128)
        # divisibility rule -> no extra pad pass over the activation.
        xb = jnp.pad(xb, ((0, Mp - M), (0, 0)))
        wb = jnp.pad(wb, ((0, 0), (0, Np - N)))
        grid = (Mp // tm, Np // tn)
        cost = pl.CostEstimate(flops=2 * Mp * Np * K, transcendentals=0,
                               bytes_accessed=xb.size * 2 + wb.size * 2 + out_bytes)
        out = pl.pallas_call(
            functools.partial(_mm_kernel_single_k, act=act),
            out_shape=jax.ShapeDtypeStruct((Mp, Np), out_dtype),
            grid_spec=pltpu.PrefetchScalarGridSpec(
                num_scalar_prefetch=0,
                grid=grid,
                in_specs=[
                    pl.BlockSpec((tm, K), lambda i, j: (i, 0)),
                    pl.BlockSpec((K, tn), lambda i, j: (0, j)),
                    pl.BlockSpec((1, tn), lambda i, j: (0, j)),
                ],
                out_specs=pl.BlockSpec((tm, tn), lambda i, j: (i, j)),
            ),
            compiler_params=pltpu.CompilerParams(
                dimension_semantics=("parallel", "parallel"),
                vmem_limit_bytes=_VMEM_LIMIT),
            cost_estimate=cost,
        )(xb, wb, bp)
    else:
        tk = 512
        Kp = _round_up(K, tk)
        xb = jnp.pad(xb, ((0, Mp - M), (0, Kp - K)))
        wb = jnp.pad(wb, ((0, Kp - K), (0, Np - N)))
        grid = (Mp // tm, Np // tn, Kp // tk)
        cost = pl.CostEstimate(flops=2 * Mp * Np * Kp, transcendentals=0,
                               bytes_accessed=xb.size * 2 + wb.size * 2 + out_bytes)
        out = pl.pallas_call(
            functools.partial(_mm_kernel_acc, act=act),
            out_shape=jax.ShapeDtypeStruct((Mp, Np), out_dtype),
            grid_spec=pltpu.PrefetchScalarGridSpec(
                num_scalar_prefetch=0,
                grid=grid,
                in_specs=[
                    pl.BlockSpec((tm, tk), lambda i, j, k: (i, k)),
                    pl.BlockSpec((tk, tn), lambda i, j, k: (k, j)),
                    pl.BlockSpec((1, tn), lambda i, j, k: (0, j)),
                ],
                out_specs=pl.BlockSpec((tm, tn), lambda i, j, k: (i, j)),
                scratch_shapes=[pltpu.VMEM((tm, tn), jnp.float32)],
            ),
            compiler_params=pltpu.CompilerParams(
                dimension_semantics=("parallel", "parallel", "arbitrary"),
                vmem_limit_bytes=_VMEM_LIMIT),
            cost_estimate=cost,
        )(xb, wb, bp)
    return out[:M, :N]


# -----------------------------------------------------------------------------
# Fused-tap conv kernel (stride-1 KxK conv, no im2col materialization).
# Input is the zero-padded activation flattened to (Hp*Wp + extra, Cin); each
# tap is a static-offset contiguous slice, accumulated in f32 on the MXU.
# -----------------------------------------------------------------------------

def _conv_taps_kernel(x_ref, w_ref, b_ref, o_ref, *, taps, cin, wp, dh, dw,
                      act, m_inner):
    mout, tn = o_ref.shape
    bias = b_ref[...]                                   # (1, tn) f32
    for m0 in range(0, mout, m_inner):                  # static loop
        msz = min(m_inner, mout - m0)
        acc = jnp.zeros((msz, tn), jnp.float32)
        for t, (ky, kx) in enumerate(taps):             # static tap loop
            off = m0 + ky * dh * wp + kx * dw
            patch = x_ref[pl.ds(off, msz), :]           # (msz, cin) bf16
            wk = w_ref[pl.ds(t * cin, cin), :]          # (cin, tn) bf16
            acc = acc + jnp.dot(patch, wk,
                                preferred_element_type=jnp.float32)
        y = acc + bias
        o_ref[pl.ds(m0, msz), :] = _apply_act(y, act).astype(o_ref.dtype)


def _conv_taps_pallas(x, w, scale, bias, kh, kw, ph, pw, dh, dw, act,
                      out_dtype):
    N, H, W, Cin = x.shape
    O = w.shape[0]
    Hp, Wp = H + 2 * ph, W + 2 * pw
    Ho = H + 2 * ph - dh * (kh - 1)
    Wo = W + 2 * pw - dw * (kw - 1)
    Mout = Ho * Wp                     # "wide" rows: garbage cols sliced later
    K = kh * kw * Cin

    xb = x.astype(jnp.bfloat16)
    xp = jnp.pad(xb, ((0, 0), (ph, ph), (pw, pw), (0, 0)))
    xf = xp.reshape(N, Hp * Wp, Cin)
    extra = dw * (kw - 1)              # keeps every tap read in bounds
    if extra:
        xf = jnp.pad(xf, ((0, 0), (0, extra), (0, 0)))
    Lp = Hp * Wp + extra

    wm = (jnp.transpose(w, (2, 3, 1, 0)).reshape(K, O)
          * scale[None, :]).astype(jnp.bfloat16)
    bp = bias.astype(jnp.float32).reshape(1, O)

    if O <= 256:
        tn = O                          # single channel tile, x read once
    elif O % 256 == 0:
        tn = 256
    else:
        tn = 128
    m_inner = 256 if tn <= 128 else 128
    taps = tuple((ky, kx) for ky in range(kh) for kx in range(kw))

    cost = pl.CostEstimate(
        flops=2 * N * Mout * K * O, transcendentals=0,
        bytes_accessed=(xf.size * 2 + wm.size * 2
                        + N * Mout * O * jnp.dtype(out_dtype).itemsize))

    yflat = pl.pallas_call(
        functools.partial(_conv_taps_kernel, taps=taps, cin=Cin, wp=Wp,
                          dh=dh, dw=dw, act=act, m_inner=m_inner),
        out_shape=jax.ShapeDtypeStruct((N, Mout, O), out_dtype),
        grid_spec=pltpu.PrefetchScalarGridSpec(
            num_scalar_prefetch=0,
            grid=(N, O // tn),
            in_specs=[
                pl.BlockSpec((None, Lp, Cin), lambda n, j: (n, 0, 0)),
                pl.BlockSpec((K, tn), lambda n, j: (0, j)),
                pl.BlockSpec((1, tn), lambda n, j: (0, j)),
            ],
            out_specs=pl.BlockSpec((None, Mout, tn), lambda n, j: (n, 0, j)),
        ),
        compiler_params=pltpu.CompilerParams(
            dimension_semantics=("parallel", "parallel"),
            vmem_limit_bytes=_VMEM_LIMIT),
        cost_estimate=cost,
    )(xf, wm, bp)

    return yflat.reshape(N, Ho, Wp, O)[:, :, :Wo, :]


# -----------------------------------------------------------------------------
# Convolution dispatch: Pallas for big stride-1 / 1x1 convs, XLA for the rest.
# -----------------------------------------------------------------------------

def conv2d(x, w, *, stride=(1, 1), padding=(0, 0), dilation=(1, 1), groups=1,
           conv_bias=None, bn=None, act="none", out_dtype=jnp.float32):
    """x: NHWC; w: (O, I/groups, kh, kw) (PyTorch layout). Eval-mode BN folded."""
    N, H, W, Cin = x.shape
    O, Ig, kh, kw = w.shape
    sh, sw = stride
    ph, pw = padding
    dh, dw = dilation
    Ho = (H + 2 * ph - dh * (kh - 1) - 1) // sh + 1
    Wo = (W + 2 * pw - dw * (kw - 1) - 1) // sw + 1

    if bn is not None:
        scale = bn["gamma"] / jnp.sqrt(bn["var"] + bn["eps"])
        bias = bn["beta"] - bn["mean"] * scale
    else:
        scale = jnp.ones((O,), jnp.float32)
        bias = jnp.zeros((O,), jnp.float32)
    if conv_bias is not None:
        bias = bias + conv_bias * scale

    big_out = (groups == 1) and (O >= 128) and (O % 128 == 0)

    # ---- Path 1: 1x1 convs -> plain Pallas GEMM (no im2col needed) ----------
    if big_out and kh == 1 and kw == 1 and Cin >= 64 and N * Ho * Wo >= 128:
        xs = x
        if (sh, sw) != (1, 1):
            xs = x[:, ::sh, ::sw, :]
        xs = xs[:, :Ho, :Wo, :]
        wm = jnp.transpose(w, (2, 3, 1, 0)).reshape(Cin, O) * scale[None, :]
        y = matmul_bias_act(xs.reshape(-1, Cin), wm, bias, act=act,
                            out_dtype=out_dtype)
        return y.reshape(N, Ho, Wo, O)

    # ---- Path 2: stride-1 KxK conv -> fused-tap Pallas kernel ---------------
    if big_out and (sh, sw) == (1, 1) and kh * kw > 1 and Cin >= 32:
        return _conv_taps_pallas(x, w, scale, bias, kh, kw, ph, pw, dh, dw,
                                 act, out_dtype)

    # ---- Path 3: tiny / grouped / strided-KxK convs -> XLA native conv ------
    rhs = jnp.transpose(w, (2, 3, 1, 0)).astype(jnp.float32)   # HWIO
    y = jax.lax.conv_general_dilated(
        x.astype(jnp.float32), rhs,
        window_strides=(sh, sw),
        padding=[(ph, ph), (pw, pw)],
        rhs_dilation=(dh, dw),
        dimension_numbers=("NHWC", "HWIO", "NHWC"),
        feature_group_count=groups)
    y = y * scale + bias
    return _apply_act(y, act).astype(out_dtype)


# -----------------------------------------------------------------------------
# Attention submodules (tiny tensors -> plain jnp glue, fused by XLA)
# -----------------------------------------------------------------------------

def dwa_forward(p, x):
    """DynamicWeightAggregationBlock."""
    y = jnp.mean(x, axis=(1, 2))                                  # (N, C)
    y = jnp.maximum(y @ p["fc1_w"].T, 0.0)
    y = jax.nn.sigmoid(y @ p["fc2_w"].T)
    return x * y[:, None, None, :]


def channel_attn_forward(p, x):
    """EnhancedChannelAttention2."""
    C = x.shape[-1]
    avg = jnp.mean(x, axis=(1, 2))                                # (N, C)
    mx = jnp.max(x, axis=(1, 2))
    w1 = p["conv1_w"].reshape(p["conv1_w"].shape[0], C)           # (mid, C)
    w2 = p["conv2_w"].reshape(C, -1)                              # (C, mid)

    def mlp(v):
        h = jnp.maximum(v @ w1.T, 0.0)
        return h @ w2.T

    attn = jax.nn.sigmoid(mlp(avg) + mlp(mx))
    return x * attn[:, None, None, :]


def spatial_attn_forward(p, x):
    """EnhancedSpatialAttention2."""
    avg_out = jnp.mean(x, axis=-1, keepdims=True)                 # (N,H,W,1)
    max_out = jnp.max(x, axis=-1, keepdims=True)
    x_comp = jnp.concatenate([avg_out, max_out], axis=-1)
    feats = []
    for cp, k in zip(p["convs"], (3, 5, 7)):
        feats.append(conv2d(x_comp, cp["w"], padding=(k // 2, k // 2),
                            bn=cp["bn"]))
    feats.append(conv2d(avg_out, p["h_w"], padding=(0, 7), bn=p["h_bn"]))
    feats.append(conv2d(avg_out, p["v_w"], padding=(7, 0), bn=p["v_bn"]))
    allf = jnp.concatenate(feats, axis=-1)                        # (N,H,W,5)
    fused = conv2d(allf, p["fuse_w"], act="sigmoid")              # (N,H,W,1)
    return x * fused


def coord_attn_forward(p, x):
    """CoordAtt."""
    N, H, W, C = x.shape
    x_h = jnp.mean(x, axis=2, keepdims=True)                      # (N,H,1,C)
    x_w = jnp.mean(x, axis=1, keepdims=True)                      # (N,1,W,C)
    x_w_t = jnp.transpose(x_w, (0, 2, 1, 3))                      # (N,W,1,C)
    y = jnp.concatenate([x_h, x_w_t], axis=1)                     # (N,H+W,1,C)
    y = conv2d(y, p["conv1_w"], conv_bias=p["conv1_b"], bn=p["bn1"],
               act="relu")
    a_h = conv2d(y[:, :H], p["convh_w"], conv_bias=p["convh_b"],
                 act="sigmoid")                                   # (N,H,1,C)
    a_w = conv2d(y[:, H:], p["convw_w"], conv_bias=p["convw_b"],
                 act="sigmoid")                                   # (N,W,1,C)
    a_w = jnp.transpose(a_w, (0, 2, 1, 3))                        # (N,1,W,C)
    return x * a_h * a_w


def cbam_forward(p, x):
    """EnhancedCBAM."""
    N, H, W, C = x.shape
    c_out = channel_attn_forward(p["ca"], x)
    s_out = spatial_attn_forward(p["sa"], x)
    co_out = coord_attn_forward(p["coord"], x)
    fused = jnp.concatenate([c_out, s_out, co_out], axis=-1)      # (N,H,W,3C)
    wts = jnp.mean(fused, axis=(1, 2)).reshape(N, 1, 1, 3 * C)    # (N,1,1,3C)
    wts = conv2d(wts, p["fuse1_w"], conv_bias=p["fuse1_b"], groups=3,
                 act="leaky_relu")
    wts = conv2d(wts, p["fuse2_w"], conv_bias=p["fuse2_b"])
    wts = jax.nn.softmax(wts.reshape(N, 3, C), axis=1)            # (N,3,C)
    w1 = wts[:, 0][:, None, None, :]
    w2 = wts[:, 1][:, None, None, :]
    w3 = wts[:, 2][:, None, None, :]
    return x + w1 * c_out + w2 * s_out + w3 * co_out


# -----------------------------------------------------------------------------
# BasicBlock forward (enable_lateral=False path), NHWC throughout
# -----------------------------------------------------------------------------

def basic_block_forward(p, x):
    identity = x
    # conv1 output only feeds conv2 (which re-casts to bf16 for the MXU
    # anyway) -> emit bf16 to halve its HBM writeback + conv2's read.
    out = conv2d(x, p["conv1_w"], stride=p["stride"], padding=(1, 1),
                 bn=p["bn1"], act="relu", out_dtype=jnp.bfloat16)
    out = conv2d(out, p["conv2_w"], padding=(1, 1), bn=p["bn2"])
    out = dwa_forward(p["dwa"], out)
    if p["downsample"] is not None:
        identity = conv2d(x, p["downsample"]["w"], stride=p["stride"],
                          bn=p["downsample"]["bn"])
    if p["cbam"] is not None:
        out = cbam_forward(p["cbam"], out)
    return jnp.maximum(out + identity, 0.0)                       # residual+ReLU


def basic_block_nchw(p, x_nchw):
    """Single-block NCHW wrapper (matches the PyTorch interface)."""
    x = jnp.transpose(x_nchw, (0, 2, 3, 1)).astype(jnp.float32)
    y = basic_block_forward(p, x)
    return jnp.transpose(y, (0, 3, 1, 2))


# -----------------------------------------------------------------------------
# Deterministic parameter construction (shapes from the module __init__)
# -----------------------------------------------------------------------------

class KeyGen:
    def __init__(self, seed):
        self._key = jax.random.PRNGKey(seed)

    def __call__(self):
        self._key, k = jax.random.split(self._key)
        return k


def _conv_w(kg, o, i, kh, kw):
    fan_out = o * kh * kw
    std = math.sqrt(2.0 / fan_out)
    return std * jax.random.normal(kg(), (o, i, kh, kw), jnp.float32)


def _conv_b(kg, o, fan_in):
    bound = 1.0 / math.sqrt(fan_in)
    return jax.random.uniform(kg(), (o,), jnp.float32, -bound, bound)


def _lin_w(kg, o, i):
    bound = 1.0 / math.sqrt(i)
    return jax.random.uniform(kg(), (o, i), jnp.float32, -bound, bound)


def _bn(c):
    return dict(gamma=jnp.ones((c,), jnp.float32),
                beta=jnp.zeros((c,), jnp.float32),
                mean=jnp.zeros((c,), jnp.float32),
                var=jnp.ones((c,), jnp.float32),
                eps=1e-5)


def make_dwa(kg, c, reduction=4):
    return dict(fc1_w=_lin_w(kg, c // reduction, c),
                fc2_w=_lin_w(kg, c, c // reduction))


def make_channel_attn(kg, c, r=16):
    mid = c // r
    return dict(conv1_w=_conv_w(kg, mid, c, 1, 1),
                conv2_w=_conv_w(kg, c, mid, 1, 1))


def make_spatial_attn(kg):
    convs = [dict(w=_conv_w(kg, 1, 2, k, k), bn=_bn(1)) for k in (3, 5, 7)]
    return dict(convs=convs,
                h_w=_conv_w(kg, 1, 1, 1, 15), h_bn=_bn(1),
                v_w=_conv_w(kg, 1, 1, 15, 1), v_bn=_bn(1),
                fuse_w=_conv_w(kg, 1, 5, 1, 1))


def make_coord_attn(kg, c, r=16):
    mip = max(8, c // r)
    return dict(conv1_w=_conv_w(kg, mip, c, 1, 1), conv1_b=_conv_b(kg, mip, c),
                bn1=_bn(mip),
                convh_w=_conv_w(kg, c, mip, 1, 1), convh_b=_conv_b(kg, c, mip),
                convw_w=_conv_w(kg, c, mip, 1, 1), convw_b=_conv_b(kg, c, mip))


def make_cbam(kg, c):
    return dict(ca=make_channel_attn(kg, c),
                sa=make_spatial_attn(kg),
                coord=make_coord_attn(kg, c),
                fuse1_w=_conv_w(kg, 3 * c, c, 1, 1),
                fuse1_b=_conv_b(kg, 3 * c, c),
                fuse2_w=_conv_w(kg, 3 * c, 3 * c, 1, 1),
                fuse2_b=_conv_b(kg, 3 * c, 3 * c))


def make_basic_block(kg, inplanes, planes, stride=1, downsample=False,
                     use_cbam=True):
    return dict(
        stride=(stride, stride),
        conv1_w=_conv_w(kg, planes, inplanes, 3, 3), bn1=_bn(planes),
        conv2_w=_conv_w(kg, planes, planes, 3, 3), bn2=_bn(planes),
        dwa=make_dwa(kg, planes),
        downsample=(dict(w=_conv_w(kg, planes, inplanes, 1, 1),
                         bn=_bn(planes)) if downsample else None),
        cbam=(make_cbam(kg, planes) if (use_cbam and stride == 1) else None),
    )


# -----------------------------------------------------------------------------

if __name__ == "__main__":
    kg = KeyGen(0)
    # Block 1: stride=1, CBAM enabled, identity shortcut (128 -> 128).
    # 128 channels keeps the Pallas fused-tap conv path lane-dense (Cout%128==0).
    blk1 = make_basic_block(kg, inplanes=128, planes=128, stride=1,
                            downsample=False, use_cbam=True)
    # Block 2: stride=2 with 1x1 downsample (Pallas GEMM), CBAM disabled
    # (stride != 1), 128 -> 256 channels (exercises a 256-wide output tile).
    blk2 = make_basic_block(kg, inplanes=128, planes=256, stride=2,
                            downsample=True, use_cbam=True)

    x = jax.random.normal(jax.random.PRNGKey(0), (2, 128, 16, 16), jnp.float32)

    @jax.jit
    def fwd(inp):
        # NCHW<->NHWC hoisted to the model boundary; blocks chain in NHWC.
        h = jnp.transpose(inp, (0, 2, 3, 1)).astype(jnp.float32)
        h1 = basic_block_forward(blk1, h)
        h2 = basic_block_forward(blk2, h1)
        return jnp.transpose(h1, (0, 3, 1, 2)), jnp.transpose(h2, (0, 3, 1, 2))

    y1, y2 = fwd(x)
    y1 = jax.block_until_ready(y1)
    y2 = jax.block_until_ready(y2)

    assert y1.shape == (2, 128, 16, 16), y1.shape
    assert y2.shape == (2, 256, 8, 8), y2.shape
    assert bool(jnp.all(jnp.isfinite(y1))) and bool(jnp.all(jnp.isfinite(y2)))
    assert bool(jnp.all(y1 >= 0.0)) and bool(jnp.all(y2 >= 0.0))  # final ReLU
    print("KERNEL_OK")
</pallas_src>

<mosaic_0001>
module attributes {stable_mosaic.version = 11 : i64} {
  func.func @_conv_taps_kernel(%arg0: i32, %arg1: i32, %arg2: memref<1x326x128xbf16, #tpu.memory_space<vmem>>, %arg3: memref<1152x128xbf16, #tpu.memory_space<vmem>>, %arg4: memref<1x128xf32, #tpu.memory_space<vmem>>, %arg5: memref<1x288x128xbf16, #tpu.memory_space<vmem>>) attributes {dimension_semantics = [#tpu.dimension_semantics<parallel>, #tpu.dimension_semantics<parallel>], iteration_bounds = array<i64: 2, 1>, scalar_prefetch = 0 : i64, scratch_operands = 0 : i64, tpu.core_type = #tpu.core_type<tc>, window_params = [{transform_indices = @transform_0, window_bounds = array<i64: 1, 326, 128>}, {transform_indices = @transform_1, window_bounds = array<i64: 1152, 128>}, {transform_indices = @transform_2, window_bounds = array<i64: 1, 128>}, {transform_indices = @transform_3, window_bounds = array<i64: 1, 288, 128>}]} {
    %c0 = arith.constant 0 : index
    %c0_0 = arith.constant 0 : index
    %0 = vector.load %arg4[%c0, %c0_0] : memref<1x128xf32, #tpu.memory_space<vmem>>, vector<1x128xf32>
    %cst = arith.constant 0.000000e+00 : f32
    %1 = vector.broadcast %cst : f32 to vector<256x128xf32>
    %c0_1 = arith.constant 0 : index
    %c0_2 = arith.constant 0 : index
    %c0_3 = arith.constant 0 : index
    %2 = vector.load %arg2[%c0_1, %c0_2, %c0_3] : memref<1x326x128xbf16, #tpu.memory_space<vmem>>, vector<1x256x128xbf16>
    %3 = vector.shape_cast %2 : vector<1x256x128xbf16> to vector<256x128xbf16>
    %c0_4 = arith.constant 0 : index
    %c0_5 = arith.constant 0 : index
    %4 = vector.load %arg3[%c0_4, %c0_5] : memref<1152x128xbf16, #tpu.memory_space<vmem>>, vector<128x128xbf16>
    %cst_6 = arith.constant dense<0.000000e+00> : vector<256x128xf32>
    %5 = tpu.matmul %3, %4, %cst_6 {dimension_numbers = #tpu.dot_dimension_numbers<[1], [0], [0], [1], [0, 0, 1, 1], [], []>} : vector<256x128xbf16>, vector<128x128xbf16>, vector<256x128xf32> -> vector<256x128xf32>
    %6 = arith.addf %1, %5 : vector<256x128xf32>
    %c0_7 = arith.constant 0 : index
    %c1 = arith.constant 1 : index
    %c0_8 = arith.constant 0 : index
    %7 = vector.load %arg2[%c0_7, %c1, %c0_8] : memref<1x326x128xbf16, #tpu.memory_space<vmem>>, vector<1x256x128xbf16>
    %8 = vector.shape_cast %7 : vector<1x256x128xbf16> to vector<256x128xbf16>
    %c128 = arith.constant 128 : index
    %c0_9 = arith.constant 0 : index
    %9 = vector.load %arg3[%c128, %c0_9] : memref<1152x128xbf16, #tpu.memory_space<vmem>>, vector<128x128xbf16>
    %cst_10 = arith.constant dense<0.000000e+00> : vector<256x128xf32>
    %10 = tpu.matmul %8, %9, %cst_10 {dimension_numbers = #tpu.dot_dimension_numbers<[1], [0], [0], [1], [0, 0, 1, 1], [], []>} : vector<256x128xbf16>, vector<128x128xbf16>, vector<256x128xf32> -> vector<256x128xf32>
    %11 = arith.addf %6, %10 : vector<256x128xf32>
    %c0_11 = arith.constant 0 : index
    %c2 = arith.constant 2 : index
    %c0_12 = arith.constant 0 : index
    %12 = vector.load %arg2[%c0_11, %c2, %c0_12] : memref<1x326x128xbf16, #tpu.memory_space<vmem>>, vector<1x256x128xbf16>
    %13 = vector.shape_cast %12 : vector<1x256x128xbf16> to vector<256x128xbf16>
    %c256 = arith.constant 256 : index
    %c0_13 = arith.constant 0 : index
    %14 = vector.load %arg3[%c256, %c0_13] : memref<1152x128xbf16, #tpu.memory_space<vmem>>, vector<128x128xbf16>
    %cst_14 = arith.constant dense<0.000000e+00> : vector<256x128xf32>
    %15 = tpu.matmul %13, %14, %cst_14 {dimension_numbers = #tpu.dot_dimension_numbers<[1], [0], [0], [1], [0, 0, 1, 1], [], []>} : vector<256x128xbf16>, vector<128x128xbf16>, vector<256x128xf32> -> vector<256x128xf32>
    %16 = arith.addf %11, %15 : vector<256x128xf32>
    %c0_15 = arith.constant 0 : index
    %c18 = arith.constant 18 : index
    %c0_16 = arith.constant 0 : index
    %17 = vector.load %arg2[%c0_15, %c18, %c0_16] : memref<1x326x128xbf16, #tpu.memory_space<vmem>>, vector<1x256x128xbf16>
    %18 = vector.shape_cast %17 : vector<1x256x128xbf16> to vector<256x128xbf16>
    %c384 = arith.constant 384 : index
    %c0_17 = arith.constant 0 : index
    %19 = vector.load %arg3[%c384, %c0_17] : memref<1152x128xbf16, #tpu.memory_space<vmem>>, vector<128x128xbf16>
    %cst_18 = arith.constant dense<0.000000e+00> : vector<256x128xf32>
    %20 = tpu.matmul %18, %19, %cst_18 {dimension_numbers = #tpu.dot_dimension_numbers<[1], [0], [0], [1], [0, 0, 1, 1], [], []>} : vector<256x128xbf16>, vector<128x128xbf16>, vector<256x128xf32> -> vector<256x128xf32>
    %21 = arith.addf %16, %20 : vector<256x128xf32>
    %c0_19 = arith.constant 0 : index
    %c19 = arith.constant 19 : index
    %c0_20 = arith.constant 0 : index
    %22 = vector.load %arg2[%c0_19, %c19, %c0_20] : memref<1x326x128xbf16, #tpu.memory_space<vmem>>, vector<1x256x128xbf16>
    %23 = vector.shape_cast %22 : vector<1x256x128xbf16> to vector<256x128xbf16>
    %c512 = arith.constant 512 : index
    %c0_21 = arith.constant 0 : index
    %24 = vector.load %arg3[%c512, %c0_21] : memref<1152x128xbf16, #tpu.memory_space<vmem>>, vector<128x128xbf16>
    %cst_22 = arith.constant dense<0.000000e+00> : vector<256x128xf32>
    %25 = tpu.matmul %23, %24, %cst_22 {dimension_numbers = #tpu.dot_dimension_numbers<[1], [0], [0], [1], [0, 0, 1, 1], [], []>} : vector<256x128xbf16>, vector<128x128xbf16>, vector<256x128xf32> -> vector<256x128xf32>
    %26 = arith.addf %21, %25 : vector<256x128xf32>
    %c0_23 = arith.constant 0 : index
    %c20 = arith.constant 20 : index
    %c0_24 = arith.constant 0 : index
    %27 = vector.load %arg2[%c0_23, %c20, %c0_24] : memref<1x326x128xbf16, #tpu.memory_space<vmem>>, vector<1x256x128xbf16>
    %28 = vector.shape_cast %27 : vector<1x256x128xbf16> to vector<256x128xbf16>
    %c640 = arith.constant 640 : index
    %c0_25 = arith.constant 0 : index
    %29 = vector.load %arg3[%c640, %c0_25] : memref<1152x128xbf16, #tpu.memory_space<vmem>>, vector<128x128xbf16>
    %cst_26 = arith.constant dense<0.000000e+00> : vector<256x128xf32>
    %30 = tpu.matmul %28, %29, %cst_26 {dimension_numbers = #tpu.dot_dimension_numbers<[1], [0], [0], [1], [0, 0, 1, 1], [], []>} : vector<256x128xbf16>, vector<128x128xbf16>, vector<256x128xf32> -> vector<256x128xf32>
    %31 = arith.addf %26, %30 : vector<256x128xf32>
    %c0_27 = arith.constant 0 : index
    %c36 = arith.constant 36 : index
    %c0_28 = arith.constant 0 : index
    %32 = vector.load %arg2[%c0_27, %c36, %c0_28] : memref<1x326x128xbf16, #tpu.memory_space<vmem>>, vector<1x256x128xbf16>
    %33 = vector.shape_cast %32 : vector<1x256x128xbf16> to vector<256x128xbf16>
    %c768 = arith.constant 768 : index
    %c0_29 = arith.constant 0 : index
    %34 = vector.load %arg3[%c768, %c0_29] : memref<1152x128xbf16, #tpu.memory_space<vmem>>, vector<128x128xbf16>
    %cst_30 = arith.constant dense<0.000000e+00> : vector<256x128xf32>
    %35 = tpu.matmul %33, %34, %cst_30 {dimension_numbers = #tpu.dot_dimension_numbers<[1], [0], [0], [1], [0, 0, 1, 1], [], []>} : vector<256x128xbf16>, vector<128x128xbf16>, vector<256x128xf32> -> vector<256x128xf32>
    %36 = arith.addf %31, %35 : vector<256x128xf32>
    %c0_31 = arith.constant 0 : index
    %c37 = arith.constant 37 : index
    %c0_32 = arith.constant 0 : index
    %37 = vector.load %arg2[%c0_31, %c37, %c0_32] : memref<1x326x128xbf16, #tpu.memory_space<vmem>>, vector<1x256x128xbf16>
    %38 = vector.shape_cast %37 : vector<1x256x128xbf16> to vector<256x128xbf16>
    %c896 = arith.constant 896 : index
    %c0_33 = arith.constant 0 : index
    %39 = vector.load %arg3[%c896, %c0_33] : memref<1152x128xbf16, #tpu.memory_space<vmem>>, vector<128x128xbf16>
    %cst_34 = arith.constant dense<0.000000e+00> : vector<256x128xf32>
    %40 = tpu.matmul %38, %39, %cst_34 {dimension_numbers = #tpu.dot_dimension_numbers<[1], [0], [0], [1], [0, 0, 1, 1], [], []>} : vector<256x128xbf16>, vector<128x128xbf16>, vector<256x128xf32> -> vector<256x128xf32>
    %41 = arith.addf %36, %40 : vector<256x128xf32>
    %c0_35 = arith.constant 0 : index
    %c38 = arith.constant 38 : index
    %c0_36 = arith.constant 0 : index
    %42 = vector.load %arg2[%c0_35, %c38, %c0_36] : memref<1x326x128xbf16, #tpu.memory_space<vmem>>, vector<1x256x128xbf16>
    %43 = vector.shape_cast %42 : vector<1x256x128xbf16> to vector<256x128xbf16>
    %c1024 = arith.constant 1024 : index
    %c0_37 = arith.constant 0 : index
    %44 = vector.load %arg3[%c1024, %c0_37] : memref<1152x128xbf16, #tpu.memory_space<vmem>>, vector<128x128xbf16>
    %cst_38 = arith.constant dense<0.000000e+00> : vector<256x128xf32>
    %45 = tpu.matmul %43, %44, %cst_38 {dimension_numbers = #tpu.dot_dimension_numbers<[1], [0], [0], [1], [0, 0, 1, 1], [], []>} : vector<256x128xbf16>, vector<128x128xbf16>, vector<256x128xf32> -> vector<256x128xf32>
    %46 = arith.addf %41, %45 : vector<256x128xf32>
    %47 = vector.broadcast %0 : vector<1x128xf32> to vector<256x128xf32>
    %48 = arith.addf %46, %47 : vector<256x128xf32>
    %cst_39 = arith.constant 0.000000e+00 : f32
    %49 = vector.broadcast %cst_39 : f32 to vector<256x128xf32>
    %50 = arith.maximumf %48, %49 : vector<256x128xf32>
    %51 = arith.truncf %50 : vector<256x128xf32> to vector<256x128xbf16>
    %c0_40 = arith.constant 0 : index
    %c0_41 = arith.constant 0 : index
    %c0_42 = arith.constant 0 : index
    %52 = vector.load %arg5[%c0_40, %c0_41, %c0_42] : memref<1x288x128xbf16, #tpu.memory_space<vmem>>, vector<1x256x128xbf16>
    %53 = vector.shape_cast %52 : vector<1x256x128xbf16> to vector<256x128xbf16>
    %54 = vector.shape_cast %51 : vector<256x128xbf16> to vector<1x256x128xbf16>
    tpu.vector_store %arg5[%c0_40, %c0_41, %c0_42], %54 {strides = array<i32>} : memref<1x288x128xbf16, #tpu.memory_space<vmem>>, vector<1x256x128xbf16>,
    %cst_43 = arith.constant 0.000000e+00 : f32
    %55 = vector.broadcast %cst_43 : f32 to vector<32x128xf32>
    %c0_44 = arith.constant 0 : index
    %c256_45 = arith.constant 256 : index
    %c0_46 = arith.constant 0 : index
    %56 = vector.load %arg2[%c0_44, %c256_45, %c0_46] : memref<1x326x128xbf16, #tpu.memory_space<vmem>>, vector<1x32x128xbf16>
    %57 = vector.shape_cast %56 : vector<1x32x128xbf16> to vector<32x128xbf16>
    %c0_47 = arith.constant 0 : index
    %c0_48 = arith.constant 0 : index
    %58 = vector.load %arg3[%c0_47, %c0_48] : memref<1152x128xbf16, #tpu.memory_space<vmem>>, vector<128x128xbf16>
    %cst_49 = arith.constant dense<0.000000e+00> : vector<32x128xf32>
    %59 = tpu.matmul %57, %58, %cst_49 {dimension_numbers = #tpu.dot_dimension_numbers<[1], [0], [0], [1], [0, 0, 1, 1], [], []>} : vector<32x128xbf16>, vector<128x128xbf16>, vector<32x128xf32> -> vector<32x128xf32>
    %60 = arith.addf %55, %59 : vector<32x128xf32>
    %c0_50 = arith.constant 0 : index
    %c257 = arith.constant 257 : index
    %c0_51 = arith.constant 0 : index
    %61 = vector.load %arg2[%c0_50, %c257, %c0_51] : memref<1x326x128xbf16, #tpu.memory_space<vmem>>, vector<1x32x128xbf16>
    %62 = vector.shape_cast %61 : vector<1x32x128xbf16> to vector<32x128xbf16>
    %c128_52 = arith.constant 128 : index
    %c0_53 = arith.constant 0 : index
    %63 = vector.load %arg3[%c128_52, %c0_53] : memref<1152x128xbf16, #tpu.memory_space<vmem>>, vector<128x128xbf16>
    %cst_54 = arith.constant dense<0.000000e+00> : vector<32x128xf32>
    %64 = tpu.matmul %62, %63, %cst_54 {dimension_numbers = #tpu.dot_dimension_numbers<[1], [0], [0], [1], [0, 0, 1, 1], [], []>} : vector<32x128xbf16>, vector<128x128xbf16>, vector<32x128xf32> -> vector<32x128xf32>
    %65 = arith.addf %60, %64 : vector<32x128xf32>
    %c0_55 = arith.constant 0 : index
    %c258 = arith.constant 258 : index
    %c0_56 = arith.constant 0 : index
    %66 = vector.load %arg2[%c0_55, %c258, %c0_56] : memref<1x326x128xbf16, #tpu.memory_space<vmem>>, vector<1x32x128xbf16>
    %67 = vector.shape_cast %66 : vector<1x32x128xbf16> to vector<32x128xbf16>
    %c256_57 = arith.constant 256 : index
    %c0_58 = arith.constant 0 : index
    %68 = vector.load %arg3[%c256_57, %c0_58] : memref<1152x128xbf16, #tpu.memory_space<vmem>>, vector<128x128xbf16>
    %cst_59 = arith.constant dense<0.000000e+00> : vector<32x128xf32>
    %69 = tpu.matmul %67, %68, %cst_59 {dimension_numbers = #tpu.dot_dimension_numbers<[1], [0], [0], [1], [0, 0, 1, 1], [], []>} : vector<32x128xbf16>, vector<128x128xbf16>, vector<32x128xf32> -> vector<32x128xf32>
    %70 = arith.addf %65, %69 : vector<32x128xf32>
    %c0_60 = arith.constant 0 : index
    %c274 = arith.constant 274 : index
    %c0_61 = arith.constant 0 : index
    %71 = vector.load %arg2[%c0_60, %c274, %c0_61] : memref<1x326x128xbf16, #tpu.memory_space<vmem>>, vector<1x32x128xbf16>
    %72 = vector.shape_cast %71 : vector<1x32x128xbf16> to vector<32x128xbf16>
    %c384_62 = arith.constant 384 : index
    %c0_63 = arith.constant 0 : index
    %73 = vector.load %arg3[%c384_62, %c0_63] : memref<1152x128xbf16, #tpu.memory_space<vmem>>, vector<128x128xbf16>
    %cst_64 = arith.constant dense<0.000000e+00> : vector<32x128xf32>
    %74 = tpu.matmul %72, %73, %cst_64 {dimension_numbers = #tpu.dot_dimension_numbers<[1], [0], [0], [1], [0, 0, 1, 1], [], []>} : vector<32x128xbf16>, vector<128x128xbf16>, vector<32x128xf32> -> vector<32x128xf32>
    %75 = arith.addf %70, %74 : vector<32x128xf32>
    %c0_65 = arith.constant 0 : index
    %c275 = arith.constant 275 : index
    %c0_66 = arith.constant 0 : index
    %76 = vector.load %arg2[%c0_65, %c275, %c0_66] : memref<1x326x128xbf16, #tpu.memory_space<vmem>>, vector<1x32x128xbf16>
    %77 = vector.shape_cast %76 : vector<1x32x128xbf16> to vector<32x128xbf16>
    %c512_67 = arith.constant 512 : index
    %c0_68 = arith.constant 0 : index
    %78 = vector.load %arg3[%c512_67, %c0_68] : memref<1152x128xbf16, #tpu.memory_space<vmem>>, vector<128x128xbf16>
    %cst_69 = arith.constant dense<0.000000e+00> : vector<32x128xf32>
    %79 = tpu.matmul %77, %78, %cst_69 {dimension_numbers = #tpu.dot_dimension_numbers<[1], [0], [0], [1], [0, 0, 1, 1], [], []>} : vector<32x128xbf16>, vector<128x128xbf16>, vector<32x128xf32> -> vector<32x128xf32>
    %80 = arith.addf %75, %79 : vector<32x128xf32>
    %c0_70 = arith.constant 0 : index
    %c276 = arith.constant 276 : index
    %c0_71 = arith.constant 0 : index
    %81 = vector.load %arg2[%c0_70, %c276, %c0_71] : memref<1x326x128xbf16, #tpu.memory_space<vmem>>, vector<1x32x128xbf16>
    %82 = vector.shape_cast %81 : vector<1x32x128xbf16> to vector<32x128xbf16>
    %c640_72 = arith.constant 640 : index
    %c0_73 = arith.constant 0 : index
    %83 = vector.load %arg3[%c640_72, %c0_73] : memref<1152x128xbf16, #tpu.memory_space<vmem>>, vector<128x128xbf16>
    %cst_74 = arith.constant dense<0.000000e+00> : vector<32x128xf32>
    %84 = tpu.matmul %82, %83, %cst_74 {dimension_numbers = #tpu.dot_dimension_numbers<[1], [0], [0], [1], [0, 0, 1, 1], [], []>} : vector<32x128xbf16>, vector<128x128xbf16>, vector<32x128xf32> -> vector<32x128xf32>
    %85 = arith.addf %80, %84 : vector<32x128xf32>
    %c0_75 = arith.constant 0 : index
    %c292 = arith.constant 292 : index
    %c0_76 = arith.constant 0 : index
    %86 = vector.load %arg2[%c0_75, %c292, %c0_76] : memref<1x326x128xbf16, #tpu.memory_space<vmem>>, vector<1x32x128xbf16>
    %87 = vector.shape_cast %86 : vector<1x32x128xbf16> to vector<32x128xbf16>
    %c768_77 = arith.constant 768 : index
    %c0_78 = arith.constant 0 : index
    %88 = vector.load %arg3[%c768_77, %c0_78] : memref<1152x128xbf16, #tpu.memory_space<vmem>>, vector<128x128xbf16>
    %cst_79 = arith.constant dense<0.000000e+00> : vector<32x128xf32>
    %89 = tpu.matmul %87, %88, %cst_79 {dimension_numbers = #tpu.dot_dimension_numbers<[1], [0], [0], [1], [0, 0, 1, 1], [], []>} : vector<32x128xbf16>, vector<128x128xbf16>, vector<32x128xf32> -> vector<32x128xf32>
    %90 = arith.addf %85, %89 : vector<32x128xf32>
    %c0_80 = arith.constant 0 : index
    %c293 = arith.constant 293 : index
    %c0_81 = arith.constant 0 : index
    %91 = vector.load %arg2[%c0_80, %c293, %c0_81] : memref<1x326x128xbf16, #tpu.memory_space<vmem>>, vector<1x32x128xbf16>
    %92 = vector.shape_cast %91 : vector<1x32x128xbf16> to vector<32x128xbf16>
    %c896_82 = arith.constant 896 : index
    %c0_83 = arith.constant 0 : index
    %93 = vector.load %arg3[%c896_82, %c0_83] : memref<1152x128xbf16, #tpu.memory_space<vmem>>, vector<128x128xbf16>
    %cst_84 = arith.constant dense<0.000000e+00> : vector<32x128xf32>
    %94 = tpu.matmul %92, %93, %cst_84 {dimension_numbers = #tpu.dot_dimension_numbers<[1], [0], [0], [1], [0, 0, 1, 1], [], []>} : vector<32x128xbf16>, vector<128x128xbf16>, vector<32x128xf32> -> vector<32x128xf32>
    %95 = arith.addf %90, %94 : vector<32x128xf32>
    %c0_85 = arith.constant 0 : index
    %c294 = arith.constant 294 : index
    %c0_86 = arith.constant 0 : index
    %96 = vector.load %arg2[%c0_85, %c294, %c0_86] : memref<1x326x128xbf16, #tpu.memory_space<vmem>>, vector<1x32x128xbf16>
    %97 = vector.shape_cast %96 : vector<1x32x128xbf16> to vector<32x128xbf16>
    %c1024_87 = arith.constant 1024 : index
    %c0_88 = arith.constant 0 : index
    %98 = vector.load %arg3[%c1024_87, %c0_88] : memref<1152x128xbf16, #tpu.memory_space<vmem>>, vector<128x128xbf16>
    %cst_89 = arith.constant dense<0.000000e+00> : vector<32x128xf32>
    %99 = tpu.matmul %97, %98, %cst_89 {dimension_numbers = #tpu.dot_dimension_numbers<[1], [0], [0], [1], [0, 0, 1, 1], [], []>} : vector<32x128xbf16>, vector<128x128xbf16>, vector<32x128xf32> -> vector<32x128xf32>
    %100 = arith.addf %95, %99 : vector<32x128xf32>
    %101 = vector.broadcast %0 : vector<1x128xf32> to vector<32x128xf32>
    %102 = arith.addf %100, %101 : vector<32x128xf32>
    %cst_90 = arith.constant 0.000000e+00 : f32
    %103 = vector.broadcast %cst_90 : f32 to vector<32x128xf32>
    %104 = arith.maximumf %102, %103 : vector<32x128xf32>
    %105 = arith.truncf %104 : vector<32x128xf32> to vector<32x128xbf16>
    %c0_91 = arith.constant 0 : index
    %c256_92 = arith.constant 256 : index
    %c0_93 = arith.constant 0 : index
    %106 = vector.load %arg5[%c0_91, %c256_92, %c0_93] : memref<1x288x128xbf16, #tpu.memory_space<vmem>>, vector<1x32x128xbf16>
    %107 = vector.shape_cast %106 : vector<1x32x128xbf16> to vector<32x128xbf16>
    %108 = vector.shape_cast %105 : vector<32x128xbf16> to vector<1x32x128xbf16>
    tpu.vector_store %arg5[%c0_91, %c256_92, %c0_93], %108 {strides = array<i32>} : memref<1x288x128xbf16, #tpu.memory_space<vmem>>, vector<1x32x128xbf16>,
    return
  }
  func.func @transform_0(%arg0: i32, %arg1: i32) -> (i32, i32, i32) {
    %c0_i32 = arith.constant 0 : i32
    %c0_i32_0 = arith.constant 0 : i32
    %c0_i32_1 = arith.constant 0 : i32
    return %arg0, %c0_i32, %c0_i32_0 : i32, i32, i32
  }
  func.func @transform_1(%arg0: i32, %arg1: i32) -> (i32, i32) {
    %c0_i32 = arith.constant 0 : i32
    %c0_i32_0 = arith.constant 0 : i32
    return %c0_i32, %arg1 : i32, i32
  }
  func.func @transform_2(%arg0: i32, %arg1: i32) -> (i32, i32) {
    %c0_i32 = arith.constant 0 : i32
    %c0_i32_0 = arith.constant 0 : i32
    return %c0_i32, %arg1 : i32, i32
  }
  func.func @transform_3(%arg0: i32, %arg1: i32) -> (i32, i32, i32) {
    %c0_i32 = arith.constant 0 : i32
    %c0_i32_0 = arith.constant 0 : i32
    return %arg0, %c0_i32, %arg1 : i32, i32, i32
  }
}

module attributes {stable_mosaic.version = 11 : i64} {
  func.func @_conv_taps_kernel(%arg0: i32, %arg1: i32, %arg2: memref<1x326x128xbf16, #tpu.memory_space<vmem>>, %arg3: memref<1152x128xbf16, #tpu.memory_space<vmem>>, %arg4: memref<1x128xf32, #tpu.memory_space<vmem>>, %arg5: memref<1x288x128xf32, #tpu.memory_space<vmem>>) attributes {dimension_semantics = [#tpu.dimension_semantics<parallel>, #tpu.dimension_semantics<parallel>], iteration_bounds = array<i64: 2, 1>, scalar_prefetch = 0 : i64, scratch_operands = 0 : i64, tpu.core_type = #tpu.core_type<tc>, window_params = [{transform_indices = @transform_0, window_bounds = array<i64: 1, 326, 128>}, {transform_indices = @transform_1, window_bounds = array<i64: 1152, 128>}, {transform_indices = @transform_2, window_bounds = array<i64: 1, 128>}, {transform_indices = @transform_3, window_bounds = array<i64: 1, 288, 128>}]} {
    %c0 = arith.constant 0 : index
    %c0_0 = arith.constant 0 : index
    %0 = vector.load %arg4[%c0, %c0_0] : memref<1x128xf32, #tpu.memory_space<vmem>>, vector<1x128xf32>
    %cst = arith.constant 0.000000e+00 : f32
    %1 = vector.broadcast %cst : f32 to vector<256x128xf32>
    %c0_1 = arith.constant 0 : index
    %c0_2 = arith.constant 0 : index
    %c0_3 = arith.constant 0 : index
    %2 = vector.load %arg2[%c0_1, %c0_2, %c0_3] : memref<1x326x128xbf16, #tpu.memory_space<vmem>>, vector<1x256x128xbf16>
    %3 = vector.shape_cast %2 : vector<1x256x128xbf16> to vector<256x128xbf16>
    %c0_4 = arith.constant 0 : index
    %c0_5 = arith.constant 0 : index
    %4 = vector.load %arg3[%c0_4, %c0_5] : memref<1152x128xbf16, #tpu.memory_space<vmem>>, vector<128x128xbf16>
    %cst_6 = arith.constant dense<0.000000e+00> : vector<256x128xf32>
    %5 = tpu.matmul %3, %4, %cst_6 {dimension_numbers = #tpu.dot_dimension_numbers<[1], [0], [0], [1], [0, 0, 1, 1], [], []>} : vector<256x128xbf16>, vector<128x128xbf16>, vector<256x128xf32> -> vector<256x128xf32>
    %6 = arith.addf %1, %5 : vector<256x128xf32>
    %c0_7 = arith.constant 0 : index
    %c1 = arith.constant 1 : index
    %c0_8 = arith.constant 0 : index
    %7 = vector.load %arg2[%c0_7, %c1, %c0_8] : memref<1x326x128xbf16, #tpu.memory_space<vmem>>, vector<1x256x128xbf16>
    %8 = vector.shape_cast %7 : vector<1x256x128xbf16> to vector<256x128xbf16>
    %c128 = arith.constant 128 : index
    %c0_9 = arith.constant 0 : index
    %9 = vector.load %arg3[%c128, %c0_9] : memref<1152x128xbf16, #tpu.memory_space<vmem>>, vector<128x128xbf16>
    %cst_10 = arith.constant dense<0.000000e+00> : vector<256x128xf32>
    %10 = tpu.matmul %8, %9, %cst_10 {dimension_numbers = #tpu.dot_dimension_numbers<[1], [0], [0], [1], [0, 0, 1, 1], [], []>} : vector<256x128xbf16>, vector<128x128xbf16>, vector<256x128xf32> -> vector<256x128xf32>
    %11 = arith.addf %6, %10 : vector<256x128xf32>
    %c0_11 = arith.constant 0 : index
    %c2 = arith.constant 2 : index
    %c0_12 = arith.constant 0 : index
    %12 = vector.load %arg2[%c0_11, %c2, %c0_12] : memref<1x326x128xbf16, #tpu.memory_space<vmem>>, vector<1x256x128xbf16>
    %13 = vector.shape_cast %12 : vector<1x256x128xbf16> to vector<256x128xbf16>
    %c256 = arith.constant 256 : index
    %c0_13 = arith.constant 0 : index
    %14 = vector.load %arg3[%c256, %c0_13] : memref<1152x128xbf16, #tpu.memory_space<vmem>>, vector<128x128xbf16>
    %cst_14 = arith.constant dense<0.000000e+00> : vector<256x128xf32>
    %15 = tpu.matmul %13, %14, %cst_14 {dimension_numbers = #tpu.dot_dimension_numbers<[1], [0], [0], [1], [0, 0, 1, 1], [], []>} : vector<256x128xbf16>, vector<128x128xbf16>, vector<256x128xf32> -> vector<256x128xf32>
    %16 = arith.addf %11, %15 : vector<256x128xf32>
    %c0_15 = arith.constant 0 : index
    %c18 = arith.constant 18 : index
    %c0_16 = arith.constant 0 : index
    %17 = vector.load %arg2[%c0_15, %c18, %c0_16] : memref<1x326x128xbf16, #tpu.memory_space<vmem>>, vector<1x256x128xbf16>
    %18 = vector.shape_cast %17 : vector<1x256x128xbf16> to vector<256x128xbf16>
    %c384 = arith.constant 384 : index
    %c0_17 = arith.constant 0 : index
    %19 = vector.load %arg3[%c384, %c0_17] : memref<1152x128xbf16, #tpu.memory_space<vmem>>, vector<128x128xbf16>
    %cst_18 = arith.constant dense<0.000000e+00> : vector<256x128xf32>
    %20 = tpu.matmul %18, %19, %cst_18 {dimension_numbers = #tpu.dot_dimension_numbers<[1], [0], [0], [1], [0, 0, 1, 1], [], []>} : vector<256x128xbf16>, vector<128x128xbf16>, vector<256x128xf32> -> vector<256x128xf32>
    %21 = arith.addf %16, %20 : vector<256x128xf32>
    %c0_19 = arith.constant 0 : index
    %c19 = arith.constant 19 : index
    %c0_20 = arith.constant 0 : index
    %22 = vector.load %arg2[%c0_19, %c19, %c0_20] : memref<1x326x128xbf16, #tpu.memory_space<vmem>>, vector<1x256x128xbf16>
    %23 = vector.shape_cast %22 : vector<1x256x128xbf16> to vector<256x128xbf16>
    %c512 = arith.constant 512 : index
    %c0_21 = arith.constant 0 : index
    %24 = vector.load %arg3[%c512, %c0_21] : memref<1152x128xbf16, #tpu.memory_space<vmem>>, vector<128x128xbf16>
    %cst_22 = arith.constant dense<0.000000e+00> : vector<256x128xf32>
    %25 = tpu.matmul %23, %24, %cst_22 {dimension_numbers = #tpu.dot_dimension_numbers<[1], [0], [0], [1], [0, 0, 1, 1], [], []>} : vector<256x128xbf16>, vector<128x128xbf16>, vector<256x128xf32> -> vector<256x128xf32>
    %26 = arith.addf %21, %25 : vector<256x128xf32>
    %c0_23 = arith.constant 0 : index
    %c20 = arith.constant 20 : index
    %c0_24 = arith.constant 0 : index
    %27 = vector.load %arg2[%c0_23, %c20, %c0_24] : memref<1x326x128xbf16, #tpu.memory_space<vmem>>, vector<1x256x128xbf16>
    %28 = vector.shape_cast %27 : vector<1x256x128xbf16> to vector<256x128xbf16>
    %c640 = arith.constant 640 : index
    %c0_25 = arith.constant 0 : index
    %29 = vector.load %arg3[%c640, %c0_25] : memref<1152x128xbf16, #tpu.memory_space<vmem>>, vector<128x128xbf16>
    %cst_26 = arith.constant dense<0.000000e+00> : vector<256x128xf32>
    %30 = tpu.matmul %28, %29, %cst_26 {dimension_numbers = #tpu.dot_dimension_numbers<[1], [0], [0], [1], [0, 0, 1, 1], [], []>} : vector<256x128xbf16>, vector<128x128xbf16>, vector<256x128xf32> -> vector<256x128xf32>
    %31 = arith.addf %26, %30 : vector<256x128xf32>
    %c0_27 = arith.constant 0 : index
    %c36 = arith.constant 36 : index
    %c0_28 = arith.constant 0 : index
    %32 = vector.load %arg2[%c0_27, %c36, %c0_28] : memref<1x326x128xbf16, #tpu.memory_space<vmem>>, vector<1x256x128xbf16>
    %33 = vector.shape_cast %32 : vector<1x256x128xbf16> to vector<256x128xbf16>
    %c768 = arith.constant 768 : index
    %c0_29 = arith.constant 0 : index
    %34 = vector.load %arg3[%c768, %c0_29] : memref<1152x128xbf16, #tpu.memory_space<vmem>>, vector<128x128xbf16>
    %cst_30 = arith.constant dense<0.000000e+00> : vector<256x128xf32>
    %35 = tpu.matmul %33, %34, %cst_30 {dimension_numbers = #tpu.dot_dimension_numbers<[1], [0], [0], [1], [0, 0, 1, 1], [], []>} : vector<256x128xbf16>, vector<128x128xbf16>, vector<256x128xf32> -> vector<256x128xf32>
    %36 = arith.addf %31, %35 : vector<256x128xf32>
    %c0_31 = arith.constant 0 : index
    %c37 = arith.constant 37 : index
    %c0_32 = arith.constant 0 : index
    %37 = vector.load %arg2[%c0_31, %c37, %c0_32] : memref<1x326x128xbf16, #tpu.memory_space<vmem>>, vector<1x256x128xbf16>
    %38 = vector.shape_cast %37 : vector<1x256x128xbf16> to vector<256x128xbf16>
    %c896 = arith.constant 896 : index
    %c0_33 = arith.constant 0 : index
    %39 = vector.load %arg3[%c896, %c0_33] : memref<1152x128xbf16, #tpu.memory_space<vmem>>, vector<128x128xbf16>
    %cst_34 = arith.constant dense<0.000000e+00> : vector<256x128xf32>
    %40 = tpu.matmul %38, %39, %cst_34 {dimension_numbers = #tpu.dot_dimension_numbers<[1], [0], [0], [1], [0, 0, 1, 1], [], []>} : vector<256x128xbf16>, vector<128x128xbf16>, vector<256x128xf32> -> vector<256x128xf32>
    %41 = arith.addf %36, %40 : vector<256x128xf32>
    %c0_35 = arith.constant 0 : index
    %c38 = arith.constant 38 : index
    %c0_36 = arith.constant 0 : index
    %42 = vector.load %arg2[%c0_35, %c38, %c0_36] : memref<1x326x128xbf16, #tpu.memory_space<vmem>>, vector<1x256x128xbf16>
    %43 = vector.shape_cast %42 : vector<1x256x128xbf16> to vector<256x128xbf16>
    %c1024 = arith.constant 1024 : index
    %c0_37 = arith.constant 0 : index
    %44 = vector.load %arg3[%c1024, %c0_37] : memref<1152x128xbf16, #tpu.memory_space<vmem>>, vector<128x128xbf16>
    %cst_38 = arith.constant dense<0.000000e+00> : vector<256x128xf32>
    %45 = tpu.matmul %43, %44, %cst_38 {dimension_numbers = #tpu.dot_dimension_numbers<[1], [0], [0], [1], [0, 0, 1, 1], [], []>} : vector<256x128xbf16>, vector<128x128xbf16>, vector<256x128xf32> -> vector<256x128xf32>
    %46 = arith.addf %41, %45 : vector<256x128xf32>
    %47 = vector.broadcast %0 : vector<1x128xf32> to vector<256x128xf32>
    %48 = arith.addf %46, %47 : vector<256x128xf32>
    %c0_39 = arith.constant 0 : index
    %c0_40 = arith.constant 0 : index
    %c0_41 = arith.constant 0 : index
    %49 = vector.load %arg5[%c0_39, %c0_40, %c0_41] : memref<1x288x128xf32, #tpu.memory_space<vmem>>, vector<1x256x128xf32>
    %50 = vector.shape_cast %49 : vector<1x256x128xf32> to vector<256x128xf32>
    %51 = vector.shape_cast %48 : vector<256x128xf32> to vector<1x256x128xf32>
    tpu.vector_store %arg5[%c0_39, %c0_40, %c0_41], %51 {strides = array<i32>} : memref<1x288x128xf32, #tpu.memory_space<vmem>>, vector<1x256x128xf32>,
    %cst_42 = arith.constant 0.000000e+00 : f32
    %52 = vector.broadcast %cst_42 : f32 to vector<32x128xf32>
    %c0_43 = arith.constant 0 : index
    %c256_44 = arith.constant 256 : index
    %c0_45 = arith.constant 0 : index
    %53 = vector.load %arg2[%c0_43, %c256_44, %c0_45] : memref<1x326x128xbf16, #tpu.memory_space<vmem>>, vector<1x32x128xbf16>
    %54 = vector.shape_cast %53 : vector<1x32x128xbf16> to vector<32x128xbf16>
    %c0_46 = arith.constant 0 : index
    %c0_47 = arith.constant 0 : index
    %55 = vector.load %arg3[%c0_46, %c0_47] : memref<1152x128xbf16, #tpu.memory_space<vmem>>, vector<128x128xbf16>
    %cst_48 = arith.constant dense<0.000000e+00> : vector<32x128xf32>
    %56 = tpu.matmul %54, %55, %cst_48 {dimension_numbers = #tpu.dot_dimension_numbers<[1], [0], [0], [1], [0, 0, 1, 1], [], []>} : vector<32x128xbf16>, vector<128x128xbf16>, vector<32x128xf32> -> vector<32x128xf32>
    %57 = arith.addf %52, %56 : vector<32x128xf32>
    %c0_49 = arith.constant 0 : index
    %c257 = arith.constant 257 : index
    %c0_50 = arith.constant 0 : index
    %58 = vector.load %arg2[%c0_49, %c257, %c0_50] : memref<1x326x128xbf16, #tpu.memory_space<vmem>>, vector<1x32x128xbf16>
    %59 = vector.shape_cast %58 : vector<1x32x128xbf16> to vector<32x128xbf16>
    %c128_51 = arith.constant 128 : index
    %c0_52 = arith.constant 0 : index
    %60 = vector.load %arg3[%c128_51, %c0_52] : memref<1152x128xbf16, #tpu.memory_space<vmem>>, vector<128x128xbf16>
    %cst_53 = arith.constant dense<0.000000e+00> : vector<32x128xf32>
    %61 = tpu.matmul %59, %60, %cst_53 {dimension_numbers = #tpu.dot_dimension_numbers<[1], [0], [0], [1], [0, 0, 1, 1], [], []>} : vector<32x128xbf16>, vector<128x128xbf16>, vector<32x128xf32> -> vector<32x128xf32>
    %62 = arith.addf %57, %61 : vector<32x128xf32>
    %c0_54 = arith.constant 0 : index
    %c258 = arith.constant 258 : index
    %c0_55 = arith.constant 0 : index
    %63 = vector.load %arg2[%c0_54, %c258, %c0_55] : memref<1x326x128xbf16, #tpu.memory_space<vmem>>, vector<1x32x128xbf16>
    %64 = vector.shape_cast %63 : vector<1x32x128xbf16> to vector<32x128xbf16>
    %c256_56 = arith.constant 256 : index
    %c0_57 = arith.constant 0 : index
    %65 = vector.load %arg3[%c256_56, %c0_57] : memref<1152x128xbf16, #tpu.memory_space<vmem>>, vector<128x128xbf16>
    %cst_58 = arith.constant dense<0.000000e+00> : vector<32x128xf32>
    %66 = tpu.matmul %64, %65, %cst_58 {dimension_numbers = #tpu.dot_dimension_numbers<[1], [0], [0], [1], [0, 0, 1, 1], [], []>} : vector<32x128xbf16>, vector<128x128xbf16>, vector<32x128xf32> -> vector<32x128xf32>
    %67 = arith.addf %62, %66 : vector<32x128xf32>
    %c0_59 = arith.constant 0 : index
    %c274 = arith.constant 274 : index
    %c0_60 = arith.constant 0 : index
    %68 = vector.load %arg2[%c0_59, %c274, %c0_60] : memref<1x326x128xbf16, #tpu.memory_space<vmem>>, vector<1x32x128xbf16>
    %69 = vector.shape_cast %68 : vector<1x32x128xbf16> to vector<32x128xbf16>
    %c384_61 = arith.constant 384 : index
    %c0_62 = arith.constant 0 : index
    %70 = vector.load %arg3[%c384_61, %c0_62] : memref<1152x128xbf16, #tpu.memory_space<vmem>>, vector<128x128xbf16>
    %cst_63 = arith.constant dense<0.000000e+00> : vector<32x128xf32>
    %71 = tpu.matmul %69, %70, %cst_63 {dimension_numbers = #tpu.dot_dimension_numbers<[1], [0], [0], [1], [0, 0, 1, 1], [], []>} : vector<32x128xbf16>, vector<128x128xbf16>, vector<32x128xf32> -> vector<32x128xf32>
    %72 = arith.addf %67, %71 : vector<32x128xf32>
    %c0_64 = arith.constant 0 : index
    %c275 = arith.constant 275 : index
    %c0_65 = arith.constant 0 : index
    %73 = vector.load %arg2[%c0_64, %c275, %c0_65] : memref<1x326x128xbf16, #tpu.memory_space<vmem>>, vector<1x32x128xbf16>
    %74 = vector.shape_cast %73 : vector<1x32x128xbf16> to vector<32x128xbf16>
    %c512_66 = arith.constant 512 : index
    %c0_67 = arith.constant 0 : index
    %75 = vector.load %arg3[%c512_66, %c0_67] : memref<1152x128xbf16, #tpu.memory_space<vmem>>, vector<128x128xbf16>
    %cst_68 = arith.constant dense<0.000000e+00> : vector<32x128xf32>
    %76 = tpu.matmul %74, %75, %cst_68 {dimension_numbers = #tpu.dot_dimension_numbers<[1], [0], [0], [1], [0, 0, 1, 1], [], []>} : vector<32x128xbf16>, vector<128x128xbf16>, vector<32x128xf32> -> vector<32x128xf32>
    %77 = arith.addf %72, %76 : vector<32x128xf32>
    %c0_69 = arith.constant 0 : index
    %c276 = arith.constant 276 : index
    %c0_70 = arith.constant 0 : index
    %78 = vector.load %arg2[%c0_69, %c276, %c0_70] : memref<1x326x128xbf16, #tpu.memory_space<vmem>>, vector<1x32x128xbf16>
    %79 = vector.shape_cast %78 : vector<1x32x128xbf16> to vector<32x128xbf16>
    %c640_71 = arith.constant 640 : index
    %c0_72 = arith.constant 0 : index
    %80 = vector.load %arg3[%c640_71, %c0_72] : memref<1152x128xbf16, #tpu.memory_space<vmem>>, vector<128x128xbf16>
    %cst_73 = arith.constant dense<0.000000e+00> : vector<32x128xf32>
    %81 = tpu.matmul %79, %80, %cst_73 {dimension_numbers = #tpu.dot_dimension_numbers<[1], [0], [0], [1], [0, 0, 1, 1], [], []>} : vector<32x128xbf16>, vector<128x128xbf16>, vector<32x128xf32> -> vector<32x128xf32>
    %82 = arith.addf %77, %81 : vector<32x128xf32>
    %c0_74 = arith.constant 0 : index
    %c292 = arith.constant 292 : index
    %c0_75 = arith.constant 0 : index
    %83 = vector.load %arg2[%c0_74, %c292, %c0_75] : memref<1x326x128xbf16, #tpu.memory_space<vmem>>, vector<1x32x128xbf16>
    %84 = vector.shape_cast %83 : vector<1x32x128xbf16> to vector<32x128xbf16>
    %c768_76 = arith.constant 768 : index
    %c0_77 = arith.constant 0 : index
    %85 = vector.load %arg3[%c768_76, %c0_77] : memref<1152x128xbf16, #tpu.memory_space<vmem>>, vector<128x128xbf16>
    %cst_78 = arith.constant dense<0.000000e+00> : vector<32x128xf32>
    %86 = tpu.matmul %84, %85, %cst_78 {dimension_numbers = #tpu.dot_dimension_numbers<[1], [0], [0], [1], [0, 0, 1, 1], [], []>} : vector<32x128xbf16>, vector<128x128xbf16>, vector<32x128xf32> -> vector<32x128xf32>
    %87 = arith.addf %82, %86 : vector<32x128xf32>
    %c0_79 = arith.constant 0 : index
    %c293 = arith.constant 293 : index
    %c0_80 = arith.constant 0 : index
    %88 = vector.load %arg2[%c0_79, %c293, %c0_80] : memref<1x326x128xbf16, #tpu.memory_space<vmem>>, vector<1x32x128xbf16>
    %89 = vector.shape_cast %88 : vector<1x32x128xbf16> to vector<32x128xbf16>
    %c896_81 = arith.constant 896 : index
    %c0_82 = arith.constant 0 : index
    %90 = vector.load %arg3[%c896_81, %c0_82] : memref<1152x128xbf16, #tpu.memory_space<vmem>>, vector<128x128xbf16>
    %cst_83 = arith.constant dense<0.000000e+00> : vector<32x128xf32>
    %91 = tpu.matmul %89, %90, %cst_83 {dimension_numbers = #tpu.dot_dimension_numbers<[1], [0], [0], [1], [0, 0, 1, 1], [], []>} : vector<32x128xbf16>, vector<128x128xbf16>, vector<32x128xf32> -> vector<32x128xf32>
    %92 = arith.addf %87, %91 : vector<32x128xf32>
    %c0_84 = arith.constant 0 : index
    %c294 = arith.constant 294 : index
    %c0_85 = arith.constant 0 : index
    %93 = vector.load %arg2[%c0_84, %c294, %c0_85] : memref<1x326x128xbf16, #tpu.memory_space<vmem>>, vector<1x32x128xbf16>
    %94 = vector.shape_cast %93 : vector<1x32x128xbf16> to vector<32x128xbf16>
    %c1024_86 = arith.constant 1024 : index
    %c0_87 = arith.constant 0 : index
    %95 = vector.load %arg3[%c1024_86, %c0_87] : memref<1152x128xbf16, #tpu.memory_space<vmem>>, vector<128x128xbf16>
    %cst_88 = arith.constant dense<0.000000e+00> : vector<32x128xf32>
    %96 = tpu.matmul %94, %95, %cst_88 {dimension_numbers = #tpu.dot_dimension_numbers<[1], [0], [0], [1], [0, 0, 1, 1], [], []>} : vector<32x128xbf16>, vector<128x128xbf16>, vector<32x128xf32> -> vector<32x128xf32>
    %97 = arith.addf %92, %96 : vector<32x128xf32>
    %98 = vector.broadcast %0 : vector<1x128xf32> to vector<32x128xf32>
    %99 = arith.addf %97, %98 : vector<32x128xf32>
    %c0_89 = arith.constant 0 : index
    %c256_90 = arith.constant 256 : index
    %c0_91 = arith.constant 0 : index
    %100 = vector.load %arg5[%c0_89, %c256_90, %c0_91] : memref<1x288x128xf32, #tpu.memory_space<vmem>>, vector<1x32x128xf32>
    %101 = vector.shape_cast %100 : vector<1x32x128xf32> to vector<32x128xf32>
    %102 = vector.shape_cast %99 : vector<32x128xf32> to vector<1x32x128xf32>
    tpu.vector_store %arg5[%c0_89, %c256_90, %c0_91], %102 {strides = array<i32>} : memref<1x288x128xf32, #tpu.memory_space<vmem>>, vector<1x32x128xf32>,
    return
  }
  func.func @transform_0(%arg0: i32, %arg1: i32) -> (i32, i32, i32) {
    %c0_i32 = arith.constant 0 : i32
    %c0_i32_0 = arith.constant 0 : i32
    %c0_i32_1 = arith.constant 0 : i32
    return %arg0, %c0_i32, %c0_i32_0 : i32, i32, i32
  }
  func.func @transform_1(%arg0: i32, %arg1: i32) -> (i32, i32) {
    %c0_i32 = arith.constant 0 : i32
    %c0_i32_0 = arith.constant 0 : i32
    return %c0_i32, %arg1 : i32, i32
  }
  func.func @transform_2(%arg0: i32, %arg1: i32) -> (i32, i32) {
    %c0_i32 = arith.constant 0 : i32
    %c0_i32_0 = arith.constant 0 : i32
    return %c0_i32, %arg1 : i32, i32
  }
  func.func @transform_3(%arg0: i32, %arg1: i32) -> (i32, i32, i32) {
    %c0_i32 = arith.constant 0 : i32
    %c0_i32_0 = arith.constant 0 : i32
    return %arg0, %c0_i32, %arg1 : i32, i32, i32
  }
}

module attributes {stable_mosaic.version = 11 : i64} {
  func.func @_mm_kernel_single_k(%arg0: i32, %arg1: i32, %arg2: memref<128x128xbf16, #tpu.memory_space<vmem>>, %arg3: memref<128x128xbf16, #tpu.memory_space<vmem>>, %arg4: memref<1x128xf32, #tpu.memory_space<vmem>>, %arg5: memref<128x128xf32, #tpu.memory_space<vmem>>) attributes {dimension_semantics = [#tpu.dimension_semantics<parallel>, #tpu.dimension_semantics<parallel>], iteration_bounds = array<i64: 1, 2>, scalar_prefetch = 0 : i64, scratch_operands = 0 : i64, tpu.core_type = #tpu.core_type<tc>, window_params = [{transform_indices = @transform_0, window_bounds = array<i64: 128, 128>}, {transform_indices = @transform_1, window_bounds = array<i64: 128, 128>}, {transform_indices = @transform_2, window_bounds = array<i64: 1, 128>}, {transform_indices = @transform_3, window_bounds = array<i64: 128, 128>}]} {
    %c0 = arith.constant 0 : index
    %c0_0 = arith.constant 0 : index
    %0 = vector.load %arg2[%c0, %c0_0] : memref<128x128xbf16, #tpu.memory_space<vmem>>, vector<128x128xbf16>
    %c0_1 = arith.constant 0 : index
    %c0_2 = arith.constant 0 : index
    %1 = vector.load %arg3[%c0_1, %c0_2] : memref<128x128xbf16, #tpu.memory_space<vmem>>, vector<128x128xbf16>
    %cst = arith.constant dense<0.000000e+00> : vector<128x128xf32>
    %2 = tpu.matmul %0, %1, %cst {dimension_numbers = #tpu.dot_dimension_numbers<[1], [0], [0], [1], [0, 0, 1, 1], [], []>} : vector<128x128xbf16>, vector<128x128xbf16>, vector<128x128xf32> -> vector<128x128xf32>
    %c0_3 = arith.constant 0 : index
    %c0_4 = arith.constant 0 : index
    %3 = vector.load %arg4[%c0_3, %c0_4] : memref<1x128xf32, #tpu.memory_space<vmem>>, vector<1x128xf32>
    %4 = vector.broadcast %3 : vector<1x128xf32> to vector<128x128xf32>
    %5 = arith.addf %2, %4 : vector<128x128xf32>
    %c0_5 = arith.constant 0 : index
    %c0_6 = arith.constant 0 : index
    %6 = vector.load %arg5[%c0_5, %c0_6] : memref<128x128xf32, #tpu.memory_space<vmem>>, vector<128x128xf32>
    tpu.vector_store %arg5[%c0_5, %c0_6], %5 {strides = array<i32>} : memref<128x128xf32, #tpu.memory_space<vmem>>, vector<128x128xf32>,
    return
  }
  func.func @transform_0(%arg0: i32, %arg1: i32) -> (i32, i32) {
    %c0_i32 = arith.constant 0 : i32
    %c0_i32_0 = arith.constant 0 : i32
    return %arg0, %c0_i32 : i32, i32
  }
  func.func @transform_1(%arg0: i32, %arg1: i32) -> (i32, i32) {
    %c0_i32 = arith.constant 0 : i32
    %c0_i32_0 = arith.constant 0 : i32
    return %c0_i32, %arg1 : i32, i32
  }
  func.func @transform_2(%arg0: i32, %arg1: i32) -> (i32, i32) {
    %c0_i32 = arith.constant 0 : i32
    %c0_i32_0 = arith.constant 0 : i32
    return %c0_i32, %arg1 : i32, i32
  }
  func.func @transform_3(%arg0: i32, %arg1: i32) -> (i32, i32) {
    %c0_i32 = arith.constant 0 : i32
    return %arg0, %arg1 : i32, i32
  }
}

module attributes {stable_mosaic.version = 11 : i64} {
  func.func @_conv_taps_kernel(%arg0: i32, %arg1: i32, %arg2: memref<1x102x256xbf16, #tpu.memory_space<vmem>>, %arg3: memref<2304x256xbf16, #tpu.memory_space<vmem>>, %arg4: memref<1x256xf32, #tpu.memory_space<vmem>>, %arg5: memref<1x80x256xf32, #tpu.memory_space<vmem>>) attributes {dimension_semantics = [#tpu.dimension_semantics<parallel>, #tpu.dimension_semantics<parallel>], iteration_bounds = array<i64: 2, 1>, scalar_prefetch = 0 : i64, scratch_operands = 0 : i64, tpu.core_type = #tpu.core_type<tc>, window_params = [{transform_indices = @transform_0, window_bounds = array<i64: 1, 102, 256>}, {transform_indices = @transform_1, window_bounds = array<i64: 2304, 256>}, {transform_indices = @transform_2, window_bounds = array<i64: 1, 256>}, {transform_indices = @transform_3, window_bounds = array<i64: 1, 80, 256>}]} {
    %c0 = arith.constant 0 : index
    %c0_0 = arith.constant 0 : index
    %0 = vector.load %arg4[%c0, %c0_0] : memref<1x256xf32, #tpu.memory_space<vmem>>, vector<1x256xf32>
    %cst = arith.constant 0.000000e+00 : f32
    %1 = vector.broadcast %cst : f32 to vector<80x256xf32>
    %c0_1 = arith.constant 0 : index
    %c0_2 = arith.constant 0 : index
    %c0_3 = arith.constant 0 : index
    %2 = vector.load %arg2[%c0_1, %c0_2, %c0_3] : memref<1x102x256xbf16, #tpu.memory_space<vmem>>, vector<1x80x256xbf16>
    %3 = vector.shape_cast %2 : vector<1x80x256xbf16> to vector<80x256xbf16>
    %c0_4 = arith.constant 0 : index
    %c0_5 = arith.constant 0 : index
    %4 = vector.load %arg3[%c0_4, %c0_5] : memref<2304x256xbf16, #tpu.memory_space<vmem>>, vector<256x256xbf16>
    %cst_6 = arith.constant dense<0.000000e+00> : vector<80x256xf32>
    %5 = tpu.matmul %3, %4, %cst_6 {dimension_numbers = #tpu.dot_dimension_numbers<[1], [0], [0], [1], [0, 0, 1, 1], [], []>} : vector<80x256xbf16>, vector<256x256xbf16>, vector<80x256xf32> -> vector<80x256xf32>
    %6 = arith.addf %1, %5 : vector<80x256xf32>
    %c0_7 = arith.constant 0 : index
    %c1 = arith.constant 1 : index
    %c0_8 = arith.constant 0 : index
    %7 = vector.load %arg2[%c0_7, %c1, %c0_8] : memref<1x102x256xbf16, #tpu.memory_space<vmem>>, vector<1x80x256xbf16>
    %8 = vector.shape_cast %7 : vector<1x80x256xbf16> to vector<80x256xbf16>
    %c256 = arith.constant 256 : index
    %c0_9 = arith.constant 0 : index
    %9 = vector.load %arg3[%c256, %c0_9] : memref<2304x256xbf16, #tpu.memory_space<vmem>>, vector<256x256xbf16>
    %cst_10 = arith.constant dense<0.000000e+00> : vector<80x256xf32>
    %10 = tpu.matmul %8, %9, %cst_10 {dimension_numbers = #tpu.dot_dimension_numbers<[1], [0], [0], [1], [0, 0, 1, 1], [], []>} : vector<80x256xbf16>, vector<256x256xbf16>, vector<80x256xf32> -> vector<80x256xf32>
    %11 = arith.addf %6, %10 : vector<80x256xf32>
    %c0_11 = arith.constant 0 : index
    %c2 = arith.constant 2 : index
    %c0_12 = arith.constant 0 : index
    %12 = vector.load %arg2[%c0_11, %c2, %c0_12] : memref<1x102x256xbf16, #tpu.memory_space<vmem>>, vector<1x80x256xbf16>
    %13 = vector.shape_cast %12 : vector<1x80x256xbf16> to vector<80x256xbf16>
    %c512 = arith.constant 512 : index
    %c0_13 = arith.constant 0 : index
    %14 = vector.load %arg3[%c512, %c0_13] : memref<2304x256xbf16, #tpu.memory_space<vmem>>, vector<256x256xbf16>
    %cst_14 = arith.constant dense<0.000000e+00> : vector<80x256xf32>
    %15 = tpu.matmul %13, %14, %cst_14 {dimension_numbers = #tpu.dot_dimension_numbers<[1], [0], [0], [1], [0, 0, 1, 1], [], []>} : vector<80x256xbf16>, vector<256x256xbf16>, vector<80x256xf32> -> vector<80x256xf32>
    %16 = arith.addf %11, %15 : vector<80x256xf32>
    %c0_15 = arith.constant 0 : index
    %c10 = arith.constant 10 : index
    %c0_16 = arith.constant 0 : index
    %17 = vector.load %arg2[%c0_15, %c10, %c0_16] : memref<1x102x256xbf16, #tpu.memory_space<vmem>>, vector<1x80x256xbf16>
    %18 = vector.shape_cast %17 : vector<1x80x256xbf16> to vector<80x256xbf16>
    %c768 = arith.constant 768 : index
    %c0_17 = arith.constant 0 : index
    %19 = vector.load %arg3[%c768, %c0_17] : memref<2304x256xbf16, #tpu.memory_space<vmem>>, vector<256x256xbf16>
    %cst_18 = arith.constant dense<0.000000e+00> : vector<80x256xf32>
    %20 = tpu.matmul %18, %19, %cst_18 {dimension_numbers = #tpu.dot_dimension_numbers<[1], [0], [0], [1], [0, 0, 1, 1], [], []>} : vector<80x256xbf16>, vector<256x256xbf16>, vector<80x256xf32> -> vector<80x256xf32>
    %21 = arith.addf %16, %20 : vector<80x256xf32>
    %c0_19 = arith.constant 0 : index
    %c11 = arith.constant 11 : index
    %c0_20 = arith.constant 0 : index
    %22 = vector.load %arg2[%c0_19, %c11, %c0_20] : memref<1x102x256xbf16, #tpu.memory_space<vmem>>, vector<1x80x256xbf16>
    %23 = vector.shape_cast %22 : vector<1x80x256xbf16> to vector<80x256xbf16>
    %c1024 = arith.constant 1024 : index
    %c0_21 = arith.constant 0 : index
    %24 = vector.load %arg3[%c1024, %c0_21] : memref<2304x256xbf16, #tpu.memory_space<vmem>>, vector<256x256xbf16>
    %cst_22 = arith.constant dense<0.000000e+00> : vector<80x256xf32>
    %25 = tpu.matmul %23, %24, %cst_22 {dimension_numbers = #tpu.dot_dimension_numbers<[1], [0], [0], [1], [0, 0, 1, 1], [], []>} : vector<80x256xbf16>, vector<256x256xbf16>, vector<80x256xf32> -> vector<80x256xf32>
    %26 = arith.addf %21, %25 : vector<80x256xf32>
    %c0_23 = arith.constant 0 : index
    %c12 = arith.constant 12 : index
    %c0_24 = arith.constant 0 : index
    %27 = vector.load %arg2[%c0_23, %c12, %c0_24] : memref<1x102x256xbf16, #tpu.memory_space<vmem>>, vector<1x80x256xbf16>
    %28 = vector.shape_cast %27 : vector<1x80x256xbf16> to vector<80x256xbf16>
    %c1280 = arith.constant 1280 : index
    %c0_25 = arith.constant 0 : index
    %29 = vector.load %arg3[%c1280, %c0_25] : memref<2304x256xbf16, #tpu.memory_space<vmem>>, vector<256x256xbf16>
    %cst_26 = arith.constant dense<0.000000e+00> : vector<80x256xf32>
    %30 = tpu.matmul %28, %29, %cst_26 {dimension_numbers = #tpu.dot_dimension_numbers<[1], [0], [0], [1], [0, 0, 1, 1], [], []>} : vector<80x256xbf16>, vector<256x256xbf16>, vector<80x256xf32> -> vector<80x256xf32>
    %31 = arith.addf %26, %30 : vector<80x256xf32>
    %c0_27 = arith.constant 0 : index
    %c20 = arith.constant 20 : index
    %c0_28 = arith.constant 0 : index
    %32 = vector.load %arg2[%c0_27, %c20, %c0_28] : memref<1x102x256xbf16, #tpu.memory_space<vmem>>, vector<1x80x256xbf16>
    %33 = vector.shape_cast %32 : vector<1x80x256xbf16> to vector<80x256xbf16>
    %c1536 = arith.constant 1536 : index
    %c0_29 = arith.constant 0 : index
    %34 = vector.load %arg3[%c1536, %c0_29] : memref<2304x256xbf16, #tpu.memory_space<vmem>>, vector<256x256xbf16>
    %cst_30 = arith.constant dense<0.000000e+00> : vector<80x256xf32>
    %35 = tpu.matmul %33, %34, %cst_30 {dimension_numbers = #tpu.dot_dimension_numbers<[1], [0], [0], [1], [0, 0, 1, 1], [], []>} : vector<80x256xbf16>, vector<256x256xbf16>, vector<80x256xf32> -> vector<80x256xf32>
    %36 = arith.addf %31, %35 : vector<80x256xf32>
    %c0_31 = arith.constant 0 : index
    %c21 = arith.constant 21 : index
    %c0_32 = arith.constant 0 : index
    %37 = vector.load %arg2[%c0_31, %c21, %c0_32] : memref<1x102x256xbf16, #tpu.memory_space<vmem>>, vector<1x80x256xbf16>
    %38 = vector.shape_cast %37 : vector<1x80x256xbf16> to vector<80x256xbf16>
    %c1792 = arith.constant 1792 : index
    %c0_33 = arith.constant 0 : index
    %39 = vector.load %arg3[%c1792, %c0_33] : memref<2304x256xbf16, #tpu.memory_space<vmem>>, vector<256x256xbf16>
    %cst_34 = arith.constant dense<0.000000e+00> : vector<80x256xf32>
    %40 = tpu.matmul %38, %39, %cst_34 {dimension_numbers = #tpu.dot_dimension_numbers<[1], [0], [0], [1], [0, 0, 1, 1], [], []>} : vector<80x256xbf16>, vector<256x256xbf16>, vector<80x256xf32> -> vector<80x256xf32>
    %41 = arith.addf %36, %40 : vector<80x256xf32>
    %c0_35 = arith.constant 0 : index
    %c22 = arith.constant 22 : index
    %c0_36 = arith.constant 0 : index
    %42 = vector.load %arg2[%c0_35, %c22, %c0_36] : memref<1x102x256xbf16, #tpu.memory_space<vmem>>, vector<1x80x256xbf16>
    %43 = vector.shape_cast %42 : vector<1x80x256xbf16> to vector<80x256xbf16>
    %c2048 = arith.constant 2048 : index
    %c0_37 = arith.constant 0 : index
    %44 = vector.load %arg3[%c2048, %c0_37] : memref<2304x256xbf16, #tpu.memory_space<vmem>>, vector<256x256xbf16>
    %cst_38 = arith.constant dense<0.000000e+00> : vector<80x256xf32>
    %45 = tpu.matmul %43, %44, %cst_38 {dimension_numbers = #tpu.dot_dimension_numbers<[1], [0], [0], [1], [0, 0, 1, 1], [], []>} : vector<80x256xbf16>, vector<256x256xbf16>, vector<80x256xf32> -> vector<80x256xf32>
    %46 = arith.addf %41, %45 : vector<80x256xf32>
    %47 = vector.broadcast %0 : vector<1x256xf32> to vector<80x256xf32>
    %48 = arith.addf %46, %47 : vector<80x256xf32>
    %c0_39 = arith.constant 0 : index
    %c0_40 = arith.constant 0 : index
    %c0_41 = arith.constant 0 : index
    %49 = vector.load %arg5[%c0_39, %c0_40, %c0_41] : memref<1x80x256xf32, #tpu.memory_space<vmem>>, vector<1x80x256xf32>
    %50 = vector.shape_cast %49 : vector<1x80x256xf32> to vector<80x256xf32>
    %51 = vector.shape_cast %48 : vector<80x256xf32> to vector<1x80x256xf32>
    tpu.vector_store %arg5[%c0_39, %c0_40, %c0_41], %51 {strides = array<i32>} : memref<1x80x256xf32, #tpu.memory_space<vmem>>, vector<1x80x256xf32>,
    return
  }
  func.func @transform_0(%arg0: i32, %arg1: i32) -> (i32, i32, i32) {
    %c0_i32 = arith.constant 0 : i32
    %c0_i32_0 = arith.constant 0 : i32
    %c0_i32_1 = arith.constant 0 : i32
    return %arg0, %c0_i32, %c0_i32_0 : i32, i32, i32
  }
  func.func @transform_1(%arg0: i32, %arg1: i32) -> (i32, i32) {
    %c0_i32 = arith.constant 0 : i32
    %c0_i32_0 = arith.constant 0 : i32
    return %c0_i32, %arg1 : i32, i32
  }
  func.func @transform_2(%arg0: i32, %arg1: i32) -> (i32, i32) {
    %c0_i32 = arith.constant 0 : i32
    %c0_i32_0 = arith.constant 0 : i32
    return %c0_i32, %arg1 : i32, i32
  }
  func.func @transform_3(%arg0: i32, %arg1: i32) -> (i32, i32, i32) {
    %c0_i32 = arith.constant 0 : i32
    %c0_i32_0 = arith.constant 0 : i32
    return %arg0, %c0_i32, %arg1 : i32, i32, i32
  }
}

</mosaic_0001>

<bundles_post_ra>
// kernel: fwd.5
= control target key start
LH: loop header
LB: loop body
LE: loop exit
PB: predicated region body
PF: predicated region fallthrough
CT: control target
= control target key end

     0   :  { %s5187_s12 = smov 0   ;;  %s5189_s13 = smov 0   ;;  %s6755_s0 = inlined_call_operand.vmem [shape: bf16[2,326,128], index: 0, kind: input, shape index: {}]   ;;  %s6756_s1 = inlined_call_operand.vmem [shape: bf16[1152,128], index: 1, kind: input, shape index: {}]   ;;  %s6757_s2 = inlined_call_operand.vmem [shape: f32[1,128], index: 2, kind: input, shape index: {}]   ;;  %s6758_s3 = inlined_call_operand.vmem [shape: f32[2,288,128], index: 3, kind: output, shape index: {}]  }
   0x1   :  { %s5191_s14 = smov 0  }
   0x2 LB: > { %s25_s15 = sadd.s32 1, %s5161_s13  ;;  %p4093_p0 = scmp.ge.s32.totalorder %s5165_s14, 1  ;;  %s5165_s14 = sphi %s5191_s14, %s13_s14   ;;  %s5161_s13 = sphi %s5189_s13, %s6776_s13   ;;  %s5157_s12 = sphi %s5187_s12, %s6775_s12  }
   0x3   : > { %p27_p1 = scmp.ge.s32.totalorder %s25_s15, 2  ;;  %p168_p2 = scmp.lt.s32.totalorder %s5165_s14, 3 }
   0x5   : > { %s6778_s15 = smov (%p27_p1, %s25_s15), 0  ;;  %p169_p3 = pnand %p4093_p0, %p168_p2 }
   0x7   : > { %172 = sbr.rel (%p169_p3) target bundleno = 828 (0x33c), region = 32 }
   0xc   : > { %v4896_v0 = vld [vmem:[%s6756_s1 + $0x78] sm:$0xff]  ;;  %p202_p4 = scmp.lt.s32.totalorder %s5157_s12, 1  ;;  %v4895_v1 = vld [vmem:[%s6756_s1 + $0x70] sm:$0xff]  ;;  %v4894_v2 = vld [vmem:[%s6756_s1 + $0x68] sm:$0xff]  ;;  %vm371_vm0 = vsmask.f32 7424 }
   0xd   : > { %568 = vmatpush.bf16.msra.mxu0 %v4896_v0  ;;  %5073 = vmatpush.bf16.msra.mxu1 %v4896_v0  ;;  %v4893_v3 = vld [vmem:[%s6756_s1 + $0x60] sm:$0xff]  ;;  %v4892_v4 = vld [vmem:[%s6756_s1 + $0x58] sm:$0xff]  ;;  %v4891_v10 = vld [vmem:[%s6756_s1 + $0x50] sm:$0xff]  ;;  %vm830_vm1 = vcmask 1046528   ;;  %vm1419_vm2 = vsmask.f32 6400 }
   0xe   : > { %5074 = vmatpush.bf16.msra.mxu2 %v4896_v0  ;;  %5075 = vmatpush.bf16.msra.mxu3 %v4896_v0  ;;  %s6780_s12 = smov (!%p202_p4, %s5157_s12), 1  ;;  %v4890_v20 = vld [vmem:[%s6756_s1 + $0x48] sm:$0xff]  ;;  %v4889_v31 = vld [vmem:[%s6756_s1 + $0x40] sm:$0xff]  ;;  %v4888_v36 = vld [vmem:[%s6756_s1 + $0x38] sm:$0xff]  ;;  %vm1777_vm3 = vcmask 1045504   ;;  %vm2724_vm5 = vcmask 1044480  }
   0xf   : > { %s5097_s22 = smul.u32 164, %s6780_s12  ;;  %v4935_v39 = vld [vmem:[%s6756_s1 + $0x138] sm:$0xff]  ;;  %v4887_v49 = vld [vmem:[%s6756_s1 + $0x30] sm:$0xff]  ;;  %v4886_v56 = vld [vmem:[%s6756_s1 + $0x28] sm:$0xff]  ;;  %vm2366_vm4 = vsmask.f32 5376 }
  0x10   : > { %v4927_v45 = vld [vmem:[%s6756_s1 + $0xf8] sm:$0xff]  ;;  %v4934_v51 = vld [vmem:[%s6756_s1 + $0x130] sm:$0xff]  ;;  %v4933_v58 = vld [vmem:[%s6756_s1 + $0x128] sm:$0xff]  ;;  %s5098_s21 = smul.u32 288, %s6780_s12 }
  0x11   : > { %569 = vmatpush.bf16.msra.mxu0 %v4895_v1  ;;  %5076 = vmatpush.bf16.msra.mxu1 %v4895_v1  ;;  %s5223_s27 = scalar_lea.vmem %s6755_s0, %s5097_s22  ;;  %v4904_v47 = vld [vmem:[%s6756_s1 + $0xb8] sm:$0xff]  ;;  %v4926_v52 = vld [vmem:[%s6756_s1 + $0xf0] sm:$0xff]  ;;  %v4925_v59 = vld [vmem:[%s6756_s1 + $0xe8] sm:$0xff] }
  0x12   : > { %5077 = vmatpush.bf16.msra.mxu2 %v4895_v1  ;;  %5078 = vmatpush.bf16.msra.mxu3 %v4895_v1  ;;  %v5229_v5 = vld [vmem:[%s5223_s27 + $0x48] sm:$0xff]  ;;  %v5232_v6 = vld [vmem:[%s5223_s27] sm:$0xff]   ;;  %v5238_v8 = vld [vmem:[%s5223_s27 + $0x70] sm:$0xff]  ;;  %s6329_s30 = scalar_lea.vmem %s6758_s3, %s5098_s21 }
  0x13   : > { %v5235_v7 = vld [vmem:[%s5223_s27 + $0x60] sm:$0xff]  ;;  %v5241_v9 = vld [vmem:[%s5223_s27 + $0x8] sm:$0xff]  ;;  %v375_v11 = vshll.u32 %v5232_v6, 16  ;;  %v5248_v12 = vld [vmem:[%s5223_s27 + $0x50] sm:$0xff]  ;;  %v444_v13 = vshll.u32 %v5229_v5, 16  ;;  %v484_v17 = vshll.u32 %v5238_v8, 16 }
  0x14   : > { %v5252_v14 = vld [vmem:[%s5223_s27 + $0x68] sm:$0xff]  ;;  %v468_v15 = vshll.u32 %v5235_v7, 16  ;;  %v5256_v16 = vld [vmem:[%s5223_s27 + $0x78] sm:$0xff]  ;;  %v373_v18 = vshrl.u32 %v5232_v6, 16  ;;  %v380_v19 = vshll.u32 %v5241_v9, 16  ;;  %v448_v23 = vshrl.u32 %v5229_v5, 16 }
  0x15   : > { %570 = vmatpush.bf16.msra.mxu0 %v4894_v2  ;;  %5079 = vmatpush.bf16.msra.mxu1 %v4894_v2  ;;  %v377_v21 = vrot.slane %v375_v11, 1  ;;  %v5264_v22 = vrot.slane %v444_v13, 1  ;;  %v452_v24 = vshll.u32 %v5248_v12, 16  ;;  %v472_v26 = vshrl.u32 %v5235_v7, 16  ;;  %v271_v42 = vld [vmem:[%s5223_s27 + $0x80] sm:$0x1] }
  0x16   : > { %5080 = vmatpush.bf16.msra.mxu2 %v4894_v2  ;;  %5081 = vmatpush.bf16.msra.mxu3 %v4894_v2  ;;  %v5268_v25 = vrot.slane %v468_v15, 1  ;;  %v476_v27 = vshll.u32 %v5252_v14, 16  ;;  %v5272_v28 = vrot.slane %v484_v17, 1  ;;  %v488_v29 = vshrl.u32 %v5238_v8, 16  ;;  %v5309_v53 = vld [vmem:[%s5223_s27 + $0x10] sm:$0xff]  ;;  %v5312_v54 = vld [vmem:[%s5223_s27 + $0x58] sm:$0xff] }
  0x17   : > { %v492_v30 = vshll.u32 %v5256_v16, 16  ;;  %v378_v32 = vor.u32 %v377_v21, %v373_v18  ;;  %v382_v33 = vrot.slane %v380_v19, 1  ;;  %v450_v34 = vor.u32 %v448_v23, %v5264_v22  ;;  %v4903_v55 = vld [vmem:[%s6756_s1 + $0xb0] sm:$0xff]  ;;  %v4902_v0 = vld [vmem:[%s6756_s1 + $0xa8] sm:$0xff]  ;;  %v4885_v2 = vld [vmem:[%s6756_s1 + $0x20] sm:$0xff] }
  0x18   : > { %v454_v35 = vrot.slane %v452_v24, 1  ;;  %v474_v37 = vor.u32 %v472_v26, %v5268_v25  ;;  %v478_v38 = vrot.slane %v476_v27, 1  ;;  %v490_v40 = vor.u32 %v488_v29, %v5272_v28  ;;  %v4924_v17 = vld [vmem:[%s6756_s1 + $0xe0] sm:$0xff]  ;;  %v4884_v21 = vld [vmem:[%s6756_s1 + $0x18] sm:$0xff] }
  0x19   : > { %571 = vmatpush.bf16.msra.mxu0 %v4893_v3  ;;  %5082 = vmatpush.bf16.msra.mxu1 %v4893_v3  ;;  %v494_v41 = vrot.slane %v492_v30, 1  ;;  %v383_v43 = vsel %vm371_vm0, %v378_v32, %v382_v33  ;;  %v353_v50 = vunpack.c.l.b16 %v271_v42  ;;  %v384_v60 = vshrl.u32 %v5241_v9, 16  ;;  %v4901_v18 = vld [vmem:[%s6756_s1 + $0xa0] sm:$0xff]  ;;  %v4923_v26 = vld [vmem:[%s6756_s1 + $0xd8] sm:$0xff]  ;;  %v1049_v32 = vld [vmem:[%s5223_s27 + $0x8] sm:$0xe] }
  0x1a   : > { %5083 = vmatpush.bf16.msra.mxu2 %v4893_v3  ;;  %5084 = vmatpush.bf16.msra.mxu3 %v4893_v3  ;;  %v455_v44 = vsel %vm371_vm0, %v450_v34, %v454_v35  ;;  %v479_v46 = vsel %vm371_vm0, %v474_v37, %v478_v38  ;;  %v388_v61 = vshll.u32 %v5309_v53, 16  ;;  %v456_v62 = vshrl.u32 %v5248_v12, 16  ;;  %v4900_v29 = vld [vmem:[%s6756_s1 + $0x98] sm:$0xff]  ;;  %v4882_v37 = vld [vmem:[%s6756_s1 + $0x8] sm:$0xff] }
  0x1b   : > { %v495_v48 = vsel %vm371_vm0, %v490_v40, %v494_v41  ;;  %v5320_v57 = vpack.c.b16 %v353_v50, %v353_v50  ;;  %v460_v63 = vshll.u32 %v5312_v54, 16  ;;  %v480_v1 = vshrl.u32 %v5252_v14, 16  ;;  %v5372_v34 = vld [vmem:[%s5223_s27 + $0x18] sm:$0xff]  ;;  %v4921_v42 = vld [vmem:[%s6756_s1 + $0xc8] sm:$0xff]  ;;  %v4881_v50 = vld [vmem:[%s6756_s1] sm:$0xff] }
  0x1c   : > { %v496_v3 = vshrl.u32 %v5256_v16, 16  ;;  %v390_v11 = vrot.slane %v388_v61, 1  ;;  %v458_v13 = vor.u32 %v456_v62, %v454_v35  ;;  %v4899_v35 = vld [vmem:[%s6756_s1 + $0x90] sm:$0xff]  ;;  %v1131_v40 = vunpack.c.l.b16 %v1049_v32  ;;  %v4974_v62 = vld [vmem:[%s6756_s1 + $0x1f8] sm:$0xff] }
  0x1d   : > { %572 = vmatpush.bf16.msra.mxu0 %v4892_v4  ;;  %5085 = vmatpush.bf16.msra.mxu1 %v4892_v4  ;;  %v462_v15 = vrot.slane %v460_v63, 1  ;;  %v482_v19 = vor.u32 %v480_v1, %v478_v38  ;;  %v5066_v38 = vld [vmem:[%s5223_s27] sm:$0xf0]  ;;  %v832_v61 = vrot.slane %v5241_v9, 1  ;;  %v4966_v1 = vld [vmem:[%s6756_s1 + $0x1b8] sm:$0xff] }
  0x1e   : > { %5086 = vmatpush.bf16.msra.mxu2 %v4892_v4  ;;  %5087 = vmatpush.bf16.msra.mxu3 %v4892_v4  ;;  %v500_v4 = vshll.u32 %v5320_v57, 16  ;;  %v498_v16 = vor.u32 %v496_v3, %v494_v41 }
  0x1f   : > { %v463_v24 = vsel %vm371_vm0, %v458_v13, %v462_v15  ;;  %v487_v27 = vsel %vm371_vm0, %v482_v19, %v5272_v28  ;;  %v4922_v28 = vld [vmem:[%s6756_s1 + $0xd0] sm:$0xff]  ;;  %v4931_v13 = vld [vmem:[%s6756_s1 + $0x118] sm:$0xff] }
  0x20   : > { %v5443_v19 = vld [vmem:[%s5223_s27 + $0x18] sm:$0xff] }
  0x21   : > { %573 = vmatpush.bf16.msra.mxu0 %v4891_v10  ;;  %5088 = vmatpush.bf16.msra.mxu1 %v4891_v10 }
  0x22   : > { %5089 = vmatpush.bf16.msra.mxu2 %v4891_v10  ;;  %5090 = vmatpush.bf16.msra.mxu3 %v4891_v10  ;;  %v386_v10 = vor.u32 %v384_v60, %v382_v33  ;;  %v5366_v33 = vld [vmem:[%s5223_s27 + $0xc] sm:$0xf] }
  0x23   : > { %v6759_v41 = vunpack.c.l.b16 %v5366_v33 }
  0x24   : > { %v391_v23 = vsel %vm371_vm0, %v386_v10, %v390_v11 }
  0x25   : > { %574 = vmatpush.bf16.msra.mxu0 %v4890_v20  ;;  %5091 = vmatpush.bf16.msra.mxu1 %v4890_v20 }
  0x26   : > { %5092 = vmatpush.bf16.msra.mxu2 %v4890_v20  ;;  %5093 = vmatpush.bf16.msra.mxu3 %v4890_v20  ;;  %v502_v20 = vrot.slane %v500_v4, 1 }
  0x28   : > { %v503_v30 = vsel %vm371_vm0, %v498_v16, %v502_v20 }
  0x29   : > { %575 = vmatpush.bf16.msra.mxu0 %v4889_v31  ;;  %5094 = vmatpush.bf16.msra.mxu1 %v4889_v31 }
  0x2a   : > { %5095 = vmatpush.bf16.msra.mxu2 %v4889_v31  ;;  %5096 = vmatpush.bf16.msra.mxu3 %v4889_v31  ;;  %v4883_v31 = vld [vmem:[%s6756_s1 + $0x10] sm:$0xff] }
  0x2c   : > { %576 = vmatmul.bf16.vlgmr.msra.gmra.mxu0 %v383_v43  ;;  %621 = vmatmul.bf16.vlgmr.msra.gmra.mxu1 %v455_v44  ;;  %v392_v43 = vshrl.u32 %v5309_v53, 16  ;;  %v396_v44 = vshll.u32 %v5372_v34, 16 }
  0x2d   : > { %721 = vmatpush.bf16.msrb.mxu1 %v4888_v36  ;;  %1636 = vmatpush.bf16.msrb.mxu0 %v4935_v39  ;;  %v4932_v36 = vld [vmem:[%s6756_s1 + $0x120] sm:$0xff] }
  0x2e   : > { %636 = vmatmul.bf16.vlgmr.msra.gmra.mxu2 %v479_v46  ;;  %1278 = vmatpush.bf16.msrb.mxu3 %v4927_v45  ;;  %v5067_v39 = vld [vmem:[%s5223_s27] sm:$0xe]  ;;  %v464_v45 = vshrl.u32 %v5312_v54, 16  ;;  %v4898_v46 = vld [vmem:[%s6756_s1 + $0x88] sm:$0xff] }
  0x2f   : > { %928 = vmatpush.bf16.msrb.mxu2 %v4904_v47  ;;  %646 = vmatmul.bf16.vlgmr.msra.gmra.mxu3 %v495_v48  ;;  %v5068_v47 = vor.u32 %v5067_v39, %v5066_v38  ;;  %v5396_v48 = vld [vmem:[%s5223_s27 + $0x10] sm:$0xff] }
  0x31   : > { %722 = vmatpush.bf16.msrb.mxu1 %v4887_v49  ;;  %1637 = vmatpush.bf16.msrb.mxu0 %v4934_v51  ;;  %v5400_v49 = vpack.c.b16 %v6759_v41, %v1131_v40  ;;  %v4943_v51 = vld [vmem:[%s6756_s1 + $0x178] sm:$0xff]  ;;  %v831_v60 = vrot.slane %v5068_v47, 1  ;;  %v5795_v41 = vld [vmem:[%s5223_s27 + $0x14] sm:$0xf] }
  0x32   : > { %1279 = vmatpush.bf16.msrb.mxu3 %v4926_v52  ;;  %v394_v52 = vor.u32 %v392_v43, %v390_v11  ;;  %v5429_v11 = vld [vmem:[%s5223_s27 + $0x20] sm:$0xff]  ;;  %v5472_v43 = vld [vmem:[%s5223_s27 + $0x30] sm:$0xff] }
  0x33   : > { %929 = vmatpush.bf16.msrb.mxu2 %v4903_v55  ;;  %v398_v55 = vrot.slane %v396_v44, 1  ;;  %v1181_v63 = vrot.slane %v5400_v49, 1  ;;  %v833_v4 = vsel %vm830_vm1, %v831_v60, %v832_v61  ;;  %v408_v32 = vshrl.u32 %v5429_v11, 16  ;;  %v4964_v44 = vld [vmem:[%s6756_s1 + $0x1a8] sm:$0xff] }
  0x34   : > { %v420_v47 = vshll.u32 %v5472_v43, 16  ;;  %v4929_v60 = vld [vmem:[%s6756_s1 + $0x108] sm:$0xff] }
  0x35   : > { %723 = vmatpush.bf16.msrb.mxu1 %v4886_v56  ;;  %1638 = vmatpush.bf16.msrb.mxu0 %v4933_v58  ;;  %v466_v56 = vor.u32 %v464_v45, %v462_v15  ;;  %v4920_v58 = vld [vmem:[%s6756_s1 + $0xc0] sm:$0xff]  ;;  %v4973_v15 = vld [vmem:[%s6756_s1 + $0x1f0] sm:$0xff]  ;;  %v4972_v45 = vld [vmem:[%s6756_s1 + $0x1e8] sm:$0xff] }
  0x36   : > { %1280 = vmatpush.bf16.msrb.mxu3 %v4925_v59  ;;  %v4897_v59 = vld [vmem:[%s6756_s1 + $0x80] sm:$0xff] }
  0x37   : > { %930 = vmatpush.bf16.msrb.mxu2 %v4902_v0  ;;  %v1182_v0 = vrot.slane %v5396_v48, 1  ;;  %v471_v3 = vsel %vm371_vm0, %v466_v56, %v5268_v25  ;;  %v4965_v25 = vld [vmem:[%s6756_s1 + $0x1b0] sm:$0xff] }
  0x39   : > { %724 = vmatpush.bf16.msrb.mxu1 %v4885_v2  ;;  %1639 = vmatpush.bf16.msrb.mxu0 %v4932_v36  ;;  %v399_v2 = vsel %vm371_vm0, %v394_v52, %v398_v55  ;;  %v1183_v10 = vsel %vm830_vm1, %v1181_v63, %v1182_v0  ;;  %v838_v52 = vrot.slane %v5429_v11, 1  ;;  %v424_v63 = vshrl.u32 %v5472_v43, 16 }
  0x3a   : > { %1281 = vmatpush.bf16.msrb.mxu3 %v4924_v17  ;;  %v400_v17 = vshrl.u32 %v5372_v34, 16 }
  0x3b   : > { %931 = vmatpush.bf16.msrb.mxu2 %v4901_v18  ;;  %v404_v18 = vshll.u32 %v5429_v11, 16 }
  0x3c   : > { %581 = vmatmul.bf16.gmra.mxu0 %v391_v23  ;;  %626 = vmatmul.bf16.gmra.mxu1 %v463_v24  ;;  %v402_v16 = vor.u32 %v400_v17, %v398_v55  ;;  %v1184_v23 = vrot.slane %v5443_v19, 1  ;;  %v5515_v17 = vld [vmem:[%s5223_s27 + $0x40] sm:$0xff] }
  0x3d   : > { %725 = vmatpush.bf16.msrb.mxu1 %v4884_v21  ;;  %1640 = vmatpush.bf16.msrb.mxu0 %v4931_v13  ;;  %v406_v20 = vrot.slane %v404_v18, 1  ;;  %v834_v21 = vrot.slane %v5309_v53, 1 }
  0x3e   : > { %641 = vmatmul.bf16.gmra.mxu2 %v487_v27  ;;  %1282 = vmatpush.bf16.msrb.mxu3 %v4923_v26  ;;  %v1185_v27 = vsel %vm830_vm1, %v1182_v0, %v1184_v23 }
  0x3f   : > { %932 = vmatpush.bf16.msrb.mxu2 %v4900_v29  ;;  %651 = vmatmul.bf16.gmra.mxu3 %v503_v30  ;;  %v407_v24 = vsel %vm371_vm0, %v402_v16, %v406_v20  ;;  %v835_v26 = vsel %vm830_vm1, %v832_v61, %v834_v21  ;;  %v4942_v29 = vld [vmem:[%s6756_s1 + $0x170] sm:$0xff]  ;;  %v5455_v30 = vld [vmem:[%s5223_s27 + $0x28] sm:$0xff]  ;;  %v436_v16 = vshll.u32 %v5515_v17, 16 }
  0x40   : > { %v4941_v61 = vld [vmem:[%s6756_s1 + $0x168] sm:$0xff] }
  0x41   : > { %726 = vmatpush.bf16.msrb.mxu1 %v4883_v31  ;;  %v4930_v31 = vld [vmem:[%s6756_s1 + $0x110] sm:$0xff] }
  0x42   : > { %1283 = vmatpush.bf16.msrb.mxu3 %v4922_v28  ;;  %1641 = vmatpush.bf16.msrb.mxu0 %v4930_v31  ;;  %v412_v28 = vshll.u32 %v5455_v30, 16 }
  0x43   : > { %933 = vmatpush.bf16.msrb.mxu2 %v4899_v35  ;;  %v410_v35 = vor.u32 %v408_v32, %v406_v20  ;;  %v4963_v20 = vld [vmem:[%s6756_s1 + $0x1a0] sm:$0xff] }
  0x44   : > { %v414_v36 = vrot.slane %v412_v28, 1  ;;  %v4940_v28 = vld [vmem:[%s6756_s1 + $0x160] sm:$0xff] }
  0x45   : > { %727 = vmatpush.bf16.msrb.mxu1 %v4882_v37  ;;  %v836_v37 = vrot.slane %v5372_v34, 1 }
  0x46   : > { %1284 = vmatpush.bf16.msrb.mxu3 %v4921_v42  ;;  %v415_v39 = vsel %vm371_vm0, %v410_v35, %v414_v36  ;;  %1642 = vmatpush.bf16.msrb.mxu0 %v4929_v60  ;;  %v4982_v35 = vld [vmem:[%s6756_s1 + $0x238] sm:$0xff] }
  0x47   : > { %934 = vmatpush.bf16.msrb.mxu2 %v4898_v46  ;;  %v837_v40 = vsel %vm830_vm1, %v834_v21, %v836_v37  ;;  %v416_v46 = vshrl.u32 %v5455_v30, 16  ;;  %v5523_v21 = vld [vmem:[%s5223_s27 + $0x38] sm:$0xff] }
  0x49   : > { %728 = vmatpush.bf16.msrb.mxu1 %v4881_v50  ;;  %v418_v50 = vor.u32 %v416_v46, %v414_v36  ;;  %v440_v36 = vshrl.u32 %v5515_v17, 16 }
  0x4a   : > { %1285 = vmatpush.bf16.msrb.mxu3 %v4920_v58  ;;  %v839_v58 = vsel %vm830_vm1, %v836_v37, %v838_v52  ;;  %v5542_v37 = vld [vmem:[%s5223_s27 + $0x40] sm:$0xff] }
  0x4b   : > { %935 = vmatpush.bf16.msrb.mxu2 %v4897_v59 }
  0x4c   : > { %586 = vmatmul.bf16.gmra.mxu0 %v399_v2  ;;  %631 = vmatmul.bf16.gmra.mxu1 %v471_v3  ;;  %v840_v3 = vrot.slane %v5455_v30, 1 }
  0x4d   : > { %1875 = vmatpush.bf16.msra.mxu1 %v4943_v51  ;;  %v422_v51 = vrot.slane %v420_v47, 1  ;;  %v1421_v47 = vshrl.u32 %v5400_v49, 16 }
  0x4e   : > { %2583 = vmatpush.bf16.msra.mxu3 %v4974_v62  ;;  %936 = vmatmul.bf16.vlgmr.msrb.gmra.mxu2 %v833_v4  ;;  %v5498_v62 = vld [vmem:[%s5223_s27 + $0x38] sm:$0xff]  ;;  %v841_v13 = vsel %vm830_vm1, %v838_v52, %v840_v3  ;;  %v1432_v52 = vshll.u32 %v5396_v48, 16 }
  0x4f   : > { %2225 = vmatpush.bf16.msra.mxu2 %v4966_v1  ;;  %1286 = vmatmul.bf16.vlgmr.msrb.gmra.mxu3 %v1183_v10  ;;  %v423_v56 = vsel %vm371_vm0, %v418_v50, %v422_v51  ;;  %v428_v0 = vshll.u32 %v5498_v62, 16  ;;  %v426_v1 = vor.u32 %v424_v63, %v422_v51  ;;  %v432_v18 = vshrl.u32 %v5498_v62, 16  ;;  %v5571_v63 = vld [vmem:[%s5223_s27 + $0x48] sm:$0xff] }
  0x50   : > { %v1424_v50 = vshll.u32 %v5400_v49, 16  ;;  %v1429_v51 = vshrl.u32 %v5396_v48, 16  ;;  %v1434_v60 = vrot.slane %v1432_v52, 2  ;;  %v4962_v49 = vld [vmem:[%s6756_s1 + $0x198] sm:$0xff] }
  0x51   : > { %1876 = vmatpush.bf16.msra.mxu1 %v4942_v29  ;;  %v430_v2 = vrot.slane %v428_v0, 1  ;;  %v4971_v29 = vld [vmem:[%s6756_s1 + $0x1e0] sm:$0xff] }
  0x52   : > { %2584 = vmatpush.bf16.msra.mxu3 %v4973_v15  ;;  %v4928_v15 = vld [vmem:[%s6756_s1 + $0x100] sm:$0xff] }
  0x53   : > { %2226 = vmatpush.bf16.msra.mxu2 %v4965_v25  ;;  %v431_v10 = vsel %vm371_vm0, %v426_v1, %v430_v2  ;;  %1643 = vmatpush.bf16.msrb.mxu0 %v4928_v15  ;;  %v846_v1 = vrot.slane %v5515_v17, 1 }
  0x55   : > { %1877 = vmatpush.bf16.msra.mxu1 %v4941_v61 }
  0x56   : > { %2585 = vmatpush.bf16.msra.mxu3 %v4972_v45 }
  0x57   : > { %2227 = vmatpush.bf16.msra.mxu2 %v4964_v44  ;;  %2822 = vmatpush.bf16.msra.mxu0 %v4982_v35  ;;  %v848_v35 = vrot.slane %v5229_v5, 1 }
  0x59   : > { %1878 = vmatpush.bf16.msra.mxu1 %v4940_v28  ;;  %v5607_v28 = vld [vmem:[%s5223_s27 + $0x50] sm:$0xff] }
  0x5a   : > { %2586 = vmatpush.bf16.msra.mxu3 %v4971_v29 }
  0x5b   : > { %2228 = vmatpush.bf16.msra.mxu2 %v4963_v20  ;;  %v4939_v20 = vld [vmem:[%s6756_s1 + $0x158] sm:$0xff] }
  0x5c   : > { %591 = vmatmul.bf16.gmra.mxu0 %v407_v24  ;;  %729 = vmatmul.bf16.vlgmr.msrb.gmra.mxu1 %v5232_v6  ;;  %v5463_v6 = vld [vmem:[%s5223_s27 + $0x20] sm:$0xff]  ;;  %v842_v24 = vrot.slane %v5472_v43, 1 }
  0x5d   : > { %v1186_v38 = vrot.slane %v5463_v6, 1  ;;  %1879 = vmatpush.bf16.msra.mxu1 %v4939_v20 }
  0x5e   : > { %941 = vmatmul.bf16.gmra.mxu2 %v835_v26  ;;  %v1192_v26 = vrot.slane %v5523_v21, 1  ;;  %v843_v31 = vsel %vm830_vm1, %v840_v3, %v842_v24 }
  0x5f   : > { %1291 = vmatmul.bf16.gmra.mxu3 %v1185_v27  ;;  %v1187_v42 = vsel %vm830_vm1, %v1184_v23, %v1186_v38  ;;  %v438_v23 = vrot.slane %v436_v16, 1  ;;  %2229 = vmatpush.bf16.msra.mxu2 %v4962_v49  ;;  %v4970_v16 = vld [vmem:[%s6756_s1 + $0x1d8] sm:$0xff] }
  0x60   : > { %2587 = vmatpush.bf16.msra.mxu3 %v4970_v16 }
  0x6c   : > { %596 = vmatmul.bf16.gmra.mxu0 %v415_v39  ;;  %734 = vmatmul.bf16.gmra.mxu1 %v5241_v9  ;;  %v5483_v9 = vld [vmem:[%s5223_s27 + $0x28] sm:$0xff]  ;;  %v844_v39 = vrot.slane %v5498_v62, 1 }
  0x6d   : > { %v1188_v55 = vrot.slane %v5483_v9, 1 }
  0x6e   : > { %946 = vmatmul.bf16.gmra.mxu2 %v837_v40  ;;  %v845_v45 = vsel %vm830_vm1, %v842_v24, %v844_v39  ;;  %v847_v15 = vsel %vm830_vm1, %v844_v39, %v846_v1  ;;  %v4981_v24 = vld [vmem:[%s6756_s1 + $0x230] sm:$0xff] }
  0x6f   : > { %1296 = vmatmul.bf16.gmra.mxu3 %v1187_v42  ;;  %v1189_v59 = vsel %vm830_vm1, %v1186_v38, %v1188_v55  ;;  %v442_v38 = vor.u32 %v440_v36, %v438_v23  ;;  %2823 = vmatpush.bf16.msra.mxu0 %v4981_v24  ;;  %v1198_v36 = vrot.slane %v5607_v28, 1 }
  0x71   : > { %v447_v44 = vsel %vm371_vm0, %v442_v38, %v5264_v22 }
  0x7c   : > { %601 = vmatmul.bf16.gmra.mxu0 %v423_v56  ;;  %739 = vmatmul.bf16.gmra.mxu1 %v5309_v53  ;;  %v5503_v53 = vld [vmem:[%s5223_s27 + $0x30] sm:$0xff] }
  0x7d   : > { %v1190_v4 = vrot.slane %v5503_v53, 1 }
  0x7e   : > { %951 = vmatmul.bf16.gmra.mxu2 %v839_v58  ;;  %v1423_v58 = vrot.slane %v1421_v47, 1 }
  0x7f   : > { %1301 = vmatmul.bf16.gmra.mxu3 %v1189_v59  ;;  %v1191_v25 = vsel %vm830_vm1, %v1188_v55, %v1190_v4  ;;  %v1193_v32 = vsel %vm830_vm1, %v1190_v4, %v1192_v26  ;;  %v1426_v59 = vrot.slane %v1424_v50, 2  ;;  %v1447_v50 = vshrl.u32 %v5463_v6, 16 }
  0x81   : > { %v1427_v48 = vor.u32 %v1426_v59, %v1423_v58 }
  0x8c   : > { %606 = vmatmul.bf16.gmra.mxu0 %v431_v10  ;;  %744 = vmatmul.bf16.gmra.mxu1 %v5372_v34  ;;  %v434_v34 = vor.u32 %v432_v18, %v430_v2  ;;  %v1196_v2 = vrot.slane %v5571_v63, 1 }
  0x8e   : > { %956 = vmatmul.bf16.gmra.mxu2 %v841_v13  ;;  %v439_v27 = vsel %vm371_vm0, %v434_v34, %v438_v23  ;;  %v1438_v34 = vshrl.u32 %v5443_v19, 16  ;;  %v1441_v23 = vshll.u32 %v5443_v19, 16  ;;  %v1199_v47 = vsel %vm830_vm1, %v1196_v2, %v1198_v36 }
  0x8f   : > { %1306 = vmatmul.bf16.gmra.mxu3 %v1191_v25 }
  0x90   : > { %v1440_v29 = vrot.slane %v1438_v34, 1 }
  0x9c   : > { %611 = vmatmul.bf16.gmra.mxu0 %v439_v27  ;;  %749 = vmatmul.bf16.gmra.mxu1 %v5429_v11  ;;  %v1194_v11 = vrot.slane %v5542_v37, 1 }
  0x9e   : > { %961 = vmatmul.bf16.gmra.mxu2 %v843_v31  ;;  %v1195_v46 = vsel %vm830_vm1, %v1192_v26, %v1194_v11  ;;  %v1197_v18 = vsel %vm830_vm1, %v1194_v11, %v1196_v2  ;;  %v1443_v31 = vrot.slane %v1441_v23, 2 }
  0x9f   : > { %1311 = vmatmul.bf16.gmra.mxu3 %v1193_v32 }
  0xa0   : > { %v1444_v19 = vor.u32 %v1443_v31, %v1440_v29  ;;  %v4969_v29 = vld [vmem:[%s6756_s1 + $0x1d0] sm:$0xff] }
  0xa1   : > { %v4938_v31 = vld [vmem:[%s6756_s1 + $0x150] sm:$0xff]  ;;  %2588 = vmatpush.bf16.msra.mxu3 %v4969_v29 }
  0xa2   : > { %1880 = vmatpush.bf16.msra.mxu1 %v4938_v31 }
  0xa9   : > { %v5546_v40 = vpop.f32.mrf.mxu0  ;;  %v5548_v42 = vpop.f32.mrf.mxu1 }
  0xac   : > { %616 = vmatmul.bf16.gmra.mxu0 %v447_v44  ;;  %754 = vmatmul.bf16.gmra.mxu1 %v5455_v30  ;;  %v1431_v30 = vrot.slane %v1429_v51, 1  ;;  %v1450_v51 = vshll.u32 %v5463_v6, 16 }
  0xae   : > { %966 = vmatmul.bf16.gmra.mxu2 %v845_v45  ;;  %v1435_v0 = vor.u32 %v1434_v60, %v1431_v30  ;;  %v1449_v30 = vrot.slane %v1447_v50, 1  ;;  %v1452_v60 = vrot.slane %v1450_v51, 2 }
  0xaf   : > { %1316 = vmatmul.bf16.gmra.mxu3 %v1195_v46  ;;  %v849_v46 = vsel %vm830_vm1, %v846_v1, %v848_v35  ;;  %v850_v1 = vrot.slane %v5248_v12, 1 }
  0xb0   : > { %v1436_v13 = vsel %vm1419_vm2, %v1427_v48, %v1435_v0  ;;  %v1445_v44 = vsel %vm1419_vm2, %v1435_v0, %v1444_v19  ;;  %v5630_v48 = vld [vmem:[%s5223_s27 + $0x58] sm:$0xff]  ;;  %v1453_v0 = vor.u32 %v1452_v60, %v1449_v30 }
  0xb1   : > { %v5559_v55 = vpop.f32.mrf.mxu2  ;;  %v5561_v22 = vpop.f32.mrf.mxu0  ;;  %v1200_v6 = vrot.slane %v5630_v48, 1  ;;  %v851_v34 = vsel %vm830_vm1, %v848_v35, %v850_v1  ;;  %v4980_v35 = vld [vmem:[%s6756_s1 + $0x228] sm:$0xff] }
  0xb2   : > { %v5563_v56 = vpop.f32.mrf.mxu1  ;;  %v5565_v61 = vpop.f32.mrf.mxu3  ;;  %2824 = vmatpush.bf16.msra.mxu0 %v4980_v35 }
  0xb3   : > { %v1201_v23 = vsel %vm830_vm1, %v1198_v36, %v1200_v6 }
  0xb9   : > { %v5575_v3 = vpop.f32.mrf.mxu2  ;;  %v5577_v4 = vpop.f32.mrf.mxu0 }
  0xba   : > { %v5579_v10 = vpop.f32.mrf.mxu1  ;;  %v5582_v25 = vpop.f32.mrf.mxu3 }
  0xbb   : > { %6761 = vst [vmem:[#allocation2_spill] sm:$0xff] %v5582_v25 }
  0xbc   : > { %759 = vmatmul.bf16.gmra.mxu1 %v5472_v43  ;;  %1644 = vmatmul.bf16.vlgmr.msrb.gmra.mxu0 %v1436_v13 }
  0xbe   : > { %971 = vmatmul.bf16.gmra.mxu2 %v847_v15 }
  0xbf   : > { %1321 = vmatmul.bf16.gmra.mxu3 %v1197_v18  ;;  %v1454_v18 = vsel %vm1419_vm2, %v1444_v19, %v1453_v0  ;;  %v1459_v19 = vshll.u32 %v5483_v9, 16 }
  0xc1   : > { %v5598_v43 = vpop.f32.mrf.mxu2  ;;  %v5600_v26 = vpop.f32.mrf.mxu0  ;;  %v1461_v50 = vrot.slane %v1459_v19, 2 }
  0xc2   : > { %v5602_v27 = vpop.f32.mrf.mxu1  ;;  %v5604_v32 = vpop.f32.mrf.mxu3 }
  0xc3   : > { %6762 = vst [vmem:[#allocation3_spill] sm:$0xff] %v5604_v32 }
  0xc9   : > { %v5611_v38 = vpop.f32.mrf.mxu2  ;;  %v5613_v39 = vpop.f32.mrf.mxu0 }
  0xca   : > { %v5615_v11 = vpop.f32.mrf.mxu1  ;;  %v5618_v45 = vpop.f32.mrf.mxu3 }
  0xcb   : > { %6763 = vst [vmem:[#allocation4_spill] sm:$0xff] %v5618_v45 }
  0xcc   : > { %764 = vmatmul.bf16.gmra.mxu1 %v5498_v62  ;;  %1649 = vmatmul.bf16.gmra.mxu0 %v1445_v44  ;;  %v4961_v62 = vld [vmem:[%s6756_s1 + $0x190] sm:$0xff] }
  0xcd   : > { %2230 = vmatpush.bf16.msra.mxu2 %v4961_v62  ;;  %v852_v62 = vrot.slane %v5312_v54, 1 }
  0xce   : > { %976 = vmatmul.bf16.gmra.mxu2 %v849_v46 }
  0xcf   : > { %1326 = vmatmul.bf16.gmra.mxu3 %v1199_v47  ;;  %v853_v29 = vsel %vm830_vm1, %v850_v1, %v852_v62 }
  0xd1   : > { %v937_v52 = vpop.f32.mrf.mxu2  ;;  %v5625_v58 = vpop.f32.mrf.mxu0 }
  0xd2   : > { %v5627_v59 = vpop.f32.mrf.mxu1  ;;  %v1287_v49 = vpop.f32.mrf.mxu3 }
  0xd9   : > { %v939_v2 = vpop.f32.mrf.mxu2  ;;  %v5637_v13 = vpop.f32.mrf.mxu0 }
  0xda   : > { %v730_v15 = vpop.f32.mrf.mxu1  ;;  %v1289_v20 = vpop.f32.mrf.mxu3 }
  0xdb   : > { %v731_v16 = vadd.f32 %v730_v15, %v5546_v40  ;;  %v1456_v40 = vshrl.u32 %v5483_v9, 16  ;;  %v5661_v9 = vld [vmem:[%s5223_s27 + $0x60] sm:$0xff] }
  0xdc   : > { %769 = vmatmul.bf16.gmra.mxu1 %v5515_v17  ;;  %1654 = vmatmul.bf16.gmra.mxu0 %v1454_v18 }
  0xdd   : > { %v1017_v24 = vadd.f32 %v937_v52, %v731_v16  ;;  %v1458_v47 = vrot.slane %v1456_v40, 1  ;;  %v1468_v40 = vshll.u32 %v5503_v53, 16 }
  0xde   : > { %981 = vmatmul.bf16.gmra.mxu2 %v851_v34 }
  0xdf   : > { %1331 = vmatmul.bf16.gmra.mxu3 %v1201_v23  ;;  %v5655_v17 = vadd.f32 %v1287_v49, %v1017_v24  ;;  %v1462_v60 = vor.u32 %v1461_v50, %v1458_v47  ;;  %v1202_v49 = vrot.slane %v5661_v9, 1  ;;  %v5682_v47 = vld [vmem:[%s5223_s27 + $0x68] sm:$0xff] }
  0xe0   : > { %v4960_v50 = vld [vmem:[%s6756_s1 + $0x188] sm:$0xff] }
  0xe1   : > { %v942_v36 = vpop.f32.mrf.mxu2  ;;  %v5657_v44 = vpop.f32.mrf.mxu0  ;;  %v1463_v23 = vsel %vm1419_vm2, %v1453_v0, %v1462_v60  ;;  %2231 = vmatpush.bf16.msra.mxu2 %v4960_v50 }
  0xe2   : > { %v732_v46 = vpop.f32.mrf.mxu1  ;;  %v1292_v52 = vpop.f32.mrf.mxu3 }
  0xe3   : > { %v733_v51 = vadd.f32 %v732_v46, %v5561_v22  ;;  %v1470_v46 = vrot.slane %v1468_v40, 2  ;;  %v4937_v40 = vld [vmem:[%s6756_s1 + $0x148] sm:$0xff] }
  0xe4   : > { %1881 = vmatpush.bf16.msra.mxu1 %v4937_v40 }
  0xe5   : > { %v1018_v30 = vadd.f32 %v939_v2, %v733_v51  ;;  %v1203_v2 = vsel %vm830_vm1, %v1200_v6, %v1202_v49  ;;  %v854_v51 = vrot.slane %v5235_v7, 1 }
  0xe7   : > { %v5664_v15 = vadd.f32 %v1289_v20, %v1018_v30  ;;  %v1465_v20 = vshrl.u32 %v5503_v53, 16  ;;  %v1204_v30 = vrot.slane %v5682_v47, 1 }
  0xe9   : > { %v944_v18 = vpop.f32.mrf.mxu2  ;;  %v5667_v16 = vpop.f32.mrf.mxu0  ;;  %v1467_v1 = vrot.slane %v1465_v20, 1 }
  0xea   : > { %v735_v34 = vpop.f32.mrf.mxu1  ;;  %v1294_v22 = vpop.f32.mrf.mxu3 }
  0xeb   : > { %v736_v24 = vadd.f32 %v735_v34, %v5577_v4  ;;  %v1471_v53 = vor.u32 %v1470_v46, %v1467_v1 }
  0xec   : > { %774 = vmatmul.bf16.gmra.mxu1 %v5229_v5  ;;  %1659 = vmatmul.bf16.gmra.mxu0 %v1463_v23 }
  0xed   : > { %v1019_v31 = vadd.f32 %v942_v36, %v736_v24  ;;  %v1472_v24 = vsel %vm1419_vm2, %v1462_v60, %v1471_v53  ;;  %v1477_v60 = vshll.u32 %v5523_v21, 16 }
  0xee   : > { %986 = vmatmul.bf16.gmra.mxu2 %v853_v29 }
  0xef   : > { %1336 = vmatmul.bf16.gmra.mxu3 %v1203_v2  ;;  %v5676_v19 = vadd.f32 %v1292_v52, %v1019_v31  ;;  %v855_v2 = vsel %vm830_vm1, %v852_v62, %v854_v51  ;;  %v1205_v31 = vsel %vm830_vm1, %v1202_v49, %v1204_v30  ;;  %v4979_v62 = vld [vmem:[%s6756_s1 + $0x220] sm:$0xff]  ;;  %v1479_v46 = vrot.slane %v1477_v60, 2 }
  0xf0   : > { %2825 = vmatpush.bf16.msra.mxu0 %v4979_v62 }
  0xf1   : > { %v947_v0 = vpop.f32.mrf.mxu2  ;;  %v5678_v4 = vpop.f32.mrf.mxu0 }
  0xf2   : > { %v737_v35 = vpop.f32.mrf.mxu1  ;;  %v1297_v36 = vpop.f32.mrf.mxu3 }
  0xf3   : > { %v738_v6 = vadd.f32 %v737_v35, %v5600_v26 }
  0xf5   : > { %v1020_v5 = vadd.f32 %v944_v18, %v738_v6 }
  0xf7   : > { %v5688_v52 = vadd.f32 %v1294_v22, %v1020_v5  ;;  %v4968_v22 = vld [vmem:[%s6756_s1 + $0x1c8] sm:$0xff] }
  0xf8   : > { %2589 = vmatpush.bf16.msra.mxu3 %v4968_v22 }
  0xf9   : > { %v949_v34 = vpop.f32.mrf.mxu2  ;;  %v5691_v23 = vpop.f32.mrf.mxu0 }
  0xfa   : > { %v740_v26 = vpop.f32.mrf.mxu1  ;;  %v1299_v29 = vpop.f32.mrf.mxu3 }
  0xfb   : > { %v741_v18 = vadd.f32 %v740_v26, %v5613_v39  ;;  %v1474_v39 = vshrl.u32 %v5523_v21, 16  ;;  %v5715_v21 = vld [vmem:[%s5223_s27 + $0x70] sm:$0xff] }
  0xfc   : > { %779 = vmatmul.bf16.gmra.mxu1 %v5248_v12  ;;  %1664 = vmatmul.bf16.gmra.mxu0 %v1472_v24  ;;  %v856_v24 = vrot.slane %v5252_v14, 1  ;;  %v1483_v14 = vshrl.u32 %v5542_v37, 16 }
  0xfd   : > { %v1021_v20 = vadd.f32 %v947_v0, %v741_v18  ;;  %v1476_v1 = vrot.slane %v1474_v39, 1 }
  0xfe   : > { %991 = vmatmul.bf16.gmra.mxu2 %v855_v2  ;;  %v857_v39 = vsel %vm830_vm1, %v854_v51, %v856_v24  ;;  %v1485_v51 = vrot.slane %v1483_v14, 1 }
  0xff   : > { %1341 = vmatmul.bf16.gmra.mxu3 %v1205_v31  ;;  %v5709_v12 = vadd.f32 %v1297_v36, %v1021_v20  ;;  %v1480_v26 = vor.u32 %v1479_v46, %v1476_v1  ;;  %v1206_v36 = vrot.slane %v5715_v21, 1  ;;  %v5736_v46 = vld [vmem:[%s5223_s27 + $0x78] sm:$0xff] }
 0x101   : > { %v952_v49 = vpop.f32.mrf.mxu2  ;;  %v5711_v0 = vpop.f32.mrf.mxu0  ;;  %v1481_v22 = vsel %vm1419_vm2, %v1471_v53, %v1480_v26 }
 0x102   : > { %v742_v35 = vpop.f32.mrf.mxu1  ;;  %v1302_v5 = vpop.f32.mrf.mxu3 }
 0x103   : > { %v743_v6 = vadd.f32 %v742_v35, %v5625_v58 }
 0x105   : > { %v1022_v50 = vadd.f32 %v949_v34, %v743_v6  ;;  %v1207_v34 = vsel %vm830_vm1, %v1204_v30, %v1206_v36  ;;  %v4959_v6 = vld [vmem:[%s6756_s1 + $0x180] sm:$0xff] }
 0x106   : > { %2232 = vmatpush.bf16.msra.mxu2 %v4959_v6 }
 0x107   : > { %v5718_v18 = vadd.f32 %v1299_v29, %v1022_v50  ;;  %v1486_v29 = vshll.u32 %v5542_v37, 16 }
 0x109   : > { %v954_v2 = vpop.f32.mrf.mxu2  ;;  %v5721_v31 = vpop.f32.mrf.mxu0  ;;  %v1488_v1 = vrot.slane %v1486_v29, 2 }
 0x10a   : > { %v745_v20 = vpop.f32.mrf.mxu1  ;;  %v1304_v58 = vpop.f32.mrf.mxu3 }
 0x10b   : > { %v746_v40 = vadd.f32 %v745_v20, %v5637_v13  ;;  %v1489_v37 = vor.u32 %v1488_v1, %v1485_v51  ;;  %v1208_v20 = vrot.slane %v5736_v46, 1 }
 0x10c   : > { %784 = vmatmul.bf16.gmra.mxu1 %v5312_v54  ;;  %1669 = vmatmul.bf16.gmra.mxu0 %v1481_v22 }
 0x10d   : > { %v1023_v60 = vadd.f32 %v952_v49, %v746_v40  ;;  %v1209_v14 = vsel %vm830_vm1, %v1206_v36, %v1208_v20 }
 0x10e   : > { %996 = vmatmul.bf16.gmra.mxu2 %v857_v39  ;;  %v1490_v39 = vsel %vm1419_vm2, %v1480_v26, %v1489_v37  ;;  %v1495_v26 = vshll.u32 %v5571_v63, 16 }
 0x10f   : > { %1346 = vmatmul.bf16.gmra.mxu3 %v1207_v34  ;;  %v5730_v62 = vadd.f32 %v1302_v5, %v1023_v60  ;;  %v858_v5 = vrot.slane %v5238_v8, 1  ;;  %v4967_v8 = vld [vmem:[%s6756_s1 + $0x1c0] sm:$0xff] }
 0x110   : > { %2590 = vmatpush.bf16.msra.mxu3 %v4967_v8  ;;  %v1497_v1 = vrot.slane %v1495_v26, 2 }
 0x111   : > { %v957_v53 = vpop.f32.mrf.mxu2  ;;  %v5732_v13 = vpop.f32.mrf.mxu0  ;;  %v859_v60 = vsel %vm830_vm1, %v856_v24, %v858_v5  ;;  %v4978_v24 = vld [vmem:[%s6756_s1 + $0x218] sm:$0xff] }
 0x112   : > { %v747_v35 = vpop.f32.mrf.mxu1  ;;  %v1307_v49 = vpop.f32.mrf.mxu3  ;;  %2826 = vmatpush.bf16.msra.mxu0 %v4978_v24 }
 0x113   : > { %v748_v30 = vadd.f32 %v747_v35, %v5657_v44 }
 0x115   : > { %v1024_v54 = vadd.f32 %v954_v2, %v748_v30 }
 0x117   : > { %v5742_v50 = vadd.f32 %v1304_v58, %v1024_v54  ;;  %v4936_v58 = vld [vmem:[%s6756_s1 + $0x140] sm:$0xff] }
 0x118   : > { %1882 = vmatpush.bf16.msra.mxu1 %v4936_v58  ;;  %v5769_v54 = vld [vmem:[%s5223_s27 + $0x80] sm:$0xff] }
 0x119   : > { %v959_v22 = vpop.f32.mrf.mxu2  ;;  %v5745_v40 = vpop.f32.mrf.mxu0 }
 0x11a   : > { %v750_v44 = vpop.f32.mrf.mxu1  ;;  %v1309_v34 = vpop.f32.mrf.mxu3 }
 0x11b   : > { %v751_v2 = vadd.f32 %v750_v44, %v5667_v16  ;;  %v1492_v16 = vshrl.u32 %v5571_v63, 16 }
 0x11c   : > { %789 = vmatmul.bf16.gmra.mxu1 %v5235_v7  ;;  %1674 = vmatmul.bf16.gmra.mxu0 %v1490_v39  ;;  %v5772_v39 = vld [vmem:[%s5223_s27 + $0x78] sm:$0xff] }
 0x11d   : > { %v1025_v29 = vadd.f32 %v957_v53, %v751_v2  ;;  %v1494_v51 = vrot.slane %v1492_v16, 1 }
 0x11e   : > { %1001 = vmatmul.bf16.gmra.mxu2 %v859_v60  ;;  %v1210_v60 = vrot.slane %v5769_v54, 1 }
 0x11f   : > { %1351 = vmatmul.bf16.gmra.mxu3 %v1209_v14  ;;  %v5763_v7 = vadd.f32 %v1307_v49, %v1025_v29  ;;  %v1498_v44 = vor.u32 %v1497_v1, %v1494_v51  ;;  %v860_v49 = vrot.slane %v5772_v39, 1  ;;  %v1501_v51 = vshrl.u32 %v5607_v28, 16 }
 0x120   : > { %v1211_v26 = vsel %vm830_vm1, %v1208_v20, %v1210_v60  ;;  %v1504_v1 = vshll.u32 %v5607_v28, 16  ;;  %v4991_v28 = vld [vmem:[%s6756_s1 + $0x38] sm:$0xff] }
 0x121   : > { %v962_v36 = vpop.f32.mrf.mxu2  ;;  %v5765_v53 = vpop.f32.mrf.mxu0  ;;  %3199 = vmatpush.bf16.msrb.mxu2 %v4991_v28  ;;  %v5126_v28 = vld [vmem:[%s5223_s27 + $0x70] sm:$0xff] }
 0x122   : > { %v752_v35 = vpop.f32.mrf.mxu1  ;;  %v1312_v63 = vpop.f32.mrf.mxu3 }
 0x123   : > { %v753_v30 = vadd.f32 %v752_v35, %v5678_v4  ;;  %v1499_v4 = vsel %vm1419_vm2, %v1489_v37, %v1498_v44  ;;  %v5125_v35 = vld [vmem:[%s5223_s27 + $0x68] sm:$0xff] }
 0x125   : > { %v1026_v6 = vadd.f32 %v959_v22, %v753_v30  ;;  %v861_v22 = vsel %vm830_vm1, %v858_v5, %v860_v49 }
 0x127   : > { %v5775_v2 = vadd.f32 %v1309_v34, %v1026_v6  ;;  %v1081_v34 = vld [vmem:[%s5223_s27 + $0x88] sm:$0x1]  ;;  %v1506_v6 = vrot.slane %v1504_v1, 2 }
 0x129   : > { %v964_v14 = vpop.f32.mrf.mxu2  ;;  %v5778_v29 = vpop.f32.mrf.mxu0 }
 0x12a   : > { %v755_v8 = vpop.f32.mrf.mxu1  ;;  %v1314_v16 = vpop.f32.mrf.mxu3 }
 0x12b   : > { %v756_v58 = vadd.f32 %v755_v8, %v5691_v23  ;;  %v1163_v23 = vunpack.c.l.b16 %v1081_v34 }
 0x12c   : > { %794 = vmatmul.bf16.gmra.mxu1 %v5125_v35  ;;  %1679 = vmatmul.bf16.gmra.mxu0 %v1499_v4  ;;  %v1996_v35 = vld [vmem:[%s5223_s27 + $0x10] sm:$0xc] }
 0x12d   : > { %v1027_v24 = vadd.f32 %v962_v36, %v756_v58  ;;  %v1503_v36 = vrot.slane %v1501_v51, 1  ;;  %v1180_v58 = vpack.c.b16 %v1163_v23, %v1163_v23  ;;  %v6760_v51 = vunpack.c.l.b16 %v5795_v41 }
 0x12e   : > { %1006 = vmatmul.bf16.gmra.mxu2 %v861_v22 }
 0x12f   : > { %1356 = vmatmul.bf16.gmra.mxu3 %v1211_v26  ;;  %v5788_v37 = vadd.f32 %v1312_v63, %v1027_v24  ;;  %v1507_v63 = vor.u32 %v1506_v6, %v1503_v36  ;;  %v862_v26 = vrot.slane %v5320_v57, 1  ;;  %v1212_v34 = vrot.slane %v1180_v58, 1 }
 0x131   : > { %v967_v30 = vpop.f32.mrf.mxu2  ;;  %v5790_v5 = vpop.f32.mrf.mxu0  ;;  %v863_v57 = vsel %vm830_vm1, %v860_v49, %v862_v26  ;;  %v1513_v49 = vshll.u32 %v5630_v48, 16 }
 0x132   : > { %v757_v20 = vpop.f32.mrf.mxu1  ;;  %v1317_v4 = vpop.f32.mrf.mxu3 }
 0x133   : > { %v758_v8 = vadd.f32 %v757_v20, %v5711_v0  ;;  %v2078_v0 = vunpack.c.l.b16 %v1996_v35  ;;  %v1508_v20 = vsel %vm1419_vm2, %v1498_v44, %v1507_v63  ;;  %v1510_v44 = vshrl.u32 %v5630_v48, 16 }
 0x135   : > { %v1028_v22 = vadd.f32 %v964_v14, %v758_v8  ;;  %v2111_v58 = vpack.c.b16 %v6760_v51, %v2078_v0  ;;  %v1512_v48 = vrot.slane %v1510_v44, 1 }
 0x137   : > { %v5801_v24 = vadd.f32 %v1314_v16, %v1028_v22  ;;  %v1213_v16 = vsel %vm830_vm1, %v1210_v60, %v1212_v34  ;;  %v5812_v22 = vld [vmem:[%s5223_s27 + $0x18] sm:$0xff]  ;;  %v4977_v60 = vld [vmem:[%s6756_s1 + $0x210] sm:$0xff]  ;;  %v2368_v26 = vshrl.u32 %v2111_v58, 16  ;;  %v2371_v34 = vshll.u32 %v2111_v58, 16 }
 0x138   : > { %v2376_v0 = vshrl.u32 %v5812_v22, 16  ;;  %2827 = vmatpush.bf16.msra.mxu0 %v4977_v60  ;;  %v2129_v60 = vrot.slane %v5812_v22, 2 }
 0x139   : > { %v969_v14 = vpop.f32.mrf.mxu2  ;;  %v1645_v23 = vpop.f32.mrf.mxu0 }
 0x13a   : > { %v760_v1 = vpop.f32.mrf.mxu1  ;;  %v5807_v36 = vadd.f32 %v1645_v23, %v5655_v17  ;;  %v1319_v6 = vpop.f32.mrf.mxu3  ;;  %v4999_v17 = vld [vmem:[%s6756_s1 + $0x78] sm:$0xff]  ;;  %v2378_v51 = vrot.slane %v2376_v0, 2 }
 0x13b   : > { %v761_v8 = vadd.f32 %v760_v1, %v5721_v31  ;;  %v5007_v31 = vld [vmem:[%s6756_s1 + $0xb8] sm:$0xff]  ;;  %3130 = vmatpush.bf16.msrb.mxu1 %v4999_v17  ;;  %v2379_v1 = vshll.u32 %v5812_v22, 16  ;;  %v2373_v17 = vrot.slane %v2371_v34, 3 }
 0x13c   : > { %6764 = vst [vmem:[#allocation5_spill] sm:$0xff] %v5807_v36  ;;  %799 = vmatmul.bf16.gmra.mxu1 %v5126_v28  ;;  %1684 = vmatmul.bf16.gmra.mxu0 %v1508_v20 }
 0x13d   : > { %v1029_v35 = vadd.f32 %v967_v30, %v761_v8  ;;  %3293 = vmatpush.bf16.msrb.mxu3 %v5007_v31  ;;  %v2381_v36 = vrot.slane %v2379_v1, 3  ;;  %v2128_v31 = vrot.slane %v2111_v58, 2  ;;  %v1757_v1 = vld [vmem:[%s5223_s27 + $0x8] sm:$0xc] }
 0x13e   : > { %1011 = vmatmul.bf16.gmra.mxu2 %v863_v57  ;;  %v1515_v57 = vrot.slane %v1513_v49, 2 }
 0x13f   : > { %1361 = vmatmul.bf16.gmra.mxu3 %v1213_v16  ;;  %v5828_v30 = vadd.f32 %v1317_v4, %v1029_v35  ;;  %v2370_v35 = vrot.slane %v2368_v26, 2  ;;  %v2130_v0 = vsel %vm1777_vm3, %v2128_v31, %v2129_v60 }
 0x140   : > { %v1516_v32 = vor.u32 %v1515_v57, %v1512_v48 }
 0x141   : > { %v972_v23 = vpop.f32.mrf.mxu2  ;;  %v1647_v8 = vpop.f32.mrf.mxu0  ;;  %v2374_v44 = vor.u32 %v2373_v17, %v2370_v35  ;;  %v6765_v17 = vunpack.c.l.b16 %v5366_v33 }
 0x142   : > { %v762_v20 = vpop.f32.mrf.mxu1  ;;  %v5834_v16 = vadd.f32 %v1647_v8, %v5664_v15  ;;  %v1322_v4 = vpop.f32.mrf.mxu3  ;;  %v1517_v26 = vsel %vm1419_vm2, %v1507_v63, %v1516_v32  ;;  %v1519_v63 = vshrl.u32 %v5661_v9, 16 }
 0x143   : > { %v763_v28 = vadd.f32 %v762_v20, %v5732_v13  ;;  %v2382_v13 = vor.u32 %v2381_v36, %v2378_v51  ;;  %v1775_v36 = vunpack.c.l.b16 %v1757_v1 }
 0x144   : > { %v1521_v35 = vrot.slane %v1519_v63, 1 }
 0x145   : > { %v1030_v45 = vadd.f32 %v969_v14, %v763_v28  ;;  %v1776_v31 = vpack.c.b16 %v6765_v17, %v1775_v36 }
 0x147   : > { %v5837_v25 = vadd.f32 %v1319_v6, %v1030_v45  ;;  %v2383_v45 = vsel %vm2366_vm4, %v2374_v44, %v2382_v13  ;;  %v5848_v6 = vld [vmem:[%s5223_s27 + $0x20] sm:$0xff]  ;;  %v1778_v1 = vrot.slane %v1776_v31, 2 }
 0x148   : > { %v2385_v8 = vshrl.u32 %v5848_v6, 16  ;;  %v2388_v48 = vshll.u32 %v5848_v6, 16  ;;  %v2131_v33 = vrot.slane %v5848_v6, 2 }
 0x149   : > { %v974_v49 = vpop.f32.mrf.mxu2  ;;  %v1650_v20 = vpop.f32.mrf.mxu0 }
 0x14a   : > { %v765_v15 = vpop.f32.mrf.mxu1  ;;  %v5842_v14 = vadd.f32 %v1650_v20, %v5676_v19  ;;  %v1324_v58 = vpop.f32.mrf.mxu3  ;;  %v2390_v20 = vrot.slane %v2388_v48, 3 }
 0x14b   : > { %v766_v34 = vadd.f32 %v765_v15, %v5745_v40  ;;  %v1522_v40 = vshll.u32 %v5661_v9, 16  ;;  %v2387_v15 = vrot.slane %v2385_v8, 2 }
 0x14c   : > { %804 = vmatmul.bf16.gmra.mxu1 %v5772_v39  ;;  %1689 = vmatmul.bf16.gmra.mxu0 %v1517_v26 }
 0x14d   : > { %v1031_v51 = vadd.f32 %v972_v23, %v766_v34  ;;  %v1524_v39 = vrot.slane %v1522_v40, 2  ;;  %v4990_v34 = vld [vmem:[%s6756_s1 + $0x30] sm:$0xff] }
 0x14e   : > { %2233 = vmatmul.bf16.vlgmr.msra.gmra.mxu2 %v2130_v0 }
 0x14f   : > { %2591 = vmatmul.bf16.vlgmr.msra.gmra.mxu3 %v2383_v45  ;;  %v5853_v19 = vadd.f32 %v1322_v4, %v1031_v51  ;;  %v1525_v0 = vor.u32 %v1524_v39, %v1521_v35  ;;  %v5127_v45 = vld [vmem:[%s5223_s27 + $0x10] sm:$0xff]  ;;  %3200 = vmatpush.bf16.msrb.mxu2 %v4990_v34  ;;  %v2132_v35 = vsel %vm1777_vm3, %v2129_v60, %v2131_v33  ;;  %v1531_v60 = vshll.u32 %v5682_v47, 16 }
 0x150   : > { %v1779_v51 = vrot.slane %v5127_v45, 2 }
 0x151   : > { %v977_v57 = vpop.f32.mrf.mxu2  ;;  %v1652_v23 = vpop.f32.mrf.mxu0 }
 0x152   : > { %v767_v28 = vpop.f32.mrf.mxu1  ;;  %v5861_v9 = vadd.f32 %v1652_v23, %v5688_v52  ;;  %v1327_v4 = vpop.f32.mrf.mxu3  ;;  %v2391_v52 = vor.u32 %v2390_v20, %v2387_v15  ;;  %v1780_v8 = vsel %vm1777_vm3, %v1778_v1, %v1779_v51 }
 0x153   : > { %v768_v44 = vadd.f32 %v767_v28, %v5765_v53 }
 0x154   : > { %v2392_v39 = vsel %vm2366_vm4, %v2382_v13, %v2391_v52  ;;  %v4976_v13 = vld [vmem:[%s6756_s1 + $0x208] sm:$0xff] }
 0x155   : > { %v1032_v26 = vadd.f32 %v974_v49, %v768_v44  ;;  %v1526_v49 = vsel %vm1419_vm2, %v1516_v32, %v1525_v0  ;;  %v5006_v32 = vld [vmem:[%s6756_s1 + $0xb0] sm:$0xff]  ;;  %2828 = vmatpush.bf16.msra.mxu0 %v4976_v13 }
 0x156   : > { %3294 = vmatpush.bf16.msrb.mxu3 %v5006_v32 }
 0x157   : > { %v5868_v53 = vadd.f32 %v1324_v58, %v1032_v26  ;;  %v5879_v58 = vld [vmem:[%s5223_s27 + $0x28] sm:$0xff] }
 0x158   : > { %v2394_v31 = vshrl.u32 %v5879_v58, 16  ;;  %v2397_v44 = vshll.u32 %v5879_v58, 16 }
 0x159   : > { %v979_v63 = vpop.f32.mrf.mxu2  ;;  %v1655_v36 = vpop.f32.mrf.mxu0 }
 0x15a   : > { %v770_v40 = vpop.f32.mrf.mxu1  ;;  %v5874_v28 = vadd.f32 %v1655_v36, %v5709_v12  ;;  %v1329_v23 = vpop.f32.mrf.mxu3  ;;  %v1528_v12 = vshrl.u32 %v5682_v47, 16  ;;  %v1533_v47 = vrot.slane %v1531_v60, 2  ;;  %v2399_v36 = vrot.slane %v2397_v44, 3 }
 0x15b   : > { %v771_v48 = vadd.f32 %v770_v40, %v5778_v29  ;;  %v4998_v29 = vld [vmem:[%s6756_s1 + $0x70] sm:$0xff] }
 0x15c   : > { %1694 = vmatmul.bf16.gmra.mxu0 %v1526_v49  ;;  %1883 = vmatmul.bf16.vlgmr.msra.gmra.mxu1 %v1780_v8  ;;  %v1530_v34 = vrot.slane %v1528_v12, 1 }
 0x15d   : > { %v1033_v17 = vadd.f32 %v977_v57, %v771_v48  ;;  %3131 = vmatpush.bf16.msrb.mxu1 %v4998_v29  ;;  %v5128_v48 = vld [vmem:[%s5223_s27 + $0x18] sm:$0xff] }
 0x15e   : > { %2238 = vmatmul.bf16.gmra.mxu2 %v2132_v35  ;;  %v1534_v8 = vor.u32 %v1533_v47, %v1530_v34  ;;  %v1781_v35 = vrot.slane %v5128_v48, 2 }
 0x15f   : > { %2596 = vmatmul.bf16.gmra.mxu3 %v2392_v39  ;;  %v5892_v57 = vadd.f32 %v1327_v4, %v1033_v17  ;;  %v2396_v4 = vrot.slane %v2394_v31, 2  ;;  %v2133_v39 = vrot.slane %v5879_v58, 2 }
 0x161   : > { %v982_v15 = vpop.f32.mrf.mxu2  ;;  %v1657_v26 = vpop.f32.mrf.mxu0  ;;  %v2400_v32 = vor.u32 %v2399_v36, %v2396_v4  ;;  %v2134_v44 = vsel %vm1777_vm3, %v2131_v33, %v2133_v39 }
 0x162   : > { %v772_v20 = vpop.f32.mrf.mxu1  ;;  %v5898_v45 = vadd.f32 %v1657_v26, %v5718_v18  ;;  %v1332_v40 = vpop.f32.mrf.mxu3  ;;  %v1782_v18 = vsel %vm1777_vm3, %v1779_v51, %v1781_v35  ;;  %v1540_v51 = vshll.u32 %v5715_v21, 16 }
 0x163   : > { %v773_v1 = vadd.f32 %v772_v20, %v5790_v5  ;;  %v1535_v5 = vsel %vm1419_vm2, %v1525_v0, %v1534_v8  ;;  %v2401_v20 = vsel %vm2366_vm4, %v2391_v52, %v2400_v32  ;;  %v1537_v0 = vshrl.u32 %v5715_v21, 16 }
 0x165   : > { %v1034_v49 = vadd.f32 %v979_v63, %v773_v1  ;;  %v1539_v1 = vrot.slane %v1537_v0, 1 }
 0x167   : > { %v5902_v17 = vadd.f32 %v1329_v23, %v1034_v49  ;;  %v5913_v23 = vld [vmem:[%s5223_s27 + $0x30] sm:$0xff] }
 0x168   : > { %v2406_v33 = vshll.u32 %v5913_v23, 16 }
 0x169   : > { %v984_v29 = vpop.f32.mrf.mxu2  ;;  %v1660_v60 = vpop.f32.mrf.mxu0 }
 0x16a   : > { %v775_v12 = vpop.f32.mrf.mxu1  ;;  %v5908_v63 = vadd.f32 %v1660_v60, %v5730_v62  ;;  %v1334_v31 = vpop.f32.mrf.mxu3  ;;  %v2403_v62 = vshrl.u32 %v5913_v23, 16  ;;  %v2408_v48 = vrot.slane %v2406_v33, 3 }
 0x16b   : > { %v776_v13 = vadd.f32 %v775_v12, %v5548_v42  ;;  %v4989_v12 = vld [vmem:[%s6756_s1 + $0x28] sm:$0xff] }
 0x16c   : > { %1699 = vmatmul.bf16.gmra.mxu0 %v1535_v5  ;;  %1888 = vmatmul.bf16.gmra.mxu1 %v1782_v18  ;;  %v2405_v21 = vrot.slane %v2403_v62, 2  ;;  %v5129_v5 = vld [vmem:[%s5223_s27 + $0x20] sm:$0xff] }
 0x16d   : > { %v1035_v26 = vadd.f32 %v982_v15, %v776_v13  ;;  %v1542_v15 = vrot.slane %v1540_v51, 2  ;;  %v1783_v18 = vrot.slane %v5129_v5, 2  ;;  %v2135_v13 = vrot.slane %v5913_v23, 2  ;;  %3201 = vmatpush.bf16.msrb.mxu2 %v4989_v12 }
 0x16e   : > { %2243 = vmatmul.bf16.gmra.mxu2 %v2134_v44 }
 0x16f   : > { %2601 = vmatmul.bf16.gmra.mxu3 %v2401_v20  ;;  %v5917_v42 = vadd.f32 %v1332_v40, %v1035_v26  ;;  %v1543_v60 = vor.u32 %v1542_v15, %v1539_v1 }
 0x171   : > { %v987_v34 = vpop.f32.mrf.mxu2  ;;  %v1662_v47 = vpop.f32.mrf.mxu0  ;;  %v1544_v0 = vsel %vm1419_vm2, %v1534_v8, %v1543_v60  ;;  %v5005_v8 = vld [vmem:[%s6756_s1 + $0xa8] sm:$0xff] }
 0x172   : > { %v777_v52 = vpop.f32.mrf.mxu1  ;;  %v5923_v36 = vadd.f32 %v1662_v47, %v5742_v50  ;;  %v1337_v49 = vpop.f32.mrf.mxu3  ;;  %3295 = vmatpush.bf16.msrb.mxu3 %v5005_v8 }
 0x173   : > { %v778_v4 = vadd.f32 %v777_v52, %v5563_v56  ;;  %v2409_v56 = vor.u32 %v2408_v48, %v2405_v21  ;;  %v2136_v52 = vsel %vm1777_vm3, %v2133_v39, %v2135_v13  ;;  %v4975_v39 = vld [vmem:[%s6756_s1 + $0x200] sm:$0xff] }
 0x174   : > { %2829 = vmatpush.bf16.msra.mxu0 %v4975_v39 }
 0x175   : > { %v1036_v40 = vadd.f32 %v984_v29, %v778_v4  ;;  %v1784_v29 = vsel %vm1777_vm3, %v1781_v35, %v1783_v18  ;;  %v2410_v47 = vsel %vm2366_vm4, %v2400_v32, %v2409_v56  ;;  %v1549_v35 = vshll.u32 %v5736_v46, 16 }
 0x177   : > { %v5930_v44 = vadd.f32 %v1334_v31, %v1036_v40  ;;  %v5941_v31 = vld [vmem:[%s5223_s27 + $0x38] sm:$0xff] }
 0x178   : > { %v2415_v15 = vshll.u32 %v5941_v31, 16 }
 0x179   : > { %v989_v50 = vpop.f32.mrf.mxu2  ;;  %v1665_v26 = vpop.f32.mrf.mxu0 }
 0x17a   : > { %v780_v20 = vpop.f32.mrf.mxu1  ;;  %v5936_v62 = vadd.f32 %v1665_v26, %v5763_v7  ;;  %v1339_v33 = vpop.f32.mrf.mxu3  ;;  %v1546_v7 = vshrl.u32 %v5736_v46, 16  ;;  %v1551_v46 = vrot.slane %v1549_v35, 2  ;;  %v2417_v26 = vrot.slane %v2415_v15, 3 }
 0x17b   : > { %v781_v51 = vadd.f32 %v780_v20, %v5579_v10  ;;  %v4997_v10 = vld [vmem:[%s6756_s1 + $0x68] sm:$0xff] }
 0x17c   : > { %1704 = vmatmul.bf16.gmra.mxu0 %v1544_v0  ;;  %1893 = vmatmul.bf16.gmra.mxu1 %v1784_v29  ;;  %v1548_v40 = vrot.slane %v1546_v7, 1 }
 0x17d   : > { %v1037_v1 = vadd.f32 %v987_v34, %v781_v51  ;;  %3132 = vmatpush.bf16.msrb.mxu1 %v4997_v10  ;;  %v2412_v34 = vshrl.u32 %v5941_v31, 16  ;;  %v5130_v51 = vld [vmem:[%s5223_s27 + $0x28] sm:$0xff] }
 0x17e   : > { %2248 = vmatmul.bf16.gmra.mxu2 %v2136_v52  ;;  %v1552_v29 = vor.u32 %v1551_v46, %v1548_v40  ;;  %v1785_v52 = vrot.slane %v5130_v51, 2 }
 0x17f   : > { %2606 = vmatmul.bf16.gmra.mxu3 %v2410_v47  ;;  %v5954_v32 = vadd.f32 %v1337_v49, %v1037_v1  ;;  %v2414_v49 = vrot.slane %v2412_v34, 2  ;;  %v2137_v47 = vrot.slane %v5941_v31, 2 }
 0x181   : > { %v992_v4 = vpop.f32.mrf.mxu2  ;;  %v1667_v48 = vpop.f32.mrf.mxu0  ;;  %v2418_v8 = vor.u32 %v2417_v26, %v2414_v49  ;;  %v2138_v15 = vsel %vm1777_vm3, %v2135_v13, %v2137_v47 }
 0x182   : > { %v782_v21 = vpop.f32.mrf.mxu1  ;;  %v5960_v5 = vadd.f32 %v1667_v48, %v5775_v2  ;;  %v1342_v20 = vpop.f32.mrf.mxu3  ;;  %v1786_v2 = vsel %vm1777_vm3, %v1783_v18, %v1785_v52  ;;  %v1558_v18 = vshll.u32 %v5769_v54, 16 }
 0x183   : > { %v783_v12 = vadd.f32 %v782_v21, %v5602_v27  ;;  %v1553_v27 = vsel %vm1419_vm2, %v1543_v60, %v1552_v29  ;;  %v2419_v21 = vsel %vm2366_vm4, %v2409_v56, %v2418_v8  ;;  %v1555_v60 = vshrl.u32 %v5769_v54, 16  ;;  %v1399_v54 = vld [vmem:[%s5223_s27 + $0x88] sm:$0x3] }
 0x185   : > { %v1038_v0 = vadd.f32 %v989_v50, %v783_v12  ;;  %v1560_v12 = vrot.slane %v1558_v18, 2 }
 0x187   : > { %v5964_v1 = vadd.f32 %v1339_v33, %v1038_v0  ;;  %v5975_v33 = vld [vmem:[%s5223_s27 + $0x40] sm:$0xff] }
 0x188   : > { %v2424_v13 = vshll.u32 %v5975_v33, 16 }
 0x189   : > { %v994_v10 = vpop.f32.mrf.mxu2  ;;  %v1670_v35 = vpop.f32.mrf.mxu0 }
 0x18a   : > { %v785_v7 = vpop.f32.mrf.mxu1  ;;  %v5970_v50 = vadd.f32 %v1670_v35, %v5788_v37  ;;  %v1344_v34 = vpop.f32.mrf.mxu3  ;;  %v2421_v37 = vshrl.u32 %v5975_v33, 16  ;;  %v4988_v35 = vld [vmem:[%s6756_s1 + $0x20] sm:$0xff] }
 0x18b   : > { %v786_v39 = vadd.f32 %v785_v7, %v5615_v11  ;;  %3202 = vmatpush.bf16.msrb.mxu2 %v4988_v35 }
 0x18c   : > { %1709 = vmatmul.bf16.gmra.mxu0 %v1553_v27  ;;  %1898 = vmatmul.bf16.gmra.mxu1 %v1786_v2  ;;  %v2423_v51 = vrot.slane %v2421_v37, 2  ;;  %v5131_v2 = vld [vmem:[%s5223_s27 + $0x30] sm:$0xff] }
 0x18d   : > { %v1039_v48 = vadd.f32 %v992_v4, %v786_v39  ;;  %v1557_v4 = vrot.slane %v1555_v60, 1  ;;  %v1787_v39 = vrot.slane %v5131_v2, 2 }
 0x18e   : > { %2253 = vmatmul.bf16.gmra.mxu2 %v2138_v15  ;;  %v1417_v15 = vunpack.c.l.b16 %v1399_v54 }
 0x18f   : > { %2611 = vmatmul.bf16.gmra.mxu3 %v2419_v21  ;;  %v5979_v11 = vadd.f32 %v1342_v20, %v1039_v48  ;;  %v2426_v20 = vrot.slane %v2424_v13, 3  ;;  %v1561_v27 = vor.u32 %v1560_v12, %v1557_v4  ;;  %v2139_v21 = vrot.slane %v5975_v33, 2 }
 0x190   : > { %v1788_v37 = vsel %vm1777_vm3, %v1785_v52, %v1787_v39  ;;  %v5997_v13 = vpack.c.b16 %v1417_v15, %v1417_v15 }
 0x191   : > { %v997_v56 = vpop.f32.mrf.mxu2  ;;  %v1672_v46 = vpop.f32.mrf.mxu0  ;;  %v2140_v12 = vsel %vm1777_vm3, %v2137_v47, %v2139_v21 }
 0x192   : > { %v787_v40 = vpop.f32.mrf.mxu1  ;;  %v5985_v26 = vadd.f32 %v1672_v46, %v5801_v24  ;;  %v1347_v0 = vpop.f32.mrf.mxu3  ;;  %v2427_v24 = vor.u32 %v2426_v20, %v2423_v51  ;;  %v1567_v52 = vshll.u32 %v5997_v13, 16 }
 0x193   : > { %v788_v49 = vadd.f32 %v787_v40, %v5627_v59 }
 0x194   : > { %v1569_v2 = vrot.slane %v1567_v52, 2 }
 0x195   : > { %v1040_v7 = vadd.f32 %v994_v10, %v788_v49  ;;  %v1562_v10 = vsel %vm1419_vm2, %v1552_v29, %v1561_v27  ;;  %v6006_v49 = vld [vmem:[%s5223_s27 + $0x48] sm:$0xff]  ;;  %v5004_v29 = vld [vmem:[%s6756_s1 + $0xa0] sm:$0xff] }
 0x196   : > { %3296 = vmatpush.bf16.msrb.mxu3 %v5004_v29 }
 0x197   : > { %v5993_v59 = vadd.f32 %v1344_v34, %v1040_v7  ;;  %v2428_v34 = vsel %vm2366_vm4, %v2418_v8, %v2427_v24  ;;  %v2430_v8 = vshrl.u32 %v6006_v49, 16 }
 0x199   : > { %v999_v48 = vpop.f32.mrf.mxu2  ;;  %v1675_v18 = vpop.f32.mrf.mxu0 }
 0x19a   : > { %v790_v60 = vpop.f32.mrf.mxu1  ;;  %v6001_v46 = vadd.f32 %v1675_v18, %v5828_v30  ;;  %v1349_v4 = vpop.f32.mrf.mxu3  ;;  %v1564_v30 = vshrl.u32 %v5997_v13, 16 }
 0x19b   : > { %v791_v40 = vadd.f32 %v790_v60, %v5559_v55  ;;  %v4996_v55 = vld [vmem:[%s6756_s1 + $0x60] sm:$0xff] }
 0x19c   : > { %1714 = vmatmul.bf16.gmra.mxu0 %v1562_v10  ;;  %1903 = vmatmul.bf16.gmra.mxu1 %v1788_v37  ;;  %v1566_v35 = vrot.slane %v1564_v30, 1  ;;  %v2432_v10 = vrot.slane %v2430_v8, 2 }
 0x19d   : > { %v1041_v54 = vadd.f32 %v997_v56, %v791_v40  ;;  %3133 = vmatpush.bf16.msrb.mxu1 %v4996_v55  ;;  %v2433_v56 = vshll.u32 %v6006_v49, 16 }
 0x19e   : > { %2258 = vmatmul.bf16.gmra.mxu2 %v2140_v12  ;;  %v1570_v40 = vor.u32 %v1569_v2, %v1566_v35  ;;  %v5132_v12 = vld [vmem:[%s5223_s27 + $0x38] sm:$0xff]  ;;  %v2704_v35 = vld [vmem:[%s5223_s27 + $0x10] sm:$0x8] }
 0x19f   : > { %2616 = vmatmul.bf16.gmra.mxu3 %v2428_v34  ;;  %v6016_v47 = vadd.f32 %v1347_v0, %v1041_v54  ;;  %v2435_v0 = vrot.slane %v2433_v56, 3  ;;  %v1789_v34 = vrot.slane %v5132_v12, 2  ;;  %v2141_v54 = vrot.slane %v6006_v49, 2  ;;  %v6038_v2 = vld [vmem:[%s5223_s27 + $0x50] sm:$0xff] }
 0x1a1   : > { %v1002_v51 = vpop.f32.mrf.mxu2  ;;  %v1677_v7 = vpop.f32.mrf.mxu0  ;;  %v2436_v55 = vor.u32 %v2435_v0, %v2432_v10 }
 0x1a2   : > { %v792_v20 = vpop.f32.mrf.mxu1  ;;  %v6022_v60 = vadd.f32 %v1677_v7, %v5837_v25  ;;  %v1352_v18 = vpop.f32.mrf.mxu3  ;;  %v1571_v25 = vsel %vm1419_vm2, %v1561_v27, %v1570_v40  ;;  %v2142_v7 = vsel %vm1777_vm3, %v2139_v21, %v2141_v54  ;;  %v2722_v27 = vunpack.c.l.b16 %v2704_v35 }
 0x1a3   : > { %v793_v15 = vadd.f32 %v792_v20, %v5575_v3  ;;  %v1790_v20 = vsel %vm1777_vm3, %v1787_v39, %v1789_v34  ;;  %v2726_v35 = vrot.slane %v5812_v22, 3 }
 0x1a5   : > { %v1042_v37 = vadd.f32 %v999_v48, %v793_v15 }
 0x1a7   : > { %v6026_v29 = vadd.f32 %v1349_v4, %v1042_v37  ;;  %v2437_v4 = vsel %vm2366_vm4, %v2427_v24, %v2436_v55  ;;  %v6766_v24 = vunpack.c.l.b16 %v5795_v41  ;;  %v2143_v41 = vrot.slane %v6038_v2, 2 }
 0x1a9   : > { %v1004_v30 = vpop.f32.mrf.mxu2  ;;  %v1680_v3 = vpop.f32.mrf.mxu0  ;;  %v2723_v37 = vpack.c.b16 %v6766_v24, %v2722_v27 }
 0x1aa   : > { %v795_v52 = vpop.f32.mrf.mxu1  ;;  %v6032_v48 = vadd.f32 %v1680_v3, %v5853_v19  ;;  %v1354_v56 = vpop.f32.mrf.mxu3  ;;  %v2442_v19 = vshll.u32 %v6038_v2, 16 }
 0x1ab   : > { %v796_v8 = vadd.f32 %v795_v52, %v5598_v43  ;;  %v2439_v43 = vshrl.u32 %v6038_v2, 16 }
 0x1ac   : > { %1719 = vmatmul.bf16.gmra.mxu0 %v1571_v25  ;;  %1908 = vmatmul.bf16.gmra.mxu1 %v1790_v20  ;;  %v2444_v3 = vrot.slane %v2442_v19, 3  ;;  %v4987_v25 = vld [vmem:[%s6756_s1 + $0x18] sm:$0xff]  ;;  %v5133_v20 = vld [vmem:[%s5223_s27 + $0x40] sm:$0xff] }
 0x1ad   : > { %v1043_v15 = vadd.f32 %v1002_v51, %v796_v8  ;;  %v2441_v52 = vrot.slane %v2439_v43, 2  ;;  %v1791_v8 = vrot.slane %v5133_v20, 2  ;;  %3203 = vmatpush.bf16.msrb.mxu2 %v4987_v25 }
 0x1ae   : > { %2263 = vmatmul.bf16.gmra.mxu2 %v2142_v7  ;;  %v2725_v7 = vrot.slane %v2723_v37, 3 }
 0x1af   : > { %2621 = vmatmul.bf16.gmra.mxu3 %v2437_v4  ;;  %v6040_v39 = vadd.f32 %v1352_v18, %v1043_v15  ;;  %v1792_v27 = vsel %vm1777_vm3, %v1789_v34, %v1791_v8  ;;  %v5003_v34 = vld [vmem:[%s6756_s1 + $0x98] sm:$0xff] }
 0x1b0   : > { %v2727_v43 = vsel %vm2724_vm5, %v2725_v7, %v2726_v35  ;;  %3297 = vmatpush.bf16.msrb.mxu3 %v5003_v34 }
 0x1b1   : > { %v1007_v10 = vpop.f32.mrf.mxu2  ;;  %v1682_v0 = vpop.f32.mrf.mxu0 }
 0x1b2   : > { %v797_v21 = vpop.f32.mrf.mxu1  ;;  %v6048_v40 = vadd.f32 %v1682_v0, %v5868_v53  ;;  %v1357_v12 = vpop.f32.mrf.mxu3  ;;  %v2445_v53 = vor.u32 %v2444_v3, %v2441_v52  ;;  %v2144_v0 = vsel %vm1777_vm3, %v2141_v54, %v2143_v41  ;;  %v6767_v3 = vld [vmem:[#allocation2_spill] sm:$0xff] }
 0x1b3   : > { %v798_v51 = vadd.f32 %v797_v21, %v5611_v38 }
 0x1b4   : > { %v2446_v24 = vsel %vm2366_vm4, %v2436_v55, %v2445_v53 }
 0x1b5   : > { %v1044_v18 = vadd.f32 %v1004_v30, %v798_v51 }
 0x1b7   : > { %v6056_v38 = vadd.f32 %v1354_v56, %v1044_v18  ;;  %v6067_v56 = vld [vmem:[%s5223_s27 + $0x58] sm:$0xff] }
 0x1b8   : > { %v2448_v54 = vshrl.u32 %v6067_v56, 16  ;;  %v2451_v55 = vshll.u32 %v6067_v56, 16 }
 0x1b9   : > { %v1009_v4 = vpop.f32.mrf.mxu2  ;;  %v1685_v30 = vpop.f32.mrf.mxu0 }
 0x1ba   : > { %v800_v15 = vpop.f32.mrf.mxu1  ;;  %v6062_v21 = vadd.f32 %v1685_v30, %v5892_v57  ;;  %v1359_v22 = vpop.f32.mrf.mxu3  ;;  %v2450_v7 = vrot.slane %v2448_v54, 2  ;;  %v6768_v54 = vld [vmem:[#allocation3_spill] sm:$0xff] }
 0x1bb   : > { %v801_v19 = vadd.f32 %v800_v15, %v5565_v61  ;;  %v4995_v61 = vld [vmem:[%s6756_s1 + $0x58] sm:$0xff]  ;;  %v2453_v15 = vrot.slane %v2451_v55, 3 }
 0x1bc   : > { %1913 = vmatmul.bf16.gmra.mxu1 %v1792_v27  ;;  %2830 = vmatmul.bf16.vlgmr.msra.gmra.mxu0 %v2727_v43  ;;  %v5134_v27 = vld [vmem:[%s5223_s27 + $0x48] sm:$0xff]  ;;  %v2728_v43 = vrot.slane %v5848_v6, 3 }
 0x1bd   : > { %v1045_v37 = vadd.f32 %v1007_v10, %v801_v19  ;;  %3134 = vmatpush.bf16.msrb.mxu1 %v4995_v61  ;;  %v2145_v19 = vrot.slane %v6067_v56, 2 }
 0x1be   : > { %2268 = vmatmul.bf16.gmra.mxu2 %v2144_v0 }
 0x1bf   : > { %2626 = vmatmul.bf16.gmra.mxu3 %v2446_v24  ;;  %v6075_v57 = vadd.f32 %v1357_v12, %v1045_v37  ;;  %v1793_v12 = vrot.slane %v5134_v27, 2  ;;  %v2454_v24 = vor.u32 %v2453_v15, %v2450_v7  ;;  %v2146_v6 = vsel %vm1777_vm3, %v2143_v41, %v2145_v19  ;;  %v6769_v41 = vld [vmem:[#allocation4_spill] sm:$0xff] }
 0x1c1   : > { %v1012_v10 = vpop.f32.mrf.mxu2  ;;  %v1687_v52 = vpop.f32.mrf.mxu0 }
 0x1c2   : > { %v802_v51 = vpop.f32.mrf.mxu1  ;;  %v6081_v25 = vadd.f32 %v1687_v52, %v5902_v17  ;;  %v1362_v20 = vpop.f32.mrf.mxu3  ;;  %v1794_v17 = vsel %vm1777_vm3, %v1791_v8, %v1793_v12 }
 0x1c3   : > { %v803_v18 = vadd.f32 %v802_v51, %v6767_v3  ;;  %v2729_v51 = vsel %vm2724_vm5, %v2726_v35, %v2728_v43  ;;  %v2455_v3 = vsel %vm2366_vm4, %v2445_v53, %v2454_v24 }
 0x1c5   : > { %v1046_v30 = vadd.f32 %v1009_v4, %v803_v18 }
 0x1c7   : > { %v6086_v0 = vadd.f32 %v1359_v22, %v1046_v30  ;;  %v6097_v22 = vld [vmem:[%s5223_s27 + $0x60] sm:$0xff] }
 0x1c8   : > { %v2457_v35 = vshrl.u32 %v6097_v22, 16 }
 0x1c9   : > { %v1014_v37 = vpop.f32.mrf.mxu2  ;;  %v1690_v61 = vpop.f32.mrf.mxu0 }
 0x1ca   : > { %v805_v34 = vpop.f32.mrf.mxu1  ;;  %v6092_v4 = vadd.f32 %v1690_v61, %v5917_v42  ;;  %v1364_v52 = vpop.f32.mrf.mxu3  ;;  %v2460_v42 = vshll.u32 %v6097_v22, 16 }
 0x1cb   : > { %v806_v55 = vadd.f32 %v805_v34, %v6768_v54  ;;  %v2459_v34 = vrot.slane %v2457_v35, 2 }
 0x1cc   : > { %1918 = vmatmul.bf16.gmra.mxu1 %v1794_v17  ;;  %2835 = vmatmul.bf16.gmra.mxu0 %v2729_v51  ;;  %v2462_v61 = vrot.slane %v2460_v42, 3  ;;  %v5135_v51 = vld [vmem:[%s5223_s27 + $0x50] sm:$0xff] }
 0x1cd   : > { %v1047_v18 = vadd.f32 %v1012_v10, %v806_v55  ;;  %v1795_v54 = vrot.slane %v5135_v51, 2  ;;  %v2730_v55 = vrot.slane %v5879_v58, 3 }
 0x1ce   : > { %2273 = vmatmul.bf16.gmra.mxu2 %v2146_v6  ;;  %v2147_v6 = vrot.slane %v6097_v22, 2 }
 0x1cf   : > { %2631 = vmatmul.bf16.gmra.mxu3 %v2455_v3  ;;  %v6099_v8 = vadd.f32 %v1362_v20, %v1047_v18  ;;  %v4986_v20 = vld [vmem:[%s6756_s1 + $0x10] sm:$0xff]  ;;  %v2731_v42 = vsel %vm2724_vm5, %v2728_v43, %v2730_v55 }
 0x1d0   : > { %3204 = vmatpush.bf16.msrb.mxu2 %v4986_v20  ;;  %v2148_v58 = vsel %vm1777_vm3, %v2145_v19, %v2147_v6 }
 0x1d1   : > { %v2234_v7 = vpop.f32.mrf.mxu2  ;;  %v1692_v30 = vpop.f32.mrf.mxu0 }
 0x1d2   : > { %v807_v15 = vpop.f32.mrf.mxu1  ;;  %v6105_v53 = vadd.f32 %v1692_v30, %v5930_v44  ;;  %v2592_v10 = vpop.f32.mrf.mxu3  ;;  %v2463_v44 = vor.u32 %v2462_v61, %v2459_v34 }
 0x1d3   : > { %v808_v27 = vadd.f32 %v807_v15, %v6769_v41  ;;  %v6772_v41 = vld [vmem:[#allocation5_spill] sm:$0xff] }
 0x1d4   : > { %6770 = vst [vmem:[#allocation2_spill] sm:$0xff] %v6105_v53  ;;  %v2464_v20 = vsel %vm2366_vm4, %v2454_v24, %v2463_v44 }
 0x1d5   : > { %v1048_v17 = vadd.f32 %v1014_v37, %v808_v27  ;;  %v1796_v37 = vsel %vm1777_vm3, %v1793_v12, %v1795_v54  ;;  %v5002_v12 = vld [vmem:[%s6756_s1 + $0x90] sm:$0xff] }
 0x1d6   : > { %3298 = vmatpush.bf16.msrb.mxu3 %v5002_v12 }
 0x1d7   : > { %v6113_v3 = vadd.f32 %v1364_v52, %v1048_v17  ;;  %v6124_v52 = vld [vmem:[%s5223_s27 + $0x68] sm:$0xff] }
 0x1d8   : > { %v2466_v19 = vshrl.u32 %v6124_v52, 16  ;;  %v2469_v24 = vshll.u32 %v6124_v52, 16 }
 0x1d9   : > { %v2236_v18 = vpop.f32.mrf.mxu2  ;;  %v1695_v15 = vpop.f32.mrf.mxu0 }
 0x1da   : > { %v1884_v35 = vpop.f32.mrf.mxu1  ;;  %v6118_v30 = vadd.f32 %v1695_v15, %v5954_v32  ;;  %v2594_v51 = vpop.f32.mrf.mxu3  ;;  %v4994_v32 = vld [vmem:[%s6756_s1 + $0x50] sm:$0xff] }
 0x1db   : > { %v1964_v27 = vadd.f32 %v1884_v35, %v6772_v41  ;;  %3135 = vmatpush.bf16.msrb.mxu1 %v4994_v32  ;;  %v2471_v41 = vrot.slane %v2469_v24, 3 }
 0x1dc   : > { %6771 = vst [vmem:[#allocation3_spill] sm:$0xff] %v6118_v30  ;;  %1923 = vmatmul.bf16.gmra.mxu1 %v1796_v37  ;;  %2840 = vmatmul.bf16.gmra.mxu0 %v2731_v42  ;;  %v2468_v42 = vrot.slane %v2466_v19, 2 }
 0x1dd   : > { %v2314_v34 = vadd.f32 %v2234_v7, %v1964_v27 }
 0x1de   : > { %2278 = vmatmul.bf16.gmra.mxu2 %v2148_v58  ;;  %v5136_v58 = vld [vmem:[%s5223_s27 + $0x58] sm:$0xff]  ;;  %v2472_v32 = vor.u32 %v2471_v41, %v2468_v42 }
 0x1df   : > { %2636 = vmatmul.bf16.gmra.mxu3 %v2464_v20  ;;  %v6132_v43 = vadd.f32 %v2592_v10, %v2314_v34  ;;  %v1797_v10 = vrot.slane %v5136_v58, 2  ;;  %v2732_v20 = vrot.slane %v5913_v23, 3  ;;  %v2149_v34 = vrot.slane %v6124_v52, 2 }
 0x1e1   : > { %v2239_v7 = vpop.f32.mrf.mxu2  ;;  %v1697_v61 = vpop.f32.mrf.mxu0  ;;  %v2150_v23 = vsel %vm1777_vm3, %v2147_v6, %v2149_v34 }
 0x1e2   : > { %v1886_v17 = vpop.f32.mrf.mxu1  ;;  %v6137_v15 = vadd.f32 %v1697_v61, %v5964_v1  ;;  %v2597_v37 = vpop.f32.mrf.mxu3  ;;  %v1798_v61 = vsel %vm1777_vm3, %v1795_v54, %v1797_v10 }
 0x1e3   : > { %v1965_v35 = vadd.f32 %v1886_v17, %v5834_v16  ;;  %v2733_v16 = vsel %vm2724_vm5, %v2730_v55, %v2732_v20  ;;  %v2473_v17 = vsel %vm2366_vm4, %v2463_v44, %v2472_v32 }
 0x1e5   : > { %v2315_v27 = vadd.f32 %v2236_v18, %v1965_v35 }
 0x1e7   : > { %v6143_v12 = vadd.f32 %v2594_v51, %v2315_v27  ;;  %v6154_v51 = vld [vmem:[%s5223_s27 + $0x70] sm:$0xff] }
 0x1e9   : > { %v2241_v30 = vpop.f32.mrf.mxu2  ;;  %v1700_v53 = vpop.f32.mrf.mxu0 }
 0x1ea   : > { %v1889_v1 = vpop.f32.mrf.mxu1  ;;  %v6148_v19 = vadd.f32 %v1700_v53, %v5979_v11  ;;  %v2599_v24 = vpop.f32.mrf.mxu3  ;;  %v2475_v11 = vshrl.u32 %v6154_v51, 16  ;;  %v2478_v53 = vshll.u32 %v6154_v51, 16 }
 0x1eb   : > { %v1966_v18 = vadd.f32 %v1889_v1, %v5842_v14  ;;  %v5137_v1 = vld [vmem:[%s5223_s27 + $0x60] sm:$0xff] }
 0x1ec   : > { %1928 = vmatmul.bf16.gmra.mxu1 %v1798_v61  ;;  %2845 = vmatmul.bf16.gmra.mxu0 %v2733_v16  ;;  %v2477_v41 = vrot.slane %v2475_v11, 2  ;;  %v2480_v27 = vrot.slane %v2478_v53, 3  ;;  %v1799_v61 = vrot.slane %v5137_v1, 2  ;;  %v2734_v16 = vrot.slane %v5941_v31, 3 }
 0x1ed   : > { %v2316_v35 = vadd.f32 %v2239_v7, %v1966_v18  ;;  %v2151_v18 = vrot.slane %v6154_v51, 2 }
 0x1ee   : > { %2283 = vmatmul.bf16.gmra.mxu2 %v2150_v23  ;;  %v2481_v23 = vor.u32 %v2480_v27, %v2477_v41  ;;  %v2735_v11 = vsel %vm2724_vm5, %v2732_v20, %v2734_v16 }
 0x1ef   : > { %2641 = vmatmul.bf16.gmra.mxu3 %v2473_v17  ;;  %v6156_v54 = vadd.f32 %v2597_v37, %v2316_v35  ;;  %v4985_v37 = vld [vmem:[%s6756_s1 + $0x8] sm:$0xff]  ;;  %v2152_v31 = vsel %vm1777_vm3, %v2149_v34, %v2151_v18 }
 0x1f0   : > { %3205 = vmatpush.bf16.msrb.mxu2 %v4985_v37 }
 0x1f1   : > { %v2244_v14 = vpop.f32.mrf.mxu2  ;;  %v1702_v55 = vpop.f32.mrf.mxu0 }
 0x1f2   : > { %v1891_v42 = vpop.f32.mrf.mxu1  ;;  %v6161_v6 = vadd.f32 %v1702_v55, %v5993_v59  ;;  %v2602_v7 = vpop.f32.mrf.mxu3 }
 0x1f3   : > { %v1967_v44 = vadd.f32 %v1891_v42, %v5861_v9 }
 0x1f5   : > { %v2317_v58 = vadd.f32 %v2241_v30, %v1967_v44  ;;  %v1800_v30 = vsel %vm1777_vm3, %v1797_v10, %v1799_v61  ;;  %v2482_v44 = vsel %vm2366_vm4, %v2472_v32, %v2481_v23  ;;  %v5001_v10 = vld [vmem:[%s6756_s1 + $0x88] sm:$0xff] }
 0x1f6   : > { %3299 = vmatpush.bf16.msrb.mxu3 %v5001_v10 }
 0x1f7   : > { %v6170_v59 = vadd.f32 %v2599_v24, %v2317_v58  ;;  %v6181_v24 = vld [vmem:[%s5223_s27 + $0x78] sm:$0xff] }
 0x1f8   : > { %v2484_v20 = vshrl.u32 %v6181_v24, 16  ;;  %v2487_v34 = vshll.u32 %v6181_v24, 16 }
 0x1f9   : > { %v2246_v9 = vpop.f32.mrf.mxu2  ;;  %v1705_v17 = vpop.f32.mrf.mxu0 }
 0x1fa   : > { %v1894_v35 = vpop.f32.mrf.mxu1  ;;  %v6175_v53 = vadd.f32 %v1705_v17, %v6016_v47  ;;  %v2604_v42 = vpop.f32.mrf.mxu3  ;;  %v4993_v47 = vld [vmem:[%s6756_s1 + $0x48] sm:$0xff]  ;;  %v2486_v17 = vrot.slane %v2484_v20, 2 }
 0x1fb   : > { %v1968_v55 = vadd.f32 %v1894_v35, %v5874_v28  ;;  %3136 = vmatpush.bf16.msrb.mxu1 %v4993_v47  ;;  %v2489_v35 = vrot.slane %v2487_v34, 3 }
 0x1fc   : > { %1933 = vmatmul.bf16.gmra.mxu1 %v1800_v30  ;;  %2850 = vmatmul.bf16.gmra.mxu0 %v2735_v11  ;;  %v5138_v11 = vld [vmem:[%s5223_s27 + $0x68] sm:$0xff] }
 0x1fd   : > { %v2318_v41 = vadd.f32 %v2244_v14, %v1968_v55  ;;  %v2736_v55 = vrot.slane %v5975_v33, 3 }
 0x1fe   : > { %2288 = vmatmul.bf16.gmra.mxu2 %v2152_v31  ;;  %v2153_v31 = vrot.slane %v6181_v24, 2 }
 0x1ff   : > { %2646 = vmatmul.bf16.gmra.mxu3 %v2482_v44  ;;  %v6189_v28 = vadd.f32 %v2602_v7, %v2318_v41  ;;  %v1801_v7 = vrot.slane %v5138_v11, 2  ;;  %v2490_v41 = vor.u32 %v2489_v35, %v2486_v17 }
 0x200   : > { %v2154_v33 = vsel %vm1777_vm3, %v2151_v18, %v2153_v31 }
 0x201   : > { %v2249_v32 = vpop.f32.mrf.mxu2  ;;  %v1707_v14 = vpop.f32.mrf.mxu0 }
 0x202   : > { %v1896_v27 = vpop.f32.mrf.mxu1  ;;  %v6194_v58 = vadd.f32 %v1707_v14, %v6026_v29  ;;  %v2607_v1 = vpop.f32.mrf.mxu3  ;;  %v1802_v14 = vsel %vm1777_vm3, %v1799_v61, %v1801_v7 }
 0x203   : > { %v1969_v37 = vadd.f32 %v1896_v27, %v5898_v45  ;;  %v2737_v45 = vsel %vm2724_vm5, %v2734_v16, %v2736_v55  ;;  %v2491_v27 = vsel %vm2366_vm4, %v2481_v23, %v2490_v41 }
 0x205   : > { %v2319_v30 = vadd.f32 %v2246_v9, %v1969_v37 }
 0x207   : > { %v6200_v44 = vadd.f32 %v2604_v42, %v2319_v30  ;;  %v6211_v42 = vld [vmem:[%s5223_s27 + $0x80] sm:$0xff] }
 0x208   : > { %v2496_v16 = vshll.u32 %v6211_v42, 16 }
 0x209   : > { %v2251_v10 = vpop.f32.mrf.mxu2  ;;  %v1710_v47 = vpop.f32.mrf.mxu0 }
 0x20a   : > { %v1899_v29 = vpop.f32.mrf.mxu1  ;;  %v6205_v20 = vadd.f32 %v1710_v47, %v6040_v39  ;;  %v2609_v34 = vpop.f32.mrf.mxu3  ;;  %v2493_v39 = vshrl.u32 %v6211_v42, 16  ;;  %v2498_v11 = vrot.slane %v2496_v16, 3 }
 0x20b   : > { %v1970_v9 = vadd.f32 %v1899_v29, %v5908_v63  ;;  %v5139_v29 = vld [vmem:[%s5223_s27 + $0x70] sm:$0xff] }
 0x20c   : > { %1938 = vmatmul.bf16.gmra.mxu1 %v1802_v14  ;;  %2855 = vmatmul.bf16.gmra.mxu0 %v2737_v45  ;;  %v2495_v30 = vrot.slane %v2493_v39, 2  ;;  %v1803_v14 = vrot.slane %v5139_v29, 2  ;;  %v2738_v45 = vrot.slane %v6006_v49, 3 }
 0x20d   : > { %v2320_v37 = vadd.f32 %v2249_v32, %v1970_v9  ;;  %v2155_v9 = vrot.slane %v6211_v42, 2 }
 0x20e   : > { %2293 = vmatmul.bf16.gmra.mxu2 %v2154_v33  ;;  %v2499_v33 = vor.u32 %v2498_v11, %v2495_v30  ;;  %v2739_v39 = vsel %vm2724_vm5, %v2736_v55, %v2738_v45 }
 0x20f   : > { %2651 = vmatmul.bf16.gmra.mxu3 %v2491_v27  ;;  %v6213_v61 = vadd.f32 %v2607_v1, %v2320_v37  ;;  %v4984_v1 = vld [vmem:[%s6756_s1] sm:$0xff]  ;;  %v2156_v49 = vsel %vm1777_vm3, %v2153_v31, %v2155_v9 }
 0x210   : > { %3206 = vmatpush.bf16.msrb.mxu2 %v4984_v1 }
 0x211   : > { %v2254_v63 = vpop.f32.mrf.mxu2  ;;  %v1712_v17 = vpop.f32.mrf.mxu0 }
 0x212   : > { %v1901_v35 = vpop.f32.mrf.mxu1  ;;  %v6218_v18 = vadd.f32 %v1712_v17, %v6056_v38  ;;  %v2612_v32 = vpop.f32.mrf.mxu3 }
 0x213   : > { %v1971_v23 = vadd.f32 %v1901_v35, %v5923_v36 }
 0x215   : > { %v2321_v47 = vadd.f32 %v2251_v10, %v1971_v23  ;;  %v1804_v10 = vsel %vm1777_vm3, %v1801_v7, %v1803_v14  ;;  %v2500_v23 = vsel %vm2366_vm4, %v2490_v41, %v2499_v33  ;;  %v5000_v7 = vld [vmem:[%s6756_s1 + $0x80] sm:$0xff] }
 0x216   : > { %3300 = vmatpush.bf16.msrb.mxu3 %v5000_v7 }
 0x217   : > { %v6227_v38 = vadd.f32 %v2609_v34, %v2321_v47  ;;  %v6238_v34 = vld [vmem:[%s5223_s27 + $0x88] sm:$0xff] }
 0x218   : > { %v2502_v55 = vshrl.u32 %v6238_v34, 16  ;;  %v2505_v31 = vshll.u32 %v6238_v34, 16 }
 0x219   : > { %v2256_v36 = vpop.f32.mrf.mxu2  ;;  %v1715_v27 = vpop.f32.mrf.mxu0 }
 0x21a   : > { %v1904_v37 = vpop.f32.mrf.mxu1  ;;  %v6232_v16 = vadd.f32 %v1715_v27, %v6075_v57  ;;  %v2614_v35 = vpop.f32.mrf.mxu3  ;;  %v2504_v27 = vrot.slane %v2502_v55, 2 }
 0x21b   : > { %v1972_v17 = vadd.f32 %v1904_v37, %v5936_v62  ;;  %v4992_v62 = vld [vmem:[%s6756_s1 + $0x40] sm:$0xff]  ;;  %v2507_v37 = vrot.slane %v2505_v31, 3 }
 0x21c   : > { %1943 = vmatmul.bf16.gmra.mxu1 %v1804_v10  ;;  %2860 = vmatmul.bf16.gmra.mxu0 %v2739_v39  ;;  %v5140_v39 = vld [vmem:[%s5223_s27 + $0x78] sm:$0xff] }
 0x21d   : > { %v2322_v30 = vadd.f32 %v2254_v63, %v1972_v17  ;;  %3137 = vmatpush.bf16.msrb.mxu1 %v4992_v62  ;;  %v1805_v17 = vrot.slane %v5140_v39, 2  ;;  %v6260_v7 = vor.u32 %v2507_v37, %v2504_v27  ;;  %v2028_v27 = vld [vmem:[%s5223_s27 + $0x90] sm:$0x3] }
 0x21e   : > { %2298 = vmatmul.bf16.gmra.mxu2 %v2156_v49  ;;  %v2740_v49 = vrot.slane %v6038_v2, 3 }
 0x21f   : > { %2656 = vmatmul.bf16.gmra.mxu3 %v2500_v23  ;;  %v6246_v57 = vadd.f32 %v2612_v32, %v2322_v30  ;;  %v2346_v32 = vld [vmem:[%s5223_s27 + $0x90] sm:$0x7]  ;;  %v2157_v23 = vrot.slane %v6238_v34, 2  ;;  %v1806_v55 = vsel %vm1777_vm3, %v1803_v14, %v1805_v17 }
 0x221   : > { %v2259_v41 = vpop.f32.mrf.mxu2  ;;  %v1717_v63 = vpop.f32.mrf.mxu0 }
 0x222   : > { %v1906_v11 = vpop.f32.mrf.mxu1  ;;  %v6251_v47 = vadd.f32 %v1717_v63, %v6086_v0  ;;  %v2617_v29 = vpop.f32.mrf.mxu3  ;;  %v2364_v0 = vunpack.c.l.b16 %v2346_v32 }
 0x223   : > { %v1973_v1 = vadd.f32 %v1906_v11, %v5960_v5 }
 0x224   : > { %v6274_v37 = vpack.c.b16 %v2364_v0, %v2364_v0 }
 0x225   : > { %v2323_v10 = vadd.f32 %v2256_v36, %v1973_v1  ;;  %v2741_v36 = vsel %vm2724_vm5, %v2738_v45, %v2740_v49  ;;  %v2509_v1 = vsel %vm2366_vm4, %v2499_v33, %v6260_v7 }
 0x226   : > { %v2514_v45 = vshll.u32 %v6274_v37, 16 }
 0x227   : > { %v6258_v30 = vadd.f32 %v2614_v35, %v2323_v10  ;;  %v2158_v35 = vsel %vm1777_vm3, %v2155_v9, %v2157_v23  ;;  %v5024_v9 = vld [vmem:[%s6756_s1 + $0x138] sm:$0xff] }
 0x228   : > { %3524 = vmatpush.bf16.msra.mxu2 %v5024_v9 }
 0x229   : > { %v2261_v62 = vpop.f32.mrf.mxu2  ;;  %v1720_v63 = vpop.f32.mrf.mxu0 }
 0x22a   : > { %v1909_v5 = vpop.f32.mrf.mxu1  ;;  %v6265_v31 = vadd.f32 %v1720_v63, %v6099_v8  ;;  %v2619_v2 = vpop.f32.mrf.mxu3  ;;  %v2110_v8 = vunpack.c.l.b16 %v2028_v27 }
 0x22b   : > { %v1974_v11 = vadd.f32 %v1909_v5, %v5970_v50  ;;  %v2511_v50 = vshrl.u32 %v6274_v37, 16 }
 0x22c   : > { %1948 = vmatmul.bf16.gmra.mxu1 %v1806_v55  ;;  %2865 = vmatmul.bf16.gmra.mxu0 %v2741_v36  ;;  %v2127_v5 = vpack.c.b16 %v2110_v8, %v2110_v8  ;;  %v2516_v36 = vrot.slane %v2514_v45, 3  ;;  %v6310_v45 = vld [vmem:[%s6757_s2] ss:$0 sm:$0xff] }
 0x22d   : > { %v2324_v10 = vadd.f32 %v2259_v41, %v1974_v11  ;;  %v5032_v41 = vld [vmem:[%s6756_s1 + $0x178] sm:$0xff]  ;;  %v2513_v55 = vrot.slane %v2511_v50, 2  ;;  %v5023_v11 = vld [vmem:[%s6756_s1 + $0x130] sm:$0xff] }
 0x22e   : > { %2303 = vmatmul.bf16.gmra.mxu2 %v2158_v35  ;;  %3622 = vmatpush.bf16.msra.mxu3 %v5032_v41 }
 0x22f   : > { %2661 = vmatmul.bf16.gmra.mxu3 %v2509_v1  ;;  %v6276_v14 = vadd.f32 %v2617_v29, %v2324_v10  ;;  %v6294_v1 = vld [vmem:[%s5223_s27 + $0x80] sm:$0xff]  ;;  %3525 = vmatpush.bf16.msra.mxu2 %v5023_v11  ;;  %v2159_v10 = vrot.slane %v2127_v5, 2  ;;  %v2517_v50 = vor.u32 %v2516_v36, %v2513_v55 }
 0x230   : > { %v1807_v27 = vrot.slane %v6294_v1, 2  ;;  %v5069_v1 = vld [vmem:[%s5223_s27 + $0x80] sm:$0xff]  }
 0x231   : > { %v2264_v33 = vpop.f32.mrf.mxu2  ;;  %v1722_v32 = vpop.f32.mrf.mxu0  ;;  %v2160_v11 = vsel %vm1777_vm3, %v2157_v23, %v2159_v10 }
 0x232   : > { %v1911_v39 = vpop.f32.mrf.mxu1  ;;  %v6287_v29 = vadd.f32 %v1722_v32, %v6113_v3  ;;  %v2622_v63 = vpop.f32.mrf.mxu3  ;;  %v2742_v3 = vrot.slane %v6067_v56, 3 }
 0x233   : > { %v1975_v0 = vadd.f32 %v1911_v39, %v5985_v26  ;;  %v5031_v26 = vld [vmem:[%s6756_s1 + $0x170] sm:$0xff] }
 0x234   : > { %3623 = vmatpush.bf16.msra.mxu3 %v5031_v26  ;;  %v2743_v41 = vsel %vm2724_vm5, %v2740_v49, %v2742_v3  ;;  %v5020_v26 = vld [vmem:[%s6756_s1 + $0x118] sm:$0xff] }
 0x235   : > { %v2325_v35 = vadd.f32 %v2261_v62, %v1975_v0  ;;  %v5022_v62 = vld [vmem:[%s6756_s1 + $0x128] sm:$0xff] }
 0x236   : > { %3526 = vmatpush.bf16.msra.mxu2 %v5022_v62  ;;  %v5030_v0 = vld [vmem:[%s6756_s1 + $0x168] sm:$0xff]  ;;  %v5071_v62 = vld [vmem:[%s5223_s27 + $0x80] sm:$0xe] }
 0x237   : > { %v6301_v8 = vadd.f32 %v2619_v2, %v2325_v35  ;;  %v1808_v2 = vsel %vm1777_vm3, %v1805_v17, %v1807_v27  ;;  %v2518_v17 = vsel %vm2366_vm4, %v6260_v7, %v2517_v50  ;;  %v5029_v7 = vld [vmem:[%s6756_s1 + $0x160] sm:$0xff]  ;;  %v5015_v35 = vld [vmem:[%s6756_s1 + $0xf0] sm:$0xff] }
 0x238   : > { %3624 = vmatpush.bf16.msra.mxu3 %v5030_v0  ;;  %v5070_v50 = vld [vmem:[%s5223_s27 + $0x80] sm:$0xf0] }
 0x239   : > { %v2266_v9 = vpop.f32.mrf.mxu2  ;;  %v2831_v39 = vpop.f32.mrf.mxu0 }
 0x23a   : > { %v1914_v32 = vpop.f32.mrf.mxu1  ;;  %v2911_v55 = vadd.f32 %v2831_v39, %v6132_v43  ;;  %v2624_v36 = vpop.f32.mrf.mxu3  ;;  %v5021_v43 = vld [vmem:[%s6756_s1 + $0x120] sm:$0xff] }
 0x23b   : > { %v1976_v5 = vadd.f32 %v1914_v32, %v6001_v46  ;;  %v5016_v46 = vld [vmem:[%s6756_s1 + $0xf8] sm:$0xff]  ;;  %3527 = vmatpush.bf16.msra.mxu2 %v5021_v43 }
 0x23c   : > { %v2946_v23 = vadd.f32 %v6310_v45, %v2911_v55  ;;  %1953 = vmatmul.bf16.gmra.mxu1 %v1808_v2  ;;  %2870 = vmatmul.bf16.gmra.mxu0 %v2743_v41  ;;  %v5028_v2 = vld [vmem:[%s6756_s1 + $0x158] sm:$0xff]  ;;  %v5072_v55 = vor.u32 %v5071_v62, %v5070_v50 }
 0x23d   : > { %v2326_v49 = vadd.f32 %v2264_v33, %v1976_v5  ;;  %3405 = vmatpush.bf16.msra.mxu1 %v5016_v46  ;;  %3625 = vmatpush.bf16.msra.mxu3 %v5029_v7  ;;  %v6360_v5 = vld [vmem:[%s5223_s27 + $0x88] sm:$0xff] }
 0x23e   : > { %2308 = vmatmul.bf16.gmra.mxu2 %v2160_v11  ;;  %2978 = vst [vmem:[%s6329_s30] sm:$0xff] %v2946_v23  ;;  %v5014_v11 = vld [vmem:[%s6756_s1 + $0xe8] sm:$0xff]  ;;  %v5013_v23 = vld [vmem:[%s6756_s1 + $0xe0] sm:$0xff] }
 0x23f   : > { %2666 = vmatmul.bf16.gmra.mxu3 %v2518_v17  ;;  %v6347_v33 = vadd.f32 %v2622_v63, %v2326_v49  ;;  %3528 = vmatpush.bf16.msra.mxu2 %v5020_v26  ;;  %v5019_v17 = vld [vmem:[%s6756_s1 + $0x110] sm:$0xff] }
 0x240   : > { %v5027_v49 = vld [vmem:[%s6756_s1 + $0x150] sm:$0xff] }
 0x241   : > { %v2269_v10 = vpop.f32.mrf.mxu2  ;;  %v2833_v39 = vpop.f32.mrf.mxu0  ;;  %3406 = vmatpush.bf16.msra.mxu1 %v5015_v35  ;;  %3626 = vmatpush.bf16.msra.mxu3 %v5028_v2  ;;  %v3239_v35 = vrot.slane %v6360_v5, 1 }
 0x242   : > { %v1916_v32 = vpop.f32.mrf.mxu1  ;;  %v2912_v63 = vadd.f32 %v2833_v39, %v6143_v12  ;;  %v2627_v0 = vpop.f32.mrf.mxu3  ;;  %v2744_v12 = vrot.slane %v6097_v22, 3  ;;  %v5026_v39 = vld [vmem:[%s6756_s1 + $0x148] sm:$0xff]  ;;  %v6472_v22 = vld [vmem:[%s5223_s27 + $0x90] sm:$0xff] }
 0x243   : > { %v1977_v41 = vadd.f32 %v1916_v32, %v6022_v60  ;;  %v1809_v60 = vrot.slane %v5997_v13, 2  ;;  %3529 = vmatpush.bf16.msra.mxu2 %v5019_v17  ;;  %v5018_v13 = vld [vmem:[%s6756_s1 + $0x108] sm:$0xff]  ;;  %v5025_v17 = vld [vmem:[%s6756_s1 + $0x140] sm:$0xff] }
 0x244   : > { %v2947_v43 = vadd.f32 %v6310_v45, %v2912_v63 }
 0x245   : > { %v2327_v46 = vadd.f32 %v2266_v9, %v1977_v41  ;;  %3407 = vmatpush.bf16.msra.mxu1 %v5014_v11  ;;  %v3238_v9 = vrot.slane %v5072_v55, 1  ;;  %3627 = vmatpush.bf16.msra.mxu3 %v5027_v49  ;;  %v1810_v32 = vsel %vm1777_vm3, %v1807_v27, %v1809_v60  ;;  %v5012_v27 = vld [vmem:[%s6756_s1 + $0xd8] sm:$0xff]  ;;  %v3063_v55 = vshll.u32 %v5069_v1, 16  ;;  %v3030_v11 = vld [vmem:[%s5223_s27 + $0x90] sm:$0x1] }
 0x246   : > { %2979 = vst [vmem:[%s6329_s30 + $0x8] sm:$0xff] %v2947_v43  ;;  %v3056_v43 = vunpack.c.l.b16 %v3030_v11  ;;  %v5049_v60 = vld [vmem:[%s6756_s1 + $0x1f8] sm:$0xff]  ;;  %v3061_v49 = vshrl.u32 %v5069_v1, 16 }
 0x247   : > { %v6378_v7 = vadd.f32 %v2624_v36, %v2327_v46  ;;  %v2745_v36 = vsel %vm2724_vm5, %v2742_v3, %v2744_v12  ;;  %3530 = vmatpush.bf16.msra.mxu2 %v5018_v13  ;;  %v3240_v56 = vsel %vm830_vm1, %v3238_v9, %v3239_v35  ;;  %v5017_v3 = vld [vmem:[%s6756_s1 + $0x100] sm:$0xff]  ;;  %v5011_v46 = vld [vmem:[%s6756_s1 + $0xd0] sm:$0xff] }
 0x249   : > { %v2271_v26 = vpop.f32.mrf.mxu2  ;;  %v2836_v62 = vpop.f32.mrf.mxu0  ;;  %3408 = vmatpush.bf16.msra.mxu1 %v5013_v23  ;;  %3628 = vmatpush.bf16.msra.mxu3 %v5026_v39  ;;  %v3065_v23 = vrot.slane %v3063_v55, 1 }
 0x24a   : > { %v1919_v50 = vpop.f32.mrf.mxu1  ;;  %v2913_v41 = vadd.f32 %v2836_v62, %v6156_v54  ;;  %v2629_v63 = vpop.f32.mrf.mxu3  ;;  %v3068_v62 = vshll.u32 %v6360_v5, 16 }
 0x24b   : > { %v1978_v2 = vadd.f32 %v1919_v50, %v6032_v48  ;;  %3531 = vmatpush.bf16.msra.mxu2 %v5017_v3  ;;  %v3066_v3 = vor.u32 %v3065_v23, %v3061_v49 }
 0x24c   : > { %v2948_v54 = vadd.f32 %v6310_v45, %v2913_v41  ;;  %1958 = vmatmul.bf16.gmra.mxu1 %v1810_v32  ;;  %2875 = vmatmul.bf16.gmra.mxu0 %v2745_v36  ;;  %v6429_v41 = vld [vmem:[%s5223_s27 + $0x8c] sm:$0xf] }
 0x24d   : > { %v2328_v48 = vadd.f32 %v2269_v10, %v1978_v2  ;;  %3409 = vmatpush.bf16.msra.mxu1 %v5012_v27  ;;  %3629 = vmatpush.bf16.msra.mxu3 %v5025_v17  ;;  %v3316_v2 = vld [vmem:[%s5223_s27 + $0x88] sm:$0xe]  ;;  %v5048_v27 = vld [vmem:[%s6756_s1 + $0x1f0] sm:$0xff]  ;;  %v3343_v11 = vunpack.c.l.b16 %v6429_v41  ;;  %v5041_v41 = vld [vmem:[%s6756_s1 + $0x1b8] sm:$0xff] }
 0x24e   : > { %3207 = vmatmul.bf16.vlgmr.msrb.gmra.mxu2 %v5069_v1  ;;  %2980 = vst [vmem:[%s6329_s30 + $0x10] sm:$0xff] %v2948_v54  ;;  %v6431_v1 = vpack.c.b16 %v3056_v43, %v3056_v43  ;;  %v6441_v54 = vrot.slane %v3068_v62, 1  ;;  %v3342_v55 = vunpack.c.l.b16 %v3316_v2  ;;  %v5056_v17 = vld [vmem:[%s6756_s1 + $0x230] sm:$0xff] }
 0x24f   : > { %3301 = vmatmul.bf16.vlgmr.msrb.gmra.mxu3 %v3240_v56  ;;  %v6416_v10 = vadd.f32 %v2627_v0, %v2328_v48  ;;  %3853 = vmatpush.bf16.msrb.mxu2 %v5049_v60  ;;  %v5057_v0 = vld [vmem:[%s6756_s1 + $0x238] sm:$0xff]  ;;  %v5010_v56 = vld [vmem:[%s6756_s1 + $0xc8] sm:$0xff]  ;;  %v2746_v48 = vrot.slane %v6124_v52, 3 }
 0x250   : > { %v3241_v43 = vrot.slane %v6431_v1, 1  ;;  %v5047_v60 = vld [vmem:[%s6756_s1 + $0x1e8] sm:$0xff]  ;;  %v6464_v62 = vpack.c.b16 %v3343_v11, %v3342_v55  ;;  %v5040_v55 = vld [vmem:[%s6756_s1 + $0x1b0] sm:$0xff] }
 0x251   : > { %v2274_v9 = vpop.f32.mrf.mxu2  ;;  %v2838_v50 = vpop.f32.mrf.mxu0  ;;  %3410 = vmatpush.bf16.msra.mxu1 %v5011_v46  ;;  %3951 = vmatpush.bf16.msrb.mxu3 %v5057_v0  ;;  %v5055_v0 = vld [vmem:[%s6756_s1 + $0x228] sm:$0xff] }
 0x252   : > { %v1921_v13 = vpop.f32.mrf.mxu1  ;;  %v2914_v36 = vadd.f32 %v2838_v50, %v6170_v59  ;;  %v2632_v39 = vpop.f32.mrf.mxu3  ;;  %v2747_v50 = vsel %vm2724_vm5, %v2744_v12, %v2746_v48  ;;  %v3242_v12 = vsel %vm830_vm1, %v3239_v35, %v3241_v43  ;;  %v3452_v35 = vshll.u32 %v6464_v62, 16  ;;  %v5045_v43 = vld [vmem:[%s6756_s1 + $0x1d8] sm:$0xff] }
 0x253   : > { %v1979_v32 = vadd.f32 %v1921_v13, %v6048_v40  ;;  %3854 = vmatpush.bf16.msrb.mxu2 %v5048_v27  ;;  %v3547_v27 = vld [vmem:[%s5223_s27 + $0x88] sm:$0xc] }
 0x254   : > { %v2949_v59 = vadd.f32 %v6310_v45, %v2914_v36 }
 0x255   : > { %v2329_v40 = vadd.f32 %v2271_v26, %v1979_v32  ;;  %3411 = vmatpush.bf16.msra.mxu1 %v5010_v56  ;;  %v5009_v26 = vld [vmem:[%s6756_s1 + $0xc0] sm:$0xff]  ;;  %3952 = vmatpush.bf16.msrb.mxu3 %v5056_v17 }
 0x256   : > { %2981 = vst [vmem:[%s6329_s30 + $0x18] sm:$0xff] %v2949_v59  ;;  %v5046_v56 = vld [vmem:[%s6756_s1 + $0x1e0] sm:$0xff]  ;;  %v3460_v59 = vshll.u32 %v6472_v22, 16 }
 0x257   : > { %v6451_v46 = vadd.f32 %v2629_v63, %v2329_v40  ;;  %v3071_v63 = vsel %vm371_vm0, %v3066_v3, %v6441_v54  ;;  %3855 = vmatpush.bf16.msrb.mxu2 %v5047_v60  ;;  %v3449_v3 = vshrl.u32 %v6464_v62, 16  ;;  %v5054_v40 = vld [vmem:[%s6756_s1 + $0x220] sm:$0xff] }
 0x259   : > { %v2276_v49 = vpop.f32.mrf.mxu2  ;;  %v2841_v13 = vpop.f32.mrf.mxu0  ;;  %3412 = vmatpush.bf16.msra.mxu1 %v5009_v26  ;;  %3953 = vmatpush.bf16.msrb.mxu3 %v5055_v0  ;;  %v3565_v26 = vunpack.c.l.b16 %v3547_v27  ;;  %v3451_v0 = vrot.slane %v3449_v3, 1  ;;  %v5044_v27 = vld [vmem:[%s6756_s1 + $0x1d0] sm:$0xff] }
 0x25a   : > { %v1924_v23 = vpop.f32.mrf.mxu1  ;;  %v2915_v36 = vadd.f32 %v2841_v13, %v6189_v28  ;;  %v2634_v2 = vpop.f32.mrf.mxu3 }
 0x25b   : > { %v1980_v32 = vadd.f32 %v1924_v23, %v6062_v21  ;;  %3856 = vmatpush.bf16.msrb.mxu2 %v5046_v56 }
 0x25c   : > { %v2950_v28 = vadd.f32 %v6310_v45, %v2915_v36  ;;  %2880 = vmatmul.bf16.gmra.mxu0 %v2747_v50  ;;  %3138 = vmatmul.bf16.vlgmr.msrb.gmra.mxu1 %v3071_v63  ;;  %v3072_v50 = vshrl.u32 %v6360_v5, 16  ;;  %v3076_v63 = vshll.u32 %v6431_v1, 16  ;;  %v5039_v1 = vld [vmem:[%s6756_s1 + $0x1a8] sm:$0xff] }
 0x25d   : > { %v2330_v21 = vadd.f32 %v2274_v9, %v1980_v32  ;;  %3734 = vmatpush.bf16.msrb.mxu1 %v5041_v41  ;;  %v3457_v9 = vshrl.u32 %v6472_v22, 16  ;;  %3954 = vmatpush.bf16.msrb.mxu3 %v5054_v40  ;;  %v3454_v32 = vrot.slane %v3452_v35, 2 }
 0x25e   : > { %3212 = vmatmul.bf16.gmra.mxu2 %v6360_v5  ;;  %2982 = vst [vmem:[%s6329_s30 + $0x20] sm:$0xff] %v2950_v28  ;;  %v3566_v28 = vpack.c.b16 %v3343_v11, %v3565_v26  ;;  %v3428_v5 = vld [vmem:[%s5223_s27 + $0x98] sm:$0x3]  ;;  %v3074_v35 = vor.u32 %v3072_v50, %v6441_v54  ;;  %v3078_v40 = vrot.slane %v3076_v63, 1  ;;  %v5052_v11 = vld [vmem:[%s6756_s1 + $0x210] sm:$0xff]  ;;  %v3568_v54 = vrot.slane %v6472_v22, 2 }
 0x25f   : > { %3306 = vmatmul.bf16.gmra.mxu3 %v3242_v12  ;;  %v6497_v17 = vadd.f32 %v2632_v39, %v2330_v21  ;;  %v5053_v39 = vld [vmem:[%s6756_s1 + $0x218] sm:$0xff]  ;;  %v3459_v56 = vrot.slane %v3457_v9, 1  ;;  %v3462_v21 = vrot.slane %v3460_v59, 2  ;;  %3857 = vmatpush.bf16.msrb.mxu2 %v5045_v43  ;;  %v3455_v9 = vor.u32 %v3454_v32, %v3451_v0  ;;  %v5051_v32 = vld [vmem:[%s6756_s1 + $0x208] sm:$0xff] }
 0x260   : > { %v3567_v43 = vrot.slane %v3566_v28, 2 }
 0x261   : > { %v2279_v60 = vpop.f32.mrf.mxu2  ;;  %v2843_v13 = vpop.f32.mrf.mxu0  ;;  %3735 = vmatpush.bf16.msrb.mxu1 %v5040_v55  ;;  %3955 = vmatpush.bf16.msrb.mxu3 %v5053_v39  ;;  %v6523_v59 = vor.u32 %v3462_v21, %v3459_v56  ;;  %v3446_v55 = vunpack.c.l.b16 %v3428_v5  ;;  %v5050_v5 = vld [vmem:[%s6756_s1 + $0x200] sm:$0xff] }
 0x262   : > { %v1926_v23 = vpop.f32.mrf.mxu1  ;;  %v2916_v12 = vadd.f32 %v2843_v13, %v6200_v44  ;;  %v2637_v41 = vpop.f32.mrf.mxu3  ;;  %v2748_v44 = vrot.slane %v6154_v51, 3  ;;  %v3569_v52 = vsel %vm1777_vm3, %v3567_v43, %v3568_v54  ;;  %v3320_v51 = vld [vmem:[%s5223_s27 + $0x98] sm:$0x1] }
 0x263   : > { %v1981_v36 = vadd.f32 %v1926_v23, %v6081_v25  ;;  %3858 = vmatpush.bf16.msrb.mxu2 %v5044_v27  ;;  %v5043_v23 = vld [vmem:[%s6756_s1 + $0x1c8] sm:$0xff]  ;;  %v3464_v56 = vsel %vm1419_vm2, %v3455_v9, %v6523_v59  ;;  %v3447_v21 = vpack.c.b16 %v3446_v55, %v3446_v55 }
 0x264   : > { %v2951_v25 = vadd.f32 %v6310_v45, %v2916_v12  ;;  %v2749_v0 = vsel %vm2724_vm5, %v2746_v48, %v2748_v44  ;;  %v5037_v48 = vld [vmem:[%s6756_s1 + $0x198] sm:$0xff] }
 0x265   : > { %v2331_v3 = vadd.f32 %v2276_v49, %v1981_v36  ;;  %3736 = vmatpush.bf16.msrb.mxu1 %v5039_v1  ;;  %v5038_v49 = vld [vmem:[%s6756_s1 + $0x1a0] sm:$0xff]  ;;  %3956 = vmatpush.bf16.msrb.mxu3 %v5052_v11  ;;  %v3466_v1 = vshrl.u32 %v3447_v21, 16  ;;  %v3469_v27 = vshll.u32 %v3447_v21, 16 }
 0x266   : > { %2983 = vst [vmem:[%s6329_s30 + $0x28] sm:$0xff] %v2951_v25  ;;  %v6773_v11 = vld [vmem:[#allocation2_spill] sm:$0xff] }
 0x267   : > { %v6528_v26 = vadd.f32 %v2634_v2, %v2331_v3  ;;  %v3079_v2 = vsel %vm371_vm0, %v3074_v35, %v3078_v40  ;;  %3859 = vmatpush.bf16.msrb.mxu2 %v5043_v23  ;;  %v3468_v43 = vrot.slane %v3466_v1, 1  ;;  %v3471_v23 = vrot.slane %v3469_v27, 2 }
 0x269   : > { %v2281_v13 = vpop.f32.mrf.mxu2  ;;  %v2846_v63 = vpop.f32.mrf.mxu0  ;;  %3737 = vmatpush.bf16.msrb.mxu1 %v5038_v49  ;;  %3957 = vmatpush.bf16.msrb.mxu3 %v5051_v32  ;;  %v2750_v32 = vrot.slane %v6181_v24, 3 }
 0x26a   : > { %v1929_v50 = vpop.f32.mrf.mxu1  ;;  %v2917_v36 = vadd.f32 %v2846_v63, %v6213_v61  ;;  %v2639_v12 = vpop.f32.mrf.mxu3  ;;  %v3646_v63 = vld [vmem:[%s5223_s27 + $0x94] sm:$0xf] }
 0x26b   : > { %v1982_v39 = vadd.f32 %v1929_v50, %v6092_v4  ;;  %v5042_v4 = vld [vmem:[%s6756_s1 + $0x1c0] sm:$0xff]  ;;  %v3645_v50 = vld [vmem:[%s5223_s27 + $0x90] sm:$0xc] }
 0x26c   : > { %v2952_v28 = vadd.f32 %v6310_v45, %v2917_v36  ;;  %2885 = vmatmul.bf16.gmra.mxu0 %v2749_v0  ;;  %3143 = vmatmul.bf16.gmra.mxu1 %v3079_v2  ;;  %v3351_v36 = vrot.slane %v6472_v22, 1 }
 0x26d   : > { %v2332_v61 = vadd.f32 %v2279_v60, %v1982_v39  ;;  %3738 = vmatpush.bf16.msrb.mxu1 %v5037_v48  ;;  %3860 = vmatpush.bf16.msrb.mxu2 %v5042_v4  ;;  %v5036_v60 = vld [vmem:[%s6756_s1 + $0x190] sm:$0xff]  ;;  %v3350_v39 = vrot.slane %v6464_v62, 1  ;;  %v5034_v48 = vld [vmem:[%s6756_s1 + $0x180] sm:$0xff]  ;;  %v3570_v4 = vrot.slane %v3447_v21, 2  ;;  %v2751_v62 = vsel %vm2724_vm5, %v2748_v44, %v2750_v32 }
 0x26e   : > { %3532 = vmatmul.bf16.vlgmr.msra.gmra.mxu2 %v3464_v56  ;;  %2984 = vst [vmem:[%s6329_s30 + $0x30] sm:$0xff] %v2952_v28  ;;  %3958 = vmatpush.bf16.msrb.mxu3 %v5050_v5  ;;  %v3671_v56 = vunpack.c.l.b16 %v3645_v50 }
 0x26f   : > { %3630 = vmatmul.bf16.vlgmr.msra.gmra.mxu3 %v3569_v52  ;;  %v6564_v3 = vadd.f32 %v2637_v41, %v2332_v61  ;;  %v5035_v41 = vld [vmem:[%s6756_s1 + $0x188] sm:$0xff]  ;;  %v3472_v52 = vor.u32 %v3471_v23, %v3468_v43  ;;  %v3352_v1 = vsel %vm830_vm1, %v3350_v39, %v3351_v36  ;;  %v3571_v44 = vsel %vm1777_vm3, %v3568_v54, %v3570_v4  ;;  %v3876_v43 = vld [vmem:[%s5223_s27 + $0x90] sm:$0x8] }
 0x270   : > { %v3346_v23 = vunpack.c.l.b16 %v3320_v51 }
 0x271   : > { %v2284_v25 = vpop.f32.mrf.mxu2  ;;  %v2848_v40 = vpop.f32.mrf.mxu0  ;;  %3739 = vmatpush.bf16.msrb.mxu1 %v5036_v60 }
 0x272   : > { %v1931_v35 = vpop.f32.mrf.mxu1  ;;  %v2918_v55 = vadd.f32 %v2848_v40, %v6227_v38  ;;  %v2642_v49 = vpop.f32.mrf.mxu3  ;;  %v3672_v38 = vunpack.c.l.b16 %v3646_v63  ;;  %v3473_v40 = vsel %vm1419_vm2, %v6523_v59, %v3472_v52  ;;  %v3349_v39 = vpack.c.b16 %v3346_v23, %v3346_v23 }
 0x273   : > { %v1983_v9 = vadd.f32 %v1931_v35, %v6773_v11  ;;  %v6599_v11 = vld [vmem:[%s5223_s27 + $0x98] sm:$0xff] }
 0x274   : > { %v2953_v2 = vadd.f32 %v6310_v45, %v2918_v55  ;;  %v6591_v27 = vpack.c.b16 %v3672_v38, %v3671_v56  ;;  %v3786_v59 = vshrl.u32 %v6599_v11, 16  ;;  %v3789_v63 = vshll.u32 %v6599_v11, 16 }
 0x275   : > { %v2333_v0 = vadd.f32 %v2281_v13, %v1983_v9  ;;  %3740 = vmatpush.bf16.msrb.mxu1 %v5035_v41 }
 0x276   : > { %2985 = vst [vmem:[%s6329_s30 + $0x38] sm:$0xff] %v2953_v2  ;;  %v3781_v50 = vshll.u32 %v6591_v27, 16 }
 0x277   : > { %v6581_v13 = vadd.f32 %v2639_v12, %v2333_v0  ;;  %v6774_v12 = vld [vmem:[#allocation3_spill] sm:$0xff] }
 0x278   : > { %v3783_v52 = vrot.slane %v3781_v50, 3 }
 0x279   : > { %v2286_v61 = vpop.f32.mrf.mxu2  ;;  %v2851_v5 = vpop.f32.mrf.mxu0  ;;  %3741 = vmatpush.bf16.msrb.mxu1 %v5034_v48 }
 0x27a   : > { %v1934_v28 = vpop.f32.mrf.mxu1  ;;  %v2919_v21 = vadd.f32 %v2851_v5, %v6246_v57  ;;  %v2644_v35 = vpop.f32.mrf.mxu3  ;;  %v3778_v57 = vshrl.u32 %v6591_v27, 16  ;;  %v3788_v5 = vrot.slane %v3786_v59, 2 }
 0x27b   : > { %v1984_v60 = vadd.f32 %v1934_v28, %v6774_v12  ;;  %v3757_v12 = vld [vmem:[%s5223_s27 + $0xa0] sm:$0x7] }
 0x27c   : > { %v2954_v55 = vadd.f32 %v6310_v45, %v2919_v21  ;;  %2890 = vmatmul.bf16.gmra.mxu0 %v2751_v62  ;;  %3413 = vmatmul.bf16.vlgmr.msra.gmra.mxu1 %v3352_v1  ;;  %v3780_v56 = vrot.slane %v3778_v57, 2  ;;  %v3791_v62 = vrot.slane %v3789_v63, 3  ;;  %v2752_v21 = vrot.slane %v6211_v42, 3 }
 0x27d   : > { %v2334_v9 = vadd.f32 %v2284_v25, %v1984_v60  ;;  %v3894_v25 = vunpack.c.l.b16 %v3876_v43 }
 0x27e   : > { %3537 = vmatmul.bf16.gmra.mxu2 %v3473_v40  ;;  %2986 = vst [vmem:[%s6329_s30 + $0x40] sm:$0xff] %v2954_v55  ;;  %v3353_v40 = vrot.slane %v3349_v39, 1  ;;  %v3784_v51 = vor.u32 %v3783_v52, %v3780_v56 }
 0x27f   : > { %3635 = vmatmul.bf16.gmra.mxu3 %v3571_v44  ;;  %v6611_v54 = vadd.f32 %v2642_v49, %v2334_v9  ;;  %v3895_v1 = vpack.c.b16 %v3672_v38, %v3894_v25  ;;  %v3792_v44 = vor.u32 %v3791_v62, %v3788_v5  ;;  %v3775_v9 = vunpack.c.l.b16 %v3757_v12 }
 0x280   : > { %v3354_v42 = vsel %vm830_vm1, %v3351_v36, %v3353_v40  ;;  %v2754_v62 = vrot.slane %v6238_v34, 3 }
 0x281   : > { %v2289_v41 = vpop.f32.mrf.mxu2  ;;  %v2853_v2 = vpop.f32.mrf.mxu0  ;;  %v3793_v59 = vsel %vm2366_vm4, %v3784_v51, %v3792_v44  ;;  %v3776_v63 = vpack.c.b16 %v3775_v9, %v3775_v9 }
 0x282   : > { %v1936_v0 = vpop.f32.mrf.mxu1  ;;  %v2920_v4 = vadd.f32 %v2853_v2, %v6258_v30  ;;  %v2647_v28 = vpop.f32.mrf.mxu3  ;;  %v3897_v30 = vrot.slane %v6599_v11, 3  ;;  %v2755_v51 = vsel %vm2724_vm5, %v2752_v21, %v2754_v62 }
 0x283   : > { %v1985_v48 = vadd.f32 %v1936_v0, %v6137_v15  ;;  %v3896_v15 = vrot.slane %v3895_v1, 3  ;;  %v3795_v24 = vshrl.u32 %v3776_v63, 16  ;;  %v3798_v22 = vshll.u32 %v3776_v63, 16 }
 0x284   : > { %v2955_v49 = vadd.f32 %v6310_v45, %v2920_v4  ;;  %v3679_v1 = vrot.slane %v6591_v27, 2 }
 0x285   : > { %v2335_v60 = vadd.f32 %v2286_v61, %v1985_v48  ;;  %v2753_v61 = vsel %vm2724_vm5, %v2750_v32, %v2752_v21  ;;  %v3898_v25 = vsel %vm2724_vm5, %v3896_v15, %v3897_v30  ;;  %v3797_v52 = vrot.slane %v3795_v24, 2 }
 0x286   : > { %2987 = vst [vmem:[%s6329_s30 + $0x48] sm:$0xff] %v2955_v49  ;;  %v3800_v48 = vrot.slane %v3798_v22, 3 }
 0x287   : > { %v6619_v55 = vadd.f32 %v2644_v35, %v2335_v60 }
 0x288   : > { %v3801_v12 = vor.u32 %v3800_v48, %v3797_v52 }
 0x289   : > { %v2291_v43 = vpop.f32.mrf.mxu2  ;;  %v2856_v38 = vpop.f32.mrf.mxu0 }
 0x28a   : > { %v1939_v23 = vpop.f32.mrf.mxu1  ;;  %v2921_v35 = vadd.f32 %v2856_v38, %v6276_v14  ;;  %v2649_v50 = vpop.f32.mrf.mxu3 }
 0x28b   : > { %v1986_v57 = vadd.f32 %v1939_v23, %v6148_v19 }
 0x28c   : > { %v2956_v2 = vadd.f32 %v6310_v45, %v2921_v35  ;;  %2895 = vmatmul.bf16.gmra.mxu0 %v2753_v61  ;;  %3418 = vmatmul.bf16.gmra.mxu1 %v3354_v42 }
 0x28d   : > { %v2336_v0 = vadd.f32 %v2289_v41, %v1986_v57 }
 0x28e   : > { %3861 = vmatmul.bf16.vlgmr.msrb.gmra.mxu2 %v3793_v59  ;;  %2988 = vst [vmem:[%s6329_s30 + $0x50] sm:$0xff] %v2956_v2 }
 0x28f   : > { %3959 = vmatmul.bf16.vlgmr.msrb.gmra.mxu3 %v3898_v25  ;;  %v6634_v19 = vadd.f32 %v2647_v28, %v2336_v0  ;;  %v3680_v28 = vrot.slane %v6599_v11, 2  ;;  %v3802_v11 = vsel %vm2366_vm4, %v3792_v44, %v3801_v12  ;;  %v2756_v25 = vrot.slane %v6274_v37, 3 }
 0x291   : > { %v2294_v14 = vpop.f32.mrf.mxu2  ;;  %v2858_v36 = vpop.f32.mrf.mxu0  ;;  %v3681_v9 = vsel %vm1777_vm3, %v3679_v1, %v3680_v28 }
 0x292   : > { %v1941_v32 = vpop.f32.mrf.mxu1  ;;  %v2922_v56 = vadd.f32 %v2858_v36, %v6301_v8  ;;  %v2652_v41 = vpop.f32.mrf.mxu3 }
 0x293   : > { %v1987_v39 = vadd.f32 %v1941_v32, %v6161_v6  ;;  %v3899_v6 = vrot.slane %v3776_v63, 3  ;;  %v2757_v32 = vsel %vm2724_vm5, %v2754_v62, %v2756_v25 }
 0x294   : > { %v2957_v5 = vadd.f32 %v6310_v45, %v2922_v56 }
 0x295   : > { %v2337_v4 = vadd.f32 %v2291_v43, %v1987_v39  ;;  %v3649_v43 = vld [vmem:[%s5223_s27 + $0xa0] sm:$0x3]  ;;  %v3900_v23 = vsel %vm2724_vm5, %v3897_v30, %v3899_v6 }
 0x296   : > { %2989 = vst [vmem:[%s6329_s30 + $0x58] sm:$0xff] %v2957_v5  ;;  %v3675_v21 = vunpack.c.l.b16 %v3649_v43 }
 0x297   : > { %v6643_v60 = vadd.f32 %v2649_v50, %v2337_v4 }
 0x298   : > { %v3678_v35 = vpack.c.b16 %v3675_v21, %v3675_v21 }
 0x299   : > { %v2296_v49 = vpop.f32.mrf.mxu2  ;;  %v2861_v40 = vpop.f32.mrf.mxu0 }
 0x29a   : > { %v1944_v8 = vpop.f32.mrf.mxu1  ;;  %v2923_v15 = vadd.f32 %v2861_v40, %v6347_v33  ;;  %v2654_v27 = vpop.f32.mrf.mxu3  ;;  %v3682_v0 = vrot.slane %v3678_v35, 2 }
 0x29b   : > { %v1988_v34 = vadd.f32 %v1944_v8, %v6175_v53 }
 0x29c   : > { %v2958_v61 = vadd.f32 %v6310_v45, %v2923_v15  ;;  %2900 = vmatmul.bf16.gmra.mxu0 %v2755_v51  ;;  %3742 = vmatmul.bf16.vlgmr.msrb.gmra.mxu1 %v3681_v9 }
 0x29d   : > { %v2338_v38 = vadd.f32 %v2294_v14, %v1988_v34 }
 0x29e   : > { %3866 = vmatmul.bf16.gmra.mxu2 %v3802_v11  ;;  %2990 = vst [vmem:[%s6329_s30 + $0x60] sm:$0xff] %v2958_v61 }
 0x29f   : > { %3964 = vmatmul.bf16.gmra.mxu3 %v3900_v23  ;;  %v6654_v42 = vadd.f32 %v2652_v41, %v2338_v38 }
 0x2a1   : > { %v2299_v53 = vpop.f32.mrf.mxu2  ;;  %v2863_v57 = vpop.f32.mrf.mxu0 }
 0x2a2   : > { %v1946_v33 = vpop.f32.mrf.mxu1  ;;  %v2924_v30 = vadd.f32 %v2863_v57, %v6378_v7  ;;  %v2657_v50 = vpop.f32.mrf.mxu3 }
 0x2a3   : > { %v1989_v44 = vadd.f32 %v1946_v33, %v6194_v58  ;;  %v3683_v58 = vsel %vm1777_vm3, %v3680_v28, %v3682_v0 }
 0x2a4   : > { %v2959_v63 = vadd.f32 %v6310_v45, %v2924_v30 }
 0x2a5   : > { %v2339_v59 = vadd.f32 %v2296_v49, %v1989_v44 }
 0x2a6   : > { %2991 = vst [vmem:[%s6329_s30 + $0x68] sm:$0xff] %v2959_v63 }
 0x2a7   : > { %v6661_v2 = vadd.f32 %v2654_v27, %v2339_v59 }
 0x2a9   : > { %v2301_v24 = vpop.f32.mrf.mxu2  ;;  %v2866_v14 = vpop.f32.mrf.mxu0 }
 0x2aa   : > { %v1949_v22 = vpop.f32.mrf.mxu1  ;;  %v2925_v36 = vadd.f32 %v2866_v14, %v6416_v10  ;;  %v2659_v39 = vpop.f32.mrf.mxu3 }
 0x2ab   : > { %v1990_v7 = vadd.f32 %v1949_v22, %v6205_v20 }
 0x2ac   : > { %v2960_v37 = vadd.f32 %v6310_v45, %v2925_v36  ;;  %2905 = vmatmul.bf16.gmra.mxu0 %v2757_v32  ;;  %3747 = vmatmul.bf16.gmra.mxu1 %v3683_v58 }
 0x2ad   : > { %v2340_v56 = vadd.f32 %v2299_v53, %v1990_v7 }
 0x2ae   : > { %2992 = vst [vmem:[%s6329_s30 + $0x70] sm:$0xff] %v2960_v37 }
 0x2af   : > { %v6669_v41 = vadd.f32 %v2657_v50, %v2340_v56 }
 0x2b1   : > { %v2304_v52 = vpop.f32.mrf.mxu2  ;;  %v2868_v4 = vpop.f32.mrf.mxu0 }
 0x2b2   : > { %v1951_v48 = vpop.f32.mrf.mxu1  ;;  %v2926_v20 = vadd.f32 %v2868_v4, %v6451_v46  ;;  %v2662_v62 = vpop.f32.mrf.mxu3 }
 0x2b3   : > { %v1991_v5 = vadd.f32 %v1951_v48, %v6218_v18 }
 0x2b4   : > { %v2961_v1 = vadd.f32 %v6310_v45, %v2926_v20 }
 0x2b5   : > { %v2341_v10 = vadd.f32 %v2301_v24, %v1991_v5 }
 0x2b6   : > { %2993 = vst [vmem:[%s6329_s30 + $0x78] sm:$0xff] %v2961_v1 }
 0x2b7   : > { %v6675_v28 = vadd.f32 %v2659_v39, %v2341_v10 }
 0x2b9   : > { %v2306_v12 = vpop.f32.mrf.mxu2  ;;  %v2871_v49 = vpop.f32.mrf.mxu0 }
 0x2ba   : > { %v1954_v6 = vpop.f32.mrf.mxu1  ;;  %v2927_v40 = vadd.f32 %v2871_v49, %v6497_v17  ;;  %v2664_v51 = vpop.f32.mrf.mxu3 }
 0x2bb   : > { %v1992_v8 = vadd.f32 %v1954_v6, %v6232_v16 }
 0x2bc   : > { %v2962_v18 = vadd.f32 %v6310_v45, %v2927_v40 }
 0x2bd   : > { %v2342_v9 = vadd.f32 %v2304_v52, %v1992_v8 }
 0x2be   : > { %2994 = vst [vmem:[%s6329_s30 + $0x80] sm:$0xff] %v2962_v18 }
 0x2bf   : > { %v6681_v46 = vadd.f32 %v2662_v62, %v2342_v9 }
 0x2c1   : > { %v2309_v34 = vpop.f32.mrf.mxu2  ;;  %v2873_v27 = vpop.f32.mrf.mxu0 }
 0x2c2   : > { %v1956_v15 = vpop.f32.mrf.mxu1  ;;  %v2928_v43 = vadd.f32 %v2873_v27, %v6528_v26  ;;  %v2667_v23 = vpop.f32.mrf.mxu3 }
 0x2c3   : > { %v1993_v11 = vadd.f32 %v1956_v15, %v6251_v47 }
 0x2c4   : > { %v2963_v16 = vadd.f32 %v6310_v45, %v2928_v43 }
 0x2c5   : > { %v2343_v38 = vadd.f32 %v2306_v12, %v1993_v11 }
 0x2c6   : > { %2995 = vst [vmem:[%s6329_s30 + $0x88] sm:$0xff] %v2963_v16 }
 0x2c7   : > { %v6687_v17 = vadd.f32 %v2664_v51, %v2343_v38 }
 0x2c9   : > { %v2311_v61 = vpop.f32.mrf.mxu2  ;;  %v2876_v53 = vpop.f32.mrf.mxu0 }
 0x2ca   : > { %v1959_v21 = vpop.f32.mrf.mxu1  ;;  %v2929_v57 = vadd.f32 %v2876_v53, %v6564_v3  ;;  %v2669_v35 = vpop.f32.mrf.mxu3 }
 0x2cb   : > { %v1994_v33 = vadd.f32 %v1959_v21, %v6265_v31 }
 0x2cc   : > { %v2964_v47 = vadd.f32 %v6310_v45, %v2929_v57 }
 0x2cd   : > { %v2344_v44 = vadd.f32 %v2309_v34, %v1994_v33 }
 0x2ce   : > { %2996 = vst [vmem:[%s6329_s30 + $0x90] sm:$0xff] %v2964_v47 }
 0x2cf   : > { %v6693_v26 = vadd.f32 %v2667_v23, %v2344_v44 }
 0x2d1   : > { %v3208_v30 = vpop.f32.mrf.mxu2  ;;  %v2878_v59 = vpop.f32.mrf.mxu0 }
 0x2d2   : > { %v1961_v50 = vpop.f32.mrf.mxu1  ;;  %v2930_v25 = vadd.f32 %v2878_v59, %v6581_v13  ;;  %v3302_v0 = vpop.f32.mrf.mxu3 }
 0x2d3   : > { %v1995_v63 = vadd.f32 %v1961_v50, %v6287_v29 }
 0x2d4   : > { %v2965_v31 = vadd.f32 %v6310_v45, %v2930_v25 }
 0x2d5   : > { %v2345_v24 = vadd.f32 %v2311_v61, %v1995_v63 }
 0x2d6   : > { %2997 = vst [vmem:[%s6329_s30 + $0x98] sm:$0xff] %v2965_v31 }
 0x2d7   : > { %v6699_v3 = vadd.f32 %v2669_v35, %v2345_v24 }
 0x2d9   : > { %v3210_v22 = vpop.f32.mrf.mxu2  ;;  %v2881_v14 = vpop.f32.mrf.mxu0 }
 0x2da   : > { %v3139_v32 = vpop.f32.mrf.mxu1  ;;  %v2931_v58 = vadd.f32 %v2881_v14, %v6611_v54  ;;  %v3304_v7 = vpop.f32.mrf.mxu3 }
 0x2db   : > { %v3209_v16 = vadd.f32 %v3208_v30, %v3139_v32 }
 0x2dc   : > { %v2966_v36 = vadd.f32 %v6310_v45, %v2931_v58 }
 0x2dd   : > { %v3312_v33 = vadd.f32 %v3302_v0, %v3209_v16 }
 0x2de   : > { %2998 = vst [vmem:[%s6329_s30 + $0xa0] sm:$0xff] %v2966_v36 }
 0x2e1   : > { %v3213_v29 = vpop.f32.mrf.mxu2  ;;  %v2883_v13 = vpop.f32.mrf.mxu0 }
 0x2e2   : > { %v3141_v39 = vpop.f32.mrf.mxu1  ;;  %v2932_v56 = vadd.f32 %v2883_v13, %v6619_v55  ;;  %v3307_v37 = vpop.f32.mrf.mxu3 }
 0x2e4   : > { %v2967_v52 = vadd.f32 %v6310_v45, %v2932_v56 }
 0x2e6   : > { %2999 = vst [vmem:[%s6329_s30 + $0xa8] sm:$0xff] %v2967_v52 }
 0x2e9   : > { %v6707_v48 = vpop.f32.mrf.mxu2  ;;  %v2886_v4 = vpop.f32.mrf.mxu0 }
 0x2ea   : > { %v3144_v5 = vpop.f32.mrf.mxu1  ;;  %v2933_v54 = vadd.f32 %v2886_v4, %v6634_v19  ;;  %v6710_v20 = vpop.f32.mrf.mxu3 }
 0x2eb   : > { %v3214_v0 = vadd.f32 %v3213_v29, %v3144_v5 }
 0x2ec   : > { %v2968_v62 = vadd.f32 %v6310_v45, %v2933_v54 }
 0x2ed   : > { %v3314_v13 = vadd.f32 %v3307_v37, %v3214_v0 }
 0x2ee   : > { %3000 = vst [vmem:[%s6329_s30 + $0xb0] sm:$0xff] %v2968_v62 }
 0x2f1   : > { %v3533_v10 = vpop.f32.mrf.mxu2  ;;  %v2888_v1 = vpop.f32.mrf.mxu0 }
 0x2f2   : > { %v3146_v55 = vpop.f32.mrf.mxu1  ;;  %v2934_v12 = vadd.f32 %v2888_v1, %v6643_v60  ;;  %v3631_v6 = vpop.f32.mrf.mxu3 }
 0x2f3   : > { %v3216_v54 = vadd.f32 %v6707_v48, %v3146_v55 }
 0x2f4   : > { %v2969_v49 = vadd.f32 %v6310_v45, %v2934_v12 }
 0x2f6   : > { %3001 = vst [vmem:[%s6329_s30 + $0xb8] sm:$0xff] %v2969_v49 }
 0x2f9   : > { %v3535_v8 = vpop.f32.mrf.mxu2  ;;  %v2891_v40 = vpop.f32.mrf.mxu0 }
 0x2fa   : > { %v3414_v51 = vpop.f32.mrf.mxu1  ;;  %v2935_v19 = vadd.f32 %v2891_v40, %v6654_v42  ;;  %v3633_v9 = vpop.f32.mrf.mxu3 }
 0x2fb   : > { %v3424_v57 = vadd.f32 %v3414_v51, %v3312_v33 }
 0x2fc   : > { %v2970_v18 = vadd.f32 %v6310_v45, %v2935_v19 }
 0x2fd   : > { %v3543_v50 = vadd.f32 %v3533_v10, %v3424_v57 }
 0x2fe   : > { %3002 = vst [vmem:[%s6329_s30 + $0xc0] sm:$0xff] %v2970_v18 }
 0x2ff   : > { %v3641_v24 = vadd.f32 %v3631_v6, %v3543_v50  ;;  %v3315_v6 = vadd.f32 %v6710_v20, %v3216_v54 }
 0x301   : > { %v3538_v34 = vpop.f32.mrf.mxu2  ;;  %v2893_v15 = vpop.f32.mrf.mxu0 }
 0x302   : > { %v3416_v27 = vpop.f32.mrf.mxu1  ;;  %v2936_v60 = vadd.f32 %v2893_v15, %v6661_v2  ;;  %v3636_v11 = vpop.f32.mrf.mxu3  ;;  %v3211_v2 = vadd.f32 %v3210_v22, %v3141_v39 }
 0x304   : > { %v2971_v43 = vadd.f32 %v6310_v45, %v2936_v60  ;;  %v3313_v30 = vadd.f32 %v3304_v7, %v3211_v2 }
 0x306   : > { %3003 = vst [vmem:[%s6329_s30 + $0xc8] sm:$0xff] %v2971_v43  ;;  %v3425_v25 = vadd.f32 %v3416_v27, %v3313_v30 }
 0x308   : > { %v3544_v22 = vadd.f32 %v3535_v8, %v3425_v25 }
 0x309   : > { %v2896_v23 = vpop.f32.mrf.mxu0  ;;  %v3540_v61 = vpop.f32.mrf.mxu2 }
 0x30a   : > { %v3419_v38 = vpop.f32.mrf.mxu1  ;;  %v2937_v42 = vadd.f32 %v2896_v23, %v6669_v41  ;;  %v3638_v53 = vpop.f32.mrf.mxu3  ;;  %v3642_v29 = vadd.f32 %v3633_v9, %v3544_v22 }
 0x30b   : > { %v3426_v56 = vadd.f32 %v3419_v38, %v3314_v13 }
 0x30c   : > { %v2972_v21 = vadd.f32 %v6310_v45, %v2937_v42 }
 0x30d   : > { %v3545_v1 = vadd.f32 %v3538_v34, %v3426_v56 }
 0x30e   : > { %3004 = vst [vmem:[%s6329_s30 + $0xd0] sm:$0xff] %v2972_v21 }
 0x30f   : > { %v3643_v19 = vadd.f32 %v3636_v11, %v3545_v1 }
 0x311   : > { %v2898_v35 = vpop.f32.mrf.mxu0  ;;  %v3862_v63 = vpop.f32.mrf.mxu2 }
 0x312   : > { %v3421_v44 = vpop.f32.mrf.mxu1  ;;  %v2938_v47 = vadd.f32 %v2898_v35, %v6675_v28  ;;  %v3960_v41 = vpop.f32.mrf.mxu3  ;;  %v5142_v28 = vld [vmem:[%s6757_s2] ss:$0 sm:$0xff] }
 0x313   : > { %v3427_v8 = vadd.f32 %v3421_v44, %v3315_v6 }
 0x314   : > { %v2973_v59 = vadd.f32 %v6310_v45, %v2938_v47 }
 0x315   : > { %v3546_v34 = vadd.f32 %v3540_v61, %v3427_v8 }
 0x316   : > { %3005 = vst [vmem:[%s6329_s30 + $0xd8] sm:$0xff] %v2973_v59 }
 0x317   : > { %v3644_v43 = vadd.f32 %v3638_v53, %v3546_v34 }
 0x319   : > { %v2901_v31 = vpop.f32.mrf.mxu0  ;;  %v3864_v39 = vpop.f32.mrf.mxu2 }
 0x31a   : > { %v3743_v14 = vpop.f32.mrf.mxu1  ;;  %v2939_v32 = vadd.f32 %v2901_v31, %v6681_v46  ;;  %v3962_v4 = vpop.f32.mrf.mxu3 }
 0x31b   : > { %v3753_v58 = vadd.f32 %v3743_v14, %v3641_v24 }
 0x31c   : > { %v2974_v45 = vadd.f32 %v5142_v28, %v2939_v32 }
 0x31d   : > { %v3872_v36 = vadd.f32 %v3862_v63, %v3753_v58 }
 0x31e   : > { %3006 = vst [vmem:[%s6329_s30 + $0xe0] sm:$0xff] %v2974_v45 }
 0x31f   : > { %v3970_v7 = vadd.f32 %v3960_v41, %v3872_v36 }
 0x321   : > { %v3974_v52 = vadd.f32 %v5142_v28, %v3970_v7  ;;  %v2903_v5 = vpop.f32.mrf.mxu0  ;;  %v3867_v51 = vpop.f32.mrf.mxu2 }
 0x322   : > { %v3745_v46 = vpop.f32.mrf.mxu1  ;;  %v2940_v62 = vadd.f32 %v2903_v5, %v6687_v17  ;;  %v3965_v18 = vpop.f32.mrf.mxu3 }
 0x323   : > { %3978 = vst [vmem:[%s6329_s30 + $0x100] sm:$0xff] %v3974_v52  ;;  %v3754_v10 = vadd.f32 %v3745_v46, %v3642_v29 }
 0x324   : > { %v2975_v12 = vadd.f32 %v5142_v28, %v2940_v62 }
 0x325   : > { %v3873_v37 = vadd.f32 %v3864_v39, %v3754_v10 }
 0x326   : > { %3007 = vst [vmem:[%s6329_s30 + $0xe8] sm:$0xff] %v2975_v12 }
 0x327   : > { %v3971_v49 = vadd.f32 %v3962_v4, %v3873_v37 }
 0x329   : > { %v3975_v40 = vadd.f32 %v5142_v28, %v3971_v49  ;;  %v2906_v9 = vpop.f32.mrf.mxu0  ;;  %v3869_v42 = vpop.f32.mrf.mxu2 }
 0x32a   : > { %v3748_v48 = vpop.f32.mrf.mxu1  ;;  %v2941_v55 = vadd.f32 %v2906_v9, %v6693_v26  ;;  %v3967_v33 = vpop.f32.mrf.mxu3 }
 0x32b   : > { %3979 = vst [vmem:[%s6329_s30 + $0x108] sm:$0xff] %v3975_v40  ;;  %v3755_v17 = vadd.f32 %v3748_v48, %v3643_v19 }
 0x32c   : > { %v2976_v15 = vadd.f32 %v5142_v28, %v2941_v55 }
 0x32d   : > { %v3874_v27 = vadd.f32 %v3867_v51, %v3755_v17 }
 0x32e   : > { %3008 = vst [vmem:[%s6329_s30 + $0xf0] sm:$0xff] %v2976_v15 }
 0x32f   : > { %v3972_v20 = vadd.f32 %v3965_v18, %v3874_v27 }
 0x331   : > { %v3976_v60 = vadd.f32 %v5142_v28, %v3972_v20  ;;  %v2908_v23 = vpop.f32.mrf.mxu0 }
 0x332   : > { %v3750_v38 = vpop.f32.mrf.mxu1  ;;  %v2942_v11 = vadd.f32 %v2908_v23, %v6699_v3 }
 0x333   : > { %3980 = vst [vmem:[%s6329_s30 + $0x110] sm:$0xff] %v3976_v60  ;;  %v3756_v16 = vadd.f32 %v3750_v38, %v3644_v43 }
 0x334   : > { %v2977_v21 = vadd.f32 %v5142_v28, %v2942_v11 }
 0x335   : > { %v3875_v26 = vadd.f32 %v3869_v42, %v3756_v16 }
 0x336   : > { %3009 = vst [vmem:[%s6329_s30 + $0xf8] sm:$0xff] %v2977_v21 }
 0x337   : > { %v3973_v61 = vadd.f32 %v3967_v33, %v3875_v26 }
 0x339   : > { %v3977_v57 = vadd.f32 %v5142_v28, %v3973_v61 }
 0x33b   : > { %3981 = vst [vmem:[%s6329_s30 + $0x118] sm:$0xff] %v3977_v57 }
 0x33c PF: > { %s13_s14 = sadd.s32 1, %s5165_s14   ;;  %s6775_s12 = smov %s5161_s13 }
 0x33d   : > { %p10_p5 = scmp.ge.s32.totalorder %s13_s14, 4   ;;  %s6776_s13 = smov %s6778_s15 }
 0x33f   :  { %12 = sbr.rel (!%p10_p5) target bundleno = 2 (0x2), region = 68 }

// kernel: fwd.4
= control target key start
LH: loop header
LB: loop body
LE: loop exit
PB: predicated region body
PF: predicated region fallthrough
CT: control target
= control target key end

     0   :  { %s5366_s12 = smov 0   ;;  %s5368_s13 = smov 0   ;;  %s6929_s0 = inlined_call_operand.vmem [shape: bf16[2,326,128], index: 0, kind: input, shape index: {}]   ;;  %s6930_s1 = inlined_call_operand.vmem [shape: bf16[1152,128], index: 1, kind: input, shape index: {}]   ;;  %s6931_s2 = inlined_call_operand.vmem [shape: f32[1,128], index: 2, kind: input, shape index: {}]   ;;  %s6932_s3 = inlined_call_operand.vmem [shape: bf16[2,288,128], index: 3, kind: output, shape index: {}]  }
   0x1   :  { %s5370_s14 = smov 0  }
   0x2 LB: > { %s25_s15 = sadd.s32 1, %s5340_s13  ;;  %p4165_p0 = scmp.ge.s32.totalorder %s5344_s14, 1  ;;  %s5344_s14 = sphi %s5370_s14, %s13_s14   ;;  %s5340_s13 = sphi %s5368_s13, %s6952_s13   ;;  %s5336_s12 = sphi %s5366_s12, %s6951_s12  }
   0x3   : > { %p27_p1 = scmp.ge.s32.totalorder %s25_s15, 2  ;;  %p168_p2 = scmp.lt.s32.totalorder %s5344_s14, 3 }
   0x5   : > { %s6954_s15 = smov (%p27_p1, %s25_s15), 0  ;;  %p169_p3 = pnand %p4165_p0, %p168_p2 }
   0x7   : > { %172 = sbr.rel (%p169_p3) target bundleno = 832 (0x340), region = 32 }
   0xc   : > { %v4968_v0 = vld [vmem:[%s6930_s1 + $0x78] sm:$0xff]  ;;  %p202_p4 = scmp.lt.s32.totalorder %s5336_s12, 1  ;;  %v4967_v1 = vld [vmem:[%s6930_s1 + $0x70] sm:$0xff]  ;;  %v4966_v2 = vld [vmem:[%s6930_s1 + $0x68] sm:$0xff]  ;;  %vm371_vm0 = vsmask.f32 7424 }
   0xd   : > { %568 = vmatpush.bf16.msra.mxu0 %v4968_v0  ;;  %5252 = vmatpush.bf16.msra.mxu1 %v4968_v0  ;;  %v4965_v3 = vld [vmem:[%s6930_s1 + $0x60] sm:$0xff]  ;;  %v4964_v4 = vld [vmem:[%s6930_s1 + $0x58] sm:$0xff]  ;;  %v4963_v10 = vld [vmem:[%s6930_s1 + $0x50] sm:$0xff]  ;;  %vm830_vm1 = vcmask 1046528   ;;  %vm1419_vm2 = vsmask.f32 6400 }
   0xe   : > { %5253 = vmatpush.bf16.msra.mxu2 %v4968_v0  ;;  %5254 = vmatpush.bf16.msra.mxu3 %v4968_v0  ;;  %s6956_s12 = smov (!%p202_p4, %s5336_s12), 1  ;;  %v4962_v20 = vld [vmem:[%s6930_s1 + $0x48] sm:$0xff]  ;;  %v4961_v31 = vld [vmem:[%s6930_s1 + $0x40] sm:$0xff]  ;;  %v4960_v36 = vld [vmem:[%s6930_s1 + $0x38] sm:$0xff]  ;;  %vm1777_vm3 = vcmask 1045504   ;;  %vm2724_vm5 = vcmask 1044480  }
   0xf   : > { %s5276_s22 = smul.u32 164, %s6956_s12  ;;  %v5007_v39 = vld [vmem:[%s6930_s1 + $0x138] sm:$0xff]  ;;  %v4959_v49 = vld [vmem:[%s6930_s1 + $0x30] sm:$0xff]  ;;  %v4958_v56 = vld [vmem:[%s6930_s1 + $0x28] sm:$0xff]  ;;  %vm2366_vm4 = vsmask.f32 5376 }
  0x10   : > { %v4999_v45 = vld [vmem:[%s6930_s1 + $0xf8] sm:$0xff]  ;;  %v5006_v51 = vld [vmem:[%s6930_s1 + $0x130] sm:$0xff]  ;;  %v5005_v58 = vld [vmem:[%s6930_s1 + $0x128] sm:$0xff]  ;;  %s5277_s17 = smul.u32 144, %s6956_s12 }
  0x11   : > { %569 = vmatpush.bf16.msra.mxu0 %v4967_v1  ;;  %5255 = vmatpush.bf16.msra.mxu1 %v4967_v1  ;;  %s5402_s27 = scalar_lea.vmem %s6929_s0, %s5276_s22  ;;  %v4976_v47 = vld [vmem:[%s6930_s1 + $0xb8] sm:$0xff]  ;;  %v4998_v52 = vld [vmem:[%s6930_s1 + $0xf0] sm:$0xff]  ;;  %v4997_v59 = vld [vmem:[%s6930_s1 + $0xe8] sm:$0xff] }
  0x12   : > { %5256 = vmatpush.bf16.msra.mxu2 %v4967_v1  ;;  %5257 = vmatpush.bf16.msra.mxu3 %v4967_v1  ;;  %v5408_v5 = vld [vmem:[%s5402_s27 + $0x48] sm:$0xff]  ;;  %v5411_v6 = vld [vmem:[%s5402_s27] sm:$0xff]   ;;  %v5417_v8 = vld [vmem:[%s5402_s27 + $0x70] sm:$0xff]  ;;  %s6544_s25 = scalar_lea.vmem %s6932_s3, %s5277_s17 }
  0x13   : > { %v5414_v7 = vld [vmem:[%s5402_s27 + $0x60] sm:$0xff]  ;;  %v5420_v9 = vld [vmem:[%s5402_s27 + $0x8] sm:$0xff]  ;;  %v375_v11 = vshll.u32 %v5411_v6, 16  ;;  %v5427_v12 = vld [vmem:[%s5402_s27 + $0x50] sm:$0xff]  ;;  %v444_v13 = vshll.u32 %v5408_v5, 16  ;;  %v484_v17 = vshll.u32 %v5417_v8, 16 }
  0x14   : > { %v5431_v14 = vld [vmem:[%s5402_s27 + $0x68] sm:$0xff]  ;;  %v468_v15 = vshll.u32 %v5414_v7, 16  ;;  %v5435_v16 = vld [vmem:[%s5402_s27 + $0x78] sm:$0xff]  ;;  %v373_v18 = vshrl.u32 %v5411_v6, 16  ;;  %v380_v19 = vshll.u32 %v5420_v9, 16  ;;  %v448_v23 = vshrl.u32 %v5408_v5, 16 }
  0x15   : > { %570 = vmatpush.bf16.msra.mxu0 %v4966_v2  ;;  %5258 = vmatpush.bf16.msra.mxu1 %v4966_v2  ;;  %v377_v21 = vrot.slane %v375_v11, 1  ;;  %v5443_v22 = vrot.slane %v444_v13, 1  ;;  %v452_v24 = vshll.u32 %v5427_v12, 16  ;;  %v472_v26 = vshrl.u32 %v5414_v7, 16  ;;  %v271_v42 = vld [vmem:[%s5402_s27 + $0x80] sm:$0x1] }
  0x16   : > { %5259 = vmatpush.bf16.msra.mxu2 %v4966_v2  ;;  %5260 = vmatpush.bf16.msra.mxu3 %v4966_v2  ;;  %v5447_v25 = vrot.slane %v468_v15, 1  ;;  %v476_v27 = vshll.u32 %v5431_v14, 16  ;;  %v5451_v28 = vrot.slane %v484_v17, 1  ;;  %v488_v29 = vshrl.u32 %v5417_v8, 16  ;;  %v5488_v53 = vld [vmem:[%s5402_s27 + $0x10] sm:$0xff]  ;;  %v5491_v54 = vld [vmem:[%s5402_s27 + $0x58] sm:$0xff] }
  0x17   : > { %v492_v30 = vshll.u32 %v5435_v16, 16  ;;  %v378_v32 = vor.u32 %v377_v21, %v373_v18  ;;  %v382_v33 = vrot.slane %v380_v19, 1  ;;  %v450_v34 = vor.u32 %v448_v23, %v5443_v22  ;;  %v4975_v55 = vld [vmem:[%s6930_s1 + $0xb0] sm:$0xff]  ;;  %v4974_v0 = vld [vmem:[%s6930_s1 + $0xa8] sm:$0xff]  ;;  %v4957_v2 = vld [vmem:[%s6930_s1 + $0x20] sm:$0xff] }
  0x18   : > { %v454_v35 = vrot.slane %v452_v24, 1  ;;  %v474_v37 = vor.u32 %v472_v26, %v5447_v25  ;;  %v478_v38 = vrot.slane %v476_v27, 1  ;;  %v490_v40 = vor.u32 %v488_v29, %v5451_v28  ;;  %v4996_v17 = vld [vmem:[%s6930_s1 + $0xe0] sm:$0xff]  ;;  %v4956_v21 = vld [vmem:[%s6930_s1 + $0x18] sm:$0xff] }
  0x19   : > { %571 = vmatpush.bf16.msra.mxu0 %v4965_v3  ;;  %5261 = vmatpush.bf16.msra.mxu1 %v4965_v3  ;;  %v494_v41 = vrot.slane %v492_v30, 1  ;;  %v383_v43 = vsel %vm371_vm0, %v378_v32, %v382_v33  ;;  %v353_v50 = vunpack.c.l.b16 %v271_v42  ;;  %v384_v60 = vshrl.u32 %v5420_v9, 16  ;;  %v4973_v18 = vld [vmem:[%s6930_s1 + $0xa0] sm:$0xff]  ;;  %v4995_v26 = vld [vmem:[%s6930_s1 + $0xd8] sm:$0xff]  ;;  %v1049_v32 = vld [vmem:[%s5402_s27 + $0x8] sm:$0xe] }
  0x1a   : > { %5262 = vmatpush.bf16.msra.mxu2 %v4965_v3  ;;  %5263 = vmatpush.bf16.msra.mxu3 %v4965_v3  ;;  %v455_v44 = vsel %vm371_vm0, %v450_v34, %v454_v35  ;;  %v479_v46 = vsel %vm371_vm0, %v474_v37, %v478_v38  ;;  %v388_v61 = vshll.u32 %v5488_v53, 16  ;;  %v456_v62 = vshrl.u32 %v5427_v12, 16  ;;  %v4972_v29 = vld [vmem:[%s6930_s1 + $0x98] sm:$0xff]  ;;  %v4954_v37 = vld [vmem:[%s6930_s1 + $0x8] sm:$0xff] }
  0x1b   : > { %v495_v48 = vsel %vm371_vm0, %v490_v40, %v494_v41  ;;  %v5499_v57 = vpack.c.b16 %v353_v50, %v353_v50  ;;  %v460_v63 = vshll.u32 %v5491_v54, 16  ;;  %v480_v1 = vshrl.u32 %v5431_v14, 16  ;;  %v5551_v34 = vld [vmem:[%s5402_s27 + $0x18] sm:$0xff]  ;;  %v4993_v42 = vld [vmem:[%s6930_s1 + $0xc8] sm:$0xff]  ;;  %v4953_v50 = vld [vmem:[%s6930_s1] sm:$0xff] }
  0x1c   : > { %v496_v3 = vshrl.u32 %v5435_v16, 16  ;;  %v390_v11 = vrot.slane %v388_v61, 1  ;;  %v458_v13 = vor.u32 %v456_v62, %v454_v35  ;;  %v4971_v35 = vld [vmem:[%s6930_s1 + $0x90] sm:$0xff]  ;;  %v1131_v40 = vunpack.c.l.b16 %v1049_v32  ;;  %v5046_v62 = vld [vmem:[%s6930_s1 + $0x1f8] sm:$0xff] }
  0x1d   : > { %572 = vmatpush.bf16.msra.mxu0 %v4964_v4  ;;  %5264 = vmatpush.bf16.msra.mxu1 %v4964_v4  ;;  %v462_v15 = vrot.slane %v460_v63, 1  ;;  %v482_v19 = vor.u32 %v480_v1, %v478_v38  ;;  %v5228_v38 = vld [vmem:[%s5402_s27] sm:$0xf0]  ;;  %v832_v61 = vrot.slane %v5420_v9, 1  ;;  %v5038_v1 = vld [vmem:[%s6930_s1 + $0x1b8] sm:$0xff] }
  0x1e   : > { %5265 = vmatpush.bf16.msra.mxu2 %v4964_v4  ;;  %5266 = vmatpush.bf16.msra.mxu3 %v4964_v4  ;;  %v500_v4 = vshll.u32 %v5499_v57, 16  ;;  %v498_v16 = vor.u32 %v496_v3, %v494_v41 }
  0x1f   : > { %v463_v24 = vsel %vm371_vm0, %v458_v13, %v462_v15  ;;  %v487_v27 = vsel %vm371_vm0, %v482_v19, %v5451_v28  ;;  %v4994_v28 = vld [vmem:[%s6930_s1 + $0xd0] sm:$0xff]  ;;  %v5003_v13 = vld [vmem:[%s6930_s1 + $0x118] sm:$0xff] }
  0x20   : > { %v5622_v19 = vld [vmem:[%s5402_s27 + $0x18] sm:$0xff] }
  0x21   : > { %573 = vmatpush.bf16.msra.mxu0 %v4963_v10  ;;  %5267 = vmatpush.bf16.msra.mxu1 %v4963_v10 }
  0x22   : > { %5268 = vmatpush.bf16.msra.mxu2 %v4963_v10  ;;  %5269 = vmatpush.bf16.msra.mxu3 %v4963_v10  ;;  %v386_v10 = vor.u32 %v384_v60, %v382_v33  ;;  %v5545_v33 = vld [vmem:[%s5402_s27 + $0xc] sm:$0xf] }
  0x23   : > { %v6933_v41 = vunpack.c.l.b16 %v5545_v33 }
  0x24   : > { %v391_v23 = vsel %vm371_vm0, %v386_v10, %v390_v11 }
  0x25   : > { %574 = vmatpush.bf16.msra.mxu0 %v4962_v20  ;;  %5270 = vmatpush.bf16.msra.mxu1 %v4962_v20 }
  0x26   : > { %5271 = vmatpush.bf16.msra.mxu2 %v4962_v20  ;;  %5272 = vmatpush.bf16.msra.mxu3 %v4962_v20  ;;  %v502_v20 = vrot.slane %v500_v4, 1 }
  0x28   : > { %v503_v30 = vsel %vm371_vm0, %v498_v16, %v502_v20 }
  0x29   : > { %575 = vmatpush.bf16.msra.mxu0 %v4961_v31  ;;  %5273 = vmatpush.bf16.msra.mxu1 %v4961_v31 }
  0x2a   : > { %5274 = vmatpush.bf16.msra.mxu2 %v4961_v31  ;;  %5275 = vmatpush.bf16.msra.mxu3 %v4961_v31  ;;  %v4955_v31 = vld [vmem:[%s6930_s1 + $0x10] sm:$0xff] }
  0x2c   : > { %576 = vmatmul.bf16.vlgmr.msra.gmra.mxu0 %v383_v43  ;;  %621 = vmatmul.bf16.vlgmr.msra.gmra.mxu1 %v455_v44  ;;  %v392_v43 = vshrl.u32 %v5488_v53, 16  ;;  %v396_v44 = vshll.u32 %v5551_v34, 16 }
  0x2d   : > { %721 = vmatpush.bf16.msrb.mxu1 %v4960_v36  ;;  %1636 = vmatpush.bf16.msrb.mxu0 %v5007_v39  ;;  %v5004_v36 = vld [vmem:[%s6930_s1 + $0x120] sm:$0xff] }
  0x2e   : > { %636 = vmatmul.bf16.vlgmr.msra.gmra.mxu2 %v479_v46  ;;  %1278 = vmatpush.bf16.msrb.mxu3 %v4999_v45  ;;  %v5229_v39 = vld [vmem:[%s5402_s27] sm:$0xe]  ;;  %v464_v45 = vshrl.u32 %v5491_v54, 16  ;;  %v4970_v46 = vld [vmem:[%s6930_s1 + $0x88] sm:$0xff] }
  0x2f   : > { %928 = vmatpush.bf16.msrb.mxu2 %v4976_v47  ;;  %646 = vmatmul.bf16.vlgmr.msra.gmra.mxu3 %v495_v48  ;;  %v5230_v47 = vor.u32 %v5229_v39, %v5228_v38  ;;  %v5575_v48 = vld [vmem:[%s5402_s27 + $0x10] sm:$0xff] }
  0x31   : > { %722 = vmatpush.bf16.msrb.mxu1 %v4959_v49  ;;  %1637 = vmatpush.bf16.msrb.mxu0 %v5006_v51  ;;  %v5579_v49 = vpack.c.b16 %v6933_v41, %v1131_v40  ;;  %v5015_v51 = vld [vmem:[%s6930_s1 + $0x178] sm:$0xff]  ;;  %v831_v60 = vrot.slane %v5230_v47, 1  ;;  %v5974_v41 = vld [vmem:[%s5402_s27 + $0x14] sm:$0xf] }
  0x32   : > { %1279 = vmatpush.bf16.msrb.mxu3 %v4998_v52  ;;  %v394_v52 = vor.u32 %v392_v43, %v390_v11  ;;  %v5608_v11 = vld [vmem:[%s5402_s27 + $0x20] sm:$0xff]  ;;  %v5651_v43 = vld [vmem:[%s5402_s27 + $0x30] sm:$0xff] }
  0x33   : > { %929 = vmatpush.bf16.msrb.mxu2 %v4975_v55  ;;  %v398_v55 = vrot.slane %v396_v44, 1  ;;  %v1181_v63 = vrot.slane %v5579_v49, 1  ;;  %v833_v4 = vsel %vm830_vm1, %v831_v60, %v832_v61  ;;  %v408_v32 = vshrl.u32 %v5608_v11, 16  ;;  %v5036_v44 = vld [vmem:[%s6930_s1 + $0x1a8] sm:$0xff] }
  0x34   : > { %v420_v47 = vshll.u32 %v5651_v43, 16  ;;  %v5001_v60 = vld [vmem:[%s6930_s1 + $0x108] sm:$0xff] }
  0x35   : > { %723 = vmatpush.bf16.msrb.mxu1 %v4958_v56  ;;  %1638 = vmatpush.bf16.msrb.mxu0 %v5005_v58  ;;  %v466_v56 = vor.u32 %v464_v45, %v462_v15  ;;  %v4992_v58 = vld [vmem:[%s6930_s1 + $0xc0] sm:$0xff]  ;;  %v5045_v15 = vld [vmem:[%s6930_s1 + $0x1f0] sm:$0xff]  ;;  %v5044_v45 = vld [vmem:[%s6930_s1 + $0x1e8] sm:$0xff] }
  0x36   : > { %1280 = vmatpush.bf16.msrb.mxu3 %v4997_v59  ;;  %v4969_v59 = vld [vmem:[%s6930_s1 + $0x80] sm:$0xff] }
  0x37   : > { %930 = vmatpush.bf16.msrb.mxu2 %v4974_v0  ;;  %v1182_v0 = vrot.slane %v5575_v48, 1  ;;  %v471_v3 = vsel %vm371_vm0, %v466_v56, %v5447_v25  ;;  %v5037_v25 = vld [vmem:[%s6930_s1 + $0x1b0] sm:$0xff] }
  0x39   : > { %724 = vmatpush.bf16.msrb.mxu1 %v4957_v2  ;;  %1639 = vmatpush.bf16.msrb.mxu0 %v5004_v36  ;;  %v399_v2 = vsel %vm371_vm0, %v394_v52, %v398_v55  ;;  %v1183_v10 = vsel %vm830_vm1, %v1181_v63, %v1182_v0  ;;  %v838_v52 = vrot.slane %v5608_v11, 1  ;;  %v424_v63 = vshrl.u32 %v5651_v43, 16 }
  0x3a   : > { %1281 = vmatpush.bf16.msrb.mxu3 %v4996_v17  ;;  %v400_v17 = vshrl.u32 %v5551_v34, 16 }
  0x3b   : > { %931 = vmatpush.bf16.msrb.mxu2 %v4973_v18  ;;  %v404_v18 = vshll.u32 %v5608_v11, 16 }
  0x3c   : > { %581 = vmatmul.bf16.gmra.mxu0 %v391_v23  ;;  %626 = vmatmul.bf16.gmra.mxu1 %v463_v24  ;;  %v402_v16 = vor.u32 %v400_v17, %v398_v55  ;;  %v1184_v23 = vrot.slane %v5622_v19, 1  ;;  %v5694_v17 = vld [vmem:[%s5402_s27 + $0x40] sm:$0xff] }
  0x3d   : > { %725 = vmatpush.bf16.msrb.mxu1 %v4956_v21  ;;  %1640 = vmatpush.bf16.msrb.mxu0 %v5003_v13  ;;  %v406_v20 = vrot.slane %v404_v18, 1  ;;  %v834_v21 = vrot.slane %v5488_v53, 1 }
  0x3e   : > { %641 = vmatmul.bf16.gmra.mxu2 %v487_v27  ;;  %1282 = vmatpush.bf16.msrb.mxu3 %v4995_v26  ;;  %v1185_v27 = vsel %vm830_vm1, %v1182_v0, %v1184_v23 }
  0x3f   : > { %932 = vmatpush.bf16.msrb.mxu2 %v4972_v29  ;;  %651 = vmatmul.bf16.gmra.mxu3 %v503_v30  ;;  %v407_v24 = vsel %vm371_vm0, %v402_v16, %v406_v20  ;;  %v835_v26 = vsel %vm830_vm1, %v832_v61, %v834_v21  ;;  %v5014_v29 = vld [vmem:[%s6930_s1 + $0x170] sm:$0xff]  ;;  %v5634_v30 = vld [vmem:[%s5402_s27 + $0x28] sm:$0xff]  ;;  %v436_v16 = vshll.u32 %v5694_v17, 16 }
  0x40   : > { %v5013_v61 = vld [vmem:[%s6930_s1 + $0x168] sm:$0xff] }
  0x41   : > { %726 = vmatpush.bf16.msrb.mxu1 %v4955_v31  ;;  %v5002_v31 = vld [vmem:[%s6930_s1 + $0x110] sm:$0xff] }
  0x42   : > { %1283 = vmatpush.bf16.msrb.mxu3 %v4994_v28  ;;  %1641 = vmatpush.bf16.msrb.mxu0 %v5002_v31  ;;  %v412_v28 = vshll.u32 %v5634_v30, 16 }
  0x43   : > { %933 = vmatpush.bf16.msrb.mxu2 %v4971_v35  ;;  %v410_v35 = vor.u32 %v408_v32, %v406_v20  ;;  %v5035_v20 = vld [vmem:[%s6930_s1 + $0x1a0] sm:$0xff] }
  0x44   : > { %v414_v36 = vrot.slane %v412_v28, 1  ;;  %v5012_v28 = vld [vmem:[%s6930_s1 + $0x160] sm:$0xff] }
  0x45   : > { %727 = vmatpush.bf16.msrb.mxu1 %v4954_v37  ;;  %v836_v37 = vrot.slane %v5551_v34, 1 }
  0x46   : > { %1284 = vmatpush.bf16.msrb.mxu3 %v4993_v42  ;;  %v415_v39 = vsel %vm371_vm0, %v410_v35, %v414_v36  ;;  %1642 = vmatpush.bf16.msrb.mxu0 %v5001_v60  ;;  %v5054_v35 = vld [vmem:[%s6930_s1 + $0x238] sm:$0xff] }
  0x47   : > { %934 = vmatpush.bf16.msrb.mxu2 %v4970_v46  ;;  %v837_v40 = vsel %vm830_vm1, %v834_v21, %v836_v37  ;;  %v416_v46 = vshrl.u32 %v5634_v30, 16  ;;  %v5702_v21 = vld [vmem:[%s5402_s27 + $0x38] sm:$0xff] }
  0x49   : > { %728 = vmatpush.bf16.msrb.mxu1 %v4953_v50  ;;  %v418_v50 = vor.u32 %v416_v46, %v414_v36  ;;  %v440_v36 = vshrl.u32 %v5694_v17, 16 }
  0x4a   : > { %1285 = vmatpush.bf16.msrb.mxu3 %v4992_v58  ;;  %v839_v58 = vsel %vm830_vm1, %v836_v37, %v838_v52  ;;  %v5721_v37 = vld [vmem:[%s5402_s27 + $0x40] sm:$0xff] }
  0x4b   : > { %935 = vmatpush.bf16.msrb.mxu2 %v4969_v59 }
  0x4c   : > { %586 = vmatmul.bf16.gmra.mxu0 %v399_v2  ;;  %631 = vmatmul.bf16.gmra.mxu1 %v471_v3  ;;  %v840_v3 = vrot.slane %v5634_v30, 1 }
  0x4d   : > { %1875 = vmatpush.bf16.msra.mxu1 %v5015_v51  ;;  %v422_v51 = vrot.slane %v420_v47, 1  ;;  %v1421_v47 = vshrl.u32 %v5579_v49, 16 }
  0x4e   : > { %2583 = vmatpush.bf16.msra.mxu3 %v5046_v62  ;;  %936 = vmatmul.bf16.vlgmr.msrb.gmra.mxu2 %v833_v4  ;;  %v5677_v62 = vld [vmem:[%s5402_s27 + $0x38] sm:$0xff]  ;;  %v841_v13 = vsel %vm830_vm1, %v838_v52, %v840_v3  ;;  %v1432_v52 = vshll.u32 %v5575_v48, 16 }
  0x4f   : > { %2225 = vmatpush.bf16.msra.mxu2 %v5038_v1  ;;  %1286 = vmatmul.bf16.vlgmr.msrb.gmra.mxu3 %v1183_v10  ;;  %v423_v56 = vsel %vm371_vm0, %v418_v50, %v422_v51  ;;  %v428_v0 = vshll.u32 %v5677_v62, 16  ;;  %v426_v1 = vor.u32 %v424_v63, %v422_v51  ;;  %v432_v18 = vshrl.u32 %v5677_v62, 16  ;;  %v5750_v63 = vld [vmem:[%s5402_s27 + $0x48] sm:$0xff] }
  0x50   : > { %v1424_v50 = vshll.u32 %v5579_v49, 16  ;;  %v1429_v51 = vshrl.u32 %v5575_v48, 16  ;;  %v1434_v60 = vrot.slane %v1432_v52, 2  ;;  %v5034_v49 = vld [vmem:[%s6930_s1 + $0x198] sm:$0xff] }
  0x51   : > { %1876 = vmatpush.bf16.msra.mxu1 %v5014_v29  ;;  %v430_v2 = vrot.slane %v428_v0, 1  ;;  %v5043_v29 = vld [vmem:[%s6930_s1 + $0x1e0] sm:$0xff] }
  0x52   : > { %2584 = vmatpush.bf16.msra.mxu3 %v5045_v15  ;;  %v5000_v15 = vld [vmem:[%s6930_s1 + $0x100] sm:$0xff] }
  0x53   : > { %2226 = vmatpush.bf16.msra.mxu2 %v5037_v25  ;;  %v431_v10 = vsel %vm371_vm0, %v426_v1, %v430_v2  ;;  %1643 = vmatpush.bf16.msrb.mxu0 %v5000_v15  ;;  %v846_v1 = vrot.slane %v5694_v17, 1 }
  0x55   : > { %1877 = vmatpush.bf16.msra.mxu1 %v5013_v61 }
  0x56   : > { %2585 = vmatpush.bf16.msra.mxu3 %v5044_v45 }
  0x57   : > { %2227 = vmatpush.bf16.msra.mxu2 %v5036_v44  ;;  %2822 = vmatpush.bf16.msra.mxu0 %v5054_v35  ;;  %v848_v35 = vrot.slane %v5408_v5, 1 }
  0x59   : > { %1878 = vmatpush.bf16.msra.mxu1 %v5012_v28  ;;  %v5786_v28 = vld [vmem:[%s5402_s27 + $0x50] sm:$0xff] }
  0x5a   : > { %2586 = vmatpush.bf16.msra.mxu3 %v5043_v29 }
  0x5b   : > { %2228 = vmatpush.bf16.msra.mxu2 %v5035_v20  ;;  %v5011_v20 = vld [vmem:[%s6930_s1 + $0x158] sm:$0xff] }
  0x5c   : > { %591 = vmatmul.bf16.gmra.mxu0 %v407_v24  ;;  %729 = vmatmul.bf16.vlgmr.msrb.gmra.mxu1 %v5411_v6  ;;  %v5642_v6 = vld [vmem:[%s5402_s27 + $0x20] sm:$0xff]  ;;  %v842_v24 = vrot.slane %v5651_v43, 1 }
  0x5d   : > { %v1186_v38 = vrot.slane %v5642_v6, 1  ;;  %1879 = vmatpush.bf16.msra.mxu1 %v5011_v20 }
  0x5e   : > { %941 = vmatmul.bf16.gmra.mxu2 %v835_v26  ;;  %v1192_v26 = vrot.slane %v5702_v21, 1  ;;  %v843_v31 = vsel %vm830_vm1, %v840_v3, %v842_v24 }
  0x5f   : > { %1291 = vmatmul.bf16.gmra.mxu3 %v1185_v27  ;;  %v1187_v42 = vsel %vm830_vm1, %v1184_v23, %v1186_v38  ;;  %v438_v23 = vrot.slane %v436_v16, 1  ;;  %2229 = vmatpush.bf16.msra.mxu2 %v5034_v49  ;;  %v5042_v16 = vld [vmem:[%s6930_s1 + $0x1d8] sm:$0xff] }
  0x60   : > { %2587 = vmatpush.bf16.msra.mxu3 %v5042_v16 }
  0x6c   : > { %596 = vmatmul.bf16.gmra.mxu0 %v415_v39  ;;  %734 = vmatmul.bf16.gmra.mxu1 %v5420_v9  ;;  %v5662_v9 = vld [vmem:[%s5402_s27 + $0x28] sm:$0xff]  ;;  %v844_v39 = vrot.slane %v5677_v62, 1 }
  0x6d   : > { %v1188_v55 = vrot.slane %v5662_v9, 1 }
  0x6e   : > { %946 = vmatmul.bf16.gmra.mxu2 %v837_v40  ;;  %v845_v45 = vsel %vm830_vm1, %v842_v24, %v844_v39  ;;  %v847_v15 = vsel %vm830_vm1, %v844_v39, %v846_v1  ;;  %v5053_v24 = vld [vmem:[%s6930_s1 + $0x230] sm:$0xff] }
  0x6f   : > { %1296 = vmatmul.bf16.gmra.mxu3 %v1187_v42  ;;  %v1189_v59 = vsel %vm830_vm1, %v1186_v38, %v1188_v55  ;;  %v442_v38 = vor.u32 %v440_v36, %v438_v23  ;;  %2823 = vmatpush.bf16.msra.mxu0 %v5053_v24  ;;  %v1198_v36 = vrot.slane %v5786_v28, 1 }
  0x71   : > { %v447_v44 = vsel %vm371_vm0, %v442_v38, %v5443_v22 }
  0x7c   : > { %601 = vmatmul.bf16.gmra.mxu0 %v423_v56  ;;  %739 = vmatmul.bf16.gmra.mxu1 %v5488_v53  ;;  %v5682_v53 = vld [vmem:[%s5402_s27 + $0x30] sm:$0xff] }
  0x7d   : > { %v1190_v4 = vrot.slane %v5682_v53, 1 }
  0x7e   : > { %951 = vmatmul.bf16.gmra.mxu2 %v839_v58  ;;  %v1423_v58 = vrot.slane %v1421_v47, 1 }
  0x7f   : > { %1301 = vmatmul.bf16.gmra.mxu3 %v1189_v59  ;;  %v1191_v25 = vsel %vm830_vm1, %v1188_v55, %v1190_v4  ;;  %v1193_v32 = vsel %vm830_vm1, %v1190_v4, %v1192_v26  ;;  %v1426_v59 = vrot.slane %v1424_v50, 2  ;;  %v1447_v50 = vshrl.u32 %v5642_v6, 16 }
  0x81   : > { %v1427_v48 = vor.u32 %v1426_v59, %v1423_v58 }
  0x8c   : > { %606 = vmatmul.bf16.gmra.mxu0 %v431_v10  ;;  %744 = vmatmul.bf16.gmra.mxu1 %v5551_v34  ;;  %v434_v34 = vor.u32 %v432_v18, %v430_v2  ;;  %v1196_v2 = vrot.slane %v5750_v63, 1 }
  0x8e   : > { %956 = vmatmul.bf16.gmra.mxu2 %v841_v13  ;;  %v439_v27 = vsel %vm371_vm0, %v434_v34, %v438_v23  ;;  %v1438_v34 = vshrl.u32 %v5622_v19, 16  ;;  %v1441_v23 = vshll.u32 %v5622_v19, 16  ;;  %v1199_v47 = vsel %vm830_vm1, %v1196_v2, %v1198_v36 }
  0x8f   : > { %1306 = vmatmul.bf16.gmra.mxu3 %v1191_v25 }
  0x90   : > { %v1440_v29 = vrot.slane %v1438_v34, 1 }
  0x9c   : > { %611 = vmatmul.bf16.gmra.mxu0 %v439_v27  ;;  %749 = vmatmul.bf16.gmra.mxu1 %v5608_v11  ;;  %v1194_v11 = vrot.slane %v5721_v37, 1 }
  0x9e   : > { %961 = vmatmul.bf16.gmra.mxu2 %v843_v31  ;;  %v1195_v46 = vsel %vm830_vm1, %v1192_v26, %v1194_v11  ;;  %v1197_v18 = vsel %vm830_vm1, %v1194_v11, %v1196_v2  ;;  %v1443_v31 = vrot.slane %v1441_v23, 2 }
  0x9f   : > { %1311 = vmatmul.bf16.gmra.mxu3 %v1193_v32 }
  0xa0   : > { %v1444_v19 = vor.u32 %v1443_v31, %v1440_v29  ;;  %v5041_v29 = vld [vmem:[%s6930_s1 + $0x1d0] sm:$0xff] }
  0xa1   : > { %v5010_v31 = vld [vmem:[%s6930_s1 + $0x150] sm:$0xff]  ;;  %2588 = vmatpush.bf16.msra.mxu3 %v5041_v29 }
  0xa2   : > { %1880 = vmatpush.bf16.msra.mxu1 %v5010_v31 }
  0xa9   : > { %v5725_v40 = vpop.f32.mrf.mxu0  ;;  %v5727_v42 = vpop.f32.mrf.mxu1 }
  0xac   : > { %616 = vmatmul.bf16.gmra.mxu0 %v447_v44  ;;  %754 = vmatmul.bf16.gmra.mxu1 %v5634_v30  ;;  %v1431_v30 = vrot.slane %v1429_v51, 1  ;;  %v1450_v51 = vshll.u32 %v5642_v6, 16 }
  0xae   : > { %966 = vmatmul.bf16.gmra.mxu2 %v845_v45  ;;  %v1435_v0 = vor.u32 %v1434_v60, %v1431_v30  ;;  %v1449_v30 = vrot.slane %v1447_v50, 1  ;;  %v1452_v60 = vrot.slane %v1450_v51, 2 }
  0xaf   : > { %1316 = vmatmul.bf16.gmra.mxu3 %v1195_v46  ;;  %v849_v46 = vsel %vm830_vm1, %v846_v1, %v848_v35  ;;  %v850_v1 = vrot.slane %v5427_v12, 1 }
  0xb0   : > { %v1436_v13 = vsel %vm1419_vm2, %v1427_v48, %v1435_v0  ;;  %v1445_v44 = vsel %vm1419_vm2, %v1435_v0, %v1444_v19  ;;  %v5809_v48 = vld [vmem:[%s5402_s27 + $0x58] sm:$0xff]  ;;  %v1453_v0 = vor.u32 %v1452_v60, %v1449_v30 }
  0xb1   : > { %v5738_v55 = vpop.f32.mrf.mxu2  ;;  %v5740_v22 = vpop.f32.mrf.mxu0  ;;  %v1200_v6 = vrot.slane %v5809_v48, 1  ;;  %v851_v34 = vsel %vm830_vm1, %v848_v35, %v850_v1  ;;  %v5052_v35 = vld [vmem:[%s6930_s1 + $0x228] sm:$0xff] }
  0xb2   : > { %v5742_v56 = vpop.f32.mrf.mxu1  ;;  %v5744_v61 = vpop.f32.mrf.mxu3  ;;  %2824 = vmatpush.bf16.msra.mxu0 %v5052_v35 }
  0xb3   : > { %v1201_v23 = vsel %vm830_vm1, %v1198_v36, %v1200_v6 }
  0xb9   : > { %v5754_v3 = vpop.f32.mrf.mxu2  ;;  %v5756_v4 = vpop.f32.mrf.mxu0 }
  0xba   : > { %v5758_v10 = vpop.f32.mrf.mxu1  ;;  %v5761_v25 = vpop.f32.mrf.mxu3 }
  0xbb   : > { %6935 = vst [vmem:[#allocation2_spill] sm:$0xff] %v5761_v25 }
  0xbc   : > { %759 = vmatmul.bf16.gmra.mxu1 %v5651_v43  ;;  %1644 = vmatmul.bf16.vlgmr.msrb.gmra.mxu0 %v1436_v13 }
  0xbe   : > { %971 = vmatmul.bf16.gmra.mxu2 %v847_v15 }
  0xbf   : > { %1321 = vmatmul.bf16.gmra.mxu3 %v1197_v18  ;;  %v1454_v18 = vsel %vm1419_vm2, %v1444_v19, %v1453_v0  ;;  %v1459_v19 = vshll.u32 %v5662_v9, 16 }
  0xc1   : > { %v5777_v43 = vpop.f32.mrf.mxu2  ;;  %v5779_v26 = vpop.f32.mrf.mxu0  ;;  %v1461_v50 = vrot.slane %v1459_v19, 2 }
  0xc2   : > { %v5781_v27 = vpop.f32.mrf.mxu1  ;;  %v5783_v32 = vpop.f32.mrf.mxu3 }
  0xc3   : > { %6936 = vst [vmem:[#allocation3_spill] sm:$0xff] %v5783_v32 }
  0xc9   : > { %v5790_v38 = vpop.f32.mrf.mxu2  ;;  %v5792_v39 = vpop.f32.mrf.mxu0 }
  0xca   : > { %v5794_v11 = vpop.f32.mrf.mxu1  ;;  %v5797_v45 = vpop.f32.mrf.mxu3 }
  0xcb   : > { %6937 = vst [vmem:[#allocation4_spill] sm:$0xff] %v5797_v45 }
  0xcc   : > { %764 = vmatmul.bf16.gmra.mxu1 %v5677_v62  ;;  %1649 = vmatmul.bf16.gmra.mxu0 %v1445_v44  ;;  %v5033_v62 = vld [vmem:[%s6930_s1 + $0x190] sm:$0xff] }
  0xcd   : > { %2230 = vmatpush.bf16.msra.mxu2 %v5033_v62  ;;  %v852_v62 = vrot.slane %v5491_v54, 1 }
  0xce   : > { %976 = vmatmul.bf16.gmra.mxu2 %v849_v46 }
  0xcf   : > { %1326 = vmatmul.bf16.gmra.mxu3 %v1199_v47  ;;  %v853_v29 = vsel %vm830_vm1, %v850_v1, %v852_v62 }
  0xd1   : > { %v937_v52 = vpop.f32.mrf.mxu2  ;;  %v5804_v58 = vpop.f32.mrf.mxu0 }
  0xd2   : > { %v5806_v59 = vpop.f32.mrf.mxu1  ;;  %v1287_v49 = vpop.f32.mrf.mxu3 }
  0xd9   : > { %v939_v2 = vpop.f32.mrf.mxu2  ;;  %v5816_v13 = vpop.f32.mrf.mxu0 }
  0xda   : > { %v730_v15 = vpop.f32.mrf.mxu1  ;;  %v1289_v20 = vpop.f32.mrf.mxu3 }
  0xdb   : > { %v731_v16 = vadd.f32 %v730_v15, %v5725_v40  ;;  %v1456_v40 = vshrl.u32 %v5662_v9, 16  ;;  %v5840_v9 = vld [vmem:[%s5402_s27 + $0x60] sm:$0xff] }
  0xdc   : > { %769 = vmatmul.bf16.gmra.mxu1 %v5694_v17  ;;  %1654 = vmatmul.bf16.gmra.mxu0 %v1454_v18 }
  0xdd   : > { %v1017_v24 = vadd.f32 %v937_v52, %v731_v16  ;;  %v1458_v47 = vrot.slane %v1456_v40, 1  ;;  %v1468_v40 = vshll.u32 %v5682_v53, 16 }
  0xde   : > { %981 = vmatmul.bf16.gmra.mxu2 %v851_v34 }
  0xdf   : > { %1331 = vmatmul.bf16.gmra.mxu3 %v1201_v23  ;;  %v5834_v17 = vadd.f32 %v1287_v49, %v1017_v24  ;;  %v1462_v60 = vor.u32 %v1461_v50, %v1458_v47  ;;  %v1202_v49 = vrot.slane %v5840_v9, 1  ;;  %v5861_v47 = vld [vmem:[%s5402_s27 + $0x68] sm:$0xff] }
  0xe0   : > { %v5032_v50 = vld [vmem:[%s6930_s1 + $0x188] sm:$0xff] }
  0xe1   : > { %v942_v36 = vpop.f32.mrf.mxu2  ;;  %v5836_v44 = vpop.f32.mrf.mxu0  ;;  %v1463_v23 = vsel %vm1419_vm2, %v1453_v0, %v1462_v60  ;;  %2231 = vmatpush.bf16.msra.mxu2 %v5032_v50 }
  0xe2   : > { %v732_v46 = vpop.f32.mrf.mxu1  ;;  %v1292_v52 = vpop.f32.mrf.mxu3 }
  0xe3   : > { %v733_v51 = vadd.f32 %v732_v46, %v5740_v22  ;;  %v1470_v46 = vrot.slane %v1468_v40, 2  ;;  %v5009_v40 = vld [vmem:[%s6930_s1 + $0x148] sm:$0xff] }
  0xe4   : > { %1881 = vmatpush.bf16.msra.mxu1 %v5009_v40 }
  0xe5   : > { %v1018_v30 = vadd.f32 %v939_v2, %v733_v51  ;;  %v1203_v2 = vsel %vm830_vm1, %v1200_v6, %v1202_v49  ;;  %v854_v51 = vrot.slane %v5414_v7, 1 }
  0xe7   : > { %v5843_v15 = vadd.f32 %v1289_v20, %v1018_v30  ;;  %v1465_v20 = vshrl.u32 %v5682_v53, 16  ;;  %v1204_v30 = vrot.slane %v5861_v47, 1 }
  0xe9   : > { %v944_v18 = vpop.f32.mrf.mxu2  ;;  %v5846_v16 = vpop.f32.mrf.mxu0  ;;  %v1467_v1 = vrot.slane %v1465_v20, 1 }
  0xea   : > { %v735_v34 = vpop.f32.mrf.mxu1  ;;  %v1294_v22 = vpop.f32.mrf.mxu3 }
  0xeb   : > { %v736_v24 = vadd.f32 %v735_v34, %v5756_v4  ;;  %v1471_v53 = vor.u32 %v1470_v46, %v1467_v1 }
  0xec   : > { %774 = vmatmul.bf16.gmra.mxu1 %v5408_v5  ;;  %1659 = vmatmul.bf16.gmra.mxu0 %v1463_v23 }
  0xed   : > { %v1019_v31 = vadd.f32 %v942_v36, %v736_v24  ;;  %v1472_v24 = vsel %vm1419_vm2, %v1462_v60, %v1471_v53  ;;  %v1477_v60 = vshll.u32 %v5702_v21, 16 }
  0xee   : > { %986 = vmatmul.bf16.gmra.mxu2 %v853_v29 }
  0xef   : > { %1336 = vmatmul.bf16.gmra.mxu3 %v1203_v2  ;;  %v5855_v19 = vadd.f32 %v1292_v52, %v1019_v31  ;;  %v855_v2 = vsel %vm830_vm1, %v852_v62, %v854_v51  ;;  %v1205_v31 = vsel %vm830_vm1, %v1202_v49, %v1204_v30  ;;  %v5051_v62 = vld [vmem:[%s6930_s1 + $0x220] sm:$0xff]  ;;  %v1479_v46 = vrot.slane %v1477_v60, 2 }
  0xf0   : > { %2825 = vmatpush.bf16.msra.mxu0 %v5051_v62 }
  0xf1   : > { %v947_v0 = vpop.f32.mrf.mxu2  ;;  %v5857_v4 = vpop.f32.mrf.mxu0 }
  0xf2   : > { %v737_v35 = vpop.f32.mrf.mxu1  ;;  %v1297_v36 = vpop.f32.mrf.mxu3 }
  0xf3   : > { %v738_v6 = vadd.f32 %v737_v35, %v5779_v26 }
  0xf5   : > { %v1020_v5 = vadd.f32 %v944_v18, %v738_v6 }
  0xf7   : > { %v5867_v52 = vadd.f32 %v1294_v22, %v1020_v5  ;;  %v5040_v22 = vld [vmem:[%s6930_s1 + $0x1c8] sm:$0xff] }
  0xf8   : > { %2589 = vmatpush.bf16.msra.mxu3 %v5040_v22 }
  0xf9   : > { %v949_v34 = vpop.f32.mrf.mxu2  ;;  %v5870_v23 = vpop.f32.mrf.mxu0 }
  0xfa   : > { %v740_v26 = vpop.f32.mrf.mxu1  ;;  %v1299_v29 = vpop.f32.mrf.mxu3 }
  0xfb   : > { %v741_v18 = vadd.f32 %v740_v26, %v5792_v39  ;;  %v1474_v39 = vshrl.u32 %v5702_v21, 16  ;;  %v5894_v21 = vld [vmem:[%s5402_s27 + $0x70] sm:$0xff] }
  0xfc   : > { %779 = vmatmul.bf16.gmra.mxu1 %v5427_v12  ;;  %1664 = vmatmul.bf16.gmra.mxu0 %v1472_v24  ;;  %v856_v24 = vrot.slane %v5431_v14, 1  ;;  %v1483_v14 = vshrl.u32 %v5721_v37, 16 }
  0xfd   : > { %v1021_v20 = vadd.f32 %v947_v0, %v741_v18  ;;  %v1476_v1 = vrot.slane %v1474_v39, 1 }
  0xfe   : > { %991 = vmatmul.bf16.gmra.mxu2 %v855_v2  ;;  %v857_v39 = vsel %vm830_vm1, %v854_v51, %v856_v24  ;;  %v1485_v51 = vrot.slane %v1483_v14, 1 }
  0xff   : > { %1341 = vmatmul.bf16.gmra.mxu3 %v1205_v31  ;;  %v5888_v12 = vadd.f32 %v1297_v36, %v1021_v20  ;;  %v1480_v26 = vor.u32 %v1479_v46, %v1476_v1  ;;  %v1206_v36 = vrot.slane %v5894_v21, 1  ;;  %v5915_v46 = vld [vmem:[%s5402_s27 + $0x78] sm:$0xff] }
 0x101   : > { %v952_v49 = vpop.f32.mrf.mxu2  ;;  %v5890_v0 = vpop.f32.mrf.mxu0  ;;  %v1481_v22 = vsel %vm1419_vm2, %v1471_v53, %v1480_v26 }
 0x102   : > { %v742_v35 = vpop.f32.mrf.mxu1  ;;  %v1302_v5 = vpop.f32.mrf.mxu3 }
 0x103   : > { %v743_v6 = vadd.f32 %v742_v35, %v5804_v58 }
 0x105   : > { %v1022_v50 = vadd.f32 %v949_v34, %v743_v6  ;;  %v1207_v34 = vsel %vm830_vm1, %v1204_v30, %v1206_v36  ;;  %v5031_v6 = vld [vmem:[%s6930_s1 + $0x180] sm:$0xff] }
 0x106   : > { %2232 = vmatpush.bf16.msra.mxu2 %v5031_v6 }
 0x107   : > { %v5897_v18 = vadd.f32 %v1299_v29, %v1022_v50  ;;  %v1486_v29 = vshll.u32 %v5721_v37, 16 }
 0x109   : > { %v954_v2 = vpop.f32.mrf.mxu2  ;;  %v5900_v31 = vpop.f32.mrf.mxu0  ;;  %v1488_v1 = vrot.slane %v1486_v29, 2 }
 0x10a   : > { %v745_v20 = vpop.f32.mrf.mxu1  ;;  %v1304_v58 = vpop.f32.mrf.mxu3 }
 0x10b   : > { %v746_v40 = vadd.f32 %v745_v20, %v5816_v13  ;;  %v1489_v37 = vor.u32 %v1488_v1, %v1485_v51  ;;  %v1208_v20 = vrot.slane %v5915_v46, 1 }
 0x10c   : > { %784 = vmatmul.bf16.gmra.mxu1 %v5491_v54  ;;  %1669 = vmatmul.bf16.gmra.mxu0 %v1481_v22 }
 0x10d   : > { %v1023_v60 = vadd.f32 %v952_v49, %v746_v40  ;;  %v1209_v14 = vsel %vm830_vm1, %v1206_v36, %v1208_v20 }
 0x10e   : > { %996 = vmatmul.bf16.gmra.mxu2 %v857_v39  ;;  %v1490_v39 = vsel %vm1419_vm2, %v1480_v26, %v1489_v37  ;;  %v1495_v26 = vshll.u32 %v5750_v63, 16 }
 0x10f   : > { %1346 = vmatmul.bf16.gmra.mxu3 %v1207_v34  ;;  %v5909_v62 = vadd.f32 %v1302_v5, %v1023_v60  ;;  %v858_v5 = vrot.slane %v5417_v8, 1  ;;  %v5039_v8 = vld [vmem:[%s6930_s1 + $0x1c0] sm:$0xff] }
 0x110   : > { %2590 = vmatpush.bf16.msra.mxu3 %v5039_v8  ;;  %v1497_v1 = vrot.slane %v1495_v26, 2 }
 0x111   : > { %v957_v53 = vpop.f32.mrf.mxu2  ;;  %v5911_v13 = vpop.f32.mrf.mxu0  ;;  %v859_v60 = vsel %vm830_vm1, %v856_v24, %v858_v5  ;;  %v5050_v24 = vld [vmem:[%s6930_s1 + $0x218] sm:$0xff] }
 0x112   : > { %v747_v35 = vpop.f32.mrf.mxu1  ;;  %v1307_v49 = vpop.f32.mrf.mxu3  ;;  %2826 = vmatpush.bf16.msra.mxu0 %v5050_v24 }
 0x113   : > { %v748_v30 = vadd.f32 %v747_v35, %v5836_v44 }
 0x115   : > { %v1024_v54 = vadd.f32 %v954_v2, %v748_v30 }
 0x117   : > { %v5921_v50 = vadd.f32 %v1304_v58, %v1024_v54  ;;  %v5008_v58 = vld [vmem:[%s6930_s1 + $0x140] sm:$0xff] }
 0x118   : > { %1882 = vmatpush.bf16.msra.mxu1 %v5008_v58  ;;  %v5948_v54 = vld [vmem:[%s5402_s27 + $0x80] sm:$0xff] }
 0x119   : > { %v959_v22 = vpop.f32.mrf.mxu2  ;;  %v5924_v40 = vpop.f32.mrf.mxu0 }
 0x11a   : > { %v750_v44 = vpop.f32.mrf.mxu1  ;;  %v1309_v34 = vpop.f32.mrf.mxu3 }
 0x11b   : > { %v751_v2 = vadd.f32 %v750_v44, %v5846_v16  ;;  %v1492_v16 = vshrl.u32 %v5750_v63, 16 }
 0x11c   : > { %789 = vmatmul.bf16.gmra.mxu1 %v5414_v7  ;;  %1674 = vmatmul.bf16.gmra.mxu0 %v1490_v39  ;;  %v5951_v39 = vld [vmem:[%s5402_s27 + $0x78] sm:$0xff] }
 0x11d   : > { %v1025_v29 = vadd.f32 %v957_v53, %v751_v2  ;;  %v1494_v51 = vrot.slane %v1492_v16, 1 }
 0x11e   : > { %1001 = vmatmul.bf16.gmra.mxu2 %v859_v60  ;;  %v1210_v60 = vrot.slane %v5948_v54, 1 }
 0x11f   : > { %1351 = vmatmul.bf16.gmra.mxu3 %v1209_v14  ;;  %v5942_v7 = vadd.f32 %v1307_v49, %v1025_v29  ;;  %v1498_v44 = vor.u32 %v1497_v1, %v1494_v51  ;;  %v860_v49 = vrot.slane %v5951_v39, 1  ;;  %v1501_v51 = vshrl.u32 %v5786_v28, 16 }
 0x120   : > { %v1211_v26 = vsel %vm830_vm1, %v1208_v20, %v1210_v60  ;;  %v1504_v1 = vshll.u32 %v5786_v28, 16  ;;  %v5063_v28 = vld [vmem:[%s6930_s1 + $0x38] sm:$0xff] }
 0x121   : > { %v962_v36 = vpop.f32.mrf.mxu2  ;;  %v5944_v53 = vpop.f32.mrf.mxu0  ;;  %3263 = vmatpush.bf16.msrb.mxu2 %v5063_v28  ;;  %v5305_v28 = vld [vmem:[%s5402_s27 + $0x70] sm:$0xff] }
 0x122   : > { %v752_v35 = vpop.f32.mrf.mxu1  ;;  %v1312_v63 = vpop.f32.mrf.mxu3 }
 0x123   : > { %v753_v30 = vadd.f32 %v752_v35, %v5857_v4  ;;  %v1499_v4 = vsel %vm1419_vm2, %v1489_v37, %v1498_v44  ;;  %v5304_v35 = vld [vmem:[%s5402_s27 + $0x68] sm:$0xff] }
 0x125   : > { %v1026_v6 = vadd.f32 %v959_v22, %v753_v30  ;;  %v861_v22 = vsel %vm830_vm1, %v858_v5, %v860_v49 }
 0x127   : > { %v5954_v2 = vadd.f32 %v1309_v34, %v1026_v6  ;;  %v1081_v34 = vld [vmem:[%s5402_s27 + $0x88] sm:$0x1]  ;;  %v1506_v6 = vrot.slane %v1504_v1, 2 }
 0x129   : > { %v964_v14 = vpop.f32.mrf.mxu2  ;;  %v5957_v29 = vpop.f32.mrf.mxu0 }
 0x12a   : > { %v755_v8 = vpop.f32.mrf.mxu1  ;;  %v1314_v16 = vpop.f32.mrf.mxu3 }
 0x12b   : > { %v756_v58 = vadd.f32 %v755_v8, %v5870_v23  ;;  %v1163_v23 = vunpack.c.l.b16 %v1081_v34 }
 0x12c   : > { %794 = vmatmul.bf16.gmra.mxu1 %v5304_v35  ;;  %1679 = vmatmul.bf16.gmra.mxu0 %v1499_v4  ;;  %v1996_v35 = vld [vmem:[%s5402_s27 + $0x10] sm:$0xc] }
 0x12d   : > { %v1027_v24 = vadd.f32 %v962_v36, %v756_v58  ;;  %v1503_v36 = vrot.slane %v1501_v51, 1  ;;  %v1180_v58 = vpack.c.b16 %v1163_v23, %v1163_v23  ;;  %v6934_v51 = vunpack.c.l.b16 %v5974_v41 }
 0x12e   : > { %1006 = vmatmul.bf16.gmra.mxu2 %v861_v22 }
 0x12f   : > { %1356 = vmatmul.bf16.gmra.mxu3 %v1211_v26  ;;  %v5967_v37 = vadd.f32 %v1312_v63, %v1027_v24  ;;  %v1507_v63 = vor.u32 %v1506_v6, %v1503_v36  ;;  %v862_v26 = vrot.slane %v5499_v57, 1  ;;  %v1212_v34 = vrot.slane %v1180_v58, 1 }
 0x131   : > { %v967_v30 = vpop.f32.mrf.mxu2  ;;  %v5969_v5 = vpop.f32.mrf.mxu0  ;;  %v863_v57 = vsel %vm830_vm1, %v860_v49, %v862_v26  ;;  %v1513_v49 = vshll.u32 %v5809_v48, 16 }
 0x132   : > { %v757_v20 = vpop.f32.mrf.mxu1  ;;  %v1317_v4 = vpop.f32.mrf.mxu3 }
 0x133   : > { %v758_v8 = vadd.f32 %v757_v20, %v5890_v0  ;;  %v2078_v0 = vunpack.c.l.b16 %v1996_v35  ;;  %v1508_v20 = vsel %vm1419_vm2, %v1498_v44, %v1507_v63  ;;  %v1510_v44 = vshrl.u32 %v5809_v48, 16 }
 0x135   : > { %v1028_v22 = vadd.f32 %v964_v14, %v758_v8  ;;  %v2111_v58 = vpack.c.b16 %v6934_v51, %v2078_v0  ;;  %v1512_v48 = vrot.slane %v1510_v44, 1 }
 0x137   : > { %v5980_v24 = vadd.f32 %v1314_v16, %v1028_v22  ;;  %v1213_v16 = vsel %vm830_vm1, %v1210_v60, %v1212_v34  ;;  %v5991_v22 = vld [vmem:[%s5402_s27 + $0x18] sm:$0xff]  ;;  %v5049_v60 = vld [vmem:[%s6930_s1 + $0x210] sm:$0xff]  ;;  %v2368_v26 = vshrl.u32 %v2111_v58, 16  ;;  %v2371_v34 = vshll.u32 %v2111_v58, 16 }
 0x138   : > { %v2376_v0 = vshrl.u32 %v5991_v22, 16  ;;  %2827 = vmatpush.bf16.msra.mxu0 %v5049_v60  ;;  %v2129_v60 = vrot.slane %v5991_v22, 2 }
 0x139   : > { %v969_v14 = vpop.f32.mrf.mxu2  ;;  %v1645_v23 = vpop.f32.mrf.mxu0 }
 0x13a   : > { %v760_v1 = vpop.f32.mrf.mxu1  ;;  %v5986_v36 = vadd.f32 %v1645_v23, %v5834_v17  ;;  %v1319_v6 = vpop.f32.mrf.mxu3  ;;  %v5071_v17 = vld [vmem:[%s6930_s1 + $0x78] sm:$0xff]  ;;  %v2378_v51 = vrot.slane %v2376_v0, 2 }
 0x13b   : > { %v761_v8 = vadd.f32 %v760_v1, %v5900_v31  ;;  %v5079_v31 = vld [vmem:[%s6930_s1 + $0xb8] sm:$0xff]  ;;  %3194 = vmatpush.bf16.msrb.mxu1 %v5071_v17  ;;  %v2379_v1 = vshll.u32 %v5991_v22, 16  ;;  %v2373_v17 = vrot.slane %v2371_v34, 3 }
 0x13c   : > { %6938 = vst [vmem:[#allocation5_spill] sm:$0xff] %v5986_v36  ;;  %799 = vmatmul.bf16.gmra.mxu1 %v5305_v28  ;;  %1684 = vmatmul.bf16.gmra.mxu0 %v1508_v20 }
 0x13d   : > { %v1029_v35 = vadd.f32 %v967_v30, %v761_v8  ;;  %3357 = vmatpush.bf16.msrb.mxu3 %v5079_v31  ;;  %v2381_v36 = vrot.slane %v2379_v1, 3  ;;  %v2128_v31 = vrot.slane %v2111_v58, 2  ;;  %v1757_v1 = vld [vmem:[%s5402_s27 + $0x8] sm:$0xc] }
 0x13e   : > { %1011 = vmatmul.bf16.gmra.mxu2 %v863_v57  ;;  %v1515_v57 = vrot.slane %v1513_v49, 2 }
 0x13f   : > { %1361 = vmatmul.bf16.gmra.mxu3 %v1213_v16  ;;  %v6007_v30 = vadd.f32 %v1317_v4, %v1029_v35  ;;  %v2370_v35 = vrot.slane %v2368_v26, 2  ;;  %v2130_v0 = vsel %vm1777_vm3, %v2128_v31, %v2129_v60 }
 0x140   : > { %v1516_v32 = vor.u32 %v1515_v57, %v1512_v48 }
 0x141   : > { %v972_v23 = vpop.f32.mrf.mxu2  ;;  %v1647_v8 = vpop.f32.mrf.mxu0  ;;  %v2374_v44 = vor.u32 %v2373_v17, %v2370_v35  ;;  %v6939_v17 = vunpack.c.l.b16 %v5545_v33 }
 0x142   : > { %v762_v20 = vpop.f32.mrf.mxu1  ;;  %v6013_v16 = vadd.f32 %v1647_v8, %v5843_v15  ;;  %v1322_v4 = vpop.f32.mrf.mxu3  ;;  %v1517_v26 = vsel %vm1419_vm2, %v1507_v63, %v1516_v32  ;;  %v1519_v63 = vshrl.u32 %v5840_v9, 16 }
 0x143   : > { %v763_v28 = vadd.f32 %v762_v20, %v5911_v13  ;;  %v2382_v13 = vor.u32 %v2381_v36, %v2378_v51  ;;  %v1775_v36 = vunpack.c.l.b16 %v1757_v1 }
 0x144   : > { %v1521_v35 = vrot.slane %v1519_v63, 1 }
 0x145   : > { %v1030_v45 = vadd.f32 %v969_v14, %v763_v28  ;;  %v1776_v31 = vpack.c.b16 %v6939_v17, %v1775_v36 }
 0x147   : > { %v6016_v25 = vadd.f32 %v1319_v6, %v1030_v45  ;;  %v2383_v45 = vsel %vm2366_vm4, %v2374_v44, %v2382_v13  ;;  %v6027_v6 = vld [vmem:[%s5402_s27 + $0x20] sm:$0xff]  ;;  %v1778_v1 = vrot.slane %v1776_v31, 2 }
 0x148   : > { %v2385_v8 = vshrl.u32 %v6027_v6, 16  ;;  %v2388_v48 = vshll.u32 %v6027_v6, 16  ;;  %v2131_v33 = vrot.slane %v6027_v6, 2 }
 0x149   : > { %v974_v49 = vpop.f32.mrf.mxu2  ;;  %v1650_v20 = vpop.f32.mrf.mxu0 }
 0x14a   : > { %v765_v15 = vpop.f32.mrf.mxu1  ;;  %v6021_v14 = vadd.f32 %v1650_v20, %v5855_v19  ;;  %v1324_v58 = vpop.f32.mrf.mxu3  ;;  %v2390_v20 = vrot.slane %v2388_v48, 3 }
 0x14b   : > { %v766_v34 = vadd.f32 %v765_v15, %v5924_v40  ;;  %v1522_v40 = vshll.u32 %v5840_v9, 16  ;;  %v2387_v15 = vrot.slane %v2385_v8, 2 }
 0x14c   : > { %804 = vmatmul.bf16.gmra.mxu1 %v5951_v39  ;;  %1689 = vmatmul.bf16.gmra.mxu0 %v1517_v26 }
 0x14d   : > { %v1031_v51 = vadd.f32 %v972_v23, %v766_v34  ;;  %v1524_v39 = vrot.slane %v1522_v40, 2  ;;  %v5062_v34 = vld [vmem:[%s6930_s1 + $0x30] sm:$0xff] }
 0x14e   : > { %2233 = vmatmul.bf16.vlgmr.msra.gmra.mxu2 %v2130_v0 }
 0x14f   : > { %2591 = vmatmul.bf16.vlgmr.msra.gmra.mxu3 %v2383_v45  ;;  %v6032_v19 = vadd.f32 %v1322_v4, %v1031_v51  ;;  %v1525_v0 = vor.u32 %v1524_v39, %v1521_v35  ;;  %v5306_v45 = vld [vmem:[%s5402_s27 + $0x10] sm:$0xff]  ;;  %3264 = vmatpush.bf16.msrb.mxu2 %v5062_v34  ;;  %v2132_v35 = vsel %vm1777_vm3, %v2129_v60, %v2131_v33  ;;  %v1531_v60 = vshll.u32 %v5861_v47, 16 }
 0x150   : > { %v1779_v51 = vrot.slane %v5306_v45, 2 }
 0x151   : > { %v977_v57 = vpop.f32.mrf.mxu2  ;;  %v1652_v23 = vpop.f32.mrf.mxu0 }
 0x152   : > { %v767_v28 = vpop.f32.mrf.mxu1  ;;  %v6040_v9 = vadd.f32 %v1652_v23, %v5867_v52  ;;  %v1327_v4 = vpop.f32.mrf.mxu3  ;;  %v2391_v52 = vor.u32 %v2390_v20, %v2387_v15  ;;  %v1780_v8 = vsel %vm1777_vm3, %v1778_v1, %v1779_v51 }
 0x153   : > { %v768_v44 = vadd.f32 %v767_v28, %v5944_v53 }
 0x154   : > { %v2392_v39 = vsel %vm2366_vm4, %v2382_v13, %v2391_v52  ;;  %v5048_v13 = vld [vmem:[%s6930_s1 + $0x208] sm:$0xff] }
 0x155   : > { %v1032_v26 = vadd.f32 %v974_v49, %v768_v44  ;;  %v1526_v49 = vsel %vm1419_vm2, %v1516_v32, %v1525_v0  ;;  %v5078_v32 = vld [vmem:[%s6930_s1 + $0xb0] sm:$0xff]  ;;  %2828 = vmatpush.bf16.msra.mxu0 %v5048_v13 }
 0x156   : > { %3358 = vmatpush.bf16.msrb.mxu3 %v5078_v32 }
 0x157   : > { %v6047_v53 = vadd.f32 %v1324_v58, %v1032_v26  ;;  %v6058_v58 = vld [vmem:[%s5402_s27 + $0x28] sm:$0xff] }
 0x158   : > { %v2394_v31 = vshrl.u32 %v6058_v58, 16  ;;  %v2397_v44 = vshll.u32 %v6058_v58, 16 }
 0x159   : > { %v979_v63 = vpop.f32.mrf.mxu2  ;;  %v1655_v36 = vpop.f32.mrf.mxu0 }
 0x15a   : > { %v770_v40 = vpop.f32.mrf.mxu1  ;;  %v6053_v28 = vadd.f32 %v1655_v36, %v5888_v12  ;;  %v1329_v23 = vpop.f32.mrf.mxu3  ;;  %v1528_v12 = vshrl.u32 %v5861_v47, 16  ;;  %v1533_v47 = vrot.slane %v1531_v60, 2  ;;  %v2399_v36 = vrot.slane %v2397_v44, 3 }
 0x15b   : > { %v771_v48 = vadd.f32 %v770_v40, %v5957_v29  ;;  %v5070_v29 = vld [vmem:[%s6930_s1 + $0x70] sm:$0xff] }
 0x15c   : > { %1694 = vmatmul.bf16.gmra.mxu0 %v1526_v49  ;;  %1883 = vmatmul.bf16.vlgmr.msra.gmra.mxu1 %v1780_v8  ;;  %v1530_v34 = vrot.slane %v1528_v12, 1 }
 0x15d   : > { %v1033_v17 = vadd.f32 %v977_v57, %v771_v48  ;;  %3195 = vmatpush.bf16.msrb.mxu1 %v5070_v29  ;;  %v5307_v48 = vld [vmem:[%s5402_s27 + $0x18] sm:$0xff] }
 0x15e   : > { %2238 = vmatmul.bf16.gmra.mxu2 %v2132_v35  ;;  %v1534_v8 = vor.u32 %v1533_v47, %v1530_v34  ;;  %v1781_v35 = vrot.slane %v5307_v48, 2 }
 0x15f   : > { %2596 = vmatmul.bf16.gmra.mxu3 %v2392_v39  ;;  %v6071_v57 = vadd.f32 %v1327_v4, %v1033_v17  ;;  %v2396_v4 = vrot.slane %v2394_v31, 2  ;;  %v2133_v39 = vrot.slane %v6058_v58, 2 }
 0x161   : > { %v982_v15 = vpop.f32.mrf.mxu2  ;;  %v1657_v26 = vpop.f32.mrf.mxu0  ;;  %v2400_v32 = vor.u32 %v2399_v36, %v2396_v4  ;;  %v2134_v44 = vsel %vm1777_vm3, %v2131_v33, %v2133_v39 }
 0x162   : > { %v772_v20 = vpop.f32.mrf.mxu1  ;;  %v6077_v45 = vadd.f32 %v1657_v26, %v5897_v18  ;;  %v1332_v40 = vpop.f32.mrf.mxu3  ;;  %v1782_v18 = vsel %vm1777_vm3, %v1779_v51, %v1781_v35  ;;  %v1540_v51 = vshll.u32 %v5894_v21, 16 }
 0x163   : > { %v773_v1 = vadd.f32 %v772_v20, %v5969_v5  ;;  %v1535_v5 = vsel %vm1419_vm2, %v1525_v0, %v1534_v8  ;;  %v2401_v20 = vsel %vm2366_vm4, %v2391_v52, %v2400_v32  ;;  %v1537_v0 = vshrl.u32 %v5894_v21, 16 }
 0x165   : > { %v1034_v49 = vadd.f32 %v979_v63, %v773_v1  ;;  %v1539_v1 = vrot.slane %v1537_v0, 1 }
 0x167   : > { %v6081_v17 = vadd.f32 %v1329_v23, %v1034_v49  ;;  %v6092_v23 = vld [vmem:[%s5402_s27 + $0x30] sm:$0xff] }
 0x168   : > { %v2406_v33 = vshll.u32 %v6092_v23, 16 }
 0x169   : > { %v984_v29 = vpop.f32.mrf.mxu2  ;;  %v1660_v60 = vpop.f32.mrf.mxu0 }
 0x16a   : > { %v775_v12 = vpop.f32.mrf.mxu1  ;;  %v6087_v63 = vadd.f32 %v1660_v60, %v5909_v62  ;;  %v1334_v31 = vpop.f32.mrf.mxu3  ;;  %v2403_v62 = vshrl.u32 %v6092_v23, 16  ;;  %v2408_v48 = vrot.slane %v2406_v33, 3 }
 0x16b   : > { %v776_v13 = vadd.f32 %v775_v12, %v5727_v42  ;;  %v5061_v12 = vld [vmem:[%s6930_s1 + $0x28] sm:$0xff] }
 0x16c   : > { %1699 = vmatmul.bf16.gmra.mxu0 %v1535_v5  ;;  %1888 = vmatmul.bf16.gmra.mxu1 %v1782_v18  ;;  %v2405_v21 = vrot.slane %v2403_v62, 2  ;;  %v5308_v5 = vld [vmem:[%s5402_s27 + $0x20] sm:$0xff] }
 0x16d   : > { %v1035_v26 = vadd.f32 %v982_v15, %v776_v13  ;;  %v1542_v15 = vrot.slane %v1540_v51, 2  ;;  %v1783_v18 = vrot.slane %v5308_v5, 2  ;;  %v2135_v13 = vrot.slane %v6092_v23, 2  ;;  %3265 = vmatpush.bf16.msrb.mxu2 %v5061_v12 }
 0x16e   : > { %2243 = vmatmul.bf16.gmra.mxu2 %v2134_v44 }
 0x16f   : > { %2601 = vmatmul.bf16.gmra.mxu3 %v2401_v20  ;;  %v6096_v42 = vadd.f32 %v1332_v40, %v1035_v26  ;;  %v1543_v60 = vor.u32 %v1542_v15, %v1539_v1 }
 0x171   : > { %v987_v34 = vpop.f32.mrf.mxu2  ;;  %v1662_v47 = vpop.f32.mrf.mxu0  ;;  %v1544_v0 = vsel %vm1419_vm2, %v1534_v8, %v1543_v60  ;;  %v5077_v8 = vld [vmem:[%s6930_s1 + $0xa8] sm:$0xff] }
 0x172   : > { %v777_v52 = vpop.f32.mrf.mxu1  ;;  %v6102_v36 = vadd.f32 %v1662_v47, %v5921_v50  ;;  %v1337_v49 = vpop.f32.mrf.mxu3  ;;  %3359 = vmatpush.bf16.msrb.mxu3 %v5077_v8 }
 0x173   : > { %v778_v4 = vadd.f32 %v777_v52, %v5742_v56  ;;  %v2409_v56 = vor.u32 %v2408_v48, %v2405_v21  ;;  %v2136_v52 = vsel %vm1777_vm3, %v2133_v39, %v2135_v13  ;;  %v5047_v39 = vld [vmem:[%s6930_s1 + $0x200] sm:$0xff] }
 0x174   : > { %2829 = vmatpush.bf16.msra.mxu0 %v5047_v39 }
 0x175   : > { %v1036_v40 = vadd.f32 %v984_v29, %v778_v4  ;;  %v1784_v29 = vsel %vm1777_vm3, %v1781_v35, %v1783_v18  ;;  %v2410_v47 = vsel %vm2366_vm4, %v2400_v32, %v2409_v56  ;;  %v1549_v35 = vshll.u32 %v5915_v46, 16 }
 0x177   : > { %v6109_v44 = vadd.f32 %v1334_v31, %v1036_v40  ;;  %v6120_v31 = vld [vmem:[%s5402_s27 + $0x38] sm:$0xff] }
 0x178   : > { %v2415_v15 = vshll.u32 %v6120_v31, 16 }
 0x179   : > { %v989_v50 = vpop.f32.mrf.mxu2  ;;  %v1665_v26 = vpop.f32.mrf.mxu0 }
 0x17a   : > { %v780_v20 = vpop.f32.mrf.mxu1  ;;  %v6115_v62 = vadd.f32 %v1665_v26, %v5942_v7  ;;  %v1339_v33 = vpop.f32.mrf.mxu3  ;;  %v1546_v7 = vshrl.u32 %v5915_v46, 16  ;;  %v1551_v46 = vrot.slane %v1549_v35, 2  ;;  %v2417_v26 = vrot.slane %v2415_v15, 3 }
 0x17b   : > { %v781_v51 = vadd.f32 %v780_v20, %v5758_v10  ;;  %v5069_v10 = vld [vmem:[%s6930_s1 + $0x68] sm:$0xff] }
 0x17c   : > { %1704 = vmatmul.bf16.gmra.mxu0 %v1544_v0  ;;  %1893 = vmatmul.bf16.gmra.mxu1 %v1784_v29  ;;  %v1548_v40 = vrot.slane %v1546_v7, 1 }
 0x17d   : > { %v1037_v1 = vadd.f32 %v987_v34, %v781_v51  ;;  %3196 = vmatpush.bf16.msrb.mxu1 %v5069_v10  ;;  %v2412_v34 = vshrl.u32 %v6120_v31, 16  ;;  %v5309_v51 = vld [vmem:[%s5402_s27 + $0x28] sm:$0xff] }
 0x17e   : > { %2248 = vmatmul.bf16.gmra.mxu2 %v2136_v52  ;;  %v1552_v29 = vor.u32 %v1551_v46, %v1548_v40  ;;  %v1785_v52 = vrot.slane %v5309_v51, 2 }
 0x17f   : > { %2606 = vmatmul.bf16.gmra.mxu3 %v2410_v47  ;;  %v6133_v32 = vadd.f32 %v1337_v49, %v1037_v1  ;;  %v2414_v49 = vrot.slane %v2412_v34, 2  ;;  %v2137_v47 = vrot.slane %v6120_v31, 2 }
 0x181   : > { %v992_v4 = vpop.f32.mrf.mxu2  ;;  %v1667_v48 = vpop.f32.mrf.mxu0  ;;  %v2418_v8 = vor.u32 %v2417_v26, %v2414_v49  ;;  %v2138_v15 = vsel %vm1777_vm3, %v2135_v13, %v2137_v47 }
 0x182   : > { %v782_v21 = vpop.f32.mrf.mxu1  ;;  %v6139_v5 = vadd.f32 %v1667_v48, %v5954_v2  ;;  %v1342_v20 = vpop.f32.mrf.mxu3  ;;  %v1786_v2 = vsel %vm1777_vm3, %v1783_v18, %v1785_v52  ;;  %v1558_v18 = vshll.u32 %v5948_v54, 16 }
 0x183   : > { %v783_v12 = vadd.f32 %v782_v21, %v5781_v27  ;;  %v1553_v27 = vsel %vm1419_vm2, %v1543_v60, %v1552_v29  ;;  %v2419_v21 = vsel %vm2366_vm4, %v2409_v56, %v2418_v8  ;;  %v1555_v60 = vshrl.u32 %v5948_v54, 16  ;;  %v1399_v54 = vld [vmem:[%s5402_s27 + $0x88] sm:$0x3] }
 0x185   : > { %v1038_v0 = vadd.f32 %v989_v50, %v783_v12  ;;  %v1560_v12 = vrot.slane %v1558_v18, 2 }
 0x187   : > { %v6143_v1 = vadd.f32 %v1339_v33, %v1038_v0  ;;  %v6154_v33 = vld [vmem:[%s5402_s27 + $0x40] sm:$0xff] }
 0x188   : > { %v2424_v13 = vshll.u32 %v6154_v33, 16 }
 0x189   : > { %v994_v10 = vpop.f32.mrf.mxu2  ;;  %v1670_v35 = vpop.f32.mrf.mxu0 }
 0x18a   : > { %v785_v7 = vpop.f32.mrf.mxu1  ;;  %v6149_v50 = vadd.f32 %v1670_v35, %v5967_v37  ;;  %v1344_v34 = vpop.f32.mrf.mxu3  ;;  %v2421_v37 = vshrl.u32 %v6154_v33, 16  ;;  %v5060_v35 = vld [vmem:[%s6930_s1 + $0x20] sm:$0xff] }
 0x18b   : > { %v786_v39 = vadd.f32 %v785_v7, %v5794_v11  ;;  %3266 = vmatpush.bf16.msrb.mxu2 %v5060_v35 }
 0x18c   : > { %1709 = vmatmul.bf16.gmra.mxu0 %v1553_v27  ;;  %1898 = vmatmul.bf16.gmra.mxu1 %v1786_v2  ;;  %v2423_v51 = vrot.slane %v2421_v37, 2  ;;  %v5310_v2 = vld [vmem:[%s5402_s27 + $0x30] sm:$0xff] }
 0x18d   : > { %v1039_v48 = vadd.f32 %v992_v4, %v786_v39  ;;  %v1557_v4 = vrot.slane %v1555_v60, 1  ;;  %v1787_v39 = vrot.slane %v5310_v2, 2 }
 0x18e   : > { %2253 = vmatmul.bf16.gmra.mxu2 %v2138_v15  ;;  %v1417_v15 = vunpack.c.l.b16 %v1399_v54 }
 0x18f   : > { %2611 = vmatmul.bf16.gmra.mxu3 %v2419_v21  ;;  %v6158_v11 = vadd.f32 %v1342_v20, %v1039_v48  ;;  %v2426_v20 = vrot.slane %v2424_v13, 3  ;;  %v1561_v27 = vor.u32 %v1560_v12, %v1557_v4  ;;  %v2139_v21 = vrot.slane %v6154_v33, 2 }
 0x190   : > { %v1788_v37 = vsel %vm1777_vm3, %v1785_v52, %v1787_v39  ;;  %v6176_v13 = vpack.c.b16 %v1417_v15, %v1417_v15 }
 0x191   : > { %v997_v56 = vpop.f32.mrf.mxu2  ;;  %v1672_v46 = vpop.f32.mrf.mxu0  ;;  %v2140_v12 = vsel %vm1777_vm3, %v2137_v47, %v2139_v21 }
 0x192   : > { %v787_v40 = vpop.f32.mrf.mxu1  ;;  %v6164_v26 = vadd.f32 %v1672_v46, %v5980_v24  ;;  %v1347_v0 = vpop.f32.mrf.mxu3  ;;  %v2427_v24 = vor.u32 %v2426_v20, %v2423_v51  ;;  %v1567_v52 = vshll.u32 %v6176_v13, 16 }
 0x193   : > { %v788_v49 = vadd.f32 %v787_v40, %v5806_v59 }
 0x194   : > { %v1569_v2 = vrot.slane %v1567_v52, 2 }
 0x195   : > { %v1040_v7 = vadd.f32 %v994_v10, %v788_v49  ;;  %v1562_v10 = vsel %vm1419_vm2, %v1552_v29, %v1561_v27  ;;  %v6185_v49 = vld [vmem:[%s5402_s27 + $0x48] sm:$0xff]  ;;  %v5076_v29 = vld [vmem:[%s6930_s1 + $0xa0] sm:$0xff] }
 0x196   : > { %3360 = vmatpush.bf16.msrb.mxu3 %v5076_v29 }
 0x197   : > { %v6172_v59 = vadd.f32 %v1344_v34, %v1040_v7  ;;  %v2428_v34 = vsel %vm2366_vm4, %v2418_v8, %v2427_v24  ;;  %v2430_v8 = vshrl.u32 %v6185_v49, 16 }
 0x199   : > { %v999_v48 = vpop.f32.mrf.mxu2  ;;  %v1675_v18 = vpop.f32.mrf.mxu0 }
 0x19a   : > { %v790_v60 = vpop.f32.mrf.mxu1  ;;  %v6180_v46 = vadd.f32 %v1675_v18, %v6007_v30  ;;  %v1349_v4 = vpop.f32.mrf.mxu3  ;;  %v1564_v30 = vshrl.u32 %v6176_v13, 16 }
 0x19b   : > { %v791_v40 = vadd.f32 %v790_v60, %v5738_v55  ;;  %v5068_v55 = vld [vmem:[%s6930_s1 + $0x60] sm:$0xff] }
 0x19c   : > { %1714 = vmatmul.bf16.gmra.mxu0 %v1562_v10  ;;  %1903 = vmatmul.bf16.gmra.mxu1 %v1788_v37  ;;  %v1566_v35 = vrot.slane %v1564_v30, 1  ;;  %v2432_v10 = vrot.slane %v2430_v8, 2 }
 0x19d   : > { %v1041_v54 = vadd.f32 %v997_v56, %v791_v40  ;;  %3197 = vmatpush.bf16.msrb.mxu1 %v5068_v55  ;;  %v2433_v56 = vshll.u32 %v6185_v49, 16 }
 0x19e   : > { %2258 = vmatmul.bf16.gmra.mxu2 %v2140_v12  ;;  %v1570_v40 = vor.u32 %v1569_v2, %v1566_v35  ;;  %v5311_v12 = vld [vmem:[%s5402_s27 + $0x38] sm:$0xff]  ;;  %v2704_v35 = vld [vmem:[%s5402_s27 + $0x10] sm:$0x8] }
 0x19f   : > { %2616 = vmatmul.bf16.gmra.mxu3 %v2428_v34  ;;  %v6195_v47 = vadd.f32 %v1347_v0, %v1041_v54  ;;  %v2435_v0 = vrot.slane %v2433_v56, 3  ;;  %v1789_v34 = vrot.slane %v5311_v12, 2  ;;  %v2141_v54 = vrot.slane %v6185_v49, 2  ;;  %v6217_v2 = vld [vmem:[%s5402_s27 + $0x50] sm:$0xff] }
 0x1a1   : > { %v1002_v51 = vpop.f32.mrf.mxu2  ;;  %v1677_v7 = vpop.f32.mrf.mxu0  ;;  %v2436_v55 = vor.u32 %v2435_v0, %v2432_v10 }
 0x1a2   : > { %v792_v20 = vpop.f32.mrf.mxu1  ;;  %v6201_v60 = vadd.f32 %v1677_v7, %v6016_v25  ;;  %v1352_v18 = vpop.f32.mrf.mxu3  ;;  %v1571_v25 = vsel %vm1419_vm2, %v1561_v27, %v1570_v40  ;;  %v2142_v7 = vsel %vm1777_vm3, %v2139_v21, %v2141_v54  ;;  %v2722_v27 = vunpack.c.l.b16 %v2704_v35 }
 0x1a3   : > { %v793_v15 = vadd.f32 %v792_v20, %v5754_v3  ;;  %v1790_v20 = vsel %vm1777_vm3, %v1787_v39, %v1789_v34  ;;  %v2726_v35 = vrot.slane %v5991_v22, 3 }
 0x1a5   : > { %v1042_v37 = vadd.f32 %v999_v48, %v793_v15 }
 0x1a7   : > { %v6205_v29 = vadd.f32 %v1349_v4, %v1042_v37  ;;  %v2437_v4 = vsel %vm2366_vm4, %v2427_v24, %v2436_v55  ;;  %v6940_v24 = vunpack.c.l.b16 %v5974_v41  ;;  %v2143_v41 = vrot.slane %v6217_v2, 2 }
 0x1a9   : > { %v1004_v30 = vpop.f32.mrf.mxu2  ;;  %v1680_v3 = vpop.f32.mrf.mxu0  ;;  %v2723_v37 = vpack.c.b16 %v6940_v24, %v2722_v27 }
 0x1aa   : > { %v795_v52 = vpop.f32.mrf.mxu1  ;;  %v6211_v48 = vadd.f32 %v1680_v3, %v6032_v19  ;;  %v1354_v56 = vpop.f32.mrf.mxu3  ;;  %v2442_v19 = vshll.u32 %v6217_v2, 16 }
 0x1ab   : > { %v796_v8 = vadd.f32 %v795_v52, %v5777_v43  ;;  %v2439_v43 = vshrl.u32 %v6217_v2, 16 }
 0x1ac   : > { %1719 = vmatmul.bf16.gmra.mxu0 %v1571_v25  ;;  %1908 = vmatmul.bf16.gmra.mxu1 %v1790_v20  ;;  %v2444_v3 = vrot.slane %v2442_v19, 3  ;;  %v5059_v25 = vld [vmem:[%s6930_s1 + $0x18] sm:$0xff]  ;;  %v5312_v20 = vld [vmem:[%s5402_s27 + $0x40] sm:$0xff] }
 0x1ad   : > { %v1043_v15 = vadd.f32 %v1002_v51, %v796_v8  ;;  %v2441_v52 = vrot.slane %v2439_v43, 2  ;;  %v1791_v8 = vrot.slane %v5312_v20, 2  ;;  %3267 = vmatpush.bf16.msrb.mxu2 %v5059_v25 }
 0x1ae   : > { %2263 = vmatmul.bf16.gmra.mxu2 %v2142_v7  ;;  %v2725_v7 = vrot.slane %v2723_v37, 3 }
 0x1af   : > { %2621 = vmatmul.bf16.gmra.mxu3 %v2437_v4  ;;  %v6219_v39 = vadd.f32 %v1352_v18, %v1043_v15  ;;  %v1792_v27 = vsel %vm1777_vm3, %v1789_v34, %v1791_v8  ;;  %v5075_v34 = vld [vmem:[%s6930_s1 + $0x98] sm:$0xff] }
 0x1b0   : > { %v2727_v43 = vsel %vm2724_vm5, %v2725_v7, %v2726_v35  ;;  %3361 = vmatpush.bf16.msrb.mxu3 %v5075_v34 }
 0x1b1   : > { %v1007_v10 = vpop.f32.mrf.mxu2  ;;  %v1682_v0 = vpop.f32.mrf.mxu0 }
 0x1b2   : > { %v797_v21 = vpop.f32.mrf.mxu1  ;;  %v6227_v40 = vadd.f32 %v1682_v0, %v6047_v53  ;;  %v1357_v12 = vpop.f32.mrf.mxu3  ;;  %v2445_v53 = vor.u32 %v2444_v3, %v2441_v52  ;;  %v2144_v0 = vsel %vm1777_vm3, %v2141_v54, %v2143_v41  ;;  %v6941_v3 = vld [vmem:[#allocation2_spill] sm:$0xff] }
 0x1b3   : > { %v798_v51 = vadd.f32 %v797_v21, %v5790_v38 }
 0x1b4   : > { %v2446_v24 = vsel %vm2366_vm4, %v2436_v55, %v2445_v53 }
 0x1b5   : > { %v1044_v18 = vadd.f32 %v1004_v30, %v798_v51 }
 0x1b7   : > { %v6235_v38 = vadd.f32 %v1354_v56, %v1044_v18  ;;  %v6246_v56 = vld [vmem:[%s5402_s27 + $0x58] sm:$0xff] }
 0x1b8   : > { %v2448_v54 = vshrl.u32 %v6246_v56, 16  ;;  %v2451_v55 = vshll.u32 %v6246_v56, 16 }
 0x1b9   : > { %v1009_v4 = vpop.f32.mrf.mxu2  ;;  %v1685_v30 = vpop.f32.mrf.mxu0 }
 0x1ba   : > { %v800_v15 = vpop.f32.mrf.mxu1  ;;  %v6241_v21 = vadd.f32 %v1685_v30, %v6071_v57  ;;  %v1359_v22 = vpop.f32.mrf.mxu3  ;;  %v2450_v7 = vrot.slane %v2448_v54, 2  ;;  %v6942_v54 = vld [vmem:[#allocation3_spill] sm:$0xff] }
 0x1bb   : > { %v801_v19 = vadd.f32 %v800_v15, %v5744_v61  ;;  %v5067_v61 = vld [vmem:[%s6930_s1 + $0x58] sm:$0xff]  ;;  %v2453_v15 = vrot.slane %v2451_v55, 3 }
 0x1bc   : > { %1913 = vmatmul.bf16.gmra.mxu1 %v1792_v27  ;;  %2830 = vmatmul.bf16.vlgmr.msra.gmra.mxu0 %v2727_v43  ;;  %v5313_v27 = vld [vmem:[%s5402_s27 + $0x48] sm:$0xff]  ;;  %v2728_v43 = vrot.slane %v6027_v6, 3 }
 0x1bd   : > { %v1045_v37 = vadd.f32 %v1007_v10, %v801_v19  ;;  %3198 = vmatpush.bf16.msrb.mxu1 %v5067_v61  ;;  %v2145_v19 = vrot.slane %v6246_v56, 2 }
 0x1be   : > { %2268 = vmatmul.bf16.gmra.mxu2 %v2144_v0 }
 0x1bf   : > { %2626 = vmatmul.bf16.gmra.mxu3 %v2446_v24  ;;  %v6254_v57 = vadd.f32 %v1357_v12, %v1045_v37  ;;  %v1793_v12 = vrot.slane %v5313_v27, 2  ;;  %v2454_v24 = vor.u32 %v2453_v15, %v2450_v7  ;;  %v2146_v6 = vsel %vm1777_vm3, %v2143_v41, %v2145_v19  ;;  %v6943_v41 = vld [vmem:[#allocation4_spill] sm:$0xff] }
 0x1c1   : > { %v1012_v10 = vpop.f32.mrf.mxu2  ;;  %v1687_v52 = vpop.f32.mrf.mxu0 }
 0x1c2   : > { %v802_v51 = vpop.f32.mrf.mxu1  ;;  %v6260_v25 = vadd.f32 %v1687_v52, %v6081_v17  ;;  %v1362_v20 = vpop.f32.mrf.mxu3  ;;  %v1794_v17 = vsel %vm1777_vm3, %v1791_v8, %v1793_v12 }
 0x1c3   : > { %v803_v18 = vadd.f32 %v802_v51, %v6941_v3  ;;  %v2729_v51 = vsel %vm2724_vm5, %v2726_v35, %v2728_v43  ;;  %v2455_v3 = vsel %vm2366_vm4, %v2445_v53, %v2454_v24 }
 0x1c5   : > { %v1046_v30 = vadd.f32 %v1009_v4, %v803_v18 }
 0x1c7   : > { %v6265_v0 = vadd.f32 %v1359_v22, %v1046_v30  ;;  %v6276_v22 = vld [vmem:[%s5402_s27 + $0x60] sm:$0xff] }
 0x1c8   : > { %v2457_v35 = vshrl.u32 %v6276_v22, 16 }
 0x1c9   : > { %v1014_v37 = vpop.f32.mrf.mxu2  ;;  %v1690_v61 = vpop.f32.mrf.mxu0 }
 0x1ca   : > { %v805_v34 = vpop.f32.mrf.mxu1  ;;  %v6271_v4 = vadd.f32 %v1690_v61, %v6096_v42  ;;  %v1364_v52 = vpop.f32.mrf.mxu3  ;;  %v2460_v42 = vshll.u32 %v6276_v22, 16 }
 0x1cb   : > { %v806_v55 = vadd.f32 %v805_v34, %v6942_v54  ;;  %v2459_v34 = vrot.slane %v2457_v35, 2 }
 0x1cc   : > { %1918 = vmatmul.bf16.gmra.mxu1 %v1794_v17  ;;  %2835 = vmatmul.bf16.gmra.mxu0 %v2729_v51  ;;  %v2462_v61 = vrot.slane %v2460_v42, 3  ;;  %v5314_v51 = vld [vmem:[%s5402_s27 + $0x50] sm:$0xff] }
 0x1cd   : > { %v1047_v18 = vadd.f32 %v1012_v10, %v806_v55  ;;  %v1795_v54 = vrot.slane %v5314_v51, 2  ;;  %v2730_v55 = vrot.slane %v6058_v58, 3 }
 0x1ce   : > { %2273 = vmatmul.bf16.gmra.mxu2 %v2146_v6  ;;  %v2147_v6 = vrot.slane %v6276_v22, 2 }
 0x1cf   : > { %2631 = vmatmul.bf16.gmra.mxu3 %v2455_v3  ;;  %v6278_v8 = vadd.f32 %v1362_v20, %v1047_v18  ;;  %v5058_v20 = vld [vmem:[%s6930_s1 + $0x10] sm:$0xff]  ;;  %v2731_v42 = vsel %vm2724_vm5, %v2728_v43, %v2730_v55 }
 0x1d0   : > { %3268 = vmatpush.bf16.msrb.mxu2 %v5058_v20  ;;  %v2148_v58 = vsel %vm1777_vm3, %v2145_v19, %v2147_v6 }
 0x1d1   : > { %v2234_v7 = vpop.f32.mrf.mxu2  ;;  %v1692_v30 = vpop.f32.mrf.mxu0 }
 0x1d2   : > { %v807_v15 = vpop.f32.mrf.mxu1  ;;  %v6284_v53 = vadd.f32 %v1692_v30, %v6109_v44  ;;  %v2592_v10 = vpop.f32.mrf.mxu3  ;;  %v2463_v44 = vor.u32 %v2462_v61, %v2459_v34 }
 0x1d3   : > { %v808_v27 = vadd.f32 %v807_v15, %v6943_v41  ;;  %v6946_v41 = vld [vmem:[#allocation5_spill] sm:$0xff] }
 0x1d4   : > { %6944 = vst [vmem:[#allocation2_spill] sm:$0xff] %v6284_v53  ;;  %v2464_v20 = vsel %vm2366_vm4, %v2454_v24, %v2463_v44 }
 0x1d5   : > { %v1048_v17 = vadd.f32 %v1014_v37, %v808_v27  ;;  %v1796_v37 = vsel %vm1777_vm3, %v1793_v12, %v1795_v54  ;;  %v5074_v12 = vld [vmem:[%s6930_s1 + $0x90] sm:$0xff] }
 0x1d6   : > { %3362 = vmatpush.bf16.msrb.mxu3 %v5074_v12 }
 0x1d7   : > { %v6292_v3 = vadd.f32 %v1364_v52, %v1048_v17  ;;  %v6303_v52 = vld [vmem:[%s5402_s27 + $0x68] sm:$0xff] }
 0x1d8   : > { %v2466_v19 = vshrl.u32 %v6303_v52, 16  ;;  %v2469_v24 = vshll.u32 %v6303_v52, 16 }
 0x1d9   : > { %v2236_v18 = vpop.f32.mrf.mxu2  ;;  %v1695_v15 = vpop.f32.mrf.mxu0 }
 0x1da   : > { %v1884_v35 = vpop.f32.mrf.mxu1  ;;  %v6297_v30 = vadd.f32 %v1695_v15, %v6133_v32  ;;  %v2594_v51 = vpop.f32.mrf.mxu3  ;;  %v5066_v32 = vld [vmem:[%s6930_s1 + $0x50] sm:$0xff] }
 0x1db   : > { %v1964_v27 = vadd.f32 %v1884_v35, %v6946_v41  ;;  %3199 = vmatpush.bf16.msrb.mxu1 %v5066_v32  ;;  %v2471_v41 = vrot.slane %v2469_v24, 3 }
 0x1dc   : > { %6945 = vst [vmem:[#allocation3_spill] sm:$0xff] %v6297_v30  ;;  %1923 = vmatmul.bf16.gmra.mxu1 %v1796_v37  ;;  %2840 = vmatmul.bf16.gmra.mxu0 %v2731_v42  ;;  %v2468_v42 = vrot.slane %v2466_v19, 2 }
 0x1dd   : > { %v2314_v34 = vadd.f32 %v2234_v7, %v1964_v27 }
 0x1de   : > { %2278 = vmatmul.bf16.gmra.mxu2 %v2148_v58  ;;  %v5315_v58 = vld [vmem:[%s5402_s27 + $0x58] sm:$0xff]  ;;  %v2472_v32 = vor.u32 %v2471_v41, %v2468_v42 }
 0x1df   : > { %2636 = vmatmul.bf16.gmra.mxu3 %v2464_v20  ;;  %v6311_v43 = vadd.f32 %v2592_v10, %v2314_v34  ;;  %v1797_v10 = vrot.slane %v5315_v58, 2  ;;  %v2732_v20 = vrot.slane %v6092_v23, 3  ;;  %v2149_v34 = vrot.slane %v6303_v52, 2 }
 0x1e1   : > { %v2239_v7 = vpop.f32.mrf.mxu2  ;;  %v1697_v61 = vpop.f32.mrf.mxu0  ;;  %v2150_v23 = vsel %vm1777_vm3, %v2147_v6, %v2149_v34 }
 0x1e2   : > { %v1886_v17 = vpop.f32.mrf.mxu1  ;;  %v6316_v15 = vadd.f32 %v1697_v61, %v6143_v1  ;;  %v2597_v37 = vpop.f32.mrf.mxu3  ;;  %v1798_v61 = vsel %vm1777_vm3, %v1795_v54, %v1797_v10 }
 0x1e3   : > { %v1965_v35 = vadd.f32 %v1886_v17, %v6013_v16  ;;  %v2733_v16 = vsel %vm2724_vm5, %v2730_v55, %v2732_v20  ;;  %v2473_v17 = vsel %vm2366_vm4, %v2463_v44, %v2472_v32 }
 0x1e5   : > { %v2315_v27 = vadd.f32 %v2236_v18, %v1965_v35 }
 0x1e7   : > { %v6322_v12 = vadd.f32 %v2594_v51, %v2315_v27  ;;  %v6333_v51 = vld [vmem:[%s5402_s27 + $0x70] sm:$0xff] }
 0x1e9   : > { %v2241_v30 = vpop.f32.mrf.mxu2  ;;  %v1700_v53 = vpop.f32.mrf.mxu0 }
 0x1ea   : > { %v1889_v1 = vpop.f32.mrf.mxu1  ;;  %v6327_v19 = vadd.f32 %v1700_v53, %v6158_v11  ;;  %v2599_v24 = vpop.f32.mrf.mxu3  ;;  %v2475_v11 = vshrl.u32 %v6333_v51, 16  ;;  %v2478_v53 = vshll.u32 %v6333_v51, 16 }
 0x1eb   : > { %v1966_v18 = vadd.f32 %v1889_v1, %v6021_v14  ;;  %v5316_v1 = vld [vmem:[%s5402_s27 + $0x60] sm:$0xff] }
 0x1ec   : > { %1928 = vmatmul.bf16.gmra.mxu1 %v1798_v61  ;;  %2845 = vmatmul.bf16.gmra.mxu0 %v2733_v16  ;;  %v2477_v41 = vrot.slane %v2475_v11, 2  ;;  %v2480_v27 = vrot.slane %v2478_v53, 3  ;;  %v1799_v61 = vrot.slane %v5316_v1, 2  ;;  %v2734_v16 = vrot.slane %v6120_v31, 3 }
 0x1ed   : > { %v2316_v35 = vadd.f32 %v2239_v7, %v1966_v18  ;;  %v2151_v18 = vrot.slane %v6333_v51, 2 }
 0x1ee   : > { %2283 = vmatmul.bf16.gmra.mxu2 %v2150_v23  ;;  %v2481_v23 = vor.u32 %v2480_v27, %v2477_v41  ;;  %v2735_v11 = vsel %vm2724_vm5, %v2732_v20, %v2734_v16 }
 0x1ef   : > { %2641 = vmatmul.bf16.gmra.mxu3 %v2473_v17  ;;  %v6335_v54 = vadd.f32 %v2597_v37, %v2316_v35  ;;  %v5057_v37 = vld [vmem:[%s6930_s1 + $0x8] sm:$0xff]  ;;  %v2152_v31 = vsel %vm1777_vm3, %v2149_v34, %v2151_v18 }
 0x1f0   : > { %3269 = vmatpush.bf16.msrb.mxu2 %v5057_v37 }
 0x1f1   : > { %v2244_v14 = vpop.f32.mrf.mxu2  ;;  %v1702_v55 = vpop.f32.mrf.mxu0 }
 0x1f2   : > { %v1891_v42 = vpop.f32.mrf.mxu1  ;;  %v6340_v6 = vadd.f32 %v1702_v55, %v6172_v59  ;;  %v2602_v7 = vpop.f32.mrf.mxu3 }
 0x1f3   : > { %v1967_v44 = vadd.f32 %v1891_v42, %v6040_v9 }
 0x1f5   : > { %v2317_v58 = vadd.f32 %v2241_v30, %v1967_v44  ;;  %v1800_v30 = vsel %vm1777_vm3, %v1797_v10, %v1799_v61  ;;  %v2482_v44 = vsel %vm2366_vm4, %v2472_v32, %v2481_v23  ;;  %v5073_v10 = vld [vmem:[%s6930_s1 + $0x88] sm:$0xff] }
 0x1f6   : > { %3363 = vmatpush.bf16.msrb.mxu3 %v5073_v10 }
 0x1f7   : > { %v6349_v59 = vadd.f32 %v2599_v24, %v2317_v58  ;;  %v6360_v24 = vld [vmem:[%s5402_s27 + $0x78] sm:$0xff] }
 0x1f8   : > { %v2484_v20 = vshrl.u32 %v6360_v24, 16  ;;  %v2487_v34 = vshll.u32 %v6360_v24, 16 }
 0x1f9   : > { %v2246_v9 = vpop.f32.mrf.mxu2  ;;  %v1705_v17 = vpop.f32.mrf.mxu0 }
 0x1fa   : > { %v1894_v35 = vpop.f32.mrf.mxu1  ;;  %v6354_v53 = vadd.f32 %v1705_v17, %v6195_v47  ;;  %v2604_v42 = vpop.f32.mrf.mxu3  ;;  %v5065_v47 = vld [vmem:[%s6930_s1 + $0x48] sm:$0xff]  ;;  %v2486_v17 = vrot.slane %v2484_v20, 2 }
 0x1fb   : > { %v1968_v55 = vadd.f32 %v1894_v35, %v6053_v28  ;;  %3200 = vmatpush.bf16.msrb.mxu1 %v5065_v47  ;;  %v2489_v35 = vrot.slane %v2487_v34, 3 }
 0x1fc   : > { %1933 = vmatmul.bf16.gmra.mxu1 %v1800_v30  ;;  %2850 = vmatmul.bf16.gmra.mxu0 %v2735_v11  ;;  %v5317_v11 = vld [vmem:[%s5402_s27 + $0x68] sm:$0xff] }
 0x1fd   : > { %v2318_v41 = vadd.f32 %v2244_v14, %v1968_v55  ;;  %v2736_v55 = vrot.slane %v6154_v33, 3 }
 0x1fe   : > { %2288 = vmatmul.bf16.gmra.mxu2 %v2152_v31  ;;  %v2153_v31 = vrot.slane %v6360_v24, 2 }
 0x1ff   : > { %2646 = vmatmul.bf16.gmra.mxu3 %v2482_v44  ;;  %v6368_v28 = vadd.f32 %v2602_v7, %v2318_v41  ;;  %v1801_v7 = vrot.slane %v5317_v11, 2  ;;  %v2490_v41 = vor.u32 %v2489_v35, %v2486_v17 }
 0x200   : > { %v2154_v33 = vsel %vm1777_vm3, %v2151_v18, %v2153_v31 }
 0x201   : > { %v2249_v32 = vpop.f32.mrf.mxu2  ;;  %v1707_v14 = vpop.f32.mrf.mxu0 }
 0x202   : > { %v1896_v27 = vpop.f32.mrf.mxu1  ;;  %v6373_v58 = vadd.f32 %v1707_v14, %v6205_v29  ;;  %v2607_v1 = vpop.f32.mrf.mxu3  ;;  %v1802_v14 = vsel %vm1777_vm3, %v1799_v61, %v1801_v7 }
 0x203   : > { %v1969_v37 = vadd.f32 %v1896_v27, %v6077_v45  ;;  %v2737_v45 = vsel %vm2724_vm5, %v2734_v16, %v2736_v55  ;;  %v2491_v27 = vsel %vm2366_vm4, %v2481_v23, %v2490_v41 }
 0x205   : > { %v2319_v30 = vadd.f32 %v2246_v9, %v1969_v37 }
 0x207   : > { %v6379_v44 = vadd.f32 %v2604_v42, %v2319_v30  ;;  %v6390_v42 = vld [vmem:[%s5402_s27 + $0x80] sm:$0xff] }
 0x208   : > { %v2496_v16 = vshll.u32 %v6390_v42, 16 }
 0x209   : > { %v2251_v10 = vpop.f32.mrf.mxu2  ;;  %v1710_v47 = vpop.f32.mrf.mxu0 }
 0x20a   : > { %v1899_v29 = vpop.f32.mrf.mxu1  ;;  %v6384_v20 = vadd.f32 %v1710_v47, %v6219_v39  ;;  %v2609_v34 = vpop.f32.mrf.mxu3  ;;  %v2493_v39 = vshrl.u32 %v6390_v42, 16  ;;  %v2498_v11 = vrot.slane %v2496_v16, 3 }
 0x20b   : > { %v1970_v9 = vadd.f32 %v1899_v29, %v6087_v63  ;;  %v5318_v29 = vld [vmem:[%s5402_s27 + $0x70] sm:$0xff] }
 0x20c   : > { %1938 = vmatmul.bf16.gmra.mxu1 %v1802_v14  ;;  %2855 = vmatmul.bf16.gmra.mxu0 %v2737_v45  ;;  %v2495_v30 = vrot.slane %v2493_v39, 2  ;;  %v1803_v14 = vrot.slane %v5318_v29, 2  ;;  %v2738_v45 = vrot.slane %v6185_v49, 3 }
 0x20d   : > { %v2320_v37 = vadd.f32 %v2249_v32, %v1970_v9  ;;  %v2155_v9 = vrot.slane %v6390_v42, 2 }
 0x20e   : > { %2293 = vmatmul.bf16.gmra.mxu2 %v2154_v33  ;;  %v2499_v33 = vor.u32 %v2498_v11, %v2495_v30  ;;  %v2739_v39 = vsel %vm2724_vm5, %v2736_v55, %v2738_v45 }
 0x20f   : > { %2651 = vmatmul.bf16.gmra.mxu3 %v2491_v27  ;;  %v6392_v61 = vadd.f32 %v2607_v1, %v2320_v37  ;;  %v5056_v1 = vld [vmem:[%s6930_s1] sm:$0xff]  ;;  %v2156_v49 = vsel %vm1777_vm3, %v2153_v31, %v2155_v9 }
 0x210   : > { %3270 = vmatpush.bf16.msrb.mxu2 %v5056_v1 }
 0x211   : > { %v2254_v63 = vpop.f32.mrf.mxu2  ;;  %v1712_v17 = vpop.f32.mrf.mxu0 }
 0x212   : > { %v1901_v35 = vpop.f32.mrf.mxu1  ;;  %v6397_v18 = vadd.f32 %v1712_v17, %v6235_v38  ;;  %v2612_v32 = vpop.f32.mrf.mxu3 }
 0x213   : > { %v1971_v23 = vadd.f32 %v1901_v35, %v6102_v36 }
 0x215   : > { %v2321_v47 = vadd.f32 %v2251_v10, %v1971_v23  ;;  %v1804_v10 = vsel %vm1777_vm3, %v1801_v7, %v1803_v14  ;;  %v2500_v23 = vsel %vm2366_vm4, %v2490_v41, %v2499_v33  ;;  %v5072_v7 = vld [vmem:[%s6930_s1 + $0x80] sm:$0xff] }
 0x216   : > { %3364 = vmatpush.bf16.msrb.mxu3 %v5072_v7 }
 0x217   : > { %v6406_v38 = vadd.f32 %v2609_v34, %v2321_v47  ;;  %v6417_v34 = vld [vmem:[%s5402_s27 + $0x88] sm:$0xff] }
 0x218   : > { %v2502_v55 = vshrl.u32 %v6417_v34, 16  ;;  %v2505_v31 = vshll.u32 %v6417_v34, 16 }
 0x219   : > { %v2256_v36 = vpop.f32.mrf.mxu2  ;;  %v1715_v27 = vpop.f32.mrf.mxu0 }
 0x21a   : > { %v1904_v37 = vpop.f32.mrf.mxu1  ;;  %v6411_v16 = vadd.f32 %v1715_v27, %v6254_v57  ;;  %v2614_v35 = vpop.f32.mrf.mxu3  ;;  %v2504_v27 = vrot.slane %v2502_v55, 2 }
 0x21b   : > { %v1972_v17 = vadd.f32 %v1904_v37, %v6115_v62  ;;  %v5064_v62 = vld [vmem:[%s6930_s1 + $0x40] sm:$0xff]  ;;  %v2507_v37 = vrot.slane %v2505_v31, 3 }
 0x21c   : > { %1943 = vmatmul.bf16.gmra.mxu1 %v1804_v10  ;;  %2860 = vmatmul.bf16.gmra.mxu0 %v2739_v39  ;;  %v5319_v39 = vld [vmem:[%s5402_s27 + $0x78] sm:$0xff] }
 0x21d   : > { %v2322_v30 = vadd.f32 %v2254_v63, %v1972_v17  ;;  %3201 = vmatpush.bf16.msrb.mxu1 %v5064_v62  ;;  %v1805_v17 = vrot.slane %v5319_v39, 2  ;;  %v2508_v7 = vor.u32 %v2507_v37, %v2504_v27 }
 0x21e   : > { %2298 = vmatmul.bf16.gmra.mxu2 %v2156_v49  ;;  %v2740_v49 = vrot.slane %v6217_v2, 3 }
 0x21f   : > { %2656 = vmatmul.bf16.gmra.mxu3 %v2500_v23  ;;  %v6425_v57 = vadd.f32 %v2612_v32, %v2322_v30  ;;  %v2346_v32 = vld [vmem:[%s5402_s27 + $0x90] sm:$0x7]  ;;  %v2157_v23 = vrot.slane %v6417_v34, 2 }
 0x220   : > { %v2364_v62 = vunpack.c.l.b16 %v2346_v32  ;;  %v2741_v55 = vsel %vm2724_vm5, %v2738_v45, %v2740_v49 }
 0x221   : > { %v2259_v41 = vpop.f32.mrf.mxu2  ;;  %v1717_v63 = vpop.f32.mrf.mxu0  ;;  %v2158_v2 = vsel %vm1777_vm3, %v2155_v9, %v2157_v23  ;;  %v5096_v9 = vld [vmem:[%s6930_s1 + $0x138] sm:$0xff] }
 0x222   : > { %v1906_v11 = vpop.f32.mrf.mxu1  ;;  %v6430_v47 = vadd.f32 %v1717_v63, %v6265_v0  ;;  %v2617_v29 = vpop.f32.mrf.mxu3  ;;  %v6448_v27 = vpack.c.b16 %v2364_v62, %v2364_v62  ;;  %3588 = vmatpush.bf16.msra.mxu2 %v5096_v9 }
 0x223   : > { %v1973_v1 = vadd.f32 %v1906_v11, %v6139_v5  ;;  %v1806_v5 = vsel %vm1777_vm3, %v1803_v14, %v1805_v17 }
 0x224   : > { %6947 = vst [vmem:[#allocation4_spill] sm:$0xff] %v6430_v47 }
 0x225   : > { %v2323_v10 = vadd.f32 %v2256_v36, %v1973_v1  ;;  %v2028_v1 = vld [vmem:[%s5402_s27 + $0x90] sm:$0x3] }
 0x226   : > { %v2110_v14 = vunpack.c.l.b16 %v2028_v1  ;;  %v2742_v1 = vrot.slane %v6246_v56, 3  ;;  %v5084_v56 = vld [vmem:[%s6930_s1 + $0xd8] sm:$0xff] }
 0x227   : > { %v6437_v30 = vadd.f32 %v2614_v35, %v2323_v10  ;;  %v2509_v35 = vsel %vm2366_vm4, %v2499_v33, %v2508_v7 }
 0x228   : > { %v2127_v62 = vpack.c.b16 %v2110_v14, %v2110_v14 }
 0x229   : > { %v2261_v0 = vpop.f32.mrf.mxu2  ;;  %v1720_v63 = vpop.f32.mrf.mxu0 }
 0x22a   : > { %v1909_v47 = vpop.f32.mrf.mxu1  ;;  %v6442_v36 = vadd.f32 %v1720_v63, %v6278_v8  ;;  %v2619_v11 = vpop.f32.mrf.mxu3  ;;  %v2511_v8 = vshrl.u32 %v6448_v27, 16 }
 0x22b   : > { %v1974_v31 = vadd.f32 %v1909_v47, %v6149_v50  ;;  %v2514_v50 = vshll.u32 %v6448_v27, 16 }
 0x22c   : > { %1948 = vmatmul.bf16.gmra.mxu1 %v1806_v5  ;;  %2865 = vmatmul.bf16.gmra.mxu0 %v2741_v55  ;;  %v2513_v63 = vrot.slane %v2511_v8, 2  ;;  %v5095_v55 = vld [vmem:[%s6930_s1 + $0x130] sm:$0xff] }
 0x22d   : > { %v2324_v37 = vadd.f32 %v2259_v41, %v1974_v31  ;;  %v5104_v41 = vld [vmem:[%s6930_s1 + $0x178] sm:$0xff]  ;;  %v2516_v5 = vrot.slane %v2514_v50, 3  ;;  %3589 = vmatpush.bf16.msra.mxu2 %v5095_v55 }
 0x22e   : > { %2303 = vmatmul.bf16.gmra.mxu2 %v2158_v2  ;;  %3686 = vmatpush.bf16.msra.mxu3 %v5104_v41  ;;  %v6468_v2 = vld [vmem:[%s5402_s27 + $0x80] sm:$0xff] }
 0x22f   : > { %2661 = vmatmul.bf16.gmra.mxu3 %v2509_v35  ;;  %v6450_v45 = vadd.f32 %v2617_v29, %v2324_v37  ;;  %v1807_v35 = vrot.slane %v6468_v2, 2  ;;  %v2517_v14 = vor.u32 %v2516_v5, %v2513_v63 }
 0x231   : > { %v2264_v33 = vpop.f32.mrf.mxu2  ;;  %v1722_v47 = vpop.f32.mrf.mxu0  ;;  %v2518_v63 = vsel %vm2366_vm4, %v2508_v7, %v2517_v14  ;;  %v6505_v7 = vld [vmem:[%s6931_s2] ss:$0 sm:$0xff] }
 0x232   : > { %v1911_v10 = vpop.f32.mrf.mxu1  ;;  %v6461_v29 = vadd.f32 %v1722_v47, %v6292_v3  ;;  %v2622_v39 = vpop.f32.mrf.mxu3  ;;  %v2159_v3 = vrot.slane %v2127_v62, 2  ;;  %v1808_v47 = vsel %vm1777_vm3, %v1805_v17, %v1807_v35  ;;  %v5088_v17 = vld [vmem:[%s6930_s1 + $0xf8] sm:$0xff] }
 0x233   : > { %v1975_v32 = vadd.f32 %v1911_v10, %v6164_v26  ;;  %v5103_v26 = vld [vmem:[%s6930_s1 + $0x170] sm:$0xff]  ;;  %v2743_v10 = vsel %vm2724_vm5, %v2740_v49, %v2742_v1  ;;  %v5093_v49 = vld [vmem:[%s6930_s1 + $0x120] sm:$0xff]  ;;  %3469 = vmatpush.bf16.msra.mxu1 %v5088_v17 }
 0x234   : > { %3687 = vmatpush.bf16.msra.mxu3 %v5103_v26  ;;  %v2160_v62 = vsel %vm1777_vm3, %v2157_v23, %v2159_v3  ;;  %v5247_v26 = vld [vmem:[%s5402_s27 + $0x80] sm:$0xf0]  ;;  %v5248_v3 = vld [vmem:[%s5402_s27 + $0x80] sm:$0xe] }
 0x235   : > { %v2325_v31 = vadd.f32 %v2261_v0, %v1975_v32  ;;  %v5094_v0 = vld [vmem:[%s6930_s1 + $0x128] sm:$0xff] }
 0x236   : > { %3590 = vmatpush.bf16.msra.mxu2 %v5094_v0 }
 0x237   : > { %v6475_v37 = vadd.f32 %v2619_v11, %v2325_v31  ;;  %v5102_v11 = vld [vmem:[%s6930_s1 + $0x168] sm:$0xff] }
 0x238   : > { %3688 = vmatpush.bf16.msra.mxu3 %v5102_v11  ;;  %v6525_v11 = vld [vmem:[%s5402_s27 + $0x88] sm:$0xff] }
 0x239   : > { %v2266_v8 = vpop.f32.mrf.mxu2  ;;  %v2831_v9 = vpop.f32.mrf.mxu0 }
 0x23a   : > { %v1914_v50 = vpop.f32.mrf.mxu1  ;;  %v2624_v32 = vpop.f32.mrf.mxu3  ;;  %v2911_v23 = vadd.f32 %v2831_v9, %v6311_v43  ;;  %3591 = vmatpush.bf16.msra.mxu2 %v5093_v49  ;;  %v5092_v43 = vld [vmem:[%s6930_s1 + $0x118] sm:$0xff]  ;;  %v2744_v49 = vrot.slane %v6276_v22, 3 }
 0x23b   : > { %v1976_v41 = vadd.f32 %v1914_v50, %v6180_v46  ;;  %v5101_v46 = vld [vmem:[%s6930_s1 + $0x160] sm:$0xff]  ;;  %v5100_v50 = vld [vmem:[%s6930_s1 + $0x158] sm:$0xff] }
 0x23c   : > { %1953 = vmatmul.bf16.gmra.mxu1 %v1808_v47  ;;  %2870 = vmatmul.bf16.gmra.mxu0 %v2743_v10  ;;  %v2946_v9 = vadd.f32 %v6505_v7, %v2911_v23 }
 0x23d   : > { %v2326_v5 = vadd.f32 %v2264_v33, %v1976_v41  ;;  %v5087_v33 = vld [vmem:[%s6930_s1 + $0xf0] sm:$0xff]  ;;  %3689 = vmatpush.bf16.msra.mxu3 %v5101_v46  ;;  %v5249_v41 = vor.u32 %v5248_v3, %v5247_v26 }
 0x23e   : > { %2308 = vmatmul.bf16.gmra.mxu2 %v2160_v62  ;;  %3470 = vmatpush.bf16.msra.mxu1 %v5087_v33  ;;  %v5086_v62 = vld [vmem:[%s6930_s1 + $0xe8] sm:$0xff]  ;;  %v2978_v46 = vmax.f32 %v2946_v9, 0.0  ;;  %v2745_v9 = vsel %vm2724_vm5, %v2742_v1, %v2744_v49 }
 0x23f   : > { %2666 = vmatmul.bf16.gmra.mxu3 %v2518_v63  ;;  %v6510_v55 = vadd.f32 %v2622_v39, %v2326_v5  ;;  %3592 = vmatpush.bf16.msra.mxu2 %v5092_v43  ;;  %v5091_v63 = vld [vmem:[%s6930_s1 + $0x110] sm:$0xff]  ;;  %v5085_v43 = vld [vmem:[%s6930_s1 + $0xe0] sm:$0xff] }
 0x240   : > { %v5099_v5 = vld [vmem:[%s6930_s1 + $0x150] sm:$0xff] }
 0x241   : > { %v2269_v31 = vpop.f32.mrf.mxu2  ;;  %v2833_v0 = vpop.f32.mrf.mxu0  ;;  %3690 = vmatpush.bf16.msra.mxu3 %v5100_v50 }
 0x242   : > { %v1916_v14 = vpop.f32.mrf.mxu1  ;;  %v2912_v47 = vadd.f32 %v2833_v0, %v6322_v12  ;;  %v2627_v10 = vpop.f32.mrf.mxu3  ;;  %v1809_v12 = vrot.slane %v6176_v13, 2  ;;  %3471 = vmatpush.bf16.msra.mxu1 %v5086_v62  ;;  %v3303_v13 = vrot.slane %v6525_v11, 1  ;;  %v5246_v62 = vld [vmem:[%s5402_s27 + $0x80] sm:$0xff]  }
 0x243   : > { %v1977_v39 = vadd.f32 %v1916_v14, %v6201_v60  ;;  %3593 = vmatpush.bf16.msra.mxu2 %v5091_v63  ;;  %v3094_v63 = vld [vmem:[%s5402_s27 + $0x90] sm:$0x1] }
 0x244   : > { %v2947_v60 = vadd.f32 %v6505_v7, %v2912_v47  ;;  %v1810_v50 = vsel %vm1777_vm3, %v1807_v35, %v1809_v12  ;;  %v5089_v35 = vld [vmem:[%s6930_s1 + $0x100] sm:$0xff]  ;;  %v5083_v12 = vld [vmem:[%s6930_s1 + $0xd0] sm:$0xff] }
 0x245   : > { %v2327_v17 = vadd.f32 %v2266_v8, %v1977_v39  ;;  %v3302_v8 = vrot.slane %v5249_v41, 1  ;;  %3691 = vmatpush.bf16.msra.mxu3 %v5099_v5  ;;  %v5098_v39 = vld [vmem:[%s6930_s1 + $0x148] sm:$0xff] }
 0x246   : > { %v2979_v23 = vmax.f32 %v2947_v60, 0.0  ;;  %3472 = vmatpush.bf16.msra.mxu1 %v5085_v43 }
 0x247   : > { %v6539_v33 = vadd.f32 %v2624_v32, %v2327_v17  ;;  %v5090_v32 = vld [vmem:[%s6930_s1 + $0x108] sm:$0xff]  ;;  %v3304_v2 = vsel %vm830_vm1, %v3302_v8, %v3303_v13  ;;  %v5097_v17 = vld [vmem:[%s6930_s1 + $0x140] sm:$0xff] }
 0x248   : > { %v5137_v26 = vpack.c.bf16 %v2979_v23, %v2978_v46  ;;  %3594 = vmatpush.bf16.msra.mxu2 %v5090_v32  ;;  %v5121_v46 = vld [vmem:[%s6930_s1 + $0x1f8] sm:$0xff]  ;;  %v3125_v23 = vshrl.u32 %v5246_v62, 16 }
 0x249   : > { %v2271_v3 = vpop.f32.mrf.mxu2  ;;  %v2836_v0 = vpop.f32.mrf.mxu0  ;;  %3692 = vmatpush.bf16.msra.mxu3 %v5098_v39  ;;  %v3380_v39 = vld [vmem:[%s5402_s27 + $0x88] sm:$0xe] }
 0x24a   : > { %v1919_v14 = vpop.f32.mrf.mxu1  ;;  %5138 = vst [vmem:[%s6544_s25] sm:$0xff] %v5137_v26   ;;  %v2629_v41 = vpop.f32.mrf.mxu3  ;;  %3473 = vmatpush.bf16.msra.mxu1 %v5084_v56  ;;  %v2913_v60 = vadd.f32 %v2836_v0, %v6335_v54  ;;  %v3132_v26 = vshll.u32 %v6525_v11, 16  ;;  %v5120_v56 = vld [vmem:[%s6930_s1 + $0x1f0] sm:$0xff] }
 0x24b   : > { %v1978_v47 = vadd.f32 %v1919_v14, %v6211_v48  ;;  %v3127_v48 = vshll.u32 %v5246_v62, 16 }
 0x24c   : > { %1958 = vmatmul.bf16.gmra.mxu1 %v1810_v50  ;;  %2875 = vmatmul.bf16.gmra.mxu0 %v2745_v9  ;;  %v2948_v14 = vadd.f32 %v6505_v7, %v2913_v60  ;;  %v5128_v60 = vld [vmem:[%s6930_s1 + $0x230] sm:$0xff] }
 0x24d   : > { %v2328_v1 = vadd.f32 %v2269_v31, %v1978_v47  ;;  %3595 = vmatpush.bf16.msra.mxu2 %v5089_v35  ;;  %v3120_v31 = vunpack.c.l.b16 %v3094_v63  ;;  %3693 = vmatpush.bf16.msra.mxu3 %v5097_v17  ;;  %v3129_v8 = vrot.slane %v3127_v48, 1  ;;  %v6598_v47 = vld [vmem:[%s5402_s27 + $0x8c] sm:$0xf]  ;;  %v6610_v48 = vrot.slane %v3132_v26, 1 }
 0x24e   : > { %3271 = vmatmul.bf16.vlgmr.msrb.gmra.mxu2 %v5246_v62  ;;  %3474 = vmatpush.bf16.msra.mxu1 %v5083_v12  ;;  %v3406_v63 = vunpack.c.l.b16 %v3380_v39  ;;  %v3407_v17 = vunpack.c.l.b16 %v6598_v47  ;;  %v2980_v12 = vmax.f32 %v2948_v14, 0.0  ;;  %v5127_v39 = vld [vmem:[%s6930_s1 + $0x228] sm:$0xff] }
 0x24f   : > { %3365 = vmatmul.bf16.vlgmr.msrb.gmra.mxu3 %v3304_v2  ;;  %v6584_v5 = vadd.f32 %v2627_v10, %v2328_v1  ;;  %v5129_v10 = vld [vmem:[%s6930_s1 + $0x238] sm:$0xff]  ;;  %v6600_v62 = vpack.c.b16 %v3120_v31, %v3120_v31  ;;  %v5082_v2 = vld [vmem:[%s6930_s1 + $0xc8] sm:$0xff]  ;;  %v3130_v35 = vor.u32 %v3129_v8, %v3125_v23  ;;  %v5081_v23 = vld [vmem:[%s6930_s1 + $0xc0] sm:$0xff] }
 0x250   : > { %v5119_v8 = vld [vmem:[%s6930_s1 + $0x1e8] sm:$0xff] }
 0x251   : > { %v2274_v43 = vpop.f32.mrf.mxu2  ;;  %v2838_v32 = vpop.f32.mrf.mxu0  ;;  %3917 = vmatpush.bf16.msrb.mxu2 %v5121_v46  ;;  %4015 = vmatpush.bf16.msrb.mxu3 %v5129_v10  ;;  %v3135_v14 = vsel %vm371_vm0, %v3130_v35, %v6610_v48  ;;  %v5118_v35 = vld [vmem:[%s6930_s1 + $0x1e0] sm:$0xff] }
 0x252   : > { %v1921_v54 = vpop.f32.mrf.mxu1  ;;  %v2914_v50 = vadd.f32 %v2838_v32, %v6349_v59  ;;  %v2632_v9 = vpop.f32.mrf.mxu3  ;;  %v2746_v59 = vrot.slane %v6303_v52, 3  ;;  %3475 = vmatpush.bf16.msra.mxu1 %v5082_v2 }
 0x253   : > { %v1979_v0 = vadd.f32 %v1921_v54, %v6227_v40 }
 0x254   : > { %v2949_v40 = vadd.f32 %v6505_v7, %v2914_v50  ;;  %v6637_v50 = vpack.c.b16 %v3407_v17, %v3406_v63 }
 0x255   : > { %v2329_v1 = vadd.f32 %v2271_v3, %v1979_v0  ;;  %3918 = vmatpush.bf16.msrb.mxu2 %v5120_v56  ;;  %v3305_v3 = vrot.slane %v6600_v62, 1  ;;  %4016 = vmatpush.bf16.msrb.mxu3 %v5128_v60  ;;  %v6633_v0 = vld [vmem:[%s5402_s27 + $0x90] sm:$0xff]  ;;  %v5113_v56 = vld [vmem:[%s6930_s1 + $0x1b8] sm:$0xff]  ;;  %v5126_v60 = vld [vmem:[%s6930_s1 + $0x220] sm:$0xff] }
 0x256   : > { %v2981_v31 = vmax.f32 %v2949_v40, 0.0  ;;  %3476 = vmatpush.bf16.msra.mxu1 %v5081_v23  ;;  %v3611_v40 = vld [vmem:[%s5402_s27 + $0x88] sm:$0xc]  ;;  %v3516_v63 = vshll.u32 %v6637_v50, 16 }
 0x257   : > { %v6616_v46 = vadd.f32 %v2629_v41, %v2329_v1  ;;  %v2747_v41 = vsel %vm2724_vm5, %v2744_v49, %v2746_v59  ;;  %v3306_v2 = vsel %vm830_vm1, %v3303_v13, %v3305_v3  ;;  %v3521_v13 = vshrl.u32 %v6633_v0, 16 }
 0x258   : > { %v5142_v54 = vpack.c.bf16 %v2981_v31, %v2980_v12  ;;  %v5112_v31 = vld [vmem:[%s6930_s1 + $0x1b0] sm:$0xff]  ;;  %v3629_v23 = vunpack.c.l.b16 %v3611_v40  ;;  %v3492_v40 = vld [vmem:[%s5402_s27 + $0x98] sm:$0x3] }
 0x259   : > { %v2276_v32 = vpop.f32.mrf.mxu2  ;;  %v2841_v10 = vpop.f32.mrf.mxu0  ;;  %3919 = vmatpush.bf16.msrb.mxu2 %v5119_v8  ;;  %4017 = vmatpush.bf16.msrb.mxu3 %v5127_v39  ;;  %v5117_v8 = vld [vmem:[%s6930_s1 + $0x1d8] sm:$0xff]  ;;  %v3518_v39 = vrot.slane %v3516_v63, 2  ;;  %v5116_v63 = vld [vmem:[%s6930_s1 + $0x1d0] sm:$0xff]  ;;  %v3510_v47 = vunpack.c.l.b16 %v3492_v40 }
 0x25a   : > { %v1924_v26 = vpop.f32.mrf.mxu1  ;;  %5231 = vst [vmem:[%s6544_s25 + $0x8] sm:$0xff] %v5142_v54   ;;  %v2634_v49 = vpop.f32.mrf.mxu3  ;;  %v2915_v12 = vadd.f32 %v2841_v10, %v6368_v28  ;;  %v3136_v28 = vshrl.u32 %v6525_v11, 16 }
 0x25b   : > { %v1980_v22 = vadd.f32 %v1924_v26, %v6241_v21  ;;  %v3513_v21 = vshrl.u32 %v6637_v50, 16 }
 0x25c   : > { %2880 = vmatmul.bf16.gmra.mxu0 %v2747_v41  ;;  %3202 = vmatmul.bf16.vlgmr.msrb.gmra.mxu1 %v3135_v14  ;;  %v3140_v41 = vshll.u32 %v6600_v62, 16  ;;  %v3630_v62 = vpack.c.b16 %v3407_v17, %v3629_v23  ;;  %v5124_v17 = vld [vmem:[%s6930_s1 + $0x210] sm:$0xff] }
 0x25d   : > { %v2330_v1 = vadd.f32 %v2274_v43, %v1980_v22  ;;  %3798 = vmatpush.bf16.msrb.mxu1 %v5113_v56  ;;  %v3524_v43 = vshll.u32 %v6633_v0, 16  ;;  %3920 = vmatpush.bf16.msrb.mxu2 %v5118_v35  ;;  %v3515_v14 = vrot.slane %v3513_v21, 1  ;;  %v3523_v22 = vrot.slane %v3521_v13, 1  ;;  %v5111_v21 = vld [vmem:[%s6930_s1 + $0x1a8] sm:$0xff] }
 0x25e   : > { %3276 = vmatmul.bf16.gmra.mxu2 %v6525_v11  ;;  %4018 = vmatpush.bf16.msrb.mxu3 %v5126_v60  ;;  %v3138_v60 = vor.u32 %v3136_v28, %v6610_v48  ;;  %v5110_v48 = vld [vmem:[%s6930_s1 + $0x1a0] sm:$0xff]  ;;  %v5115_v28 = vld [vmem:[%s6930_s1 + $0x1c8] sm:$0xff] }
 0x25f   : > { %3370 = vmatmul.bf16.gmra.mxu3 %v3306_v2  ;;  %v6666_v3 = vadd.f32 %v2632_v9, %v2330_v1  ;;  %v5125_v9 = vld [vmem:[%s6930_s1 + $0x218] sm:$0xff]  ;;  %v2950_v2 = vadd.f32 %v6505_v7, %v2915_v12  ;;  %v3526_v11 = vrot.slane %v3524_v43, 2  ;;  %v3142_v12 = vrot.slane %v3140_v41, 1 }
 0x260   : > { %v3519_v43 = vor.u32 %v3518_v39, %v3515_v14 }
 0x261   : > { %v2279_v54 = vpop.f32.mrf.mxu2  ;;  %v2843_v10 = vpop.f32.mrf.mxu0  ;;  %3799 = vmatpush.bf16.msrb.mxu1 %v5112_v31  ;;  %3921 = vmatpush.bf16.msrb.mxu2 %v5117_v8  ;;  %v2982_v31 = vmax.f32 %v2950_v2, 0.0  ;;  %v6694_v8 = vor.u32 %v3526_v11, %v3523_v22  ;;  %v6711_v2 = vpack.c.b16 %v3510_v47, %v3510_v47 }
 0x262   : > { %v1926_v26 = vpop.f32.mrf.mxu1  ;;  %v2916_v35 = vadd.f32 %v2843_v10, %v6379_v44  ;;  %v2637_v1 = vpop.f32.mrf.mxu3  ;;  %4019 = vmatpush.bf16.msrb.mxu3 %v5125_v9  ;;  %v2748_v44 = vrot.slane %v6333_v51, 3  ;;  %v3632_v10 = vrot.slane %v6633_v0, 2  ;;  %v3143_v9 = vsel %vm371_vm0, %v3138_v60, %v3142_v12 }
 0x263   : > { %v1981_v56 = vadd.f32 %v1926_v26, %v6260_v25  ;;  %v3631_v26 = vrot.slane %v3630_v62, 2  ;;  %v3528_v40 = vsel %vm1419_vm2, %v3519_v43, %v6694_v8  ;;  %v5114_v62 = vld [vmem:[%s6930_s1 + $0x1c0] sm:$0xff] }
 0x264   : > { %v2951_v25 = vadd.f32 %v6505_v7, %v2916_v35 }
 0x265   : > { %v2331_v13 = vadd.f32 %v2276_v32, %v1981_v56  ;;  %3800 = vmatpush.bf16.msrb.mxu1 %v5111_v21  ;;  %3922 = vmatpush.bf16.msrb.mxu2 %v5116_v63  ;;  %v5123_v56 = vld [vmem:[%s6930_s1 + $0x208] sm:$0xff]  ;;  %v3633_v52 = vsel %vm1777_vm3, %v3631_v26, %v3632_v10  ;;  %v5122_v63 = vld [vmem:[%s6930_s1 + $0x200] sm:$0xff] }
 0x266   : > { %v2983_v23 = vmax.f32 %v2951_v25, 0.0  ;;  %4020 = vmatpush.bf16.msrb.mxu3 %v5124_v17  ;;  %v3533_v25 = vshll.u32 %v6711_v2, 16 }
 0x267   : > { %v6696_v32 = vadd.f32 %v2634_v49, %v2331_v13  ;;  %v2749_v49 = vsel %vm2724_vm5, %v2746_v59, %v2748_v44  ;;  %v5109_v59 = vld [vmem:[%s6930_s1 + $0x198] sm:$0xff] }
 0x268   : > { %v5147_v41 = vpack.c.bf16 %v2983_v23, %v2982_v31  ;;  %v6948_v31 = vld [vmem:[#allocation2_spill] sm:$0xff] }
 0x269   : > { %v2281_v14 = vpop.f32.mrf.mxu2  ;;  %v2846_v22 = vpop.f32.mrf.mxu0  ;;  %3801 = vmatpush.bf16.msrb.mxu1 %v5110_v48  ;;  %3923 = vmatpush.bf16.msrb.mxu2 %v5115_v28  ;;  %v3535_v28 = vrot.slane %v3533_v25, 2 }
 0x26a   : > { %v1929_v39 = vpop.f32.mrf.mxu1  ;;  %5232 = vst [vmem:[%s6544_s25 + $0x10] sm:$0xff] %v5147_v41   ;;  %v2639_v11 = vpop.f32.mrf.mxu3  ;;  %4021 = vmatpush.bf16.msrb.mxu3 %v5123_v56  ;;  %v2917_v13 = vadd.f32 %v2846_v22, %v6392_v61  ;;  %v3709_v41 = vld [vmem:[%s5402_s27 + $0x90] sm:$0xc]  ;;  %v3414_v56 = vrot.slane %v6637_v50, 1 }
 0x26b   : > { %v1982_v35 = vadd.f32 %v1929_v39, %v6271_v4  ;;  %v3530_v4 = vshrl.u32 %v6711_v2, 16  ;;  %v3710_v39 = vld [vmem:[%s5402_s27 + $0x94] sm:$0xf] }
 0x26c   : > { %2885 = vmatmul.bf16.gmra.mxu0 %v2749_v49  ;;  %3207 = vmatmul.bf16.gmra.mxu1 %v3143_v9  ;;  %v2952_v61 = vadd.f32 %v6505_v7, %v2917_v13  ;;  %v2750_v9 = vrot.slane %v6360_v24, 3 }
 0x26d   : > { %v2332_v21 = vadd.f32 %v2279_v54, %v1982_v35  ;;  %3802 = vmatpush.bf16.msrb.mxu1 %v5109_v59  ;;  %3924 = vmatpush.bf16.msrb.mxu2 %v5114_v62  ;;  %v5108_v54 = vld [vmem:[%s6930_s1 + $0x190] sm:$0xff]  ;;  %v3532_v17 = vrot.slane %v3530_v4, 1  ;;  %v3415_v35 = vrot.slane %v6633_v0, 1  ;;  %v5106_v4 = vld [vmem:[%s6930_s1 + $0x180] sm:$0xff] }
 0x26e   : > { %3596 = vmatmul.bf16.vlgmr.msra.gmra.mxu2 %v3528_v40  ;;  %4022 = vmatpush.bf16.msrb.mxu3 %v5122_v63  ;;  %v3735_v40 = vunpack.c.l.b16 %v3709_v41 }
 0x26f   : > { %3694 = vmatmul.bf16.vlgmr.msra.gmra.mxu3 %v3633_v52  ;;  %v6738_v60 = vadd.f32 %v2637_v1, %v2332_v21  ;;  %v5107_v1 = vld [vmem:[%s6930_s1 + $0x188] sm:$0xff]  ;;  %v2984_v52 = vmax.f32 %v2952_v61, 0.0  ;;  %v3536_v62 = vor.u32 %v3535_v28, %v3532_v17 }
 0x271   : > { %v2284_v12 = vpop.f32.mrf.mxu2  ;;  %v2848_v47 = vpop.f32.mrf.mxu0  ;;  %3803 = vmatpush.bf16.msrb.mxu1 %v5108_v54  ;;  %v2751_v54 = vsel %vm2724_vm5, %v2748_v44, %v2750_v9 }
 0x272   : > { %v1931_v43 = vpop.f32.mrf.mxu1  ;;  %v2918_v26 = vadd.f32 %v2848_v47, %v6406_v38  ;;  %v2642_v48 = vpop.f32.mrf.mxu3  ;;  %v3736_v38 = vunpack.c.l.b16 %v3710_v39  ;;  %v6949_v47 = vld [vmem:[#allocation3_spill] sm:$0xff] }
 0x273   : > { %v1983_v23 = vadd.f32 %v1931_v43, %v6948_v31  ;;  %v3537_v31 = vsel %vm1419_vm2, %v6694_v8, %v3536_v62 }
 0x274   : > { %v2953_v49 = vadd.f32 %v6505_v7, %v2918_v26  ;;  %v6769_v43 = vpack.c.b16 %v3736_v38, %v3735_v40  ;;  %v3940_v26 = vld [vmem:[%s5402_s27 + $0x90] sm:$0x8] }
 0x275   : > { %v2333_v22 = vadd.f32 %v2281_v14, %v1983_v23  ;;  %3804 = vmatpush.bf16.msrb.mxu1 %v5107_v1  ;;  %v3634_v14 = vrot.slane %v6711_v2, 2  ;;  %v6767_v2 = vld [vmem:[%s5402_s27 + $0x98] sm:$0xff] }
 0x276   : > { %v2985_v59 = vmax.f32 %v2953_v49, 0.0  ;;  %v3384_v23 = vld [vmem:[%s5402_s27 + $0x98] sm:$0x1]  ;;  %v3842_v41 = vshrl.u32 %v6769_v43, 16  ;;  %v3845_v39 = vshll.u32 %v6769_v43, 16  ;;  %v3850_v1 = vshrl.u32 %v6767_v2, 16 }
 0x277   : > { %v6752_v21 = vadd.f32 %v2639_v11, %v2333_v22  ;;  %v3416_v11 = vsel %vm830_vm1, %v3414_v56, %v3415_v35  ;;  %v3635_v51 = vsel %vm1777_vm3, %v3632_v10, %v3634_v14  ;;  %v3410_v28 = vunpack.c.l.b16 %v3384_v23 }
 0x278   : > { %v5152_v50 = vpack.c.bf16 %v2985_v59, %v2984_v52  ;;  %v3853_v8 = vshll.u32 %v6767_v2, 16  ;;  %v3958_v10 = vunpack.c.l.b16 %v3940_v26  ;;  %v3844_v59 = vrot.slane %v3842_v41, 2 }
 0x279   : > { %v2286_v63 = vpop.f32.mrf.mxu2  ;;  %v2851_v25 = vpop.f32.mrf.mxu0  ;;  %3805 = vmatpush.bf16.msrb.mxu1 %v5106_v4  ;;  %v3413_v52 = vpack.c.b16 %v3410_v28, %v3410_v28  ;;  %v3847_v62 = vrot.slane %v3845_v39, 3  ;;  %v3852_v14 = vrot.slane %v3850_v1, 2 }
 0x27a   : > { %v1934_v13 = vpop.f32.mrf.mxu1  ;;  %5233 = vst [vmem:[%s6544_s25 + $0x18] sm:$0xff] %v5152_v50   ;;  %v2644_v61 = vpop.f32.mrf.mxu3  ;;  %v2919_v22 = vadd.f32 %v2851_v25, %v6425_v57  ;;  %v3855_v25 = vrot.slane %v3853_v8, 3 }
 0x27b   : > { %v1984_v17 = vadd.f32 %v1934_v13, %v6949_v47  ;;  %v3848_v23 = vor.u32 %v3847_v62, %v3844_v59 }
 0x27c   : > { %2890 = vmatmul.bf16.gmra.mxu0 %v2751_v54  ;;  %3477 = vmatmul.bf16.vlgmr.msra.gmra.mxu1 %v3416_v11  ;;  %v2954_v4 = vadd.f32 %v6505_v7, %v2919_v22  ;;  %v3821_v54 = vld [vmem:[%s5402_s27 + $0xa0] sm:$0x7]  ;;  %v3959_v11 = vpack.c.b16 %v3736_v38, %v3958_v10  ;;  %v3856_v28 = vor.u32 %v3855_v25, %v3852_v14 }
 0x27d   : > { %v2334_v44 = vadd.f32 %v2284_v12, %v1984_v17  ;;  %v2752_v17 = vrot.slane %v6390_v42, 3 }
 0x27e   : > { %3601 = vmatmul.bf16.gmra.mxu2 %v3537_v31  ;;  %v3417_v31 = vrot.slane %v3413_v52, 1 }
 0x27f   : > { %3699 = vmatmul.bf16.gmra.mxu3 %v3635_v51  ;;  %v6785_v49 = vadd.f32 %v2642_v48, %v2334_v44  ;;  %v3839_v51 = vunpack.c.l.b16 %v3821_v54  ;;  %v2986_v44 = vmax.f32 %v2954_v4, 0.0  ;;  %v2753_v42 = vsel %vm2724_vm5, %v2750_v9, %v2752_v17 }
 0x280   : > { %v3418_v22 = vsel %vm830_vm1, %v3415_v35, %v3417_v31 }
 0x281   : > { %v2289_v12 = vpop.f32.mrf.mxu2  ;;  %v2853_v40 = vpop.f32.mrf.mxu0  ;;  %v3840_v8 = vpack.c.b16 %v3839_v51, %v3839_v51 }
 0x282   : > { %v1936_v56 = vpop.f32.mrf.mxu1  ;;  %v2920_v57 = vadd.f32 %v2853_v40, %v6437_v30  ;;  %v2647_v13 = vpop.f32.mrf.mxu3  ;;  %v3961_v30 = vrot.slane %v6767_v2, 3 }
 0x283   : > { %v1985_v50 = vadd.f32 %v1936_v56, %v6316_v15  ;;  %v3960_v15 = vrot.slane %v3959_v11, 3  ;;  %v3857_v56 = vsel %vm2366_vm4, %v3848_v23, %v3856_v28  ;;  %v3859_v24 = vshrl.u32 %v3840_v8, 16 }
 0x284   : > { %v2955_v47 = vadd.f32 %v6505_v7, %v2920_v57  ;;  %v3862_v0 = vshll.u32 %v3840_v8, 16  ;;  %v2754_v11 = vrot.slane %v6417_v34, 3 }
 0x285   : > { %v2335_v48 = vadd.f32 %v2286_v63, %v1985_v50  ;;  %v3962_v40 = vsel %vm2724_vm5, %v3960_v15, %v3961_v30 }
 0x286   : > { %v2987_v26 = vmax.f32 %v2955_v47, 0.0  ;;  %v3864_v25 = vrot.slane %v3862_v0, 3 }
 0x287   : > { %v6793_v41 = vadd.f32 %v2644_v61, %v2335_v48  ;;  %v3744_v48 = vrot.slane %v6767_v2, 2 }
 0x288   : > { %v5157_v39 = vpack.c.bf16 %v2987_v26, %v2986_v44 }
 0x289   : > { %v2291_v1 = vpop.f32.mrf.mxu2  ;;  %v2856_v63 = vpop.f32.mrf.mxu0 }
 0x28a   : > { %v1939_v38 = vpop.f32.mrf.mxu1  ;;  %5234 = vst [vmem:[%s6544_s25 + $0x20] sm:$0xff] %v5157_v39   ;;  %v2649_v10 = vpop.f32.mrf.mxu3  ;;  %v2921_v9 = vadd.f32 %v2856_v63, %v6450_v45  ;;  %v2755_v39 = vsel %vm2724_vm5, %v2752_v17, %v2754_v11 }
 0x28b   : > { %v1986_v61 = vadd.f32 %v1939_v38, %v6327_v19  ;;  %v3861_v19 = vrot.slane %v3859_v24, 2  ;;  %v3713_v38 = vld [vmem:[%s5402_s27 + $0xa0] sm:$0x3] }
 0x28c   : > { %2895 = vmatmul.bf16.gmra.mxu0 %v2753_v42  ;;  %3482 = vmatmul.bf16.gmra.mxu1 %v3418_v22  ;;  %v2956_v4 = vadd.f32 %v6505_v7, %v2921_v9  ;;  %v3739_v22 = vunpack.c.l.b16 %v3713_v38 }
 0x28d   : > { %v2336_v52 = vadd.f32 %v2289_v12, %v1986_v61  ;;  %v3865_v23 = vor.u32 %v3864_v25, %v3861_v19 }
 0x28e   : > { %3925 = vmatmul.bf16.vlgmr.msrb.gmra.mxu2 %v3857_v56  ;;  %v2988_v47 = vmax.f32 %v2956_v4, 0.0 }
 0x28f   : > { %4023 = vmatmul.bf16.vlgmr.msrb.gmra.mxu3 %v3962_v40  ;;  %v6807_v59 = vadd.f32 %v2647_v13, %v2336_v52  ;;  %v3743_v13 = vrot.slane %v6769_v43, 2  ;;  %v3866_v2 = vsel %vm2366_vm4, %v3856_v28, %v3865_v23 }
 0x291   : > { %v2294_v35 = vpop.f32.mrf.mxu2  ;;  %v2858_v14 = vpop.f32.mrf.mxu0 }
 0x292   : > { %v1941_v62 = vpop.f32.mrf.mxu1  ;;  %v2922_v12 = vadd.f32 %v2858_v14, %v6475_v37  ;;  %v2652_v57 = vpop.f32.mrf.mxu3 }
 0x293   : > { %v1987_v50 = vadd.f32 %v1941_v62, %v6340_v6  ;;  %v3963_v6 = vrot.slane %v3840_v8, 3 }
 0x294   : > { %v2957_v45 = vadd.f32 %v6505_v7, %v2922_v12 }
 0x295   : > { %v2337_v54 = vadd.f32 %v2291_v1, %v1987_v50  ;;  %v3745_v1 = vsel %vm1777_vm3, %v3743_v13, %v3744_v48  ;;  %v3964_v63 = vsel %vm2724_vm5, %v3961_v30, %v3963_v6 }
 0x296   : > { %v2989_v31 = vmax.f32 %v2957_v45, 0.0 }
 0x297   : > { %v6816_v51 = vadd.f32 %v2649_v10, %v2337_v54 }
 0x298   : > { %v5162_v37 = vpack.c.bf16 %v2989_v31, %v2988_v47 }
 0x299   : > { %v2296_v44 = vpop.f32.mrf.mxu2  ;;  %v2861_v15 = vpop.f32.mrf.mxu0 }
 0x29a   : > { %v1944_v26 = vpop.f32.mrf.mxu1  ;;  %5235 = vst [vmem:[%s6544_s25 + $0x28] sm:$0xff] %v5162_v37   ;;  %v2654_v43 = vpop.f32.mrf.mxu3  ;;  %v2923_v8 = vadd.f32 %v2861_v15, %v6510_v55  ;;  %v2756_v55 = vrot.slane %v6448_v27, 3 }
 0x29b   : > { %v1988_v34 = vadd.f32 %v1944_v26, %v6354_v53  ;;  %v3742_v53 = vpack.c.b16 %v3739_v22, %v3739_v22 }
 0x29c   : > { %2900 = vmatmul.bf16.gmra.mxu0 %v2755_v39  ;;  %3806 = vmatmul.bf16.vlgmr.msrb.gmra.mxu1 %v3745_v1  ;;  %v2958_v40 = vadd.f32 %v6505_v7, %v2923_v8 }
 0x29d   : > { %v2338_v42 = vadd.f32 %v2294_v35, %v1988_v34  ;;  %v3746_v0 = vrot.slane %v3742_v53, 2 }
 0x29e   : > { %3930 = vmatmul.bf16.gmra.mxu2 %v3866_v2  ;;  %v2990_v35 = vmax.f32 %v2958_v40, 0.0 }
 0x29f   : > { %4028 = vmatmul.bf16.gmra.mxu3 %v3964_v63  ;;  %v6826_v17 = vadd.f32 %v2652_v57, %v2338_v42  ;;  %v3747_v57 = vsel %vm1777_vm3, %v3744_v48, %v3746_v0 }
 0x2a1   : > { %v2299_v61 = vpop.f32.mrf.mxu2  ;;  %v2863_v56 = vpop.f32.mrf.mxu0 }
 0x2a2   : > { %v1946_v10 = vpop.f32.mrf.mxu1  ;;  %v2924_v30 = vadd.f32 %v2863_v56, %v6539_v33  ;;  %v2657_v52 = vpop.f32.mrf.mxu3 }
 0x2a3   : > { %v1989_v28 = vadd.f32 %v1946_v10, %v6373_v58  ;;  %v2757_v58 = vsel %vm2724_vm5, %v2754_v11, %v2756_v55 }
 0x2a4   : > { %v2959_v9 = vadd.f32 %v6505_v7, %v2924_v30 }
 0x2a5   : > { %v2339_v24 = vadd.f32 %v2296_v44, %v1989_v28 }
 0x2a6   : > { %v2991_v62 = vmax.f32 %v2959_v9, 0.0 }
 0x2a7   : > { %v6833_v14 = vadd.f32 %v2654_v43, %v2339_v24 }
 0x2a8   : > { %v5167_v19 = vpack.c.bf16 %v2991_v62, %v2990_v35 }
 0x2a9   : > { %v2301_v4 = vpop.f32.mrf.mxu2  ;;  %v2866_v12 = vpop.f32.mrf.mxu0 }
 0x2aa   : > { %v1949_v50 = vpop.f32.mrf.mxu1  ;;  %5236 = vst [vmem:[%s6544_s25 + $0x30] sm:$0xff] %v5167_v19   ;;  %v2659_v25 = vpop.f32.mrf.mxu3  ;;  %v2925_v27 = vadd.f32 %v2866_v12, %v6584_v5 }
 0x2ab   : > { %v1990_v33 = vadd.f32 %v1949_v50, %v6384_v20 }
 0x2ac   : > { %2905 = vmatmul.bf16.gmra.mxu0 %v2757_v58  ;;  %3811 = vmatmul.bf16.gmra.mxu1 %v3747_v57  ;;  %v2960_v23 = vadd.f32 %v6505_v7, %v2925_v27 }
 0x2ad   : > { %v2340_v54 = vadd.f32 %v2299_v61, %v1990_v33  ;;  %v6950_v61 = vld [vmem:[#allocation4_spill] sm:$0xff] }
 0x2ae   : > { %v2992_v44 = vmax.f32 %v2960_v23, 0.0 }
 0x2af   : > { %v6840_v45 = vadd.f32 %v2657_v52, %v2340_v54 }
 0x2b1   : > { %v2304_v13 = vpop.f32.mrf.mxu2  ;;  %v2868_v31 = vpop.f32.mrf.mxu0 }
 0x2b2   : > { %v1951_v47 = vpop.f32.mrf.mxu1  ;;  %v2926_v48 = vadd.f32 %v2868_v31, %v6616_v46  ;;  %v2662_v6 = vpop.f32.mrf.mxu3 }
 0x2b3   : > { %v1991_v11 = vadd.f32 %v1951_v47, %v6397_v18 }
 0x2b4   : > { %v2961_v37 = vadd.f32 %v6505_v7, %v2926_v48 }
 0x2b5   : > { %v2341_v20 = vadd.f32 %v2301_v4, %v1991_v11 }
 0x2b6   : > { %v2993_v26 = vmax.f32 %v2961_v37, 0.0 }
 0x2b7   : > { %v6846_v15 = vadd.f32 %v2659_v25, %v2341_v20 }
 0x2b8   : > { %v5172_v5 = vpack.c.bf16 %v2993_v26, %v2992_v44 }
 0x2b9   : > { %v2306_v39 = vpop.f32.mrf.mxu2  ;;  %v2871_v34 = vpop.f32.mrf.mxu0 }
 0x2ba   : > { %v1954_v1 = vpop.f32.mrf.mxu1  ;;  %5237 = vst [vmem:[%s6544_s25 + $0x38] sm:$0xff] %v5172_v5   ;;  %v2664_v2 = vpop.f32.mrf.mxu3  ;;  %v2927_v18 = vadd.f32 %v2871_v34, %v6666_v3 }
 0x2bb   : > { %v1992_v43 = vadd.f32 %v1954_v1, %v6411_v16 }
 0x2bc   : > { %v2962_v8 = vadd.f32 %v6505_v7, %v2927_v18 }
 0x2bd   : > { %v2342_v38 = vadd.f32 %v2304_v13, %v1992_v43 }
 0x2be   : > { %v2994_v28 = vmax.f32 %v2962_v8, 0.0 }
 0x2bf   : > { %v6851_v46 = vadd.f32 %v2662_v6, %v2342_v38 }
 0x2c1   : > { %v2309_v63 = vpop.f32.mrf.mxu2  ;;  %v2873_v22 = vpop.f32.mrf.mxu0 }
 0x2c2   : > { %v1956_v42 = vpop.f32.mrf.mxu1  ;;  %v2928_v56 = vadd.f32 %v2873_v22, %v6696_v32  ;;  %v2667_v53 = vpop.f32.mrf.mxu3 }
 0x2c3   : > { %v1993_v10 = vadd.f32 %v1956_v42, %v6950_v61 }
 0x2c4   : > { %v2963_v16 = vadd.f32 %v6505_v7, %v2928_v56 }
 0x2c5   : > { %v2343_v40 = vadd.f32 %v2306_v39, %v1993_v10 }
 0x2c6   : > { %v2995_v30 = vmax.f32 %v2963_v16, 0.0 }
 0x2c7   : > { %v6857_v52 = vadd.f32 %v2664_v2, %v2343_v40 }
 0x2c8   : > { %v5177_v3 = vpack.c.bf16 %v2995_v30, %v2994_v28 }
 0x2c9   : > { %v2311_v24 = vpop.f32.mrf.mxu2  ;;  %v2876_v55 = vpop.f32.mrf.mxu0 }
 0x2ca   : > { %v1959_v9 = vpop.f32.mrf.mxu1  ;;  %5238 = vst [vmem:[%s6544_s25 + $0x40] sm:$0xff] %v5177_v3   ;;  %v2669_v35 = vpop.f32.mrf.mxu3  ;;  %v2929_v19 = vadd.f32 %v2876_v55, %v6738_v60 }
 0x2cb   : > { %v1994_v0 = vadd.f32 %v1959_v9, %v6442_v36 }
 0x2cc   : > { %v2964_v58 = vadd.f32 %v6505_v7, %v2929_v19 }
 0x2cd   : > { %v2344_v62 = vadd.f32 %v2309_v63, %v1994_v0 }
 0x2ce   : > { %v2996_v27 = vmax.f32 %v2964_v58, 0.0 }
 0x2cf   : > { %v6862_v32 = vadd.f32 %v2667_v53, %v2344_v62 }
 0x2d1   : > { %v6864_v4 = vpop.f32.mrf.mxu2  ;;  %v2878_v12 = vpop.f32.mrf.mxu0 }
 0x2d2   : > { %v1961_v50 = vpop.f32.mrf.mxu1  ;;  %v2930_v33 = vadd.f32 %v2878_v12, %v6752_v21  ;;  %v3366_v25 = vpop.f32.mrf.mxu3 }
 0x2d3   : > { %v1995_v57 = vadd.f32 %v1961_v50, %v6461_v29 }
 0x2d4   : > { %v2965_v36 = vadd.f32 %v6505_v7, %v2930_v33 }
 0x2d5   : > { %v2345_v54 = vadd.f32 %v2311_v24, %v1995_v57 }
 0x2d6   : > { %v2997_v13 = vmax.f32 %v2965_v36, 0.0 }
 0x2d7   : > { %v6870_v60 = vadd.f32 %v2669_v35, %v2345_v54 }
 0x2d8   : > { %v5182_v47 = vpack.c.bf16 %v2997_v13, %v2996_v27 }
 0x2d9   : > { %v3274_v31 = vpop.f32.mrf.mxu2  ;;  %v2881_v23 = vpop.f32.mrf.mxu0 }
 0x2da   : > { %v3203_v11 = vpop.f32.mrf.mxu1  ;;  %5239 = vst [vmem:[%s6544_s25 + $0x48] sm:$0xff] %v5182_v47   ;;  %v3368_v48 = vpop.f32.mrf.mxu3  ;;  %v2931_v6 = vadd.f32 %v2881_v23, %v6785_v49 }
 0x2db   : > { %v3273_v33 = vadd.f32 %v6864_v4, %v3203_v11 }
 0x2dc   : > { %v2966_v37 = vadd.f32 %v6505_v7, %v2931_v6 }
 0x2dd   : > { %v3376_v36 = vadd.f32 %v3366_v25, %v3273_v33 }
 0x2de   : > { %v2998_v39 = vmax.f32 %v2966_v37, 0.0 }
 0x2e1   : > { %v6874_v29 = vpop.f32.mrf.mxu2  ;;  %v2883_v21 = vpop.f32.mrf.mxu0 }
 0x2e2   : > { %v3205_v20 = vpop.f32.mrf.mxu1  ;;  %v2932_v44 = vadd.f32 %v2883_v21, %v6793_v41  ;;  %v6878_v26 = vpop.f32.mrf.mxu3 }
 0x2e3   : > { %v3275_v23 = vadd.f32 %v3274_v31, %v3205_v20 }
 0x2e4   : > { %v2967_v5 = vadd.f32 %v6505_v7, %v2932_v44 }
 0x2e5   : > { %v3377_v11 = vadd.f32 %v3368_v48, %v3275_v23 }
 0x2e6   : > { %v2999_v1 = vmax.f32 %v2967_v5, 0.0 }
 0x2e8   : > { %v5187_v34 = vpack.c.bf16 %v2999_v1, %v2998_v39 }
 0x2e9   : > { %v6881_v43 = vpop.f32.mrf.mxu2  ;;  %v2886_v2 = vpop.f32.mrf.mxu0 }
 0x2ea   : > { %v3208_v38 = vpop.f32.mrf.mxu1  ;;  %5240 = vst [vmem:[%s6544_s25 + $0x50] sm:$0xff] %v5187_v34   ;;  %v6884_v49 = vpop.f32.mrf.mxu3  ;;  %v2933_v18 = vadd.f32 %v2886_v2, %v6807_v59 }
 0x2eb   : > { %v3278_v31 = vadd.f32 %v6874_v29, %v3208_v38  ;;  %v5321_v29 = vld [vmem:[%s6931_s2] ss:$0 sm:$0xff] }
 0x2ec   : > { %v2968_v22 = vadd.f32 %v6505_v7, %v2933_v18 }
 0x2ee   : > { %v3000_v56 = vmax.f32 %v2968_v22, 0.0 }
 0x2f1   : > { %v3597_v63 = vpop.f32.mrf.mxu2  ;;  %v2888_v42 = vpop.f32.mrf.mxu0 }
 0x2f2   : > { %v3210_v41 = vpop.f32.mrf.mxu1  ;;  %v2934_v8 = vadd.f32 %v2888_v42, %v6816_v51  ;;  %v3695_v61 = vpop.f32.mrf.mxu3 }
 0x2f4   : > { %v2969_v10 = vadd.f32 %v6505_v7, %v2934_v8 }
 0x2f6   : > { %v3001_v53 = vmax.f32 %v2969_v10, 0.0 }
 0x2f8   : > { %v5192_v40 = vpack.c.bf16 %v3001_v53, %v3000_v56  ;;  %v3280_v56 = vadd.f32 %v6881_v43, %v3210_v41 }
 0x2f9   : > { %v3599_v16 = vpop.f32.mrf.mxu2  ;;  %v2891_v28 = vpop.f32.mrf.mxu0 }
 0x2fa   : > { %v3478_v30 = vpop.f32.mrf.mxu1  ;;  %5241 = vst [vmem:[%s6544_s25 + $0x58] sm:$0xff] %v5192_v40   ;;  %v3697_v3 = vpop.f32.mrf.mxu3  ;;  %v2935_v59 = vadd.f32 %v2891_v28, %v6826_v17 }
 0x2fb   : > { %v3488_v13 = vadd.f32 %v3478_v30, %v3376_v36 }
 0x2fc   : > { %v2970_v0 = vadd.f32 %v6505_v7, %v2935_v59  ;;  %v3379_v59 = vadd.f32 %v6884_v49, %v3280_v56 }
 0x2fd   : > { %v3607_v37 = vadd.f32 %v3597_v63, %v3488_v13 }
 0x2fe   : > { %v3002_v19 = vmax.f32 %v2970_v0, 0.0 }
 0x301   : > { %v3602_v24 = vpop.f32.mrf.mxu2  ;;  %v2893_v9 = vpop.f32.mrf.mxu0 }
 0x302   : > { %v3480_v55 = vpop.f32.mrf.mxu1  ;;  %v2936_v51 = vadd.f32 %v2893_v9, %v6833_v14  ;;  %v3700_v35 = vpop.f32.mrf.mxu3 }
 0x303   : > { %v3489_v25 = vadd.f32 %v3480_v55, %v3377_v11 }
 0x304   : > { %v2971_v62 = vadd.f32 %v6505_v7, %v2936_v51 }
 0x305   : > { %v3608_v42 = vadd.f32 %v3599_v16, %v3489_v25 }
 0x306   : > { %v3003_v50 = vmax.f32 %v2971_v62, 0.0 }
 0x307   : > { %v3706_v10 = vadd.f32 %v3697_v3, %v3608_v42 }
 0x308   : > { %v5197_v12 = vpack.c.bf16 %v3003_v50, %v3002_v19 }
 0x309   : > { %v2896_v58 = vpop.f32.mrf.mxu0  ;;  %v3604_v54 = vpop.f32.mrf.mxu2 }
 0x30a   : > { %v3483_v57 = vpop.f32.mrf.mxu1  ;;  %5242 = vst [vmem:[%s6544_s25 + $0x60] sm:$0xff] %v5197_v12   ;;  %v6897_v17 = vpop.f32.mrf.mxu3  ;;  %v2937_v27 = vadd.f32 %v2896_v58, %v6840_v45  ;;  %v3705_v45 = vadd.f32 %v3695_v61, %v3607_v37 }
 0x30c   : > { %v2972_v6 = vadd.f32 %v6505_v7, %v2937_v27 }
 0x30e   : > { %v3004_v5 = vmax.f32 %v2972_v6, 0.0 }
 0x311   : > { %v2898_v47 = vpop.f32.mrf.mxu0  ;;  %v3926_v4 = vpop.f32.mrf.mxu2 }
 0x312   : > { %v3485_v14 = vpop.f32.mrf.mxu1  ;;  %v2938_v21 = vadd.f32 %v2898_v47, %v6846_v15  ;;  %v4024_v1 = vpop.f32.mrf.mxu3  ;;  %v3378_v15 = vadd.f32 %v6878_v26, %v3278_v31 }
 0x313   : > { %v3491_v55 = vadd.f32 %v3485_v14, %v3379_v59 }
 0x314   : > { %v2973_v44 = vadd.f32 %v6505_v7, %v2938_v21  ;;  %v3490_v48 = vadd.f32 %v3483_v57, %v3378_v15 }
 0x315   : > { %v3610_v33 = vadd.f32 %v3604_v54, %v3491_v55 }
 0x316   : > { %v3005_v39 = vmax.f32 %v2973_v44, 0.0  ;;  %v3609_v28 = vadd.f32 %v3602_v24, %v3490_v48 }
 0x317   : > { %v3708_v13 = vadd.f32 %v6897_v17, %v3610_v33 }
 0x318   : > { %v5202_v34 = vpack.c.bf16 %v3005_v39, %v3004_v5  ;;  %v3707_v19 = vadd.f32 %v3700_v35, %v3609_v28 }
 0x319   : > { %v2901_v2 = vpop.f32.mrf.mxu0  ;;  %v3928_v22 = vpop.f32.mrf.mxu2 }
 0x31a   : > { %v3807_v18 = vpop.f32.mrf.mxu1  ;;  %5243 = vst [vmem:[%s6544_s25 + $0x68] sm:$0xff] %v5202_v34   ;;  %v2939_v63 = vadd.f32 %v2901_v2, %v6851_v46  ;;  %v4026_v8 = vpop.f32.mrf.mxu3 }
 0x31b   : > { %v3817_v20 = vadd.f32 %v3807_v18, %v3705_v45 }
 0x31c   : > { %v2974_v38 = vadd.f32 %v5321_v29, %v2939_v63 }
 0x31d   : > { %v3936_v7 = vadd.f32 %v3926_v4, %v3817_v20 }
 0x31e   : > { %v3006_v3 = vmax.f32 %v2974_v38, 0.0 }
 0x31f   : > { %v4034_v40 = vadd.f32 %v4024_v1, %v3936_v7 }
 0x321   : > { %v2903_v53 = vpop.f32.mrf.mxu0  ;;  %v4038_v9 = vadd.f32 %v5321_v29, %v4034_v40  ;;  %v3931_v62 = vpop.f32.mrf.mxu2 }
 0x322   : > { %v3809_v61 = vpop.f32.mrf.mxu1  ;;  %v2940_v16 = vadd.f32 %v2903_v53, %v6857_v52  ;;  %v4029_v57 = vpop.f32.mrf.mxu3 }
 0x323   : > { %v3818_v26 = vadd.f32 %v3809_v61, %v3706_v10  ;;  %v4042_v52 = vmax.f32 %v4038_v9, 0.0 }
 0x324   : > { %v2975_v46 = vadd.f32 %v5321_v29, %v2940_v16 }
 0x325   : > { %v3937_v30 = vadd.f32 %v3928_v22, %v3818_v26 }
 0x326   : > { %v3007_v43 = vmax.f32 %v2975_v46, 0.0 }
 0x327   : > { %v4035_v41 = vadd.f32 %v4026_v8, %v3937_v30 }
 0x328   : > { %v5207_v0 = vpack.c.bf16 %v3007_v43, %v3006_v3 }
 0x329   : > { %v4039_v51 = vadd.f32 %v5321_v29, %v4035_v41  ;;  %v2906_v50 = vpop.f32.mrf.mxu0  ;;  %v3933_v37 = vpop.f32.mrf.mxu2 }
 0x32a   : > { %v3812_v12 = vpop.f32.mrf.mxu1  ;;  %5244 = vst [vmem:[%s6544_s25 + $0x70] sm:$0xff] %v5207_v0   ;;  %v2941_v49 = vadd.f32 %v2906_v50, %v6862_v32  ;;  %v4031_v54 = vpop.f32.mrf.mxu3 }
 0x32b   : > { %v4043_v24 = vmax.f32 %v4039_v51, 0.0  ;;  %v3819_v58 = vadd.f32 %v3812_v12, %v3707_v19 }
 0x32c   : > { %v2976_v23 = vadd.f32 %v5321_v29, %v2941_v49 }
 0x32d   : > { %v5221_v36 = vpack.c.bf16 %v4043_v24, %v4042_v52  ;;  %v3938_v27 = vadd.f32 %v3931_v62, %v3819_v58 }
 0x32e   : > { %v3008_v11 = vmax.f32 %v2976_v23, 0.0 }
 0x32f   : > { %5250 = vst [vmem:[%s6544_s25 + $0x80] sm:$0xff] %v5221_v36   ;;  %v4036_v35 = vadd.f32 %v4029_v57, %v3938_v27 }
 0x331   : > { %v2908_v47 = vpop.f32.mrf.mxu0  ;;  %v4040_v5 = vadd.f32 %v5321_v29, %v4036_v35 }
 0x332   : > { %v3814_v14 = vpop.f32.mrf.mxu1  ;;  %v2942_v6 = vadd.f32 %v2908_v47, %v6870_v60 }
 0x333   : > { %v3820_v21 = vadd.f32 %v3814_v14, %v3708_v13  ;;  %v4044_v17 = vmax.f32 %v4040_v5, 0.0 }
 0x334   : > { %v2977_v44 = vadd.f32 %v5321_v29, %v2942_v6 }
 0x335   : > { %v3939_v4 = vadd.f32 %v3933_v37, %v3820_v21 }
 0x336   : > { %v3009_v39 = vmax.f32 %v2977_v44, 0.0 }
 0x337   : > { %v4037_v32 = vadd.f32 %v4031_v54, %v3939_v4 }
 0x338   : > { %v5212_v1 = vpack.c.bf16 %v3009_v39, %v3008_v11 }
 0x339   : > { %v4041_v25 = vadd.f32 %v5321_v29, %v4037_v32 }
 0x33a   : > { %5245 = vst [vmem:[%s6544_s25 + $0x78] sm:$0xff] %v5212_v1  }
 0x33b   : > { %v4045_v34 = vmax.f32 %v4041_v25, 0.0 }
 0x33d   : > { %v5226_v45 = vpack.c.bf16 %v4045_v34, %v4044_v17 }
 0x33f   : > { %5251 = vst [vmem:[%s6544_s25 + $0x88] sm:$0xff] %v5226_v45  }
 0x340 PF: > { %s13_s14 = sadd.s32 1, %s5344_s14   ;;  %s6951_s12 = smov %s5340_s13 }
 0x341   : > { %p10_p5 = scmp.ge.s32.totalorder %s13_s14, 4   ;;  %s6952_s13 = smov %s6954_s15 }
 0x343   :  { %12 = sbr.rel (!%p10_p5) target bundleno = 2 (0x2), region = 68 }

// kernel: fwd.7
= control target key start
LH: loop header
LB: loop body
LE: loop exit
PB: predicated region body
PF: predicated region fallthrough
CT: control target
= control target key end

     0   :  { %s931_s12 = smov 0   ;;  %s933_s13 = smov 0   ;;  %s1106_s0 = inlined_call_operand.vmem [shape: bf16[128,128], index: 0, kind: input, shape index: {}]   ;;  %s1107_s1 = inlined_call_operand.vmem [shape: bf16[128,256], index: 1, kind: input, shape index: {}]   ;;  %s1108_s2 = inlined_call_operand.vmem [shape: f32[1,256], index: 2, kind: input, shape index: {}]   ;;  %s1109_s3 = inlined_call_operand.vmem [shape: f32[128,256], index: 3, kind: output, shape index: {}]  }
   0x1   :  { %s935_s14 = smov 0   ;;  %s937_s15 = smov 0  }
   0x2   :  { %s939_s16 = smov 0  }
   0x3 LB: > { %s22_s17 = sadd.s32 1, %s905_s15  ;;  %s712_s18 = sadd.s32 4294967295, %s909_s16   ;;  %s909_s16 = sphi %s939_s16, %s13_s16   ;;  %s905_s15 = sphi %s937_s15, %s1114_s15   ;;  %s901_s14 = sphi %s935_s14, %s1113_s14   ;;  %s897_s13 = sphi %s933_s13, %s1112_s13   ;;  %s893_s12 = sphi %s931_s12, %s1111_s12  }
   0x4   : > { %p23_p0 = scmp.ge.s32.totalorder %s22_s17, 2  ;;  %p65_p1 = scmp.ne.s32.totalorder %s897_s13, %s893_s12 }
   0x5   : > { %p66_p2 = scmp.eq.s32.totalorder %s909_s16, 0  ;;  %p123_p4 = scmp.eq.s32.totalorder %s712_s18, 1 }
   0x6   : > { %s1116_s17 = smov (%p23_p0, %s22_s17), 0  ;;  %s58_s20 = sadd.s32 1, %s897_s13 }
   0x7   : > { %p67_p3 = por %p66_p2, %p65_p1  ;;  %s55_s19 = ssub.s32 %s905_s15, %s1116_s17 }
   0x8   : > { %p56_p5 = scmp.eq.s32.totalorder %s55_s19, 0  ;;  %p966_p6 = por %p123_p4, %p65_p1 }
   0x9   : > { %p716_p7 = scmp.ge.s32.totalorder %s909_s16, 2 }
   0xa   : > { %s971_s22 = scalar_select %p56_p5, %s897_s13, %s58_s20  }
   0xb   : > { %154 = sbr.rel (%p716_p7) target bundleno = 36 (0x24), region = 20 }
  0x10   : > { %157 = sbr.rel (!%p67_p3) target bundleno = 36 (0x24), region = 24  ;;  %s159_s23 = sand.u32 (%p67_p3), 1, %s897_s13  }
  0x11   : > { %s718_s24 = sshll.u32 (%p67_p3), %s905_s15, 2  ;;  %s717_s25 = sshll.u32 (%p67_p3), %s159_s23, 6 }
  0x12   : > { %s979_s28 = scalar_lea.vmem (%p67_p3), %s1107_s1, %s718_s24  ;;  %s161_s29 = scalar_lea.vmem (%p67_p3), [#allocation2], %s717_s25 }
  0x13   : > { %v180_v0 = vld [vmem:[%s979_s28] sm:$0xf] (%p67_p3)  ;;  %v182_v1 = vld [vmem:[%s979_s28 + $0x8] sm:$0xf] (%p67_p3)  ;;  %v184_v2 = vld [vmem:[%s979_s28 + $0x10] sm:$0xf] (%p67_p3) }
  0x14   : > { %181 = vst [vmem:[%s161_s29] sm:$0xf] (%p67_p3), %v180_v0  ;;  %v186_v3 = vld [vmem:[%s979_s28 + $0x18] sm:$0xf] (%p67_p3)  ;;  %v188_v4 = vld [vmem:[%s979_s28 + $0x20] sm:$0xf] (%p67_p3) }
  0x15   : > { %183 = vst [vmem:[%s161_s29 + $0x4] sm:$0xf] %v182_v1  ;;  %v190_v5 = vld [vmem:[%s979_s28 + $0x28] sm:$0xf]  ;;  %v192_v6 = vld [vmem:[%s979_s28 + $0x30] sm:$0xf] }
  0x16   : > { %185 = vst [vmem:[%s161_s29 + $0x8] sm:$0xf] %v184_v2  ;;  %v194_v7 = vld [vmem:[%s979_s28 + $0x38] sm:$0xf]  ;;  %v196_v8 = vld [vmem:[%s979_s28 + $0x40] sm:$0xf] }
  0x17   : > { %187 = vst [vmem:[%s161_s29 + $0xc] sm:$0xf] %v186_v3  ;;  %v198_v9 = vld [vmem:[%s979_s28 + $0x48] sm:$0xf]  ;;  %v200_v10 = vld [vmem:[%s979_s28 + $0x50] sm:$0xf] }
  0x18   : > { %189 = vst [vmem:[%s161_s29 + $0x10] sm:$0xf] %v188_v4  ;;  %v202_v11 = vld [vmem:[%s979_s28 + $0x58] sm:$0xf]  ;;  %v204_v12 = vld [vmem:[%s979_s28 + $0x60] sm:$0xf] }
  0x19   : > { %191 = vst [vmem:[%s161_s29 + $0x14] sm:$0xf] %v190_v5  ;;  %v206_v13 = vld [vmem:[%s979_s28 + $0x68] sm:$0xf]  ;;  %v208_v14 = vld [vmem:[%s979_s28 + $0x70] sm:$0xf] }
  0x1a   : > { %193 = vst [vmem:[%s161_s29 + $0x18] sm:$0xf] %v192_v6  ;;  %v210_v15 = vld [vmem:[%s979_s28 + $0x78] sm:$0xf] }
  0x1b   : > { %195 = vst [vmem:[%s161_s29 + $0x1c] sm:$0xf] %v194_v7 }
  0x1c   : > { %197 = vst [vmem:[%s161_s29 + $0x20] sm:$0xf] %v196_v8 }
  0x1d   : > { %199 = vst [vmem:[%s161_s29 + $0x24] sm:$0xf] %v198_v9 }
  0x1e   : > { %201 = vst [vmem:[%s161_s29 + $0x28] sm:$0xf] %v200_v10 }
  0x1f   : > { %203 = vst [vmem:[%s161_s29 + $0x2c] sm:$0xf] %v202_v11 }
  0x20   : > { %205 = vst [vmem:[%s161_s29 + $0x30] sm:$0xf] %v204_v12 }
  0x21   : > { %207 = vst [vmem:[%s161_s29 + $0x34] sm:$0xf] %v206_v13 }
  0x22   : > { %209 = vst [vmem:[%s161_s29 + $0x38] sm:$0xf] %v208_v14 }
  0x23   : > { %211 = vst [vmem:[%s161_s29 + $0x3c] sm:$0xf] %v210_v15 }
  0x24 PF: > { %p719_p8 = scmp.ge.s32.totalorder %s909_s16, 1  ;;  %p272_p9 = scmp.lt.s32.totalorder %s909_s16, 3 }
  0x26   : > { %p273_p10 = pnand %p719_p8, %p272_p9 }
  0x27   : > { %s279_s30 = sand.u32 (!%p273_p10), 1, %s893_s12   ;;  %p315_p11 = scmp.lt.s32.totalorder (!%p273_p10), %s901_s14, 1 }
  0x28   : > { %276 = sbr.rel (%p273_p10) target bundleno = 246 (0xf6), region = 69  ;;  %s720_s4 = sshll.u32 (!%p273_p10), %s279_s30, 6 }
  0x29   : > { %s1003_s5 = scalar_lea.vmem (!%p273_p10), [#allocation2], %s720_s4  ;;  %s721_s10 = sshll.u32 (!%p273_p10), %s279_s30, 7 }
  0x2a   : > { %s1051_s19 = scalar_lea.vmem (!%p273_p10), [#allocation3], %s721_s10 }
  0x2d   : > { %v805_v16 = vld [vmem:[%s1003_s5 + $0x38] sm:$0xff]  ;;  %s1007_s6 = scalar_select %p315_p11, %s901_s14, 1  ;;  %v804_v17 = vld [vmem:[%s1003_s5 + $0x30] sm:$0xff]  ;;  %v803_v18 = vld [vmem:[%s1003_s5 + $0x28] sm:$0xff] }
  0x2e   : > { %451 = vmatpush.bf16.msra.mxu0 %v805_v16  ;;  %806 = vmatpush.bf16.msra.mxu1 %v805_v16  ;;  %v802_v19 = vld [vmem:[%s1003_s5 + $0x20] sm:$0xff]  ;;  %v801_v20 = vld [vmem:[%s1003_s5 + $0x18] sm:$0xff]  ;;  %v800_v21 = vld [vmem:[%s1003_s5 + $0x10] sm:$0xff]  ;;  %s787_s12 = sshll.u32 (%p966_p6), %s901_s14, 3 }
  0x2f   : > { %807 = vmatpush.bf16.msra.mxu2 %v805_v16  ;;  %808 = vmatpush.bf16.msra.mxu3 %v805_v16  ;;  %s317_s9 = scalar_lea.vmem %s1108_s2, %s1007_s6  ;;  %v799_v22 = vld [vmem:[%s1003_s5 + $0x8] sm:$0xff]  ;;  %v798_v23 = vld [vmem:[%s1003_s5] sm:$0xff]  ;;  %v792_v25 = vld [vmem:[%s1106_s0 + $0x10] sm:$0xff] }
  0x30   : > { %v790_v24 = vld [vmem:[%s1106_s0] sm:$0xff]  ;;  %v796_v27 = vld [vmem:[%s1106_s0 + $0x30] sm:$0xff]  ;;  %v791_v28 = vld [vmem:[%s1106_s0 + $0x8] sm:$0xff] }
  0x31   : > { %v794_v26 = vld [vmem:[%s1106_s0 + $0x20] sm:$0xff]  ;;  %v793_v29 = vld [vmem:[%s1106_s0 + $0x18] sm:$0xff]  ;;  %v795_v30 = vld [vmem:[%s1106_s0 + $0x28] sm:$0xff] }
  0x32   : > { %452 = vmatpush.bf16.msra.mxu0 %v804_v17  ;;  %809 = vmatpush.bf16.msra.mxu1 %v804_v17  ;;  %v797_v31 = vld [vmem:[%s1106_s0 + $0x38] sm:$0xff]  ;;  %v870_v32 = vld [vmem:[%s317_s9] ss:$0 sm:$0xff]  ;;  %s527_s9 = scalar_lea.vmem (%p966_p6), %s1109_s3, %s787_s12 }
  0x33   : > { %810 = vmatpush.bf16.msra.mxu2 %v804_v17  ;;  %811 = vmatpush.bf16.msra.mxu3 %v804_v17 }
  0x36   : > { %453 = vmatpush.bf16.msra.mxu0 %v803_v18  ;;  %812 = vmatpush.bf16.msra.mxu1 %v803_v18 }
  0x37   : > { %813 = vmatpush.bf16.msra.mxu2 %v803_v18  ;;  %814 = vmatpush.bf16.msra.mxu3 %v803_v18 }
  0x3a   : > { %454 = vmatpush.bf16.msra.mxu0 %v802_v19  ;;  %815 = vmatpush.bf16.msra.mxu1 %v802_v19 }
  0x3b   : > { %816 = vmatpush.bf16.msra.mxu2 %v802_v19  ;;  %817 = vmatpush.bf16.msra.mxu3 %v802_v19 }
  0x3e   : > { %455 = vmatpush.bf16.msra.mxu0 %v801_v20  ;;  %818 = vmatpush.bf16.msra.mxu1 %v801_v20 }
  0x3f   : > { %819 = vmatpush.bf16.msra.mxu2 %v801_v20  ;;  %820 = vmatpush.bf16.msra.mxu3 %v801_v20 }
  0x42   : > { %456 = vmatpush.bf16.msra.mxu0 %v800_v21  ;;  %821 = vmatpush.bf16.msra.mxu1 %v800_v21 }
  0x43   : > { %822 = vmatpush.bf16.msra.mxu2 %v800_v21  ;;  %823 = vmatpush.bf16.msra.mxu3 %v800_v21 }
  0x46   : > { %457 = vmatpush.bf16.msra.mxu0 %v799_v22  ;;  %824 = vmatpush.bf16.msra.mxu1 %v799_v22 }
  0x47   : > { %825 = vmatpush.bf16.msra.mxu2 %v799_v22  ;;  %826 = vmatpush.bf16.msra.mxu3 %v799_v22 }
  0x4a   : > { %458 = vmatpush.bf16.msra.mxu0 %v798_v23  ;;  %827 = vmatpush.bf16.msra.mxu1 %v798_v23 }
  0x4b   : > { %828 = vmatpush.bf16.msra.mxu2 %v798_v23  ;;  %829 = vmatpush.bf16.msra.mxu3 %v798_v23 }
  0x4d   : > { %459 = vmatmul.bf16.vlgmr.msra.gmra.mxu0 %v790_v24  ;;  %469 = vmatmul.bf16.vlgmr.msra.gmra.mxu1 %v792_v25 }
  0x4e   : > { %479 = vmatmul.bf16.vlgmr.msra.gmra.mxu2 %v794_v26  ;;  %489 = vmatmul.bf16.vlgmr.msra.gmra.mxu3 %v796_v27 }
  0x5d   : > { %464 = vmatmul.bf16.gmra.mxu0 %v791_v28  ;;  %474 = vmatmul.bf16.gmra.mxu1 %v793_v29 }
  0x5e   : > { %484 = vmatmul.bf16.gmra.mxu2 %v795_v30  ;;  %494 = vmatmul.bf16.gmra.mxu3 %v797_v31 }
  0xca   : > { %v460_v33 = vpop.f32.mrf.mxu0  ;;  %v470_v34 = vpop.f32.mrf.mxu1 }
  0xcb   : > { %v461_v35 = vadd.f32 %v870_v32, %v460_v33  ;;  %v471_v36 = vadd.f32 %v870_v32, %v470_v34 }
  0xcd   : > { %500 = vst [vmem:[%s1051_s19] sm:$0xff] %v461_v35 }
  0xce   : > { %504 = vst [vmem:[%s1051_s19 + $0x20] sm:$0xff] %v471_v36 }
  0xd1   : > { %v480_v37 = vpop.f32.mrf.mxu2  ;;  %v490_v38 = vpop.f32.mrf.mxu3 }
  0xd2   : > { %v481_v39 = vadd.f32 %v870_v32, %v480_v37  ;;  %v491_v40 = vadd.f32 %v870_v32, %v490_v38  ;;  %v462_v41 = vpop.f32.mrf.mxu0  ;;  %v472_v42 = vpop.f32.mrf.mxu1 }
  0xd3   : > { %v463_v43 = vadd.f32 %v870_v32, %v462_v41  ;;  %v473_v44 = vadd.f32 %v870_v32, %v472_v42 }
  0xd4   : > { %508 = vst [vmem:[%s1051_s19 + $0x40] sm:$0xff] %v481_v39  ;;  %v586_v1 = vld [vmem:[%s1051_s19] sm:$0xff] (%p966_p6) }
  0xd5   : > { %512 = vst [vmem:[%s1051_s19 + $0x60] sm:$0xff] %v491_v40  ;;  %v594_v5 = vld [vmem:[%s1051_s19 + $0x20] sm:$0xff] (%p966_p6) }
  0xd6   : > { %501 = vst [vmem:[%s1051_s19 + $0x8] sm:$0xff] %v463_v43 }
  0xd7   : > { %505 = vst [vmem:[%s1051_s19 + $0x28] sm:$0xff] %v473_v44 }
  0xd8   : > { %587 = vst [vmem:[%s527_s9] sm:$0xff] (%p966_p6), %v586_v1 }
  0xd9   : > { %v482_v45 = vpop.f32.mrf.mxu2  ;;  %v492_v46 = vpop.f32.mrf.mxu3  ;;  %595 = vst [vmem:[%s527_s9 + $0x40] sm:$0xff] (%p966_p6), %v594_v5 }
  0xda   : > { %v483_v47 = vadd.f32 %v870_v32, %v482_v45  ;;  %v493_v48 = vadd.f32 %v870_v32, %v492_v46  ;;  %v465_v49 = vpop.f32.mrf.mxu0  ;;  %v475_v50 = vpop.f32.mrf.mxu1 }
  0xdb   : > { %v466_v51 = vadd.f32 %v870_v32, %v465_v49  ;;  %v476_v52 = vadd.f32 %v870_v32, %v475_v50  ;;  %v602_v9 = vld [vmem:[%s1051_s19 + $0x40] sm:$0xff] (%p966_p6) }
  0xdc   : > { %509 = vst [vmem:[%s1051_s19 + $0x48] sm:$0xff] %v483_v47  ;;  %v610_v13 = vld [vmem:[%s1051_s19 + $0x60] sm:$0xff] (%p966_p6) }
  0xdd   : > { %513 = vst [vmem:[%s1051_s19 + $0x68] sm:$0xff] %v493_v48  ;;  %v588_v2 = vld [vmem:[%s1051_s19 + $0x8] sm:$0xff] (%p966_p6) }
  0xde   : > { %502 = vst [vmem:[%s1051_s19 + $0x10] sm:$0xff] %v466_v51  ;;  %v596_v6 = vld [vmem:[%s1051_s19 + $0x28] sm:$0xff] (%p966_p6) }
  0xdf   : > { %506 = vst [vmem:[%s1051_s19 + $0x30] sm:$0xff] %v476_v52 }
  0xe0   : > { %589 = vst [vmem:[%s527_s9 + $0x10] sm:$0xff] (%p966_p6), %v588_v2 }
  0xe1   : > { %v485_v53 = vpop.f32.mrf.mxu2  ;;  %v495_v54 = vpop.f32.mrf.mxu3  ;;  %597 = vst [vmem:[%s527_s9 + $0x50] sm:$0xff] (%p966_p6), %v596_v6 }
  0xe2   : > { %v486_v55 = vadd.f32 %v870_v32, %v485_v53  ;;  %v496_v56 = vadd.f32 %v870_v32, %v495_v54  ;;  %v467_v57 = vpop.f32.mrf.mxu0  ;;  %v477_v58 = vpop.f32.mrf.mxu1  ;;  %603 = vst [vmem:[%s527_s9 + $0x80] sm:$0xff] (%p966_p6), %v602_v9 }
  0xe3   : > { %v468_v59 = vadd.f32 %v870_v32, %v467_v57  ;;  %v478_v60 = vadd.f32 %v870_v32, %v477_v58  ;;  %v604_v10 = vld [vmem:[%s1051_s19 + $0x48] sm:$0xff] (%p966_p6)  ;;  %611 = vst [vmem:[%s527_s9 + $0xc0] sm:$0xff] (%p966_p6), %v610_v13 }
  0xe4   : > { %510 = vst [vmem:[%s1051_s19 + $0x50] sm:$0xff] %v486_v55  ;;  %v612_v14 = vld [vmem:[%s1051_s19 + $0x68] sm:$0xff] (%p966_p6) }
  0xe5   : > { %514 = vst [vmem:[%s1051_s19 + $0x70] sm:$0xff] %v496_v56  ;;  %v590_v3 = vld [vmem:[%s1051_s19 + $0x10] sm:$0xff] (%p966_p6) }
  0xe6   : > { %503 = vst [vmem:[%s1051_s19 + $0x18] sm:$0xff] %v468_v59  ;;  %v598_v7 = vld [vmem:[%s1051_s19 + $0x30] sm:$0xff] (%p966_p6) }
  0xe7   : > { %507 = vst [vmem:[%s1051_s19 + $0x38] sm:$0xff] %v478_v60 }
  0xe8   : > { %591 = vst [vmem:[%s527_s9 + $0x20] sm:$0xff] (%p966_p6), %v590_v3 }
  0xe9   : > { %v487_v61 = vpop.f32.mrf.mxu2  ;;  %v497_v62 = vpop.f32.mrf.mxu3  ;;  %522 = sbr.rel (!%p966_p6) target bundleno = 246 (0xf6), region = 77  ;;  %599 = vst [vmem:[%s527_s9 + $0x60] sm:$0xff] (%p966_p6), %v598_v7 }
  0xea   : > { %v488_v63 = vadd.f32 %v870_v32, %v487_v61  ;;  %v498_v0 = vadd.f32 %v870_v32, %v497_v62  ;;  %605 = vst [vmem:[%s527_s9 + $0x90] sm:$0xff] (%p966_p6), %v604_v10 }
  0xeb   : > { %v606_v11 = vld [vmem:[%s1051_s19 + $0x50] sm:$0xff] (%p966_p6)  ;;  %613 = vst [vmem:[%s527_s9 + $0xd0] sm:$0xff] (%p966_p6), %v612_v14 }
  0xec   : > { %511 = vst [vmem:[%s1051_s19 + $0x58] sm:$0xff] %v488_v63  ;;  %v614_v15 = vld [vmem:[%s1051_s19 + $0x70] sm:$0xff] (%p966_p6) }
  0xed   : > { %515 = vst [vmem:[%s1051_s19 + $0x78] sm:$0xff] %v498_v0  ;;  %v592_v4 = vld [vmem:[%s1051_s19 + $0x18] sm:$0xff] (%p966_p6) }
  0xee   : > { %593 = vst [vmem:[%s527_s9 + $0x30] sm:$0xff] %v592_v4  ;;  %v600_v8 = vld [vmem:[%s1051_s19 + $0x38] sm:$0xff] }
  0xef   : > { %601 = vst [vmem:[%s527_s9 + $0x70] sm:$0xff] %v600_v8 }
  0xf0   : > { %607 = vst [vmem:[%s527_s9 + $0xa0] sm:$0xff] %v606_v11 }
  0xf1   : > { %615 = vst [vmem:[%s527_s9 + $0xe0] sm:$0xff] %v614_v15 }
  0xf3   : > { %v608_v12 = vld [vmem:[%s1051_s19 + $0x58] sm:$0xff] }
  0xf4   : > { %609 = vst [vmem:[%s527_s9 + $0xb0] sm:$0xff] %v608_v12  ;;  %v616_v16 = vld [vmem:[%s1051_s19 + $0x78] sm:$0xff] }
  0xf5   : > { %617 = vst [vmem:[%s527_s9 + $0xf0] sm:$0xff] %v616_v16 }
  0xf6 PF: > { %s13_s16 = sadd.s32 1, %s909_s16   ;;  %s1111_s12 = smov %s897_s13 }
  0xf7   : > { %p10_p12 = scmp.ge.s32.totalorder %s13_s16, 4   ;;  %s1112_s13 = smov %s971_s22 }
  0xf8   : > { %s1113_s14 = smov %s905_s15  ;;  %s1114_s15 = smov %s1116_s17 }
  0xf9   :  { %12 = sbr.rel (!%p10_p12) target bundleno = 3 (0x3), region = 152 }

// kernel: fwd.6
= control target key start
LH: loop header
LB: loop body
LE: loop exit
PB: predicated region body
PF: predicated region fallthrough
CT: control target
= control target key end

     0   :  { %s5826_s12 = smov 0   ;;  %s5828_s13 = smov 0   ;;  %s8693_s0 = inlined_call_operand.vmem [shape: bf16[2,102,256], index: 0, kind: input, shape index: {}]   ;;  %s8694_s1 = inlined_call_operand.vmem [shape: bf16[2304,256], index: 1, kind: input, shape index: {}]   ;;  %s8695_s2 = inlined_call_operand.vmem [shape: f32[1,256], index: 2, kind: input, shape index: {}]   ;;  %s8696_s3 = inlined_call_operand.vmem [shape: f32[2,80,256], index: 3, kind: output, shape index: {}]  }
   0x1   :  { %s5830_s14 = smov 0  }
   0x2 LB: > { %s25_s15 = sadd.s32 1, %s5800_s13  ;;  %p4191_p0 = scmp.ge.s32.totalorder %s5804_s14, 1  ;;  %s5804_s14 = sphi %s5830_s14, %s13_s14   ;;  %s5800_s13 = sphi %s5828_s13, %s8698_s13   ;;  %s5796_s12 = sphi %s5826_s12, %s8697_s12  }
   0x3   : > { %p27_p1 = scmp.ge.s32.totalorder %s25_s15, 2  ;;  %p172_p2 = scmp.lt.s32.totalorder %s5804_s14, 3 }
   0x5   : > { %s8700_s15 = smov (%p27_p1, %s25_s15), 0  ;;  %p173_p3 = pnand %p4191_p0, %p172_p2 }
   0x6   : > { %p209_p4 = scmp.lt.s32.totalorder (!%p173_p3), %s5796_s12, 1 }
   0x7   : > { %176 = sbr.rel (%p173_p3) target bundleno = 905 (0x389), region = 32 }
   0xc   : > { %v4284_v0 = vld [vmem:[%s8694_s1 + $0x170] sm:$0xf]  ;;  %v5499_v1 = vld [vmem:[%s8694_s1 + $0x174] sm:$0xf0]  ;;  %v5498_v5 = vld [vmem:[%s8694_s1 + $0x174] sm:$0xf] }
   0xd   : > { %v4348_v2 = vld [vmem:[%s8694_s1 + $0x1f0] sm:$0xf]  ;;  %v4285_v3 = vor.u32 %v5499_v1, %v4284_v0  ;;  %v5515_v4 = vld [vmem:[%s8694_s1 + $0x1f4] sm:$0xf0]  ;;  %v4286_v6 = vld [vmem:[%s8694_s1 + $0x178] sm:$0xf0] }
   0xe   : > { %v4349_v7 = vor.u32 %v5515_v4, %v4348_v2  ;;  %v4289_v8 = vor.u32 %v5498_v5, %v4286_v6  ;;  %v5514_v9 = vld [vmem:[%s8694_s1 + $0x1f4] sm:$0xf]  ;;  %v4350_v10 = vld [vmem:[%s8694_s1 + $0x1f8] sm:$0xf0]  ;;  %v4276_v11 = vld [vmem:[%s8694_s1 + $0x160] sm:$0xf] }
   0xf   : > { %615 = vmatpush.bf16.msra.mxu0 %v4285_v3  ;;  %v4353_v12 = vor.u32 %v5514_v9, %v4350_v10  ;;  %v5497_v13 = vld [vmem:[%s8694_s1 + $0x164] sm:$0xf0]  ;;  %v4340_v14 = vld [vmem:[%s8694_s1 + $0x1e0] sm:$0xf]  ;;  %v5496_v18 = vld [vmem:[%s8694_s1 + $0x164] sm:$0xf] }
  0x10   : > { %v5513_v15 = vld [vmem:[%s8694_s1 + $0x1e4] sm:$0xf0]  ;;  %649 = vmatpush.bf16.msra.mxu1 %v4349_v7  ;;  %683 = vmatpush.bf16.msra.mxu2 %v4289_v8  ;;  %v4277_v16 = vor.u32 %v5497_v13, %v4276_v11  ;;  %v4278_v19 = vld [vmem:[%s8694_s1 + $0x168] sm:$0xf0]  ;;  %v5512_v20 = vld [vmem:[%s8694_s1 + $0x1e4] sm:$0xf] }
  0x11   : > { %v4341_v17 = vor.u32 %v5513_v15, %v4340_v14  ;;  %717 = vmatpush.bf16.msra.mxu3 %v4353_v12  ;;  %v4281_v21 = vor.u32 %v5496_v18, %v4278_v19  ;;  %v4342_v22 = vld [vmem:[%s8694_s1 + $0x1e8] sm:$0xf0]  ;;  %v4268_v23 = vld [vmem:[%s8694_s1 + $0x150] sm:$0xf]  ;;  %v5495_v24 = vld [vmem:[%s8694_s1 + $0x154] sm:$0xf0] }
  0x12   : > { %v4345_v25 = vor.u32 %v5512_v20, %v4342_v22  ;;  %v4332_v26 = vld [vmem:[%s8694_s1 + $0x1d0] sm:$0xf]  ;;  %v5511_v27 = vld [vmem:[%s8694_s1 + $0x1d4] sm:$0xf0]  ;;  %v5494_v28 = vld [vmem:[%s8694_s1 + $0x154] sm:$0xf]  ;;  %v4269_v29 = vor.u32 %v5495_v24, %v4268_v23 }
  0x13   : > { %616 = vmatpush.bf16.msra.mxu0 %v4277_v16  ;;  %v4270_v30 = vld [vmem:[%s8694_s1 + $0x158] sm:$0xf0]  ;;  %v5510_v31 = vld [vmem:[%s8694_s1 + $0x1d4] sm:$0xf]  ;;  %v4333_v33 = vor.u32 %v5511_v27, %v4332_v26  ;;  %v4260_v35 = vld [vmem:[%s8694_s1 + $0x140] sm:$0xf] }
  0x14   : > { %v4334_v32 = vld [vmem:[%s8694_s1 + $0x1d8] sm:$0xf0]  ;;  %650 = vmatpush.bf16.msra.mxu1 %v4341_v17  ;;  %684 = vmatpush.bf16.msra.mxu2 %v4281_v21  ;;  %v4273_v34 = vor.u32 %v5494_v28, %v4270_v30  ;;  %v5493_v36 = vld [vmem:[%s8694_s1 + $0x144] sm:$0xf0]  ;;  %v4324_v37 = vld [vmem:[%s8694_s1 + $0x1c0] sm:$0xf] }
  0x15   : > { %718 = vmatpush.bf16.msra.mxu3 %v4345_v25  ;;  %v4337_v38 = vor.u32 %v5510_v31, %v4334_v32  ;;  %v5509_v39 = vld [vmem:[%s8694_s1 + $0x1c4] sm:$0xf0]  ;;  %v5492_v40 = vld [vmem:[%s8694_s1 + $0x144] sm:$0xf]  ;;  %v4262_v41 = vld [vmem:[%s8694_s1 + $0x148] sm:$0xf0]  ;;  %v4261_v44 = vor.u32 %v5493_v36, %v4260_v35 }
  0x16   : > { %v5508_v42 = vld [vmem:[%s8694_s1 + $0x1c4] sm:$0xf]  ;;  %v4326_v43 = vld [vmem:[%s8694_s1 + $0x1c8] sm:$0xf0]  ;;  %v4325_v45 = vor.u32 %v5509_v39, %v4324_v37  ;;  %v4265_v46 = vor.u32 %v5492_v40, %v4262_v41  ;;  %v4252_v47 = vld [vmem:[%s8694_s1 + $0x130] sm:$0xf] }
  0x17   : > { %617 = vmatpush.bf16.msra.mxu0 %v4269_v29  ;;  %v5491_v48 = vld [vmem:[%s8694_s1 + $0x134] sm:$0xf0]  ;;  %v4316_v49 = vld [vmem:[%s8694_s1 + $0x1b0] sm:$0xf]  ;;  %v4329_v50 = vor.u32 %v5508_v42, %v4326_v43  ;;  %v5490_v52 = vld [vmem:[%s8694_s1 + $0x134] sm:$0xf] }
  0x18   : > { %651 = vmatpush.bf16.msra.mxu1 %v4333_v33  ;;  %685 = vmatpush.bf16.msra.mxu2 %v4273_v34  ;;  %v5507_v51 = vld [vmem:[%s8694_s1 + $0x1b4] sm:$0xf0]  ;;  %v4254_v53 = vld [vmem:[%s8694_s1 + $0x138] sm:$0xf0]  ;;  %v5506_v54 = vld [vmem:[%s8694_s1 + $0x1b4] sm:$0xf]  ;;  %v4253_v56 = vor.u32 %v5491_v48, %v4252_v47 }
  0x19   : > { %719 = vmatpush.bf16.msra.mxu3 %v4337_v38  ;;  %v4318_v55 = vld [vmem:[%s8694_s1 + $0x1b8] sm:$0xf0]  ;;  %v4317_v57 = vor.u32 %v5507_v51, %v4316_v49  ;;  %v4257_v58 = vor.u32 %v5490_v52, %v4254_v53  ;;  %v4244_v59 = vld [vmem:[%s8694_s1 + $0x120] sm:$0xf]  ;;  %v5489_v60 = vld [vmem:[%s8694_s1 + $0x124] sm:$0xf0] }
  0x1a   : > { %v4308_v61 = vld [vmem:[%s8694_s1 + $0x1a0] sm:$0xf]  ;;  %v4321_v62 = vor.u32 %v5506_v54, %v4318_v55  ;;  %v5505_v63 = vld [vmem:[%s8694_s1 + $0x1a4] sm:$0xf0]  ;;  %v5488_v0 = vld [vmem:[%s8694_s1 + $0x124] sm:$0xf]  ;;  %v4245_v4 = vor.u32 %v5489_v60, %v4244_v59 }
  0x1b   : > { %618 = vmatpush.bf16.msra.mxu0 %v4261_v44  ;;  %v4246_v1 = vld [vmem:[%s8694_s1 + $0x128] sm:$0xf0]  ;;  %v5504_v2 = vld [vmem:[%s8694_s1 + $0x1a4] sm:$0xf]  ;;  %v4236_v5 = vld [vmem:[%s8694_s1 + $0x110] sm:$0xf]  ;;  %v4309_v8 = vor.u32 %v5505_v63, %v4308_v61 }
  0x1c   : > { %652 = vmatpush.bf16.msra.mxu1 %v4325_v45  ;;  %686 = vmatpush.bf16.msra.mxu2 %v4265_v46  ;;  %v4310_v3 = vld [vmem:[%s8694_s1 + $0x1a8] sm:$0xf0]  ;;  %v5487_v6 = vld [vmem:[%s8694_s1 + $0x114] sm:$0xf0]  ;;  %v4300_v7 = vld [vmem:[%s8694_s1 + $0x190] sm:$0xf]  ;;  %v4249_v9 = vor.u32 %v5488_v0, %v4246_v1 }
  0x1d   : > { %720 = vmatpush.bf16.msra.mxu3 %v4329_v50  ;;  %v5503_v10 = vld [vmem:[%s8694_s1 + $0x194] sm:$0xf0]  ;;  %v5486_v11 = vld [vmem:[%s8694_s1 + $0x114] sm:$0xf]  ;;  %v4238_v12 = vld [vmem:[%s8694_s1 + $0x118] sm:$0xf0]  ;;  %v4313_v13 = vor.u32 %v5504_v2, %v4310_v3  ;;  %v4237_v20 = vor.u32 %v5487_v6, %v4236_v5 }
  0x1e   : > { %v5502_v14 = vld [vmem:[%s8694_s1 + $0x194] sm:$0xf]  ;;  %v4302_v15 = vld [vmem:[%s8694_s1 + $0x198] sm:$0xf0]  ;;  %v4228_v16 = vld [vmem:[%s8694_s1 + $0x100] sm:$0xf]  ;;  %v4301_v24 = vor.u32 %v5503_v10, %v4300_v7  ;;  %v4241_v25 = vor.u32 %v5486_v11, %v4238_v12 }
  0x1f   : > { %619 = vmatpush.bf16.msra.mxu0 %v4253_v56  ;;  %v5485_v17 = vld [vmem:[%s8694_s1 + $0x104] sm:$0xf0]  ;;  %v4292_v18 = vld [vmem:[%s8694_s1 + $0x180] sm:$0xf]  ;;  %v5484_v21 = vld [vmem:[%s8694_s1 + $0x104] sm:$0xf]  ;;  %v4305_v29 = vor.u32 %v5502_v14, %v4302_v15 }
  0x20   : > { %653 = vmatpush.bf16.msra.mxu1 %v4317_v57  ;;  %687 = vmatpush.bf16.msra.mxu2 %v4257_v58  ;;  %v5501_v19 = vld [vmem:[%s8694_s1 + $0x184] sm:$0xf0]  ;;  %v4230_v22 = vld [vmem:[%s8694_s1 + $0x108] sm:$0xf0]  ;;  %v5500_v23 = vld [vmem:[%s8694_s1 + $0x184] sm:$0xf]  ;;  %v4229_v35 = vor.u32 %v5485_v17, %v4228_v16 }
  0x21   : > { %721 = vmatpush.bf16.msra.mxu3 %v4321_v62  ;;  %s8702_s12 = smov (!%p209_p4, %s5796_s12), 1  ;;  %v4294_v26 = vld [vmem:[%s8694_s1 + $0x188] sm:$0xf0]  ;;  %v5466_v27 = vld [vmem:[%s8694_s1 + $0x74] sm:$0xf]  ;;  %v4293_v36 = vor.u32 %v5501_v19, %v4292_v18  ;;  %v4233_v40 = vor.u32 %v5484_v21, %v4230_v22  ;;  %vm1095_vm1 = vcmask 1046528  }
  0x22   : > { %v4414_v28 = vld [vmem:[%s8694_s1 + $0x78] sm:$0xf0]  ;;  %s5756_s6 = smul.u32 104, %s8702_s12  ;;  %v5482_v30 = vld [vmem:[%s8694_s1 + $0xf4] sm:$0xf]  ;;  %v4297_v41 = vor.u32 %v5500_v23, %v4294_v26  ;;  %vm2389_vm3 = vcmask 1045504  }
  0x23   : > { %620 = vmatpush.bf16.msra.mxu0 %v4245_v4  ;;  %v4478_v31 = vld [vmem:[%s8694_s1 + $0xf8] sm:$0xf0]  ;;  %v4412_v32 = vld [vmem:[%s8694_s1 + $0x70] sm:$0xf]  ;;  %v5467_v33 = vld [vmem:[%s8694_s1 + $0x74] sm:$0xf0]  ;;  %v4417_v45 = vor.u32 %v5466_v27, %v4414_v28 }
  0x24   : > { %654 = vmatpush.bf16.msra.mxu1 %v4309_v8  ;;  %688 = vmatpush.bf16.msra.mxu2 %v4249_v9  ;;  %v6064_v34 = vld [vmem:[%s8694_s1 + $0xf0] sm:$0xf]  ;;  %s6069_s23 = scalar_lea.vmem %s8693_s0, %s5756_s6  ;;  %v5483_v37 = vld [vmem:[%s8694_s1 + $0xf4] sm:$0xf0]  ;;  %v6077_v38 = vld [vmem:[%s8694_s1 + $0x64] sm:$0xf]  ;;  %v4481_v55 = vor.u32 %v5482_v30, %v4478_v31  ;;  %v4413_v56 = vor.u32 %v5467_v33, %v4412_v32 }
  0x25   : > { %722 = vmatpush.bf16.msra.mxu3 %v4313_v13  ;;  %v6082_v39 = vld [vmem:[%s8694_s1 + $0x68] sm:$0xf0]  ;;  %v236_v42 = vld [vmem:[%s6069_s23] sm:$0xff]  ;;  %v4196_v44 = vld [vmem:[%s6069_s23 + $0x10] sm:$0xf]  ;;  %v4477_v62 = vor.u32 %v5483_v37, %v6064_v34  ;;  %vm3683_vm5 = vcmask 1044480  }
  0x26   : > { %v6086_v43 = vld [vmem:[%s6069_s23 + $0x8] sm:$0xff]  ;;  %v5445_v46 = vld [vmem:[%s6069_s23 + $0x14] sm:$0xf0]  ;;  %v322_v47 = vunpack.c.l.b16 %v236_v42  ;;  %v5444_v49 = vld [vmem:[%s6069_s23 + $0x14] sm:$0xf]  ;;  %v323_v51 = vunpack.c.h.b16 %v236_v42  ;;  %v4409_v4 = vor.u32 %v6077_v38, %v6082_v39  ;;  %s5757_s22 = smul.u32 160, %s8702_s12 }
  0x27   : > { %621 = vmatpush.bf16.msra.mxu0 %v4237_v20  ;;  %v324_v48 = vunpack.c.l.b16 %v6086_v43  ;;  %v4198_v50 = vld [vmem:[%s6069_s23 + $0x18] sm:$0xf0]  ;;  %v325_v52 = vunpack.c.h.b16 %v6086_v43  ;;  %v6094_v53 = vor.u32 %v5445_v46, %v4196_v44  ;;  %v5480_v57 = vld [vmem:[%s8694_s1 + $0xe4] sm:$0xf]  ;;  %v4470_v58 = vld [vmem:[%s8694_s1 + $0xe8] sm:$0xf0] }
  0x28   : > { %655 = vmatpush.bf16.msra.mxu1 %v4301_v24  ;;  %689 = vmatpush.bf16.msra.mxu2 %v4241_v25  ;;  %v6096_v54 = vor.u32 %v5444_v49, %v4198_v50  ;;  %v4404_v59 = vld [vmem:[%s8694_s1 + $0x60] sm:$0xf]  ;;  %v5465_v63 = vld [vmem:[%s8694_s1 + $0x64] sm:$0xf0]  ;;  %vm356_vm0 = vsmask.f32 7424  ;;  %v4473_v10 = vor.u32 %v5480_v57, %v4470_v58  ;;  %s8621_s26 = scalar_lea.vmem %s8696_s3, %s5757_s22 }
  0x29   : > { %723 = vmatpush.bf16.msra.mxu3 %v4305_v29  ;;  %v6109_v60 = vpack.c.b16 %v324_v48, %v322_v47  ;;  %v6113_v61 = vpack.c.b16 %v325_v52, %v323_v51  ;;  %v4468_v0 = vld [vmem:[%s8694_s1 + $0xe0] sm:$0xf]  ;;  %v5481_v1 = vld [vmem:[%s8694_s1 + $0xe4] sm:$0xf0]  ;;  %v365_v2 = vshll.u32 %v6094_v53, 16  ;;  %v4405_v11 = vor.u32 %v5465_v63, %v4404_v59 }
  0x2a   : > { %v377_v3 = vshll.u32 %v6096_v54, 16  ;;  %v5462_v9 = vld [vmem:[%s8694_s1 + $0x54] sm:$0xf]  ;;  %v4469_v12 = vor.u32 %v5481_v1, %v4468_v0  ;;  %v4398_v13 = vld [vmem:[%s8694_s1 + $0x58] sm:$0xf0]  ;;  %v381_v59 = vshrl.u32 %v6094_v53, 16 }
  0x2b   : > { %622 = vmatpush.bf16.msra.mxu0 %v4229_v35  ;;  %v358_v5 = vshrl.u32 %v6109_v60, 16  ;;  %v360_v6 = vshll.u32 %v6109_v60, 16  ;;  %v370_v7 = vshrl.u32 %v6113_v61, 16  ;;  %v372_v8 = vshll.u32 %v6113_v61, 16  ;;  %v5478_v14 = vld [vmem:[%s8694_s1 + $0xd4] sm:$0xf] }
  0x2c   : > { %656 = vmatpush.bf16.msra.mxu1 %v4293_v36  ;;  %690 = vmatpush.bf16.msra.mxu2 %v4233_v40  ;;  %v4462_v15 = vld [vmem:[%s8694_s1 + $0xd8] sm:$0xf0]  ;;  %v6145_v17 = vrot.slane %v365_v2, 1  ;;  %v6147_v19 = vrot.slane %v377_v3, 1  ;;  %v4396_v20 = vld [vmem:[%s8694_s1 + $0x50] sm:$0xf]  ;;  %v4401_v30 = vor.u32 %v5462_v9, %v4398_v13 }
  0x2d   : > { %724 = vmatpush.bf16.msra.mxu3 %v4297_v41  ;;  %v362_v16 = vrot.slane %v360_v6, 1  ;;  %v374_v18 = vrot.slane %v372_v8, 1  ;;  %v5463_v21 = vld [vmem:[%s8694_s1 + $0x54] sm:$0xf0]  ;;  %v4460_v22 = vld [vmem:[%s8694_s1 + $0xd0] sm:$0xf]  ;;  %v4465_v31 = vor.u32 %v5478_v14, %v4462_v15 }
  0x2e   : > { %v5479_v23 = vld [vmem:[%s8694_s1 + $0xd4] sm:$0xf0]  ;;  %v4204_v26 = vld [vmem:[%s6069_s23 + $0x20] sm:$0xf]  ;;  %v5447_v27 = vld [vmem:[%s6069_s23 + $0x24] sm:$0xf0]  ;;  %v4397_v35 = vor.u32 %v5463_v21, %v4396_v20  ;;  %v383_v9 = vor.u32 %v381_v59, %v6145_v17 }
  0x2f   : > { %921 = vmatpush.bf16.msrb.mxu0 %v4413_v56  ;;  %v363_v24 = vor.u32 %v362_v16, %v358_v5  ;;  %v375_v25 = vor.u32 %v374_v18, %v370_v7  ;;  %v5446_v28 = vld [vmem:[%s6069_s23 + $0x24] sm:$0xf]  ;;  %v4206_v29 = vld [vmem:[%s6069_s23 + $0x28] sm:$0xf0]  ;;  %v4461_v36 = vor.u32 %v5479_v23, %v4460_v22  ;;  %v6181_v40 = vor.u32 %v5447_v27, %v4204_v26  ;;  %v4388_v42 = vld [vmem:[%s8694_s1 + $0x40] sm:$0xf] }
  0x30   : > { %989 = vmatpush.bf16.msrb.mxu2 %v4417_v45  ;;  %955 = vmatpush.bf16.msrb.mxu1 %v4477_v62  ;;  %v5460_v32 = vld [vmem:[%s8694_s1 + $0x44] sm:$0xf]  ;;  %v4390_v37 = vld [vmem:[%s8694_s1 + $0x48] sm:$0xf0]  ;;  %v6183_v41 = vor.u32 %v5446_v28, %v4206_v29  ;;  %v5461_v44 = vld [vmem:[%s8694_s1 + $0x44] sm:$0xf0] }
  0x31   : > { %1023 = vmatpush.bf16.msrb.mxu3 %v4481_v55  ;;  %v368_v33 = vsel %vm356_vm0, %v363_v24, %v6145_v17  ;;  %v380_v34 = vsel %vm356_vm0, %v375_v25, %v6147_v19  ;;  %v5476_v38 = vld [vmem:[%s8694_s1 + $0xc4] sm:$0xf]  ;;  %v4454_v39 = vld [vmem:[%s8694_s1 + $0xc8] sm:$0xf0]  ;;  %v4452_v45 = vld [vmem:[%s8694_s1 + $0xc0] sm:$0xf]  ;;  %v4393_v46 = vor.u32 %v5460_v32, %v4390_v37  ;;  %v4389_v51 = vor.u32 %v5461_v44, %v4388_v42 }
  0x32   : > { %623 = vmatmul.bf16.vlgmr.msra.gmra.mxu0 %v368_v33  ;;  %657 = vmatmul.bf16.vlgmr.msra.gmra.mxu1 %v380_v34  ;;  %v4457_v47 = vor.u32 %v5476_v38, %v4454_v39  ;;  %v5477_v49 = vld [vmem:[%s8694_s1 + $0xc4] sm:$0xf0]  ;;  %v5458_v50 = vld [vmem:[%s8694_s1 + $0x34] sm:$0xf]  ;;  %v4382_v56 = vld [vmem:[%s8694_s1 + $0x38] sm:$0xf0] }
  0x33   : > { %922 = vmatpush.bf16.msrb.mxu0 %v4405_v11  ;;  %691 = vmatmul.bf16.vlgmr.msra.gmra.mxu2 %v368_v33  ;;  %v4453_v55 = vor.u32 %v5477_v49, %v4452_v45  ;;  %v5474_v57 = vld [vmem:[%s8694_s1 + $0xb4] sm:$0xf]  ;;  %v4446_v58 = vld [vmem:[%s8694_s1 + $0xb8] sm:$0xf0]  ;;  %v385_v62 = vshll.u32 %v6181_v40, 16  ;;  %v389_v1 = vshrl.u32 %v6096_v54, 16  ;;  %v4385_v5 = vor.u32 %v5458_v50, %v4382_v56 }
  0x34   : > { %990 = vmatpush.bf16.msrb.mxu2 %v4409_v4  ;;  %956 = vmatpush.bf16.msrb.mxu1 %v4469_v12  ;;  %v4380_v63 = vld [vmem:[%s8694_s1 + $0x30] sm:$0xf]  ;;  %v5459_v0 = vld [vmem:[%s8694_s1 + $0x34] sm:$0xf0]  ;;  %v393_v2 = vshll.u32 %v6183_v41, 16  ;;  %v4449_v6 = vor.u32 %v5474_v57, %v4446_v58  ;;  %v397_v17 = vshrl.u32 %v6181_v40, 16 }
  0x35   : > { %1024 = vmatpush.bf16.msrb.mxu3 %v4473_v10  ;;  %v4444_v3 = vld [vmem:[%s8694_s1 + $0xb0] sm:$0xf]  ;;  %v5475_v4 = vld [vmem:[%s8694_s1 + $0xb4] sm:$0xf0]  ;;  %v4381_v7 = vor.u32 %v5459_v0, %v4380_v63  ;;  %v387_v10 = vrot.slane %v385_v62, 1  ;;  %v391_v11 = vor.u32 %v389_v1, %v6147_v19  ;;  %v405_v21 = vshrl.u32 %v6183_v41, 16 }
  0x36   : > { %725 = vmatmul.bf16.vlgmr.msra.gmra.mxu3 %v380_v34  ;;  %v4445_v8 = vor.u32 %v5475_v4, %v4444_v3  ;;  %v395_v12 = vrot.slane %v393_v2, 1  ;;  %v4212_v15 = vld [vmem:[%s6069_s23 + $0x30] sm:$0xf]  ;;  %v5449_v16 = vld [vmem:[%s6069_s23 + $0x34] sm:$0xf0] }
  0x37   : > { %923 = vmatpush.bf16.msrb.mxu0 %v4397_v35  ;;  %v388_v13 = vsel %vm356_vm0, %v383_v9, %v387_v10  ;;  %v5448_v18 = vld [vmem:[%s6069_s23 + $0x34] sm:$0xf]  ;;  %v4214_v20 = vld [vmem:[%s6069_s23 + $0x38] sm:$0xf0]  ;;  %v6235_v19 = vor.u32 %v5449_v16, %v4212_v15  ;;  %v5456_v23 = vld [vmem:[%s8694_s1 + $0x24] sm:$0xf] }
  0x38   : > { %991 = vmatpush.bf16.msrb.mxu2 %v4401_v30  ;;  %957 = vmatpush.bf16.msrb.mxu1 %v4461_v36  ;;  %v396_v14 = vsel %vm356_vm0, %v391_v11, %v395_v12  ;;  %v6237_v22 = vor.u32 %v5448_v18, %v4214_v20  ;;  %v4374_v24 = vld [vmem:[%s8694_s1 + $0x28] sm:$0xf0]  ;;  %v5472_v25 = vld [vmem:[%s8694_s1 + $0xa4] sm:$0xf]  ;;  %v4372_v28 = vld [vmem:[%s8694_s1 + $0x20] sm:$0xf]  ;;  %v407_v49 = vor.u32 %v405_v21, %v395_v12 }
  0x39   : > { %1025 = vmatpush.bf16.msrb.mxu3 %v4465_v31  ;;  %v4377_v26 = vor.u32 %v5456_v23, %v4374_v24  ;;  %v4438_v27 = vld [vmem:[%s8694_s1 + $0xa8] sm:$0xf0]  ;;  %v5457_v29 = vld [vmem:[%s8694_s1 + $0x24] sm:$0xf0]  ;;  %v4436_v32 = vld [vmem:[%s8694_s1 + $0xa0] sm:$0xf] }
  0x3a   : > { %v4441_v30 = vor.u32 %v5472_v25, %v4438_v27  ;;  %v4373_v31 = vor.u32 %v5457_v29, %v4372_v28  ;;  %v5473_v33 = vld [vmem:[%s8694_s1 + $0xa4] sm:$0xf0]  ;;  %v5454_v34 = vld [vmem:[%s8694_s1 + $0x14] sm:$0xf]  ;;  %v4366_v36 = vld [vmem:[%s8694_s1 + $0x18] sm:$0xf0] }
  0x3b   : > { %924 = vmatpush.bf16.msrb.mxu0 %v4389_v51  ;;  %v4437_v35 = vor.u32 %v5473_v33, %v4436_v32  ;;  %v5470_v37 = vld [vmem:[%s8694_s1 + $0x94] sm:$0xf]  ;;  %v4430_v38 = vld [vmem:[%s8694_s1 + $0x98] sm:$0xf0]  ;;  %v401_v39 = vshll.u32 %v6235_v19, 16  ;;  %v409_v42 = vshll.u32 %v6237_v22, 16  ;;  %v4369_v44 = vor.u32 %v5454_v34, %v4366_v36 }
  0x3c   : > { %992 = vmatpush.bf16.msrb.mxu2 %v4393_v46  ;;  %958 = vmatpush.bf16.msrb.mxu1 %v4453_v55  ;;  %v4433_v45 = vor.u32 %v5470_v37, %v4430_v38  ;;  %v399_v46 = vor.u32 %v397_v17, %v387_v10  ;;  %v4220_v51 = vld [vmem:[%s6069_s23 + $0x40] sm:$0xf]  ;;  %v5451_v55 = vld [vmem:[%s6069_s23 + $0x44] sm:$0xf0]  ;;  %v5450_v59 = vld [vmem:[%s6069_s23 + $0x44] sm:$0xf] }
  0x3d   : > { %1026 = vmatpush.bf16.msrb.mxu3 %v4457_v47  ;;  %v403_v47 = vrot.slane %v401_v39, 1  ;;  %v411_v50 = vrot.slane %v409_v42, 1  ;;  %v6279_v56 = vor.u32 %v5451_v55, %v4220_v51  ;;  %v4222_v62 = vld [vmem:[%s6069_s23 + $0x48] sm:$0xf0]  ;;  %v413_v63 = vshrl.u32 %v6235_v19, 16 }
  0x3e   : > { %v6287_v1 = vor.u32 %v5450_v59, %v4222_v62  ;;  %v4364_v2 = vld [vmem:[%s8694_s1 + $0x10] sm:$0xf]  ;;  %v5455_v3 = vld [vmem:[%s8694_s1 + $0x14] sm:$0xf0]  ;;  %v5468_v11 = vld [vmem:[%s8694_s1 + $0x84] sm:$0xf] }
  0x3f   : > { %925 = vmatpush.bf16.msrb.mxu0 %v4381_v7  ;;  %v404_v57 = vsel %vm356_vm0, %v399_v46, %v403_v47  ;;  %v412_v58 = vsel %vm356_vm0, %v407_v49, %v411_v50  ;;  %v417_v0 = vshll.u32 %v6279_v56, 16  ;;  %v4428_v4 = vld [vmem:[%s8694_s1 + $0x90] sm:$0xf]  ;;  %v5452_v7 = vld [vmem:[%s8694_s1 + $0x4] sm:$0xf]  ;;  %v421_v20 = vshrl.u32 %v6237_v22, 16 }
  0x40   : > { %993 = vmatpush.bf16.msrb.mxu2 %v4385_v5  ;;  %959 = vmatpush.bf16.msrb.mxu1 %v4445_v8  ;;  %v4365_v5 = vor.u32 %v5455_v3, %v4364_v2  ;;  %v4358_v8 = vld [vmem:[%s8694_s1 + $0x8] sm:$0xf0]  ;;  %v5453_v15 = vld [vmem:[%s8694_s1 + $0x4] sm:$0xf0]  ;;  %v4420_v16 = vld [vmem:[%s8694_s1 + $0x80] sm:$0xf] }
  0x41   : > { %1027 = vmatpush.bf16.msrb.mxu3 %v4449_v6  ;;  %v5471_v6 = vld [vmem:[%s8694_s1 + $0x94] sm:$0xf0]  ;;  %v4361_v10 = vor.u32 %v5452_v7, %v4358_v8  ;;  %v4422_v12 = vld [vmem:[%s8694_s1 + $0x88] sm:$0xf0]  ;;  %v5469_v18 = vld [vmem:[%s8694_s1 + $0x84] sm:$0xf0]  ;;  %v423_v28 = vor.u32 %v421_v20, %v411_v50 }
  0x42   : > { %628 = vmatmul.bf16.gmra.mxu0 %v388_v13  ;;  %662 = vmatmul.bf16.gmra.mxu1 %v396_v14  ;;  %v4429_v9 = vor.u32 %v5471_v6, %v4428_v4  ;;  %v425_v17 = vshll.u32 %v6287_v1, 16  ;;  %v278_v21 = vld [vmem:[%s6069_s23 + $0x50] sm:$0x11]  ;;  %v4421_v24 = vor.u32 %v5469_v18, %v4420_v16  ;;  %v419_v27 = vrot.slane %v417_v0, 1  ;;  %v4542_v38 = vld [vmem:[%s8694_s1 + $0x278] sm:$0xf0] }
  0x43   : > { %696 = vmatmul.bf16.gmra.mxu2 %v388_v13  ;;  %926 = vmatpush.bf16.msrb.mxu0 %v4373_v31  ;;  %v4356_v13 = vld [vmem:[%s8694_s1] sm:$0xf]  ;;  %v342_v25 = vunpack.c.l.b16 %v278_v21  ;;  %v343_v33 = vunpack.c.h.b16 %v278_v21  ;;  %v429_v34 = vshrl.u32 %v6279_v56, 16  ;;  %v5530_v37 = vld [vmem:[%s8694_s1 + $0x274] sm:$0xf] }
  0x44   : > { %994 = vmatpush.bf16.msrb.mxu2 %v4377_v26  ;;  %960 = vmatpush.bf16.msrb.mxu1 %v4437_v35  ;;  %v4357_v23 = vor.u32 %v5453_v15, %v4356_v13  ;;  %v415_v26 = vor.u32 %v413_v63, %v403_v47  ;;  %v427_v29 = vrot.slane %v425_v17, 1  ;;  %v5546_v39 = vld [vmem:[%s8694_s1 + $0x2f4] sm:$0xf]  ;;  %v4545_v42 = vor.u32 %v5530_v37, %v4542_v38  ;;  %v5531_v46 = vld [vmem:[%s8694_s1 + $0x274] sm:$0xf0] }
  0x45   : > { %1028 = vmatpush.bf16.msrb.mxu3 %v4441_v30  ;;  %v6328_v30 = vpack.c.b16 %v342_v25, %v342_v25  ;;  %v6334_v36 = vpack.c.b16 %v343_v33, %v343_v33  ;;  %v4604_v50 = vld [vmem:[%s8694_s1 + $0x2f0] sm:$0xf]  ;;  %v5547_v51 = vld [vmem:[%s8694_s1 + $0x2f4] sm:$0xf0]  ;;  %v5528_v55 = vld [vmem:[%s8694_s1 + $0x264] sm:$0xf]  ;;  %v431_v4 = vor.u32 %v429_v34, %v419_v27 }
  0x46   : > { %730 = vmatmul.bf16.gmra.mxu3 %v396_v14  ;;  %v4425_v14 = vor.u32 %v5468_v11, %v4422_v12  ;;  %v420_v31 = vsel %vm356_vm0, %v415_v26, %v419_v27  ;;  %v428_v32 = vsel %vm356_vm0, %v423_v28, %v427_v29  ;;  %v5544_v59 = vld [vmem:[%s8694_s1 + $0x2e4] sm:$0xf]  ;;  %v4598_v62 = vld [vmem:[%s8694_s1 + $0x2e8] sm:$0xf0]  ;;  %v437_v63 = vshrl.u32 %v6287_v1, 16 }
  0x47   : > { %927 = vmatpush.bf16.msrb.mxu0 %v4365_v5  ;;  %v433_v35 = vshll.u32 %v6328_v30, 16  ;;  %v441_v0 = vshll.u32 %v6334_v36, 16  ;;  %v4601_v3 = vor.u32 %v5544_v59, %v4598_v62  ;;  %v5529_v11 = vld [vmem:[%s8694_s1 + $0x264] sm:$0xf0]  ;;  %v4596_v12 = vld [vmem:[%s8694_s1 + $0x2e0] sm:$0xf] }
  0x48   : > { %995 = vmatpush.bf16.msrb.mxu2 %v4369_v44  ;;  %961 = vmatpush.bf16.msrb.mxu1 %v4429_v9  ;;  %v4606_v44 = vld [vmem:[%s8694_s1 + $0x2f8] sm:$0xf0]  ;;  %v439_v6 = vor.u32 %v437_v63, %v427_v29  ;;  %v5526_v15 = vld [vmem:[%s8694_s1 + $0x254] sm:$0xf]  ;;  %v5527_v25 = vld [vmem:[%s8694_s1 + $0x254] sm:$0xf0] }
  0x49   : > { %1029 = vmatpush.bf16.msrb.mxu3 %v4433_v45  ;;  %v4540_v45 = vld [vmem:[%s8694_s1 + $0x270] sm:$0xf]  ;;  %v4609_v47 = vor.u32 %v5546_v39, %v4606_v44  ;;  %v435_v5 = vrot.slane %v433_v35, 1  ;;  %v443_v7 = vrot.slane %v441_v0, 1  ;;  %v4526_v16 = vld [vmem:[%s8694_s1 + $0x258] sm:$0xf0] }
  0x4a   : > { %v4541_v49 = vor.u32 %v5531_v46, %v4540_v45  ;;  %v4529_v20 = vor.u32 %v5526_v15, %v4526_v16  ;;  %v5542_v17 = vld [vmem:[%s8694_s1 + $0x2d4] sm:$0xf]  ;;  %v4590_v21 = vld [vmem:[%s8694_s1 + $0x2d8] sm:$0xf0]  ;;  %v4588_v26 = vld [vmem:[%s8694_s1 + $0x2d0] sm:$0xf] }
  0x4b   : > { %928 = vmatpush.bf16.msrb.mxu0 %v4357_v23  ;;  %v436_v8 = vsel %vm356_vm0, %v431_v4, %v435_v5  ;;  %v444_v9 = vsel %vm356_vm0, %v439_v6, %v443_v7  ;;  %v4524_v23 = vld [vmem:[%s8694_s1 + $0x250] sm:$0xf]  ;;  %v5543_v27 = vld [vmem:[%s8694_s1 + $0x2d4] sm:$0xf0]  ;;  %v5540_v33 = vld [vmem:[%s8694_s1 + $0x2c4] sm:$0xf] }
  0x4c   : > { %996 = vmatpush.bf16.msrb.mxu2 %v4361_v10  ;;  %962 = vmatpush.bf16.msrb.mxu1 %v4421_v24  ;;  %v4532_v10 = vld [vmem:[%s8694_s1 + $0x260] sm:$0xf]  ;;  %v4593_v24 = vor.u32 %v5542_v17, %v4590_v21  ;;  %v4525_v28 = vor.u32 %v5527_v25, %v4524_v23  ;;  %v4589_v29 = vor.u32 %v5543_v27, %v4588_v26  ;;  %v4582_v35 = vld [vmem:[%s8694_s1 + $0x2c8] sm:$0xf0]  ;;  %v5525_v39 = vld [vmem:[%s8694_s1 + $0x244] sm:$0xf0] }
  0x4d   : > { %1030 = vmatpush.bf16.msrb.mxu3 %v4425_v14  ;;  %v4533_v13 = vor.u32 %v5529_v11, %v4532_v10  ;;  %v5545_v14 = vld [vmem:[%s8694_s1 + $0x2e4] sm:$0xf0]  ;;  %v4585_v37 = vor.u32 %v5540_v33, %v4582_v35  ;;  %v4516_v38 = vld [vmem:[%s8694_s1 + $0x240] sm:$0xf]  ;;  %v5539_v62 = vld [vmem:[%s8694_s1 + $0x2b4] sm:$0xf0] }
  0x4e   : > { %v4597_v18 = vor.u32 %v5545_v14, %v4596_v12  ;;  %v4517_v44 = vor.u32 %v5525_v39, %v4516_v38  ;;  %v5541_v45 = vld [vmem:[%s8694_s1 + $0x2c4] sm:$0xf0]  ;;  %v5520_v0 = vld [vmem:[%s8694_s1 + $0x224] sm:$0xf]  ;;  %v4566_v5 = vld [vmem:[%s8694_s1 + $0x2a8] sm:$0xf0] }
  0x4f   : > { %1288 = vmatpush.bf16.msra.mxu0 %v4541_v49  ;;  %v5538_v49 = vld [vmem:[%s8694_s1 + $0x2b4] sm:$0xf]  ;;  %v4500_v7 = vld [vmem:[%s8694_s1 + $0x220] sm:$0xf]  ;;  %v5537_v11 = vld [vmem:[%s8694_s1 + $0x2a4] sm:$0xf0] }
  0x50   : > { %1356 = vmatpush.bf16.msra.mxu2 %v4545_v42  ;;  %v4580_v42 = vld [vmem:[%s8694_s1 + $0x2c0] sm:$0xf]  ;;  %v4494_v14 = vld [vmem:[%s8694_s1 + $0x218] sm:$0xf0]  ;;  %v5534_v15 = vld [vmem:[%s8694_s1 + $0x294] sm:$0xf] }
  0x51   : > { %1390 = vmatpush.bf16.msra.mxu3 %v4609_v47  ;;  %v4581_v46 = vor.u32 %v5541_v45, %v4580_v42  ;;  %v4492_v17 = vld [vmem:[%s8694_s1 + $0x210] sm:$0xf]  ;;  %v5519_v21 = vld [vmem:[%s8694_s1 + $0x214] sm:$0xf0]  ;;  %v5516_v27 = vld [vmem:[%s8694_s1 + $0x204] sm:$0xf] }
  0x52   : > { %633 = vmatmul.bf16.gmra.mxu0 %v404_v57  ;;  %667 = vmatmul.bf16.gmra.mxu1 %v412_v58  ;;  %v4556_v23 = vld [vmem:[%s8694_s1 + $0x290] sm:$0xf]  ;;  %v5535_v25 = vld [vmem:[%s8694_s1 + $0x294] sm:$0xf0]  ;;  %v5517_v35 = vld [vmem:[%s8694_s1 + $0x204] sm:$0xf0] }
  0x53   : > { %701 = vmatmul.bf16.gmra.mxu2 %v404_v57  ;;  %v4605_v57 = vor.u32 %v5547_v51, %v4604_v50  ;;  %1289 = vmatpush.bf16.msra.mxu0 %v4533_v13  ;;  %v4574_v50 = vld [vmem:[%s8694_s1 + $0x2b8] sm:$0xf0]  ;;  %v5518_v13 = vld [vmem:[%s8694_s1 + $0x214] sm:$0xf]  ;;  %v4557_v26 = vor.u32 %v5535_v25, %v4556_v23  ;;  %v5533_v39 = vld [vmem:[%s8694_s1 + $0x284] sm:$0xf0] }
  0x54   : > { %v4577_v51 = vor.u32 %v5538_v49, %v4574_v50  ;;  %v4497_v16 = vor.u32 %v5518_v13, %v4494_v14  ;;  %v4766_v50 = vld [vmem:[%s8694_s1 + $0x3f8] sm:$0xf0]  ;;  %v5569_v25 = vld [vmem:[%s8694_s1 + $0x364] sm:$0xf0]  ;;  %vm1918_vm2 = vsmask.f32 6400 }
  0x55   : > { %1322 = vmatpush.bf16.msra.mxu1 %v4605_v57  ;;  %1391 = vmatpush.bf16.msra.mxu3 %v4601_v3  ;;  %v5523_v57 = vld [vmem:[%s8694_s1 + $0x234] sm:$0xf0]  ;;  %v5536_v3 = vld [vmem:[%s8694_s1 + $0x2a4] sm:$0xf]  ;;  %v4750_v43 = vld [vmem:[%s8694_s1 + $0x3d8] sm:$0xf0] }
  0x56   : > { %735 = vmatmul.bf16.gmra.mxu3 %v412_v58  ;;  %v4534_v58 = vld [vmem:[%s8694_s1 + $0x268] sm:$0xf0]  ;;  %v4569_v6 = vor.u32 %v5536_v3, %v4566_v5  ;;  %v4764_v3 = vld [vmem:[%s8694_s1 + $0x3f0] sm:$0xf]  ;;  %v5587_v5 = vld [vmem:[%s8694_s1 + $0x3f4] sm:$0xf0] }
  0x57   : > { %v4537_v2 = vor.u32 %v5528_v55, %v4534_v58  ;;  %1290 = vmatpush.bf16.msra.mxu0 %v4525_v28  ;;  %v4508_v55 = vld [vmem:[%s8694_s1 + $0x230] sm:$0xf]  ;;  %v4486_v28 = vld [vmem:[%s8694_s1 + $0x208] sm:$0xf0]  ;;  %vm3212_vm4 = vsmask.f32 5376 }
  0x58   : > { %v4572_v58 = vld [vmem:[%s8694_s1 + $0x2b0] sm:$0xf]  ;;  %v4509_v59 = vor.u32 %v5523_v57, %v4508_v55 }
  0x59   : > { %1357 = vmatpush.bf16.msra.mxu2 %v4537_v2  ;;  %1323 = vmatpush.bf16.msra.mxu1 %v4597_v18  ;;  %v4573_v63 = vor.u32 %v5539_v62, %v4572_v58  ;;  %v4502_v2 = vld [vmem:[%s8694_s1 + $0x228] sm:$0xf0]  ;;  %v4558_v18 = vld [vmem:[%s8694_s1 + $0x298] sm:$0xf0] }
  0x5a   : > { %1392 = vmatpush.bf16.msra.mxu3 %v4593_v24  ;;  %v4505_v4 = vor.u32 %v5520_v0, %v4502_v2  ;;  %v4493_v24 = vor.u32 %v5519_v21, %v4492_v17  ;;  %v4700_v0 = vld [vmem:[%s8694_s1 + $0x370] sm:$0xf]  ;;  %v5571_v2 = vld [vmem:[%s8694_s1 + $0x374] sm:$0xf0]  ;;  %v1057_v17 = vld [vmem:[%s6069_s23] sm:$0xee] }
  0x5b   : > { %1291 = vmatpush.bf16.msra.mxu0 %v4517_v44  ;;  %v1091_v21 = vunpack.c.l.b16 %v1057_v17  ;;  %v1092_v23 = vunpack.c.h.b16 %v1057_v17 }
  0x5d   : > { %1358 = vmatpush.bf16.msra.mxu2 %v4529_v20  ;;  %1324 = vmatpush.bf16.msra.mxu1 %v4589_v29  ;;  %v4561_v20 = vor.u32 %v5534_v15, %v4558_v18  ;;  %v5532_v29 = vld [vmem:[%s8694_s1 + $0x284] sm:$0xf] }
  0x5e   : > { %1393 = vmatpush.bf16.msra.mxu3 %v4585_v37  ;;  %v4548_v37 = vld [vmem:[%s8694_s1 + $0x280] sm:$0xf] }
  0x5f   : > { %1292 = vmatpush.bf16.msra.mxu0 %v4509_v59  ;;  %v4549_v45 = vor.u32 %v5533_v39, %v4548_v37  ;;  %v1093_v37 = vpack.c.b16 %v324_v48, %v1091_v21  ;;  %v5566_v39 = vld [vmem:[%s8694_s1 + $0x354] sm:$0xf]  ;;  %v4684_v48 = vld [vmem:[%s8694_s1 + $0x350] sm:$0xf]  ;;  %v4676_v21 = vld [vmem:[%s8694_s1 + $0x340] sm:$0xf] }
  0x61   : > { %1325 = vmatpush.bf16.msra.mxu1 %v4581_v46  ;;  %v4702_v46 = vld [vmem:[%s8694_s1 + $0x378] sm:$0xf0] }
  0x62   : > { %638 = vmatmul.bf16.gmra.mxu0 %v420_v31  ;;  %672 = vmatmul.bf16.gmra.mxu1 %v428_v32 }
  0x63   : > { %706 = vmatmul.bf16.gmra.mxu2 %v420_v31  ;;  %v5524_v31 = vld [vmem:[%s8694_s1 + $0x244] sm:$0xf]  ;;  %1394 = vmatpush.bf16.msra.mxu3 %v4577_v51 }
  0x65   : > { %1326 = vmatpush.bf16.msra.mxu1 %v4573_v63 }
  0x66   : > { %740 = vmatmul.bf16.gmra.mxu3 %v428_v32  ;;  %v4518_v32 = vld [vmem:[%s8694_s1 + $0x248] sm:$0xf0] }
  0x67   : > { %v4521_v34 = vor.u32 %v5524_v31, %v4518_v32  ;;  %1395 = vmatpush.bf16.msra.mxu3 %v4569_v6  ;;  %v4489_v31 = vor.u32 %v5516_v27, %v4486_v28  ;;  %v4550_v32 = vld [vmem:[%s8694_s1 + $0x288] sm:$0xf0]  ;;  %v5568_v6 = vld [vmem:[%s8694_s1 + $0x364] sm:$0xf]  ;;  %v5585_v28 = vld [vmem:[%s8694_s1 + $0x3e4] sm:$0xf0] }
  0x68   : > { %v4553_v33 = vor.u32 %v5532_v29, %v4550_v32 }
  0x69   : > { %1359 = vmatpush.bf16.msra.mxu2 %v4521_v34  ;;  %v4484_v34 = vld [vmem:[%s8694_s1 + $0x200] sm:$0xf] }
  0x6a   : > { %v4485_v38 = vor.u32 %v5517_v35, %v4484_v34 }
  0x6b   : > { %1396 = vmatpush.bf16.msra.mxu3 %v4561_v20 }
  0x6f   : > { %1397 = vmatpush.bf16.msra.mxu3 %v4553_v33 }
  0x72   : > { %643 = vmatmul.bf16.gmra.mxu0 %v436_v8  ;;  %677 = vmatmul.bf16.gmra.mxu1 %v444_v9 }
  0x73   : > { %711 = vmatmul.bf16.gmra.mxu2 %v436_v8  ;;  %v5521_v8 = vld [vmem:[%s8694_s1 + $0x224] sm:$0xf0] }
  0x74   : > { %v4501_v10 = vor.u32 %v5521_v8, %v4500_v7  ;;  %v4694_v7 = vld [vmem:[%s8694_s1 + $0x368] sm:$0xf0]  ;;  %v4765_v8 = vor.u32 %v5587_v5, %v4764_v3 }
  0x76   : > { %745 = vmatmul.bf16.gmra.mxu3 %v444_v9  ;;  %v4564_v9 = vld [vmem:[%s8694_s1 + $0x2a0] sm:$0xf]  ;;  %1293 = vmatpush.bf16.msra.mxu0 %v4501_v10  ;;  %v5584_v10 = vld [vmem:[%s8694_s1 + $0x3e4] sm:$0xf] }
  0x77   : > { %v4565_v12 = vor.u32 %v5537_v11, %v4564_v9  ;;  %v4697_v9 = vor.u32 %v5568_v6, %v4694_v7  ;;  %v4758_v11 = vld [vmem:[%s8694_s1 + $0x3e8] sm:$0xf0] }
  0x79   : > { %1327 = vmatpush.bf16.msra.mxu1 %v4565_v12  ;;  %v4761_v12 = vor.u32 %v5584_v10, %v4758_v11  ;;  %v4742_v11 = vld [vmem:[%s8694_s1 + $0x3c8] sm:$0xf0] }
  0x7a   : > { %1294 = vmatpush.bf16.msra.mxu0 %v4493_v24  ;;  %v4692_v24 = vld [vmem:[%s8694_s1 + $0x360] sm:$0xf] }
  0x7b   : > { %v4693_v27 = vor.u32 %v5569_v25, %v4692_v24  ;;  %v4740_v24 = vld [vmem:[%s8694_s1 + $0x3c0] sm:$0xf] }
  0x7d   : > { %1328 = vmatpush.bf16.msra.mxu1 %v4557_v26  ;;  %v4756_v26 = vld [vmem:[%s8694_s1 + $0x3e0] sm:$0xf] }
  0x7e   : > { %1295 = vmatpush.bf16.msra.mxu0 %v4485_v38  ;;  %v4757_v29 = vor.u32 %v5585_v28, %v4756_v26  ;;  %v1094_v38 = vpack.c.b16 %v325_v52, %v1092_v23  ;;  %v5567_v52 = vld [vmem:[%s8694_s1 + $0x354] sm:$0xf0]  ;;  %v5565_v23 = vld [vmem:[%s8694_s1 + $0x344] sm:$0xf0]  ;;  %v5562_v28 = vld [vmem:[%s8694_s1 + $0x334] sm:$0xf] }
  0x7f   : > { %v4677_v26 = vor.u32 %v5565_v23, %v4676_v21 }
  0x81   : > { %1329 = vmatpush.bf16.msra.mxu1 %v4549_v45 }
  0x82   : > { %929 = vmatmul.bf16.vlgmr.msrb.gmra.mxu0 %v6109_v60  ;;  %963 = vmatmul.bf16.vlgmr.msrb.gmra.mxu1 %v6113_v61 }
  0x83   : > { %997 = vmatmul.bf16.vlgmr.msrb.gmra.mxu2 %v6109_v60  ;;  %v5522_v60 = vld [vmem:[%s8694_s1 + $0x234] sm:$0xf] }
  0x85   : > { %1758 = vmatpush.bf16.msrb.mxu1 %v4765_v8 }
  0x86   : > { %1031 = vmatmul.bf16.vlgmr.msrb.gmra.mxu3 %v6113_v61  ;;  %v4510_v61 = vld [vmem:[%s8694_s1 + $0x238] sm:$0xf0] }
  0x87   : > { %v4513_v47 = vor.u32 %v5522_v60, %v4510_v61  ;;  %v5570_v61 = vld [vmem:[%s8694_s1 + $0x374] sm:$0xf] }
  0x88   : > { %v4705_v49 = vor.u32 %v5570_v61, %v4702_v46 }
  0x89   : > { %1360 = vmatpush.bf16.msra.mxu2 %v4513_v47  ;;  %v5586_v47 = vld [vmem:[%s8694_s1 + $0x3f4] sm:$0xf]  ;;  %1759 = vmatpush.bf16.msrb.mxu1 %v4757_v29  ;;  %v4670_v29 = vld [vmem:[%s8694_s1 + $0x338] sm:$0xf0] }
  0x8a   : > { %v4769_v51 = vor.u32 %v5586_v47, %v4766_v50  ;;  %v4685_v47 = vor.u32 %v5567_v52, %v4684_v48  ;;  %v5583_v50 = vld [vmem:[%s8694_s1 + $0x3d4] sm:$0xf0] }
  0x8c   : > { %1826 = vmatpush.bf16.msrb.mxu3 %v4769_v51 }
  0x8d   : > { %1361 = vmatpush.bf16.msra.mxu2 %v4505_v4  ;;  %v4701_v4 = vor.u32 %v5571_v2, %v4700_v0 }
  0x8f   : > { %1724 = vmatpush.bf16.msrb.mxu0 %v4701_v4 }
  0x90   : > { %1827 = vmatpush.bf16.msrb.mxu3 %v4761_v12 }
  0x91   : > { %1362 = vmatpush.bf16.msra.mxu2 %v4497_v16 }
  0x92   : > { %934 = vmatmul.bf16.gmra.mxu0 %v6094_v53  ;;  %968 = vmatmul.bf16.gmra.mxu1 %v6096_v54 }
  0x93   : > { %1002 = vmatmul.bf16.gmra.mxu2 %v6094_v53  ;;  %1725 = vmatpush.bf16.msrb.mxu0 %v4693_v27  ;;  %v5581_v27 = vld [vmem:[%s8694_s1 + $0x3c4] sm:$0xf0] }
  0x95   : > { %1363 = vmatpush.bf16.msra.mxu2 %v4489_v31 }
  0x96   : > { %1036 = vmatmul.bf16.gmra.mxu3 %v6096_v54 }
  0x97   : > { %1726 = vmatpush.bf16.msrb.mxu0 %v4685_v47 }
  0x99   : > { %1792 = vmatpush.bf16.msrb.mxu2 %v4705_v49  ;;  %v4748_v49 = vld [vmem:[%s8694_s1 + $0x3d0] sm:$0xf] }
  0x9a   : > { %v4749_v51 = vor.u32 %v5583_v50, %v4748_v49  ;;  %v4732_v49 = vld [vmem:[%s8694_s1 + $0x3b0] sm:$0xf] }
  0x9b   : > { %1727 = vmatpush.bf16.msrb.mxu0 %v4677_v26 }
  0x9c   : > { %1760 = vmatpush.bf16.msrb.mxu1 %v4749_v51  ;;  %v5579_v51 = vld [vmem:[%s8694_s1 + $0x3b4] sm:$0xf0] }
  0x9d   : > { %1793 = vmatpush.bf16.msrb.mxu2 %v4697_v9  ;;  %v5580_v9 = vld [vmem:[%s8694_s1 + $0x3c4] sm:$0xf] }
  0x9e   : > { %v4745_v12 = vor.u32 %v5580_v9, %v4742_v11  ;;  %v5561_v11 = vld [vmem:[%s8694_s1 + $0x324] sm:$0xf0] }
  0xa2   : > { %939 = vmatmul.bf16.gmra.mxu0 %v6181_v40  ;;  %973 = vmatmul.bf16.gmra.mxu1 %v6183_v41 }
  0xa3   : > { %1007 = vmatmul.bf16.gmra.mxu2 %v6181_v40 }
  0xa6   : > { %1041 = vmatmul.bf16.gmra.mxu3 %v6183_v41 }
  0xaf   : > { %v624_v42 = vpop.f32.mrf.mxu0  ;;  %v658_v44 = vpop.f32.mrf.mxu1 }
  0xb0   : > { %v6544_v60 = vadd.f32 %v658_v44, %v624_v42  ;;  %v4686_v42 = vld [vmem:[%s8694_s1 + $0x358] sm:$0xf0]  ;;  %v5582_v44 = vld [vmem:[%s8694_s1 + $0x3d4] sm:$0xf] }
  0xb1   : > { %v4689_v61 = vor.u32 %v5566_v39, %v4686_v42  ;;  %v4753_v46 = vor.u32 %v5582_v44, %v4750_v43  ;;  %v1104_v39 = vrot.slane %v6183_v41, 1  ;;  %v5563_v41 = vld [vmem:[%s8694_s1 + $0x334] sm:$0xf0] }
  0xb2   : > { %944 = vmatmul.bf16.gmra.mxu0 %v6235_v19  ;;  %978 = vmatmul.bf16.gmra.mxu1 %v6237_v22 }
  0xb3   : > { %1012 = vmatmul.bf16.gmra.mxu2 %v6235_v19  ;;  %1828 = vmatpush.bf16.msrb.mxu3 %v4753_v46 }
  0xb4   : > { %1794 = vmatpush.bf16.msrb.mxu2 %v4689_v61 }
  0xb6   : > { %1046 = vmatmul.bf16.gmra.mxu3 %v6237_v22  ;;  %v692_v55 = vpop.f32.mrf.mxu2 }
  0xb7   : > { %v626_v59 = vpop.f32.mrf.mxu0  ;;  %v660_v62 = vpop.f32.mrf.mxu1  ;;  %1829 = vmatpush.bf16.msrb.mxu3 %v4745_v12  ;;  %v4724_v12 = vld [vmem:[%s8694_s1 + $0x3a0] sm:$0xf] }
  0xb8   : > { %v6564_v63 = vadd.f32 %v660_v62, %v626_v59  ;;  %v1099_v59 = vrot.slane %v1094_v38, 1  ;;  %v1100_v62 = vrot.slane %v6096_v54, 1  ;;  %v4678_v54 = vld [vmem:[%s8694_s1 + $0x348] sm:$0xf0]  ;;  %v1102_v38 = vrot.slane %v6181_v40, 1 }
  0xb9   : > { %v726_v57 = vpop.f32.mrf.mxu3  ;;  %v4668_v40 = vld [vmem:[%s8694_s1 + $0x330] sm:$0xf] }
  0xba   : > { %v6562_v58 = vadd.f32 %v726_v57, %v692_v55  ;;  %v1096_v55 = vrot.slane %v1093_v37, 1  ;;  %v1097_v57 = vrot.slane %v6094_v53, 1  ;;  %v1101_v7 = vsel %vm1095_vm1, %v1099_v59, %v1100_v62  ;;  %v5564_v53 = vld [vmem:[%s8694_s1 + $0x344] sm:$0xf] }
  0xbb   : > { %v4681_v10 = vor.u32 %v5564_v53, %v4678_v54  ;;  %v1105_v46 = vsel %vm1095_vm1, %v1100_v62, %v1104_v39  ;;  %v4669_v50 = vor.u32 %v5563_v41, %v4668_v40  ;;  %v4733_v59 = vor.u32 %v5579_v51, %v4732_v49 }
  0xbc   : > { %v1098_v6 = vsel %vm1095_vm1, %v1096_v55, %v1097_v57  ;;  %v1103_v52 = vsel %vm1095_vm1, %v1097_v57, %v1102_v38  ;;  %v5560_v55 = vld [vmem:[%s8694_s1 + $0x324] sm:$0xf]  ;;  %v4662_v57 = vld [vmem:[%s8694_s1 + $0x328] sm:$0xf0] }
  0xbd   : > { %1795 = vmatpush.bf16.msrb.mxu2 %v4681_v10  ;;  %v4665_v62 = vor.u32 %v5560_v55, %v4662_v57  ;;  %1728 = vmatpush.bf16.msrb.mxu0 %v4669_v50  ;;  %v4660_v10 = vld [vmem:[%s8694_s1 + $0x320] sm:$0xf]  ;;  %v5556_v55 = vld [vmem:[%s8694_s1 + $0x304] sm:$0xf]  ;;  %v4646_v57 = vld [vmem:[%s8694_s1 + $0x308] sm:$0xf0] }
  0xbe   : > { %v694_v13 = vpop.f32.mrf.mxu2 }
  0xbf   : > { %v629_v16 = vpop.f32.mrf.mxu0  ;;  %v663_v18 = vpop.f32.mrf.mxu1 }
  0xc0   : > { %v6592_v20 = vadd.f32 %v663_v18, %v629_v16 }
  0xc1   : > { %v728_v14 = vpop.f32.mrf.mxu3 }
  0xc2   : > { %v6590_v15 = vadd.f32 %v728_v14, %v694_v13  ;;  %949 = vmatmul.bf16.gmra.mxu0 %v6279_v56  ;;  %983 = vmatmul.bf16.gmra.mxu1 %v6287_v1 }
  0xc3   : > { %1017 = vmatmul.bf16.gmra.mxu2 %v6279_v56 }
  0xc6   : > { %1051 = vmatmul.bf16.gmra.mxu3 %v6287_v1  ;;  %v697_v31 = vpop.f32.mrf.mxu2 }
  0xc7   : > { %v631_v34 = vpop.f32.mrf.mxu0  ;;  %v665_v35 = vpop.f32.mrf.mxu1 }
  0xc8   : > { %v6626_v45 = vadd.f32 %v665_v35, %v631_v34  ;;  %v5578_v34 = vld [vmem:[%s8694_s1 + $0x3b4] sm:$0xf]  ;;  %v4734_v35 = vld [vmem:[%s8694_s1 + $0x3b8] sm:$0xf0] }
  0xc9   : > { %v731_v32 = vpop.f32.mrf.mxu3  ;;  %v4737_v37 = vor.u32 %v5578_v34, %v4734_v35  ;;  %v5574_v34 = vld [vmem:[%s8694_s1 + $0x394] sm:$0xf] }
  0xca   : > { %v6611_v33 = vadd.f32 %v731_v32, %v697_v31  ;;  %v4741_v31 = vor.u32 %v5581_v27, %v4740_v24  ;;  %v4673_v32 = vor.u32 %v5562_v28, %v4670_v29 }
  0xcb   : > { %1830 = vmatpush.bf16.msrb.mxu3 %v4737_v37  ;;  %v4718_v37 = vld [vmem:[%s8694_s1 + $0x398] sm:$0xf0] }
  0xcc   : > { %1761 = vmatpush.bf16.msrb.mxu1 %v4741_v31  ;;  %1796 = vmatpush.bf16.msrb.mxu2 %v4673_v32  ;;  %v4654_v32 = vld [vmem:[%s8694_s1 + $0x318] sm:$0xf0] }
  0xce   : > { %v699_v0 = vpop.f32.mrf.mxu2 }
  0xcf   : > { %v634_v4 = vpop.f32.mrf.mxu0  ;;  %v668_v5 = vpop.f32.mrf.mxu1 }
  0xd0   : > { %v6649_v8 = vadd.f32 %v668_v5, %v634_v4  ;;  %1762 = vmatpush.bf16.msrb.mxu1 %v4733_v59  ;;  %1797 = vmatpush.bf16.msrb.mxu2 %v4665_v62  ;;  %v5572_v59 = vld [vmem:[%s8694_s1 + $0x384] sm:$0xf]  ;;  %v1110_v62 = vrot.slane %v6279_v56, 1 }
  0xd1   : > { %v733_v2 = vpop.f32.mrf.mxu3 }
  0xd2   : > { %v6645_v3 = vadd.f32 %v733_v2, %v699_v0  ;;  %1296 = vmatmul.bf16.vlgmr.msra.gmra.mxu0 %v1098_v6  ;;  %1330 = vmatmul.bf16.vlgmr.msra.gmra.mxu1 %v1101_v7  ;;  %v5576_v0 = vld [vmem:[%s8694_s1 + $0x3a4] sm:$0xf]  ;;  %v4726_v2 = vld [vmem:[%s8694_s1 + $0x3a8] sm:$0xf0] }
  0xd3   : > { %1364 = vmatmul.bf16.vlgmr.msra.gmra.mxu2 %v1098_v6  ;;  %v4729_v4 = vor.u32 %v5576_v0, %v4726_v2  ;;  %v1112_v0 = vrot.slane %v6287_v1, 1  ;;  %v4649_v2 = vor.u32 %v5556_v55, %v4646_v57 }
  0xd5   : > { %1831 = vmatpush.bf16.msrb.mxu3 %v4729_v4  ;;  %v4710_v4 = vld [vmem:[%s8694_s1 + $0x388] sm:$0xf0] }
  0xd6   : > { %1398 = vmatmul.bf16.vlgmr.msra.gmra.mxu3 %v1101_v7  ;;  %v702_v13 = vpop.f32.mrf.mxu2 }
  0xd7   : > { %v636_v18 = vpop.f32.mrf.mxu0  ;;  %v670_v17 = vpop.f32.mrf.mxu1 }
  0xd8   : > { %v6674_v25 = vadd.f32 %v670_v17, %v636_v18  ;;  %v4661_v18 = vor.u32 %v5561_v11, %v4660_v10  ;;  %v5577_v17 = vld [vmem:[%s8694_s1 + $0x3a4] sm:$0xf0] }
  0xd9   : > { %v736_v14 = vpop.f32.mrf.mxu3  ;;  %v4725_v21 = vor.u32 %v5577_v17, %v4724_v12 }
  0xda   : > { %v6663_v16 = vadd.f32 %v736_v14, %v702_v13  ;;  %v1106_v13 = vrot.slane %v6235_v19, 1  ;;  %v1108_v14 = vrot.slane %v6237_v22, 1  ;;  %1729 = vmatpush.bf16.msrb.mxu0 %v4661_v18  ;;  %v5558_v22 = vld [vmem:[%s8694_s1 + $0x314] sm:$0xf]  ;;  %v5573_v18 = vld [vmem:[%s8694_s1 + $0x384] sm:$0xf0] }
  0xdb   : > { %1763 = vmatpush.bf16.msrb.mxu1 %v4725_v21  ;;  %v4657_v35 = vor.u32 %v5558_v22, %v4654_v32  ;;  %v5602_v22 = vld [vmem:[%s8694_s1 + $0x474] sm:$0xf]  ;;  %v4894_v32 = vld [vmem:[%s8694_s1 + $0x4f8] sm:$0xf0] }
  0xdc   : > { %v1107_v29 = vsel %vm1095_vm1, %v1102_v38, %v1106_v13  ;;  %v1109_v19 = vsel %vm1095_vm1, %v1104_v39, %v1108_v14  ;;  %v4721_v38 = vor.u32 %v5574_v34, %v4718_v37  ;;  %v4652_v39 = vld [vmem:[%s8694_s1 + $0x310] sm:$0xf] }
  0xdd   : > { %1798 = vmatpush.bf16.msrb.mxu2 %v4657_v35 }
  0xde   : > { %v704_v42 = vpop.f32.mrf.mxu2  ;;  %1832 = vmatpush.bf16.msrb.mxu3 %v4721_v38 }
  0xdf   : > { %v639_v43 = vpop.f32.mrf.mxu0  ;;  %v673_v48 = vpop.f32.mrf.mxu1 }
  0xe0   : > { %v6697_v47 = vadd.f32 %v673_v48, %v639_v43  ;;  %v5575_v48 = vld [vmem:[%s8694_s1 + $0x394] sm:$0xf0] }
  0xe1   : > { %v738_v44 = vpop.f32.mrf.mxu3  ;;  %1799 = vmatpush.bf16.msrb.mxu2 %v4649_v2  ;;  %v4886_v2 = vld [vmem:[%s8694_s1 + $0x4e8] sm:$0xf0] }
  0xe2   : > { %v6693_v61 = vadd.f32 %v738_v44, %v704_v42  ;;  %1301 = vmatmul.bf16.gmra.mxu0 %v1103_v52  ;;  %1335 = vmatmul.bf16.gmra.mxu1 %v1105_v46  ;;  %v5559_v42 = vld [vmem:[%s8694_s1 + $0x314] sm:$0xf0]  ;;  %v4716_v44 = vld [vmem:[%s8694_s1 + $0x390] sm:$0xf] }
  0xe3   : > { %1369 = vmatmul.bf16.gmra.mxu2 %v1103_v52  ;;  %v4653_v43 = vor.u32 %v5559_v42, %v4652_v39  ;;  %v4717_v52 = vor.u32 %v5575_v48, %v4716_v44  ;;  %v1114_v48 = vrot.slane %v6328_v30, 1  ;;  %v5619_v30 = vld [vmem:[%s8694_s1 + $0x4f4] sm:$0xf0] }
  0xe5   : > { %1730 = vmatpush.bf16.msrb.mxu0 %v4653_v43  ;;  %1764 = vmatpush.bf16.msrb.mxu1 %v4717_v52  ;;  %v1116_v52 = vrot.slane %v6334_v36, 1  ;;  %v5600_v36 = vld [vmem:[%s8694_s1 + $0x464] sm:$0xf] }
  0xe6   : > { %1403 = vmatmul.bf16.gmra.mxu3 %v1105_v46  ;;  %v707_v5 = vpop.f32.mrf.mxu2 }
  0xe7   : > { %v641_v53 = vpop.f32.mrf.mxu0  ;;  %v675_v54 = vpop.f32.mrf.mxu1 }
  0xe8   : > { %v6725_v9 = vadd.f32 %v675_v54, %v641_v53  ;;  %v5557_v53 = vld [vmem:[%s8694_s1 + $0x304] sm:$0xf0]  ;;  %v4708_v54 = vld [vmem:[%s8694_s1 + $0x380] sm:$0xf] }
  0xe9   : > { %v741_v6 = vpop.f32.mrf.mxu3 }
  0xea   : > { %v6723_v7 = vadd.f32 %v741_v6, %v707_v5  ;;  %v4713_v5 = vor.u32 %v5572_v59, %v4710_v4  ;;  %v4644_v6 = vld [vmem:[%s8694_s1 + $0x300] sm:$0xf]  ;;  %v5616_v59 = vld [vmem:[%s8694_s1 + $0x4e4] sm:$0xf]  ;;  %v1444_v4 = vld [vmem:[%s6069_s23 + $0x8] sm:$0xee] }
  0xeb   : > { %v4645_v12 = vor.u32 %v5557_v53, %v4644_v6  ;;  %v4889_v6 = vor.u32 %v5616_v59, %v4886_v2  ;;  %v1499_v56 = vunpack.c.h.b16 %v1444_v4  ;;  %v4812_v59 = vld [vmem:[%s8694_s1 + $0x450] sm:$0xf]  ;;  %v5599_v2 = vld [vmem:[%s8694_s1 + $0x454] sm:$0xf0] }
  0xec   : > { %1833 = vmatpush.bf16.msrb.mxu3 %v4713_v5  ;;  %v6858_v5 = vld [vmem:[%s6069_s23 + $0x10] sm:$0xff] }
  0xed   : > { %1731 = vmatpush.bf16.msrb.mxu0 %v4645_v12  ;;  %v1501_v1 = vunpack.c.h.b16 %v6858_v5 }
  0xee   : > { %v709_v23 = vpop.f32.mrf.mxu2 }
  0xef   : > { %v644_v27 = vpop.f32.mrf.mxu0  ;;  %v678_v28 = vpop.f32.mrf.mxu1 }
  0xf0   : > { %v6745_v31 = vadd.f32 %v678_v28, %v644_v27  ;;  %v1113_v27 = vsel %vm1095_vm1, %v1108_v14, %v1112_v0  ;;  %v4709_v28 = vor.u32 %v5573_v18, %v4708_v54  ;;  %v1115_v18 = vsel %vm1095_vm1, %v1110_v62, %v1114_v48 }
  0xf1   : > { %v743_v24 = vpop.f32.mrf.mxu3 }
  0xf2   : > { %v6741_v26 = vadd.f32 %v743_v24, %v709_v23  ;;  %1306 = vmatmul.bf16.gmra.mxu0 %v1107_v29  ;;  %1340 = vmatmul.bf16.gmra.mxu1 %v1109_v19  ;;  %v1111_v24 = vsel %vm1095_vm1, %v1106_v13, %v1110_v62  ;;  %v4830_v13 = vld [vmem:[%s8694_s1 + $0x478] sm:$0xf0]  ;;  %v5601_v62 = vld [vmem:[%s8694_s1 + $0x464] sm:$0xf0] }
  0xf3   : > { %1374 = vmatmul.bf16.gmra.mxu2 %v1107_v29  ;;  %1765 = vmatpush.bf16.msrb.mxu1 %v4709_v28  ;;  %v4833_v14 = vor.u32 %v5602_v22, %v4830_v13 }
  0xf5   : > { %2263 = vmatpush.bf16.msra.mxu2 %v4833_v14  ;;  %v5548_v14 = vld [vmem:[%s6069_s23 + $0x1c] sm:$0xf] }
  0xf6   : > { %1408 = vmatmul.bf16.gmra.mxu3 %v1109_v19  ;;  %v712_v46 = vpop.f32.mrf.mxu2 }
  0xf7   : > { %v646_v49 = vpop.f32.mrf.mxu0  ;;  %v680_v50 = vpop.f32.mrf.mxu1 }
  0xf8   : > { %v6773_v51 = vadd.f32 %v680_v50, %v646_v49  ;;  %v4822_v50 = vld [vmem:[%s8694_s1 + $0x468] sm:$0xf0] }
  0xf9   : > { %v746_v40 = vpop.f32.mrf.mxu3  ;;  %v4825_v57 = vor.u32 %v5600_v36, %v4822_v50  ;;  %v4814_v36 = vld [vmem:[%s8694_s1 + $0x458] sm:$0xf0]  ;;  %v5614_v50 = vld [vmem:[%s8694_s1 + $0x4d4] sm:$0xf] }
  0xfa   : > { %v6771_v41 = vadd.f32 %v746_v40, %v712_v46  ;;  %v4828_v40 = vld [vmem:[%s8694_s1 + $0x470] sm:$0xf] }
  0xfb   : > { %2264 = vmatpush.bf16.msra.mxu2 %v4825_v57  ;;  %v4878_v57 = vld [vmem:[%s8694_s1 + $0x4d8] sm:$0xf0] }
  0xfe   : > { %v714_v10 = vpop.f32.mrf.mxu2 }
  0xff   : > { %v930_v21 = vpop.f32.mrf.mxu0  ;;  %v964_v23 = vpop.f32.mrf.mxu1 }
 0x100   : > { %v931_v29 = vadd.f32 %v930_v21, %v6544_v60  ;;  %v5618_v60 = vld [vmem:[%s8694_s1 + $0x4f4] sm:$0xf]  ;;  %v1117_v21 = vsel %vm1095_vm1, %v1112_v0, %v1116_v52  ;;  %v4884_v0 = vld [vmem:[%s8694_s1 + $0x4e0] sm:$0xf]  ;;  %v6899_v52 = vpack.c.b16 %v1501_v1, %v1499_v56 }
 0x101   : > { %v748_v11 = vpop.f32.mrf.mxu3  ;;  %v4897_v34 = vor.u32 %v5618_v60, %v4894_v32  ;;  %v4614_v32 = vld [vmem:[%s6069_s23 + $0x20] sm:$0xf0] }
 0x102   : > { %v6801_v17 = vadd.f32 %v748_v11, %v714_v10  ;;  %v6810_v19 = vadd.f32 %v964_v23, %v931_v29  ;;  %1311 = vmatmul.bf16.gmra.mxu0 %v1111_v24  ;;  %1345 = vmatmul.bf16.gmra.mxu1 %v1113_v27  ;;  %v5549_v29 = vld [vmem:[%s6069_s23 + $0x1c] sm:$0xf0] }
 0x103   : > { %1379 = vmatmul.bf16.gmra.mxu2 %v1111_v24  ;;  %2297 = vmatpush.bf16.msra.mxu3 %v4897_v34  ;;  %v1498_v24 = vunpack.c.l.b16 %v1444_v4  ;;  %v1535_v4 = vrot.slane %v6899_v52, 1 }
 0x106   : > { %1413 = vmatmul.bf16.gmra.mxu3 %v1113_v27  ;;  %v998_v35 = vpop.f32.mrf.mxu2  ;;  %v1500_v27 = vunpack.c.l.b16 %v6858_v5  ;;  %v5686_v5 = vld [vmem:[%s8694_s1 + $0x6d4] sm:$0xf] }
 0x107   : > { %v999_v38 = vadd.f32 %v998_v35, %v6562_v58  ;;  %v932_v39 = vpop.f32.mrf.mxu0  ;;  %v966_v42 = vpop.f32.mrf.mxu1  ;;  %v5603_v58 = vld [vmem:[%s8694_s1 + $0x474] sm:$0xf0]  ;;  %2298 = vmatpush.bf16.msra.mxu3 %v4889_v6  ;;  %v5617_v35 = vld [vmem:[%s8694_s1 + $0x4e4] sm:$0xf0] }
 0x108   : > { %v933_v44 = vadd.f32 %v932_v39, %v6564_v63  ;;  %v4892_v63 = vld [vmem:[%s8694_s1 + $0x4f0] sm:$0xf]  ;;  %v4829_v49 = vor.u32 %v5603_v58, %v4828_v40  ;;  %v6887_v13 = vpack.c.b16 %v1500_v27, %v1498_v24  ;;  %v6901_v40 = vor.u32 %v5548_v14, %v4614_v32  ;;  %v4806_v14 = vld [vmem:[%s8694_s1 + $0x448] sm:$0xf0]  ;;  %v5612_v32 = vld [vmem:[%s8694_s1 + $0x4c4] sm:$0xf] }
 0x109   : > { %v1032_v37 = vpop.f32.mrf.mxu3  ;;  %v4893_v55 = vor.u32 %v5619_v30, %v4892_v63 }
 0x10a   : > { %v6826_v43 = vadd.f32 %v1032_v37, %v999_v38  ;;  %v6830_v46 = vadd.f32 %v966_v42, %v933_v44  ;;  %2195 = vmatpush.bf16.msra.mxu0 %v4829_v49  ;;  %v4885_v37 = vor.u32 %v5617_v35, %v4884_v0  ;;  %v1532_v63 = vrot.slane %v6887_v13, 1  ;;  %v4870_v35 = vld [vmem:[%s8694_s1 + $0x4c8] sm:$0xf0] }
 0x10b   : > { %2229 = vmatpush.bf16.msra.mxu1 %v4893_v55  ;;  %v1536_v6 = vrot.slane %v6901_v40, 1 }
 0x10d   : > { %v1537_v56 = vsel %vm1095_vm1, %v1535_v4, %v1536_v6 }
 0x10e   : > { %v1000_v53 = vpop.f32.mrf.mxu2 }
 0x10f   : > { %v1001_v10 = vadd.f32 %v1000_v53, %v6590_v15  ;;  %v935_v11 = vpop.f32.mrf.mxu0  ;;  %v969_v12 = vpop.f32.mrf.mxu1  ;;  %v4612_v15 = vld [vmem:[%s6069_s23 + $0x18] sm:$0xf]  ;;  %2230 = vmatpush.bf16.msra.mxu1 %v4885_v37  ;;  %v4881_v53 = vor.u32 %v5614_v50, %v4878_v57  ;;  %v5551_v37 = vld [vmem:[%s6069_s23 + $0x2c] sm:$0xf0] }
 0x110   : > { %v936_v23 = vadd.f32 %v935_v11, %v6592_v20  ;;  %v4820_v20 = vld [vmem:[%s8694_s1 + $0x460] sm:$0xf]  ;;  %v6889_v60 = vor.u32 %v5549_v29, %v4612_v15  ;;  %v5615_v11 = vld [vmem:[%s8694_s1 + $0x4d4] sm:$0xf0] }
 0x111   : > { %v1034_v54 = vpop.f32.mrf.mxu3  ;;  %v4821_v34 = vor.u32 %v5601_v62, %v4820_v20  ;;  %2299 = vmatpush.bf16.msra.mxu3 %v4881_v53 }
 0x112   : > { %v6869_v28 = vadd.f32 %v1034_v54, %v1001_v10  ;;  %v6873_v22 = vadd.f32 %v969_v12, %v936_v23  ;;  %1316 = vmatmul.bf16.gmra.mxu0 %v1115_v18  ;;  %1350 = vmatmul.bf16.gmra.mxu1 %v1117_v21  ;;  %v1533_v49 = vrot.slane %v6889_v60, 1  ;;  %v4813_v54 = vor.u32 %v5599_v2, %v4812_v59  ;;  %v4876_v10 = vld [vmem:[%s8694_s1 + $0x4d0] sm:$0xf]  ;;  %v4804_v59 = vld [vmem:[%s8694_s1 + $0x440] sm:$0xf] }
 0x113   : > { %1384 = vmatmul.bf16.gmra.mxu2 %v1115_v18  ;;  %2196 = vmatpush.bf16.msra.mxu0 %v4821_v34  ;;  %v4877_v12 = vor.u32 %v5615_v11, %v4876_v10  ;;  %v5597_v2 = vld [vmem:[%s8694_s1 + $0x444] sm:$0xf0]  ;;  %v4798_v10 = vld [vmem:[%s8694_s1 + $0x438] sm:$0xf0] }
 0x114   : > { %v1534_v29 = vsel %vm1095_vm1, %v1532_v63, %v1533_v49  ;;  %v4805_v53 = vor.u32 %v5597_v2, %v4804_v59  ;;  %v5608_v59 = vld [vmem:[%s8694_s1 + $0x4a4] sm:$0xf]  ;;  %v4854_v2 = vld [vmem:[%s8694_s1 + $0x4a8] sm:$0xf0] }
 0x115   : > { %2231 = vmatpush.bf16.msra.mxu1 %v4877_v12 }
 0x116   : > { %1418 = vmatmul.bf16.gmra.mxu3 %v1117_v21  ;;  %v1003_v38 = vpop.f32.mrf.mxu2 }
 0x117   : > { %v1004_v42 = vadd.f32 %v1003_v38, %v6611_v33  ;;  %v937_v44 = vpop.f32.mrf.mxu0  ;;  %v971_v48 = vpop.f32.mrf.mxu1  ;;  %v5598_v33 = vld [vmem:[%s8694_s1 + $0x454] sm:$0xf]  ;;  %2197 = vmatpush.bf16.msra.mxu0 %v4813_v54  ;;  %v5550_v38 = vld [vmem:[%s6069_s23 + $0x2c] sm:$0xf] }
 0x118   : > { %v938_v58 = vadd.f32 %v937_v44, %v6626_v45  ;;  %v4817_v45 = vor.u32 %v5598_v33, %v4814_v36  ;;  %v5594_v54 = vld [vmem:[%s8694_s1 + $0x434] sm:$0xf] }
 0x119   : > { %v1037_v39 = vpop.f32.mrf.mxu3 }
 0x11a   : > { %v6906_v30 = vadd.f32 %v1037_v39, %v1004_v42  ;;  %v6917_v55 = vadd.f32 %v971_v48, %v938_v58  ;;  %2265 = vmatpush.bf16.msra.mxu2 %v4817_v45  ;;  %v4622_v39 = vld [vmem:[%s6069_s23 + $0x30] sm:$0xf0]  ;;  %v4873_v42 = vor.u32 %v5612_v32, %v4870_v35 }
 0x11b   : > { %v6967_v50 = vor.u32 %v5550_v38, %v4622_v39  ;;  %2198 = vmatpush.bf16.msra.mxu0 %v4805_v53  ;;  %v5553_v38 = vld [vmem:[%s6069_s23 + $0x3c] sm:$0xf0]  ;;  %v5552_v39 = vld [vmem:[%s6069_s23 + $0x3c] sm:$0xf] }
 0x11c   : > { %2300 = vmatpush.bf16.msra.mxu3 %v4873_v42 }
 0x11d   : > { %v1540_v12 = vrot.slane %v6967_v50, 1 }
 0x11e   : > { %v1005_v18 = vpop.f32.mrf.mxu2 }
 0x11f   : > { %v1006_v23 = vadd.f32 %v1005_v18, %v6645_v3  ;;  %v940_v24 = vpop.f32.mrf.mxu0  ;;  %v974_v15 = vpop.f32.mrf.mxu1  ;;  %v5596_v3 = vld [vmem:[%s8694_s1 + $0x444] sm:$0xf] }
 0x120   : > { %v941_v20 = vadd.f32 %v940_v24, %v6649_v8  ;;  %v4620_v8 = vld [vmem:[%s6069_s23 + $0x28] sm:$0xf]  ;;  %v4809_v34 = vor.u32 %v5596_v3, %v4806_v14  ;;  %v4862_v24 = vld [vmem:[%s8694_s1 + $0x4b8] sm:$0xf0] }
 0x121   : > { %v1039_v21 = vpop.f32.mrf.mxu3  ;;  %v6965_v36 = vor.u32 %v5551_v37, %v4620_v8  ;;  %v1541_v8 = vsel %vm1095_vm1, %v1536_v6, %v1540_v12  ;;  %v4628_v37 = vld [vmem:[%s6069_s23 + $0x38] sm:$0xf] }
 0x122   : > { %v6944_v62 = vadd.f32 %v1039_v21, %v1006_v23  ;;  %v6946_v0 = vadd.f32 %v974_v15, %v941_v20  ;;  %1732 = vmatmul.bf16.vlgmr.msrb.gmra.mxu0 %v1534_v29  ;;  %1766 = vmatmul.bf16.vlgmr.msrb.gmra.mxu1 %v1537_v56  ;;  %v4801_v21 = vor.u32 %v5594_v54, %v4798_v10  ;;  %v5610_v23 = vld [vmem:[%s8694_s1 + $0x4b4] sm:$0xf]  ;;  %v5595_v6 = vld [vmem:[%s8694_s1 + $0x434] sm:$0xf0] }
 0x123   : > { %1800 = vmatmul.bf16.vlgmr.msrb.gmra.mxu2 %v1534_v29  ;;  %v1538_v11 = vrot.slane %v6965_v36, 1  ;;  %v4865_v15 = vor.u32 %v5610_v23, %v4862_v24 }
 0x124   : > { %2266 = vmatpush.bf16.msra.mxu2 %v4809_v34 }
 0x125   : > { %2301 = vmatpush.bf16.msra.mxu3 %v4865_v15  ;;  %v1539_v32 = vsel %vm1095_vm1, %v1533_v49, %v1538_v11  ;;  %v4796_v49 = vld [vmem:[%s8694_s1 + $0x430] sm:$0xf] }
 0x126   : > { %1834 = vmatmul.bf16.vlgmr.msrb.gmra.mxu3 %v1537_v56  ;;  %v1008_v44 = vpop.f32.mrf.mxu2  ;;  %v4797_v42 = vor.u32 %v5595_v6, %v4796_v49 }
 0x127   : > { %v1009_v58 = vadd.f32 %v1008_v44, %v6663_v16  ;;  %v942_v63 = vpop.f32.mrf.mxu0  ;;  %v976_v33 = vpop.f32.mrf.mxu1  ;;  %v4868_v16 = vld [vmem:[%s8694_s1 + $0x4c0] sm:$0xf]  ;;  %v5611_v44 = vld [vmem:[%s8694_s1 + $0x4b4] sm:$0xf0] }
 0x128   : > { %v943_v45 = vadd.f32 %v942_v63, %v6674_v25  ;;  %v5613_v25 = vld [vmem:[%s8694_s1 + $0x4c4] sm:$0xf0]  ;;  %2267 = vmatpush.bf16.msra.mxu2 %v4801_v21  ;;  %v4630_v63 = vld [vmem:[%s6069_s23 + $0x40] sm:$0xf0]  ;;  %2199 = vmatpush.bf16.msra.mxu0 %v4797_v42  ;;  %v7045_v21 = vor.u32 %v5553_v38, %v4628_v37 }
 0x129   : > { %v1042_v48 = vpop.f32.mrf.mxu3  ;;  %v4869_v18 = vor.u32 %v5613_v25, %v4868_v16  ;;  %v4857_v16 = vor.u32 %v5608_v59, %v4854_v2  ;;  %v7047_v23 = vor.u32 %v5552_v39, %v4630_v63  ;;  %v4780_v59 = vld [vmem:[%s8694_s1 + $0x410] sm:$0xf]  ;;  %v5591_v2 = vld [vmem:[%s8694_s1 + $0x414] sm:$0xf0] }
 0x12a   : > { %v6970_v57 = vadd.f32 %v1042_v48, %v1009_v58  ;;  %v6981_v4 = vadd.f32 %v976_v33, %v943_v45  ;;  %v5592_v48 = vld [vmem:[%s8694_s1 + $0x424] sm:$0xf]  ;;  %v4790_v58 = vld [vmem:[%s8694_s1 + $0x428] sm:$0xf0] }
 0x12b   : > { %2232 = vmatpush.bf16.msra.mxu1 %v4869_v18  ;;  %v4793_v45 = vor.u32 %v5592_v48, %v4790_v58  ;;  %2302 = vmatpush.bf16.msra.mxu3 %v4857_v16  ;;  %v4782_v48 = vld [vmem:[%s8694_s1 + $0x418] sm:$0xf0]  ;;  %v4844_v16 = vld [vmem:[%s8694_s1 + $0x490] sm:$0xf] }
 0x12d   : > { %2268 = vmatpush.bf16.msra.mxu2 %v4793_v45 }
 0x12e   : > { %v1010_v29 = vpop.f32.mrf.mxu2 }
 0x12f   : > { %v1011_v20 = vadd.f32 %v1010_v29, %v6693_v61  ;;  %v945_v3 = vpop.f32.mrf.mxu0  ;;  %v979_v14 = vpop.f32.mrf.mxu1 }
 0x130   : > { %v946_v34 = vadd.f32 %v945_v3, %v6697_v47  ;;  %v4860_v47 = vld [vmem:[%s8694_s1 + $0x4b0] sm:$0xf]  ;;  %v1542_v3 = vrot.slane %v7045_v21, 1 }
 0x131   : > { %v1044_v56 = vpop.f32.mrf.mxu3  ;;  %v4861_v33 = vor.u32 %v5611_v44, %v4860_v47 }
 0x132   : > { %v7012_v35 = vadd.f32 %v1044_v56, %v1011_v20  ;;  %v7014_v61 = vadd.f32 %v979_v14, %v946_v34  ;;  %1737 = vmatmul.bf16.gmra.mxu0 %v1539_v32  ;;  %1771 = vmatmul.bf16.gmra.mxu1 %v1541_v8  ;;  %v4788_v56 = vld [vmem:[%s8694_s1 + $0x420] sm:$0xf]  ;;  %v1543_v6 = vsel %vm1095_vm1, %v1538_v11, %v1542_v3  ;;  %v5606_v11 = vld [vmem:[%s8694_s1 + $0x494] sm:$0xf] }
 0x133   : > { %1805 = vmatmul.bf16.gmra.mxu2 %v1539_v32  ;;  %2233 = vmatpush.bf16.msra.mxu1 %v4861_v33  ;;  %v4852_v20 = vld [vmem:[%s8694_s1 + $0x4a0] sm:$0xf]  ;;  %v5609_v32 = vld [vmem:[%s8694_s1 + $0x4a4] sm:$0xf0]  ;;  %v4846_v33 = vld [vmem:[%s8694_s1 + $0x498] sm:$0xf0] }
 0x134   : > { %v4849_v45 = vor.u32 %v5606_v11, %v4846_v33  ;;  %v5589_v11 = vld [vmem:[%s8694_s1 + $0x404] sm:$0xf0]  ;;  %v1454_v33 = vld [vmem:[%s6069_s23 + $0x58] sm:$0x11] }
 0x136   : > { %1839 = vmatmul.bf16.gmra.mxu3 %v1541_v8  ;;  %v1013_v53 = vpop.f32.mrf.mxu2  ;;  %v4853_v8 = vor.u32 %v5609_v32, %v4852_v20 }
 0x137   : > { %v1014_v54 = vadd.f32 %v1013_v53, %v6723_v7  ;;  %v947_v10 = vpop.f32.mrf.mxu0  ;;  %v981_v18 = vpop.f32.mrf.mxu1  ;;  %v5593_v7 = vld [vmem:[%s8694_s1 + $0x424] sm:$0xf0]  ;;  %v5554_v53 = vld [vmem:[%s6069_s23 + $0x4c] sm:$0xf]  ;;  %2303 = vmatpush.bf16.msra.mxu3 %v4849_v45 }
 0x138   : > { %v948_v24 = vadd.f32 %v947_v10, %v6725_v9  ;;  %v1544_v9 = vrot.slane %v7047_v23, 1  ;;  %v4789_v14 = vor.u32 %v5593_v7, %v4788_v56  ;;  %2234 = vmatpush.bf16.msra.mxu1 %v4853_v8  ;;  %v5607_v10 = vld [vmem:[%s8694_s1 + $0x494] sm:$0xf0] }
 0x139   : > { %v1047_v25 = vpop.f32.mrf.mxu3 }
 0x13a   : > { %v7050_v15 = vadd.f32 %v1047_v25, %v1014_v54  ;;  %v7052_v29 = vadd.f32 %v981_v18, %v948_v24  ;;  %2200 = vmatpush.bf16.msra.mxu0 %v4789_v14  ;;  %v1545_v47 = vsel %vm1095_vm1, %v1540_v12, %v1544_v9  ;;  %v5555_v12 = vld [vmem:[%s6069_s23 + $0x4c] sm:$0xf0]  ;;  %v4638_v25 = vld [vmem:[%s6069_s23 + $0x50] sm:$0xf0]  ;;  %v4781_v54 = vor.u32 %v5591_v2, %v4780_v59  ;;  %v5605_v59 = vld [vmem:[%s8694_s1 + $0x484] sm:$0xf0] }
 0x13b   : > { %v4845_v18 = vor.u32 %v5607_v10, %v4844_v16  ;;  %v7115_v8 = vor.u32 %v5554_v53, %v4638_v25 }
 0x13d   : > { %2235 = vmatpush.bf16.msra.mxu1 %v4845_v18 }
 0x13e   : > { %v1015_v34 = vpop.f32.mrf.mxu2  ;;  %2201 = vmatpush.bf16.msra.mxu0 %v4781_v54 }
 0x13f   : > { %v1016_v38 = vadd.f32 %v1015_v34, %v6741_v26  ;;  %v950_v39 = vpop.f32.mrf.mxu0  ;;  %v984_v49 = vpop.f32.mrf.mxu1  ;;  %v5590_v26 = vld [vmem:[%s8694_s1 + $0x414] sm:$0xf] }
 0x140   : > { %v951_v42 = vadd.f32 %v950_v39, %v6745_v31  ;;  %v4636_v31 = vld [vmem:[%s6069_s23 + $0x48] sm:$0xf]  ;;  %v4785_v63 = vor.u32 %v5590_v26, %v4782_v48  ;;  %v5588_v39 = vld [vmem:[%s8694_s1 + $0x404] sm:$0xf]  ;;  %v4772_v48 = vld [vmem:[%s8694_s1 + $0x400] sm:$0xf] }
 0x141   : > { %v1049_v37 = vpop.f32.mrf.mxu3  ;;  %v7113_v32 = vor.u32 %v5555_v12, %v4636_v31  ;;  %v4836_v31 = vld [vmem:[%s8694_s1 + $0x480] sm:$0xf]  ;;  %v4773_v45 = vor.u32 %v5589_v11, %v4772_v48 }
 0x142   : > { %v7080_v44 = vadd.f32 %v1049_v37, %v1016_v38  ;;  %v7091_v58 = vadd.f32 %v984_v49, %v951_v42  ;;  %1742 = vmatmul.bf16.gmra.mxu0 %v1543_v6  ;;  %1776 = vmatmul.bf16.gmra.mxu1 %v1545_v47  ;;  %v5604_v49 = vld [vmem:[%s8694_s1 + $0x484] sm:$0xf]  ;;  %v4838_v42 = vld [vmem:[%s8694_s1 + $0x488] sm:$0xf0]  ;;  %v4837_v10 = vor.u32 %v5605_v59, %v4836_v31  ;;  %v5635_v59 = vld [vmem:[%s8694_s1 + $0x574] sm:$0xf0] }
 0x143   : > { %1810 = vmatmul.bf16.gmra.mxu2 %v1543_v6  ;;  %v1546_v6 = vrot.slane %v7113_v32, 1  ;;  %v4841_v26 = vor.u32 %v5604_v49, %v4838_v42  ;;  %2202 = vmatpush.bf16.msra.mxu0 %v4773_v45  ;;  %v4956_v45 = vld [vmem:[%s8694_s1 + $0x570] sm:$0xf] }
 0x144   : > { %2269 = vmatpush.bf16.msra.mxu2 %v4785_v63  ;;  %2236 = vmatpush.bf16.msra.mxu1 %v4837_v10  ;;  %v5648_v10 = vld [vmem:[%s8694_s1 + $0x5e4] sm:$0xf] }
 0x145   : > { %2304 = vmatpush.bf16.msra.mxu3 %v4841_v26  ;;  %v1547_v25 = vsel %vm1095_vm1, %v1542_v3, %v1546_v6  ;;  %v5634_v3 = vld [vmem:[%s8694_s1 + $0x574] sm:$0xf] }
 0x146   : > { %1844 = vmatmul.bf16.gmra.mxu3 %v1545_v47  ;;  %v1018_v24 = vpop.f32.mrf.mxu2 }
 0x147   : > { %v1019_v7 = vadd.f32 %v1018_v24, %v6771_v41  ;;  %v952_v20 = vpop.f32.mrf.mxu0  ;;  %v986_v14 = vpop.f32.mrf.mxu1  ;;  %v4774_v41 = vld [vmem:[%s8694_s1 + $0x408] sm:$0xf0] }
 0x148   : > { %v953_v34 = vadd.f32 %v952_v20, %v6773_v51  ;;  %v1548_v51 = vrot.slane %v7115_v8, 1  ;;  %v4777_v47 = vor.u32 %v5588_v39, %v4774_v41  ;;  %v5650_v20 = vld [vmem:[%s8694_s1 + $0x5f4] sm:$0xf] }
 0x149   : > { %v1052_v56 = vpop.f32.mrf.mxu3 }
 0x14a   : > { %v7118_v37 = vadd.f32 %v1052_v56, %v1019_v7  ;;  %v7120_v38 = vadd.f32 %v986_v14, %v953_v34  ;;  %2270 = vmatpush.bf16.msra.mxu2 %v4777_v47  ;;  %v1549_v54 = vsel %vm1095_vm1, %v1544_v9, %v1548_v51  ;;  %v1519_v56 = vunpack.c.h.b16 %v1454_v33  ;;  %v4958_v9 = vld [vmem:[%s8694_s1 + $0x578] sm:$0xf0] }
 0x14b   : > { %v4961_v14 = vor.u32 %v5634_v3, %v4958_v9 }
 0x14c   : > { %v1531_v39 = vpack.c.b16 %v1519_v56, %v1519_v56 }
 0x14e   : > { %v1020_v12 = vpop.f32.mrf.mxu2  ;;  %2650 = vmatpush.bf16.msrb.mxu2 %v4961_v14 }
 0x14f   : > { %v1021_v2 = vadd.f32 %v1020_v12, %v6801_v17  ;;  %v1297_v16 = vpop.f32.mrf.mxu0  ;;  %v1331_v53 = vpop.f32.mrf.mxu1  ;;  %v1518_v17 = vunpack.c.l.b16 %v1454_v33 }
 0x150   : > { %v1332_v18 = vadd.f32 %v1331_v53, %v1297_v16  ;;  %v4957_v16 = vor.u32 %v5635_v59, %v4956_v45  ;;  %v4950_v53 = vld [vmem:[%s8694_s1 + $0x568] sm:$0xf0] }
 0x151   : > { %v1054_v63 = vpop.f32.mrf.mxu3  ;;  %v1530_v34 = vpack.c.b16 %v1518_v17, %v1518_v17 }
 0x152   : > { %v7160_v24 = vadd.f32 %v1054_v63, %v1021_v2  ;;  %v7163_v7 = vadd.f32 %v1332_v18, %v6810_v19  ;;  %1747 = vmatmul.bf16.gmra.mxu0 %v1547_v25  ;;  %1781 = vmatmul.bf16.gmra.mxu1 %v1549_v54  ;;  %v5022_v19 = vld [vmem:[%s8694_s1 + $0x5f8] sm:$0xf0]  ;;  %v1552_v63 = vrot.slane %v1531_v39, 1  ;;  %v5020_v2 = vld [vmem:[%s8694_s1 + $0x5f0] sm:$0xf] }
 0x153   : > { %1815 = vmatmul.bf16.gmra.mxu2 %v1547_v25  ;;  %v5025_v41 = vor.u32 %v5650_v20, %v5022_v19  ;;  %v1550_v12 = vrot.slane %v1530_v34, 1  ;;  %v5014_v18 = vld [vmem:[%s8694_s1 + $0x5e8] sm:$0xf0]  ;;  %2582 = vmatpush.bf16.msrb.mxu0 %v4957_v16 }
 0x154   : > { %v5017_v17 = vor.u32 %v5648_v10, %v5014_v18  ;;  %v1553_v34 = vsel %vm1095_vm1, %v1548_v51, %v1552_v63  ;;  %v1940_v51 = vshll.u32 %v6899_v52, 16 }
 0x155   : > { %2684 = vmatpush.bf16.msrb.mxu3 %v5025_v41  ;;  %v1551_v19 = vsel %vm1095_vm1, %v1546_v6, %v1550_v12  ;;  %v1920_v41 = vshrl.u32 %v6887_v13, 16  ;;  %v5633_v12 = vld [vmem:[%s8694_s1 + $0x564] sm:$0xf0] }
 0x156   : > { %1849 = vmatmul.bf16.gmra.mxu3 %v1549_v54  ;;  %v1365_v49 = vpop.f32.mrf.mxu2 }
 0x157   : > { %v1299_v26 = vpop.f32.mrf.mxu0  ;;  %v1333_v48 = vpop.f32.mrf.mxu1  ;;  %v1922_v45 = vrot.slane %v1920_v41, 1 }
 0x158   : > { %v1334_v11 = vadd.f32 %v1333_v48, %v1299_v26  ;;  %v1931_v26 = vshll.u32 %v6889_v60, 16  ;;  %v1937_v48 = vshrl.u32 %v6899_v52, 16  ;;  %v5649_v52 = vld [vmem:[%s8694_s1 + $0x5e4] sm:$0xf0] }
 0x159   : > { %v1399_v47 = vpop.f32.mrf.mxu3  ;;  %2685 = vmatpush.bf16.msrb.mxu3 %v5017_v17  ;;  %v1942_v17 = vrot.slane %v1940_v51, 2 }
 0x15a   : > { %v1400_v42 = vadd.f32 %v1399_v47, %v1365_v49  ;;  %v7181_v33 = vadd.f32 %v1334_v11, %v6830_v46  ;;  %v5632_v46 = vld [vmem:[%s8694_s1 + $0x564] sm:$0xf]  ;;  %v1923_v49 = vshll.u32 %v6887_v13, 16  ;;  %v1945_v11 = vshrl.u32 %v6901_v40, 16 }
 0x15b   : > { %v4953_v54 = vor.u32 %v5632_v46, %v4950_v53  ;;  %v1948_v13 = vshll.u32 %v6901_v40, 16  ;;  %v1933_v53 = vrot.slane %v1931_v26, 2  ;;  %v4940_v26 = vld [vmem:[%s8694_s1 + $0x550] sm:$0xf] }
 0x15c   : > { %v7178_v31 = vadd.f32 %v1400_v42, %v6826_v43  ;;  %v5651_v43 = vld [vmem:[%s8694_s1 + $0x5f4] sm:$0xf0]  ;;  %v1928_v42 = vshrl.u32 %v6889_v60, 16 }
 0x15d   : > { %v5021_v25 = vor.u32 %v5651_v43, %v5020_v2  ;;  %2651 = vmatpush.bf16.msrb.mxu2 %v4953_v54  ;;  %v1925_v43 = vrot.slane %v1923_v49, 2 }
 0x15e   : > { %v1367_v56 = vpop.f32.mrf.mxu2  ;;  %v1930_v46 = vrot.slane %v1928_v42, 1  ;;  %v5006_v42 = vld [vmem:[%s8694_s1 + $0x5d8] sm:$0xf0] }
 0x15f   : > { %2616 = vmatpush.bf16.msrb.mxu1 %v5021_v25  ;;  %v1302_v20 = vpop.f32.mrf.mxu0  ;;  %v1336_v14 = vpop.f32.mrf.mxu1  ;;  %v1939_v25 = vrot.slane %v1937_v48, 1  ;;  %v1926_v41 = vor.u32 %v1925_v43, %v1922_v45  ;;  %v5631_v48 = vld [vmem:[%s8694_s1 + $0x554] sm:$0xf0] }
 0x160   : > { %v1337_v39 = vadd.f32 %v1336_v14, %v1302_v20  ;;  %v5630_v14 = vld [vmem:[%s8694_s1 + $0x554] sm:$0xf]  ;;  %v7254_v49 = vor.u32 %v1933_v53, %v1930_v46 }
 0x161   : > { %v1401_v3 = vpop.f32.mrf.mxu3  ;;  %v1943_v51 = vor.u32 %v1942_v17, %v1939_v25  ;;  %v1954_v25 = vshrl.u32 %v6965_v36, 16  ;;  %v1957_v17 = vshll.u32 %v6965_v36, 16 }
 0x162   : > { %v1402_v9 = vadd.f32 %v1401_v3, %v1367_v56  ;;  %v7222_v6 = vadd.f32 %v1337_v39, %v6873_v22  ;;  %1752 = vmatmul.bf16.gmra.mxu0 %v1551_v19  ;;  %1786 = vmatmul.bf16.gmra.mxu1 %v1553_v34  ;;  %v5012_v22 = vld [vmem:[%s8694_s1 + $0x5e0] sm:$0xf]  ;;  %v1947_v56 = vrot.slane %v1945_v11, 1  ;;  %v1950_v3 = vrot.slane %v1948_v13, 2 }
 0x163   : > { %1820 = vmatmul.bf16.gmra.mxu2 %v1551_v19  ;;  %v5013_v59 = vor.u32 %v5649_v52, %v5012_v22  ;;  %v4942_v19 = vld [vmem:[%s8694_s1 + $0x558] sm:$0xf0]  ;;  %v4941_v13 = vor.u32 %v5631_v48, %v4940_v26  ;;  %v1959_v48 = vrot.slane %v1957_v17, 2 }
 0x164   : > { %v7216_v47 = vadd.f32 %v1402_v9, %v6869_v28  ;;  %v4948_v28 = vld [vmem:[%s8694_s1 + $0x560] sm:$0xf]  ;;  %v7265_v11 = vor.u32 %v1950_v3, %v1947_v56  ;;  %v1966_v56 = vshll.u32 %v6967_v50, 16 }
 0x165   : > { %v4949_v63 = vor.u32 %v5633_v12, %v4948_v28  ;;  %2617 = vmatpush.bf16.msrb.mxu1 %v5013_v59  ;;  %v5004_v28 = vld [vmem:[%s8694_s1 + $0x5d0] sm:$0xf]  ;;  %v5647_v12 = vld [vmem:[%s8694_s1 + $0x5d4] sm:$0xf0] }
 0x166   : > { %1854 = vmatmul.bf16.gmra.mxu3 %v1553_v34  ;;  %v1370_v2 = vpop.f32.mrf.mxu2  ;;  %v5646_v34 = vld [vmem:[%s8694_s1 + $0x5d4] sm:$0xf]  ;;  %v5005_v22 = vor.u32 %v5647_v12, %v5004_v28  ;;  %v1952_v43 = vsel %vm1918_vm2, %v1943_v51, %v7265_v11  ;;  %v4932_v12 = vld [vmem:[%s8694_s1 + $0x540] sm:$0xf] }
 0x167   : > { %2583 = vmatpush.bf16.msrb.mxu0 %v4949_v63  ;;  %v1304_v10 = vpop.f32.mrf.mxu0  ;;  %v1338_v18 = vpop.f32.mrf.mxu1 }
 0x168   : > { %v1339_v9 = vadd.f32 %v1338_v18, %v1304_v10  ;;  %v5628_v10 = vld [vmem:[%s8694_s1 + $0x544] sm:$0xf]  ;;  %v4934_v18 = vld [vmem:[%s8694_s1 + $0x548] sm:$0xf0] }
 0x169   : > { %v1404_v16 = vpop.f32.mrf.mxu3  ;;  %2618 = vmatpush.bf16.msrb.mxu1 %v5005_v22  ;;  %v4937_v3 = vor.u32 %v5628_v10, %v4934_v18  ;;  %v5629_v22 = vld [vmem:[%s8694_s1 + $0x544] sm:$0xf0]  ;;  %v4990_v10 = vld [vmem:[%s8694_s1 + $0x5b8] sm:$0xf0] }
 0x16a   : > { %v1405_v54 = vadd.f32 %v1404_v16, %v1370_v2  ;;  %v7252_v39 = vadd.f32 %v1339_v9, %v6917_v55  ;;  %v5009_v55 = vor.u32 %v5646_v34, %v5006_v42  ;;  %v1935_v16 = vsel %vm1918_vm2, %v1926_v41, %v7254_v49  ;;  %v4998_v9 = vld [vmem:[%s8694_s1 + $0x5c8] sm:$0xf0] }
 0x16b   : > { %2584 = vmatpush.bf16.msrb.mxu0 %v4941_v13  ;;  %v1956_v41 = vrot.slane %v1954_v25, 1  ;;  %v5642_v25 = vld [vmem:[%s8694_s1 + $0x5b4] sm:$0xf] }
 0x16c   : > { %v7240_v20 = vadd.f32 %v1405_v54, %v6906_v30  ;;  %v4945_v30 = vor.u32 %v5630_v14, %v4942_v19  ;;  %2686 = vmatpush.bf16.msrb.mxu3 %v5009_v55  ;;  %v1968_v55 = vrot.slane %v1966_v56, 2  ;;  %v4993_v18 = vor.u32 %v5642_v25, %v4990_v10 }
 0x16e   : > { %2652 = vmatpush.bf16.msrb.mxu2 %v4945_v30  ;;  %v1372_v63 = vpop.f32.mrf.mxu2 }
 0x16f   : > { %v1307_v59 = vpop.f32.mrf.mxu0  ;;  %v1341_v2 = vpop.f32.mrf.mxu1 }
 0x170   : > { %v1342_v46 = vadd.f32 %v1341_v2, %v1307_v59  ;;  %v5626_v59 = vld [vmem:[%s8694_s1 + $0x534] sm:$0xf]  ;;  %v4926_v2 = vld [vmem:[%s8694_s1 + $0x538] sm:$0xf0] }
 0x171   : > { %v1406_v52 = vpop.f32.mrf.mxu3 }
 0x172   : > { %v1407_v45 = vadd.f32 %v1406_v52, %v1372_v63  ;;  %v7282_v54 = vadd.f32 %v1342_v46, %v6946_v0  ;;  %2203 = vmatmul.bf16.vlgmr.msra.gmra.mxu0 %v1935_v16  ;;  %2237 = vmatmul.bf16.vlgmr.msra.gmra.mxu1 %v1952_v43  ;;  %v1963_v0 = vshrl.u32 %v6967_v50, 16  ;;  %v4996_v63 = vld [vmem:[%s8694_s1 + $0x5c0] sm:$0xf] }
 0x173   : > { %2271 = vmatmul.bf16.vlgmr.msra.gmra.mxu2 %v1935_v16  ;;  %v7323_v16 = vor.u32 %v1959_v48, %v1956_v41 }
 0x174   : > { %v7278_v53 = vadd.f32 %v1407_v45, %v6944_v62  ;;  %v5644_v62 = vld [vmem:[%s8694_s1 + $0x5c4] sm:$0xf]  ;;  %2653 = vmatpush.bf16.msrb.mxu2 %v4937_v3  ;;  %v1965_v51 = vrot.slane %v1963_v0, 1  ;;  %v4933_v45 = vor.u32 %v5629_v22, %v4932_v12 }
 0x175   : > { %v5001_v14 = vor.u32 %v5644_v62, %v4998_v9  ;;  %v1961_v9 = vsel %vm1918_vm2, %v7254_v49, %v7323_v16  ;;  %v4924_v49 = vld [vmem:[%s8694_s1 + $0x530] sm:$0xf] }
 0x176   : > { %2305 = vmatmul.bf16.vlgmr.msra.gmra.mxu3 %v1952_v43  ;;  %v1375_v19 = vpop.f32.mrf.mxu2  ;;  %v7325_v43 = vor.u32 %v1968_v55, %v1965_v51  ;;  %2585 = vmatpush.bf16.msrb.mxu0 %v4933_v45  ;;  %v5624_v55 = vld [vmem:[%s8694_s1 + $0x524] sm:$0xf]  ;;  %v4982_v45 = vld [vmem:[%s8694_s1 + $0x5a8] sm:$0xf0] }
 0x177   : > { %2687 = vmatpush.bf16.msrb.mxu3 %v5001_v14  ;;  %v1309_v42 = vpop.f32.mrf.mxu0  ;;  %v1343_v26 = vpop.f32.mrf.mxu1 }
 0x178   : > { %v1344_v13 = vadd.f32 %v1343_v26, %v1309_v42  ;;  %v1970_v14 = vsel %vm1918_vm2, %v7265_v11, %v7325_v43  ;;  %v1981_v42 = vshrl.u32 %v7047_v23, 16  ;;  %v1984_v26 = vshll.u32 %v7047_v23, 16  ;;  %v4988_v11 = vld [vmem:[%s8694_s1 + $0x5b0] sm:$0xf] }
 0x179   : > { %v1409_v34 = vpop.f32.mrf.mxu3 }
 0x17a   : > { %v1410_v30 = vadd.f32 %v1409_v34, %v1375_v19  ;;  %v7312_v52 = vadd.f32 %v1344_v13, %v6981_v4  ;;  %v4929_v4 = vor.u32 %v5626_v59, %v4926_v2  ;;  %v1972_v34 = vshrl.u32 %v7045_v21, 16  ;;  %v4918_v13 = vld [vmem:[%s8694_s1 + $0x528] sm:$0xf0] }
 0x17b   : > { %2688 = vmatpush.bf16.msrb.mxu3 %v4993_v18  ;;  %v4921_v22 = vor.u32 %v5624_v55, %v4918_v13 }
 0x17c   : > { %v7300_v28 = vadd.f32 %v1410_v30, %v6970_v57  ;;  %v5645_v57 = vld [vmem:[%s8694_s1 + $0x5c4] sm:$0xf0]  ;;  %2654 = vmatpush.bf16.msrb.mxu2 %v4929_v4  ;;  %v1975_v30 = vshll.u32 %v7045_v21, 16 }
 0x17d   : > { %v4997_v46 = vor.u32 %v5645_v57, %v4996_v63  ;;  %v5640_v63 = vld [vmem:[%s8694_s1 + $0x5a4] sm:$0xf] }
 0x17e   : > { %v1377_v62 = vpop.f32.mrf.mxu2  ;;  %v4985_v57 = vor.u32 %v5640_v63, %v4982_v45  ;;  %v1977_v18 = vrot.slane %v1975_v30, 2  ;;  %v5622_v45 = vld [vmem:[%s8694_s1 + $0x514] sm:$0xf] }
 0x17f   : > { %2619 = vmatpush.bf16.msrb.mxu1 %v4997_v46  ;;  %v1312_v56 = vpop.f32.mrf.mxu0  ;;  %v1346_v3 = vpop.f32.mrf.mxu1  ;;  %v1974_v46 = vrot.slane %v1972_v34, 1 }
 0x180   : > { %v1347_v19 = vadd.f32 %v1346_v3, %v1312_v56  ;;  %2655 = vmatpush.bf16.msrb.mxu2 %v4921_v22  ;;  %2689 = vmatpush.bf16.msrb.mxu3 %v4985_v57  ;;  %v1993_v22 = vshll.u32 %v7113_v32, 16 }
 0x181   : > { %v1411_v17 = vpop.f32.mrf.mxu3  ;;  %v7388_v34 = vor.u32 %v1977_v18, %v1974_v46  ;;  %v4974_v46 = vld [vmem:[%s8694_s1 + $0x598] sm:$0xf0] }
 0x182   : > { %v1412_v0 = vadd.f32 %v1411_v17, %v1377_v62  ;;  %v7347_v48 = vadd.f32 %v1347_v19, %v7014_v61  ;;  %2208 = vmatmul.bf16.gmra.mxu0 %v1961_v9  ;;  %2242 = vmatmul.bf16.gmra.mxu1 %v1970_v14  ;;  %v5643_v61 = vld [vmem:[%s8694_s1 + $0x5b4] sm:$0xf0]  ;;  %v1983_v62 = vrot.slane %v1981_v42, 1  ;;  %v1986_v17 = vrot.slane %v1984_v26, 2  ;;  %v4980_v19 = vld [vmem:[%s8694_s1 + $0x5a0] sm:$0xf] }
 0x183   : > { %2276 = vmatmul.bf16.gmra.mxu2 %v1961_v9  ;;  %v4989_v12 = vor.u32 %v5643_v61, %v4988_v11  ;;  %v4916_v9 = vld [vmem:[%s8694_s1 + $0x520] sm:$0xf]  ;;  %v1979_v61 = vsel %vm1918_vm2, %v7323_v16, %v7388_v34  ;;  %v4910_v16 = vld [vmem:[%s8694_s1 + $0x518] sm:$0xf0] }
 0x184   : > { %v7341_v41 = vadd.f32 %v1412_v0, %v7012_v35  ;;  %v5627_v35 = vld [vmem:[%s8694_s1 + $0x534] sm:$0xf0]  ;;  %v7390_v30 = vor.u32 %v1986_v17, %v1983_v62 }
 0x185   : > { %v4925_v51 = vor.u32 %v5627_v35, %v4924_v49  ;;  %2620 = vmatpush.bf16.msrb.mxu1 %v4989_v12  ;;  %v1990_v12 = vshrl.u32 %v7113_v32, 16  ;;  %v5639_v62 = vld [vmem:[%s8694_s1 + $0x594] sm:$0xf0] }
 0x186   : > { %2310 = vmatmul.bf16.gmra.mxu3 %v1970_v14  ;;  %v1380_v59 = vpop.f32.mrf.mxu2  ;;  %v5625_v14 = vld [vmem:[%s8694_s1 + $0x524] sm:$0xf0]  ;;  %v1988_v55 = vsel %vm1918_vm2, %v7325_v43, %v7390_v30  ;;  %v5638_v43 = vld [vmem:[%s8694_s1 + $0x594] sm:$0xf] }
 0x187   : > { %2586 = vmatpush.bf16.msrb.mxu0 %v4925_v51  ;;  %v1314_v25 = vpop.f32.mrf.mxu0  ;;  %v1348_v10 = vpop.f32.mrf.mxu1 }
 0x188   : > { %v1349_v0 = vadd.f32 %v1348_v10, %v1314_v25  ;;  %v5623_v25 = vld [vmem:[%s8694_s1 + $0x514] sm:$0xf0]  ;;  %v4972_v10 = vld [vmem:[%s8694_s1 + $0x590] sm:$0xf] }
 0x189   : > { %v1414_v2 = vpop.f32.mrf.mxu3  ;;  %v4973_v17 = vor.u32 %v5639_v62, %v4972_v10  ;;  %v5637_v62 = vld [vmem:[%s8694_s1 + $0x584] sm:$0xf0] }
 0x18a   : > { %v1415_v4 = vadd.f32 %v1414_v2, %v1380_v59  ;;  %v7377_v3 = vadd.f32 %v1349_v0, %v7052_v29  ;;  %v5641_v29 = vld [vmem:[%s8694_s1 + $0x5a4] sm:$0xf0]  ;;  %v2002_v59 = vshll.u32 %v7115_v8, 16  ;;  %v4913_v2 = vor.u32 %v5622_v45, %v4910_v16  ;;  %v5636_v45 = vld [vmem:[%s8694_s1 + $0x584] sm:$0xf] }
 0x18b   : > { %v4981_v42 = vor.u32 %v5641_v29, %v4980_v19  ;;  %v1880_v19 = vld [vmem:[%s6069_s23 + $0x58] sm:$0x33] }
 0x18c   : > { %v7374_v56 = vadd.f32 %v1415_v4, %v7050_v15  ;;  %v4917_v15 = vor.u32 %v5625_v14, %v4916_v9  ;;  %v4977_v4 = vor.u32 %v5638_v43, %v4974_v46  ;;  %2656 = vmatpush.bf16.msrb.mxu2 %v4913_v2  ;;  %v1992_v14 = vrot.slane %v1990_v12, 1  ;;  %v5620_v12 = vld [vmem:[%s8694_s1 + $0x504] sm:$0xf]  ;;  %v4900_v2 = vld [vmem:[%s8694_s1 + $0x500] sm:$0xf] }
 0x18d   : > { %2621 = vmatpush.bf16.msrb.mxu1 %v4981_v42  ;;  %v5621_v46 = vld [vmem:[%s8694_s1 + $0x504] sm:$0xf0] }
 0x18e   : > { %2587 = vmatpush.bf16.msrb.mxu0 %v4917_v15  ;;  %v1382_v26 = vpop.f32.mrf.mxu2  ;;  %2690 = vmatpush.bf16.msrb.mxu3 %v4977_v4  ;;  %v4964_v4 = vld [vmem:[%s8694_s1 + $0x580] sm:$0xf] }
 0x18f   : > { %v1317_v11 = vpop.f32.mrf.mxu0  ;;  %v1351_v51 = vpop.f32.mrf.mxu1 }
 0x190   : > { %v1352_v13 = vadd.f32 %v1351_v51, %v1317_v11 }
 0x191   : > { %v1416_v49 = vpop.f32.mrf.mxu3  ;;  %2622 = vmatpush.bf16.msrb.mxu1 %v4973_v17 }
 0x192   : > { %v1417_v35 = vadd.f32 %v1416_v49, %v1382_v26  ;;  %v7416_v57 = vadd.f32 %v1352_v13, %v7091_v58  ;;  %2213 = vmatmul.bf16.gmra.mxu0 %v1979_v61  ;;  %2247 = vmatmul.bf16.gmra.mxu1 %v1988_v55  ;;  %v4908_v58 = vld [vmem:[%s8694_s1 + $0x510] sm:$0xf]  ;;  %v1995_v26 = vrot.slane %v1993_v22, 2  ;;  %v1915_v13 = vunpack.c.h.b16 %v1880_v19  ;;  %v4902_v22 = vld [vmem:[%s8694_s1 + $0x508] sm:$0xf0] }
 0x193   : > { %2281 = vmatmul.bf16.gmra.mxu2 %v1979_v61  ;;  %v4909_v18 = vor.u32 %v5623_v25, %v4908_v58  ;;  %v1914_v61 = vunpack.c.l.b16 %v1880_v19  ;;  %v4905_v43 = vor.u32 %v5620_v12, %v4902_v22 }
 0x194   : > { %v7404_v63 = vadd.f32 %v1417_v35, %v7080_v44  ;;  %v1999_v44 = vshrl.u32 %v7115_v8, 16  ;;  %v2004_v35 = vrot.slane %v2002_v59, 2  ;;  %v7451_v16 = vor.u32 %v1995_v26, %v1992_v14 }
 0x195   : > { %2588 = vmatpush.bf16.msrb.mxu0 %v4909_v18  ;;  %v7458_v59 = vpack.c.b16 %v1914_v61, %v1914_v61  ;;  %2657 = vmatpush.bf16.msrb.mxu2 %v4905_v43  ;;  %v7469_v10 = vpack.c.b16 %v1915_v13, %v1915_v13  ;;  %v4901_v18 = vor.u32 %v5621_v46, %v4900_v2  ;;  %v5182_v13 = vld [vmem:[%s8694_s1 + $0x6f8] sm:$0xf0] }
 0x196   : > { %2315 = vmatmul.bf16.gmra.mxu3 %v1988_v55  ;;  %v1385_v0 = vpop.f32.mrf.mxu2  ;;  %v2001_v49 = vrot.slane %v1999_v44, 1  ;;  %v1997_v14 = vsel %vm1918_vm2, %v7388_v34, %v7451_v16 }
 0x197   : > { %v1319_v29 = vpop.f32.mrf.mxu0  ;;  %v1353_v42 = vpop.f32.mrf.mxu1  ;;  %v2008_v26 = vshrl.u32 %v7458_v59, 16  ;;  %v2011_v34 = vshll.u32 %v7458_v59, 16 }
 0x198   : > { %v1354_v11 = vadd.f32 %v1353_v42, %v1319_v29 }
 0x199   : > { %v1419_v9 = vpop.f32.mrf.mxu3  ;;  %2589 = vmatpush.bf16.msrb.mxu0 %v4901_v18  ;;  %v2010_v43 = vrot.slane %v2008_v26, 1  ;;  %v2013_v46 = vrot.slane %v2011_v34, 2 }
 0x19a   : > { %v1420_v15 = vadd.f32 %v1419_v9, %v1385_v0  ;;  %v7440_v55 = vadd.f32 %v1354_v11, %v7120_v38  ;;  %v4966_v38 = vld [vmem:[%s8694_s1 + $0x588] sm:$0xf0]  ;;  %v5118_v11 = vld [vmem:[%s8694_s1 + $0x678] sm:$0xf0] }
 0x19b   : > { %v4969_v44 = vor.u32 %v5636_v45, %v4966_v38 }
 0x19c   : > { %v7437_v51 = vadd.f32 %v1420_v15, %v7118_v37  ;;  %v7453_v37 = vor.u32 %v2004_v35, %v2001_v49  ;;  %v4965_v15 = vor.u32 %v5637_v62, %v4964_v4  ;;  %v2017_v35 = vshrl.u32 %v7469_v10, 16 }
 0x19d   : > { %2691 = vmatpush.bf16.msrb.mxu3 %v4969_v44 }
 0x19e   : > { %v1387_v58 = vpop.f32.mrf.mxu2  ;;  %v2006_v19 = vsel %vm1918_vm2, %v7390_v30, %v7453_v37  ;;  %2623 = vmatpush.bf16.msrb.mxu1 %v4965_v15  ;;  %v2020_v30 = vshll.u32 %v7469_v10, 16  ;;  %v2019_v4 = vrot.slane %v2017_v35, 1  ;;  %v5688_v35 = vld [vmem:[%s8694_s1 + $0x6e4] sm:$0xf] }
 0x19f   : > { %v1733_v0 = vpop.f32.mrf.mxu0  ;;  %v1767_v9 = vpop.f32.mrf.mxu1 }
 0x1a0   : > { %v1768_v29 = vadd.f32 %v1767_v9, %v1733_v0  ;;  %v5675_v0 = vld [vmem:[%s8694_s1 + $0x674] sm:$0xf0]  ;;  %v5180_v9 = vld [vmem:[%s8694_s1 + $0x6f0] sm:$0xf] }
 0x1a1   : > { %v1421_v25 = vpop.f32.mrf.mxu3 }
 0x1a2   : > { %v1422_v17 = vadd.f32 %v1421_v25, %v1387_v58  ;;  %v7485_v49 = vadd.f32 %v1768_v29, %v7163_v7  ;;  %2218 = vmatmul.bf16.gmra.mxu0 %v1997_v14  ;;  %2252 = vmatmul.bf16.gmra.mxu1 %v2006_v19  ;;  %v5690_v7 = vld [vmem:[%s8694_s1 + $0x6f4] sm:$0xf]  ;;  %v2022_v58 = vrot.slane %v2020_v30, 2  ;;  %v5110_v29 = vld [vmem:[%s8694_s1 + $0x668] sm:$0xf0] }
 0x1a3   : > { %2286 = vmatmul.bf16.gmra.mxu2 %v1997_v14  ;;  %v5185_v12 = vor.u32 %v5690_v7, %v5182_v13  ;;  %v2014_v14 = vor.u32 %v2013_v46, %v2010_v43  ;;  %v5174_v30 = vld [vmem:[%s8694_s1 + $0x6e8] sm:$0xf0] }
 0x1a4   : > { %v7481_v42 = vadd.f32 %v1422_v17, %v7160_v24  ;;  %v5674_v24 = vld [vmem:[%s8694_s1 + $0x674] sm:$0xf]  ;;  %v5116_v17 = vld [vmem:[%s8694_s1 + $0x670] sm:$0xf] }
 0x1a5   : > { %v5121_v61 = vor.u32 %v5674_v24, %v5118_v11  ;;  %3120 = vmatpush.bf16.msra.mxu3 %v5185_v12  ;;  %v5117_v15 = vor.u32 %v5675_v0, %v5116_v17  ;;  %v2351_v24 = vld [vmem:[%s6069_s23 + $0x8] sm:$0xcc]  ;;  %v5177_v11 = vor.u32 %v5688_v35, %v5174_v30  ;;  %v5102_v35 = vld [vmem:[%s8694_s1 + $0x658] sm:$0xf0] }
 0x1a6   : > { %2320 = vmatmul.bf16.gmra.mxu3 %v2006_v19  ;;  %v1801_v22 = vpop.f32.mrf.mxu2  ;;  %v2023_v19 = vor.u32 %v2022_v58, %v2019_v4  ;;  %v2386_v4 = vunpack.c.h.b16 %v2351_v24 }
 0x1a7   : > { %3086 = vmatpush.bf16.msra.mxu2 %v5121_v61  ;;  %v1735_v44 = vpop.f32.mrf.mxu0  ;;  %v1769_v2 = vpop.f32.mrf.mxu1  ;;  %3018 = vmatpush.bf16.msra.mxu0 %v5117_v15 }
 0x1a8   : > { %v1770_v25 = vadd.f32 %v1769_v2, %v1735_v44  ;;  %v2024_v43 = vsel %vm1918_vm2, %v7453_v37, %v2023_v19  ;;  %v2385_v44 = vunpack.c.l.b16 %v2351_v24  ;;  %v5673_v37 = vld [vmem:[%s8694_s1 + $0x664] sm:$0xf0]  ;;  %v5100_v24 = vld [vmem:[%s8694_s1 + $0x650] sm:$0xf] }
 0x1a9   : > { %v1835_v45 = vpop.f32.mrf.mxu3  ;;  %3121 = vmatpush.bf16.msra.mxu3 %v5177_v11  ;;  %v5671_v11 = vld [vmem:[%s8694_s1 + $0x654] sm:$0xf0] }
 0x1aa   : > { %v1836_v38 = vadd.f32 %v1835_v45, %v1801_v22  ;;  %v7506_v62 = vadd.f32 %v1770_v25, %v7181_v33  ;;  %v5672_v33 = vld [vmem:[%s8694_s1 + $0x664] sm:$0xf]  ;;  %v2015_v45 = vsel %vm1918_vm2, %v7451_v16, %v2014_v14  ;;  %v5108_v16 = vld [vmem:[%s8694_s1 + $0x660] sm:$0xf]  ;;  %v5689_v25 = vld [vmem:[%s8694_s1 + $0x6e4] sm:$0xf0] }
 0x1ab   : > { %v5113_v34 = vor.u32 %v5672_v33, %v5110_v29  ;;  %v5109_v58 = vor.u32 %v5673_v37, %v5108_v16 }
 0x1ac   : > { %v7503_v18 = vadd.f32 %v1836_v38, %v7178_v31  ;;  %v5691_v31 = vld [vmem:[%s8694_s1 + $0x6f4] sm:$0xf0] }
 0x1ad   : > { %v5181_v26 = vor.u32 %v5691_v31, %v5180_v9  ;;  %3087 = vmatpush.bf16.msra.mxu2 %v5113_v34  ;;  %3019 = vmatpush.bf16.msra.mxu0 %v5109_v58  ;;  %v2388_v31 = vpack.c.b16 %v1501_v1, %v2386_v4  ;;  %v5670_v34 = vld [vmem:[%s8694_s1 + $0x654] sm:$0xf] }
 0x1ae   : > { %v1803_v7 = vpop.f32.mrf.mxu2  ;;  %v5105_v30 = vor.u32 %v5670_v34, %v5102_v35 }
 0x1af   : > { %3052 = vmatpush.bf16.msra.mxu1 %v5181_v26  ;;  %v1738_v12 = vpop.f32.mrf.mxu0  ;;  %v1772_v22 = vpop.f32.mrf.mxu1 }
 0x1b0   : > { %v1773_v38 = vadd.f32 %v1772_v22, %v1738_v12  ;;  %v5101_v12 = vor.u32 %v5671_v11, %v5100_v24  ;;  %v5687_v22 = vld [vmem:[%s8694_s1 + $0x6d4] sm:$0xf0] }
 0x1b1   : > { %v1837_v61 = vpop.f32.mrf.mxu3  ;;  %3088 = vmatpush.bf16.msra.mxu2 %v5105_v30  ;;  %v5669_v30 = vld [vmem:[%s8694_s1 + $0x644] sm:$0xf0] }
 0x1b2   : > { %v1838_v13 = vadd.f32 %v1837_v61, %v1803_v7  ;;  %v7541_v46 = vadd.f32 %v1773_v38, %v7222_v6  ;;  %2223 = vmatmul.bf16.gmra.mxu0 %v2015_v45  ;;  %2257 = vmatmul.bf16.gmra.mxu1 %v2024_v43  ;;  %v2387_v6 = vpack.c.b16 %v1500_v27, %v2385_v44  ;;  %v2391_v27 = vrot.slane %v6889_v60, 2  ;;  %v5084_v60 = vld [vmem:[%s8694_s1 + $0x630] sm:$0xf] }
 0x1b3   : > { %2291 = vmatmul.bf16.gmra.mxu2 %v2015_v45  ;;  %v2393_v7 = vrot.slane %v2388_v31, 2  ;;  %v2394_v61 = vrot.slane %v6901_v40, 2  ;;  %3020 = vmatpush.bf16.msra.mxu0 %v5101_v12  ;;  %v2396_v12 = vrot.slane %v6965_v36, 2  ;;  %v5148_v40 = vld [vmem:[%s8694_s1 + $0x6b0] sm:$0xf] }
 0x1b4   : > { %v7538_v2 = vadd.f32 %v1838_v13, %v7216_v47  ;;  %v5172_v47 = vld [vmem:[%s8694_s1 + $0x6e0] sm:$0xf]  ;;  %v2390_v29 = vrot.slane %v2387_v6, 2  ;;  %v5070_v36 = vld [vmem:[%s8694_s1 + $0x618] sm:$0xf0] }
 0x1b5   : > { %v5173_v17 = vor.u32 %v5689_v25, %v5172_v47  ;;  %v2395_v47 = vsel %vm2389_vm3, %v2393_v7, %v2394_v61  ;;  %v5666_v7 = vld [vmem:[%s8694_s1 + $0x634] sm:$0xf] }
 0x1b6   : > { %2325 = vmatmul.bf16.gmra.mxu3 %v2024_v43  ;;  %v1806_v0 = vpop.f32.mrf.mxu2  ;;  %v2392_v37 = vsel %vm2389_vm3, %v2390_v29, %v2391_v27 }
 0x1b7   : > { %v1740_v19 = vpop.f32.mrf.mxu0  ;;  %v1774_v15 = vpop.f32.mrf.mxu1  ;;  %3053 = vmatpush.bf16.msra.mxu1 %v5173_v17  ;;  %v5668_v17 = vld [vmem:[%s8694_s1 + $0x644] sm:$0xf] }
 0x1b8   : > { %v1775_v33 = vadd.f32 %v1774_v15, %v1740_v19 }
 0x1b9   : > { %v1840_v9 = vpop.f32.mrf.mxu3 }
 0x1ba   : > { %v1841_v14 = vadd.f32 %v1840_v9, %v1806_v0  ;;  %v7573_v1 = vadd.f32 %v1775_v33, %v7252_v39  ;;  %v5164_v39 = vld [vmem:[%s8694_s1 + $0x6d0] sm:$0xf]  ;;  %v5094_v0 = vld [vmem:[%s8694_s1 + $0x648] sm:$0xf0]  ;;  %v5684_v9 = vld [vmem:[%s8694_s1 + $0x6c4] sm:$0xf] }
 0x1bb   : > { %v5165_v45 = vor.u32 %v5687_v22, %v5164_v39  ;;  %v2398_v39 = vrot.slane %v6967_v50, 2 }
 0x1bc   : > { %v7561_v26 = vadd.f32 %v1841_v14, %v7240_v20  ;;  %v5166_v20 = vld [vmem:[%s8694_s1 + $0x6d8] sm:$0xf0] }
 0x1bd   : > { %v5169_v13 = vor.u32 %v5686_v5, %v5166_v20  ;;  %3054 = vmatpush.bf16.msra.mxu1 %v5165_v45  ;;  %v5092_v5 = vld [vmem:[%s8694_s1 + $0x640] sm:$0xf]  ;;  %v5682_v45 = vld [vmem:[%s8694_s1 + $0x6b4] sm:$0xf] }
 0x1be   : > { %v1808_v43 = vpop.f32.mrf.mxu2  ;;  %v5156_v20 = vld [vmem:[%s8694_s1 + $0x6c0] sm:$0xf]  ;;  %v5093_v11 = vor.u32 %v5669_v30, %v5092_v5 }
 0x1bf   : > { %3122 = vmatpush.bf16.msra.mxu3 %v5169_v13  ;;  %v1743_v4 = vpop.f32.mrf.mxu0  ;;  %v1777_v16 = vpop.f32.mrf.mxu1  ;;  %v5086_v13 = vld [vmem:[%s8694_s1 + $0x638] sm:$0xf0] }
 0x1c0   : > { %v1778_v6 = vadd.f32 %v1777_v16, %v1743_v4  ;;  %3021 = vmatpush.bf16.msra.mxu0 %v5093_v11 }
 0x1c1   : > { %v1842_v38 = vpop.f32.mrf.mxu3 }
 0x1c2   : > { %v1843_v44 = vadd.f32 %v1842_v38, %v1808_v43  ;;  %v7601_v25 = vadd.f32 %v1778_v6, %v7282_v54  ;;  %2590 = vmatmul.bf16.vlgmr.msrb.gmra.mxu0 %v2392_v37  ;;  %2624 = vmatmul.bf16.vlgmr.msrb.gmra.mxu1 %v2395_v47  ;;  %v5158_v54 = vld [vmem:[%s8694_s1 + $0x6c8] sm:$0xf0]  ;;  %v5150_v43 = vld [vmem:[%s8694_s1 + $0x6b8] sm:$0xf0]  ;;  %v2397_v6 = vsel %vm2389_vm3, %v2391_v27, %v2396_v12  ;;  %v5667_v27 = vld [vmem:[%s8694_s1 + $0x634] sm:$0xf0] }
 0x1c3   : > { %2658 = vmatmul.bf16.vlgmr.msrb.gmra.mxu2 %v2392_v37  ;;  %v5161_v14 = vor.u32 %v5684_v9, %v5158_v54  ;;  %v5153_v38 = vor.u32 %v5682_v45, %v5150_v43  ;;  %v5078_v54 = vld [vmem:[%s8694_s1 + $0x628] sm:$0xf0]  ;;  %v2400_v45 = vrot.slane %v7045_v21, 2  ;;  %v5706_v21 = vld [vmem:[%s8694_s1 + $0x774] sm:$0xf] }
 0x1c4   : > { %v7598_v58 = vadd.f32 %v1843_v44, %v7278_v53  ;;  %v5097_v53 = vor.u32 %v5668_v17, %v5094_v0  ;;  %v2399_v17 = vsel %vm2389_vm3, %v2394_v61, %v2398_v39  ;;  %v5664_v61 = vld [vmem:[%s8694_s1 + $0x624] sm:$0xf] }
 0x1c5   : > { %3123 = vmatpush.bf16.msra.mxu3 %v5161_v14 }
 0x1c6   : > { %2692 = vmatmul.bf16.vlgmr.msrb.gmra.mxu3 %v2395_v47  ;;  %3089 = vmatpush.bf16.msra.mxu2 %v5097_v53  ;;  %v1811_v19 = vpop.f32.mrf.mxu2 }
 0x1c7   : > { %v1745_v33 = vpop.f32.mrf.mxu0  ;;  %v1779_v29 = vpop.f32.mrf.mxu1 }
 0x1c8   : > { %v1780_v34 = vadd.f32 %v1779_v29, %v1745_v33 }
 0x1c9   : > { %v1845_v15 = vpop.f32.mrf.mxu3  ;;  %3124 = vmatpush.bf16.msra.mxu3 %v5153_v38 }
 0x1ca   : > { %v1846_v31 = vadd.f32 %v1845_v15, %v1811_v19  ;;  %v7628_v24 = vadd.f32 %v1780_v34, %v7312_v52  ;;  %v5089_v52 = vor.u32 %v5666_v7, %v5086_v13  ;;  %v5081_v19 = vor.u32 %v5664_v61, %v5078_v54  ;;  %v5680_v15 = vld [vmem:[%s8694_s1 + $0x6a4] sm:$0xf]  ;;  %v5076_v13 = vld [vmem:[%s8694_s1 + $0x620] sm:$0xf]  ;;  %v5679_v54 = vld [vmem:[%s8694_s1 + $0x694] sm:$0xf0] }
 0x1cc   : > { %v7616_v35 = vadd.f32 %v1846_v31, %v7300_v28  ;;  %v5685_v28 = vld [vmem:[%s8694_s1 + $0x6c4] sm:$0xf0]  ;;  %3090 = vmatpush.bf16.msra.mxu2 %v5089_v52  ;;  %v5142_v31 = vld [vmem:[%s8694_s1 + $0x6a8] sm:$0xf0]  ;;  %v5140_v52 = vld [vmem:[%s8694_s1 + $0x6a0] sm:$0xf] }
 0x1cd   : > { %v5157_v22 = vor.u32 %v5685_v28, %v5156_v20  ;;  %v5145_v33 = vor.u32 %v5680_v15, %v5142_v31 }
 0x1ce   : > { %v1813_v44 = vpop.f32.mrf.mxu2 }
 0x1cf   : > { %3055 = vmatpush.bf16.msra.mxu1 %v5157_v22  ;;  %v1748_v37 = vpop.f32.mrf.mxu0  ;;  %v1782_v47 = vpop.f32.mrf.mxu1  ;;  %3125 = vmatpush.bf16.msra.mxu3 %v5145_v33  ;;  %v5665_v22 = vld [vmem:[%s8694_s1 + $0x624] sm:$0xf0] }
 0x1d0   : > { %v1783_v0 = vadd.f32 %v1782_v47, %v1748_v37  ;;  %3091 = vmatpush.bf16.msra.mxu2 %v5081_v19  ;;  %v5077_v43 = vor.u32 %v5665_v22, %v5076_v13  ;;  %v5676_v13 = vld [vmem:[%s8694_s1 + $0x684] sm:$0xf]  ;;  %v2404_v22 = vrot.slane %v7113_v32, 2 }
 0x1d1   : > { %v1847_v4 = vpop.f32.mrf.mxu3 }
 0x1d2   : > { %v1848_v16 = vadd.f32 %v1847_v4, %v1813_v44  ;;  %v7661_v53 = vadd.f32 %v1783_v0, %v7347_v48  ;;  %2595 = vmatmul.bf16.gmra.mxu0 %v2397_v6  ;;  %2629 = vmatmul.bf16.gmra.mxu1 %v2399_v17  ;;  %v5683_v48 = vld [vmem:[%s8694_s1 + $0x6b4] sm:$0xf0] }
 0x1d3   : > { %2663 = vmatmul.bf16.gmra.mxu2 %v2397_v6  ;;  %v5149_v14 = vor.u32 %v5683_v48, %v5148_v40  ;;  %v2401_v6 = vsel %vm2389_vm3, %v2396_v12, %v2400_v45  ;;  %v5678_v12 = vld [vmem:[%s8694_s1 + $0x694] sm:$0xf]  ;;  %v5663_v48 = vld [vmem:[%s8694_s1 + $0x614] sm:$0xf0] }
 0x1d4   : > { %v7658_v9 = vadd.f32 %v1848_v16, %v7341_v41  ;;  %v5085_v41 = vor.u32 %v5667_v27, %v5084_v60  ;;  %v5662_v27 = vld [vmem:[%s8694_s1 + $0x614] sm:$0xf] }
 0x1d5   : > { %3056 = vmatpush.bf16.msra.mxu1 %v5149_v14 }
 0x1d6   : > { %2697 = vmatmul.bf16.gmra.mxu3 %v2399_v17  ;;  %3022 = vmatpush.bf16.msra.mxu0 %v5085_v41  ;;  %v1816_v29 = vpop.f32.mrf.mxu2  ;;  %v5068_v41 = vld [vmem:[%s8694_s1 + $0x610] sm:$0xf] }
 0x1d7   : > { %v1750_v30 = vpop.f32.mrf.mxu0  ;;  %v1784_v20 = vpop.f32.mrf.mxu1  ;;  %v5069_v61 = vor.u32 %v5663_v48, %v5068_v41 }
 0x1d8   : > { %v1785_v11 = vadd.f32 %v1784_v20, %v1750_v30  ;;  %v5660_v20 = vld [vmem:[%s8694_s1 + $0x604] sm:$0xf] }
 0x1d9   : > { %v1850_v34 = vpop.f32.mrf.mxu3 }
 0x1da   : > { %v1851_v5 = vadd.f32 %v1850_v34, %v1816_v29  ;;  %v7691_v7 = vadd.f32 %v1785_v11, %v7377_v3  ;;  %v5681_v3 = vld [vmem:[%s8694_s1 + $0x6a4] sm:$0xf0]  ;;  %3023 = vmatpush.bf16.msra.mxu0 %v5077_v43  ;;  %v5062_v11 = vld [vmem:[%s8694_s1 + $0x608] sm:$0xf0] }
 0x1db   : > { %v5141_v38 = vor.u32 %v5681_v3, %v5140_v52  ;;  %v5065_v52 = vor.u32 %v5660_v20, %v5062_v11  ;;  %v5060_v3 = vld [vmem:[%s8694_s1 + $0x600] sm:$0xf] }
 0x1dc   : > { %v7688_v28 = vadd.f32 %v1851_v5, %v7374_v56  ;;  %v2402_v56 = vrot.slane %v7047_v23, 2  ;;  %v5246_v23 = vld [vmem:[%s8694_s1 + $0x778] sm:$0xf0] }
 0x1dd   : > { %3057 = vmatpush.bf16.msra.mxu1 %v5141_v38  ;;  %v5661_v38 = vld [vmem:[%s8694_s1 + $0x604] sm:$0xf0] }
 0x1de   : > { %v1818_v44 = vpop.f32.mrf.mxu2  ;;  %v2403_v17 = vsel %vm2389_vm3, %v2398_v39, %v2402_v56  ;;  %v5073_v39 = vor.u32 %v5662_v27, %v5070_v36  ;;  %3024 = vmatpush.bf16.msra.mxu0 %v5069_v61  ;;  %v2405_v27 = vsel %vm2389_vm3, %v2400_v45, %v2404_v22  ;;  %v5249_v45 = vor.u32 %v5706_v21, %v5246_v23  ;;  %v5653_v21 = vld [vmem:[%s6069_s23 + $0x24] sm:$0xf0] }
 0x1df   : > { %v1753_v37 = vpop.f32.mrf.mxu0  ;;  %v1787_v47 = vpop.f32.mrf.mxu1 }
 0x1e0   : > { %v1788_v0 = vadd.f32 %v1787_v47, %v1753_v37  ;;  %3092 = vmatpush.bf16.msra.mxu2 %v5073_v39  ;;  %v5061_v37 = vor.u32 %v5661_v38, %v5060_v3  ;;  %v5677_v47 = vld [vmem:[%s8694_s1 + $0x684] sm:$0xf0]  ;;  %v7841_v3 = vld [vmem:[%s6069_s23 + $0x18] sm:$0xff] }
 0x1e1   : > { %v1852_v4 = vpop.f32.mrf.mxu3 }
 0x1e2   : > { %v1853_v16 = vadd.f32 %v1852_v4, %v1818_v44  ;;  %v7730_v50 = vadd.f32 %v1788_v0, %v7416_v57  ;;  %2600 = vmatmul.bf16.gmra.mxu0 %v2401_v6  ;;  %2634 = vmatmul.bf16.gmra.mxu1 %v2403_v17  ;;  %v5132_v57 = vld [vmem:[%s8694_s1 + $0x690] sm:$0xf]  ;;  %v5124_v44 = vld [vmem:[%s8694_s1 + $0x680] sm:$0xf] }
 0x1e3   : > { %2668 = vmatmul.bf16.gmra.mxu2 %v2401_v6  ;;  %v5133_v14 = vor.u32 %v5679_v54, %v5132_v57  ;;  %3025 = vmatpush.bf16.msra.mxu0 %v5061_v37 }
 0x1e4   : > { %v7718_v60 = vadd.f32 %v1853_v16, %v7404_v63  ;;  %v5134_v63 = vld [vmem:[%s8694_s1 + $0x698] sm:$0xf0]  ;;  %3093 = vmatpush.bf16.msra.mxu2 %v5065_v52  ;;  %v5720_v52 = vld [vmem:[%s8694_s1 + $0x7e4] sm:$0xf] }
 0x1e5   : > { %v5137_v40 = vor.u32 %v5678_v12, %v5134_v63  ;;  %3058 = vmatpush.bf16.msra.mxu1 %v5133_v14  ;;  %v5125_v12 = vor.u32 %v5677_v47, %v5124_v44 }
 0x1e6   : > { %2702 = vmatmul.bf16.gmra.mxu3 %v2403_v17  ;;  %v1821_v19 = vpop.f32.mrf.mxu2 }
 0x1e7   : > { %3126 = vmatpush.bf16.msra.mxu3 %v5137_v40  ;;  %v1755_v33 = vpop.f32.mrf.mxu0  ;;  %v1789_v29 = vpop.f32.mrf.mxu1 }
 0x1e8   : > { %v1790_v34 = vadd.f32 %v1789_v29, %v1755_v33  ;;  %3557 = vmatpush.bf16.msrb.mxu2 %v5249_v45  ;;  %v5244_v29 = vld [vmem:[%s8694_s1 + $0x770] sm:$0xf]  ;;  %v5652_v45 = vld [vmem:[%s6069_s23 + $0x24] sm:$0xf] }
 0x1e9   : > { %v1855_v15 = vpop.f32.mrf.mxu3  ;;  %3059 = vmatpush.bf16.msra.mxu1 %v5125_v12 }
 0x1ea   : > { %v1856_v31 = vadd.f32 %v1855_v15, %v1821_v19  ;;  %v7751_v30 = vadd.f32 %v1790_v34, %v7440_v55  ;;  %v5126_v55 = vld [vmem:[%s8694_s1 + $0x688] sm:$0xf0]  ;;  %v2408_v15 = vrot.slane %v7458_v59, 2  ;;  %v5707_v34 = vld [vmem:[%s8694_s1 + $0x774] sm:$0xf0] }
 0x1eb   : > { %v5129_v43 = vor.u32 %v5676_v13, %v5126_v55  ;;  %v5245_v20 = vor.u32 %v5707_v34, %v5244_v29  ;;  %v5723_v59 = vld [vmem:[%s8694_s1 + $0x7f4] sm:$0xf0]  ;;  %v5302_v55 = vld [vmem:[%s8694_s1 + $0x7e8] sm:$0xf0] }
 0x1ec   : > { %v7748_v5 = vadd.f32 %v1856_v31, %v7437_v51  ;;  %v2406_v51 = vrot.slane %v7115_v8, 2  ;;  %v2410_v31 = vrot.slane %v7469_v10, 2  ;;  %v5704_v10 = vld [vmem:[%s8694_s1 + $0x764] sm:$0xf]  ;;  %v5305_v38 = vor.u32 %v5720_v52, %v5302_v55  ;;  %v5228_v55 = vld [vmem:[%s8694_s1 + $0x750] sm:$0xf] }
 0x1ed   : > { %3127 = vmatpush.bf16.msra.mxu3 %v5129_v43  ;;  %v2738_v43 = vld [vmem:[%s6069_s23 + $0x10] sm:$0xcc]  ;;  %3489 = vmatpush.bf16.msrb.mxu0 %v5245_v20 }
 0x1ee   : > { %v1823_v4 = vpop.f32.mrf.mxu2  ;;  %v2407_v36 = vsel %vm2389_vm3, %v2402_v56, %v2406_v51  ;;  %v2793_v8 = vunpack.c.h.b16 %v2738_v43 }
 0x1ef   : > { %v2204_v17 = vpop.f32.mrf.mxu0  ;;  %v2238_v0 = vpop.f32.mrf.mxu1 }
 0x1f0   : > { %v2239_v39 = vadd.f32 %v2238_v0, %v2204_v17  ;;  %v2411_v17 = vsel %vm2389_vm3, %v2406_v51, %v2410_v31  ;;  %v5236_v51 = vld [vmem:[%s8694_s1 + $0x760] sm:$0xf] }
 0x1f1   : > { %v1857_v16 = vpop.f32.mrf.mxu3 }
 0x1f2   : > { %v1858_v6 = vadd.f32 %v1857_v16, %v1823_v4  ;;  %v7793_v40 = vadd.f32 %v2239_v39, %v7485_v49  ;;  %2605 = vmatmul.bf16.gmra.mxu0 %v2405_v27  ;;  %2639 = vmatmul.bf16.gmra.mxu1 %v2407_v36  ;;  %v5310_v49 = vld [vmem:[%s8694_s1 + $0x7f8] sm:$0xf0]  ;;  %v5028_v39 = vld [vmem:[%s6069_s23 + $0x20] sm:$0xf] }
 0x1f3   : > { %2673 = vmatmul.bf16.gmra.mxu2 %v2405_v27  ;;  %v2792_v27 = vunpack.c.l.b16 %v2738_v43  ;;  %v5703_v43 = vld [vmem:[%s8694_s1 + $0x754] sm:$0xf0] }
 0x1f4   : > { %v7790_v63 = vadd.f32 %v1858_v6, %v7481_v42  ;;  %v5722_v42 = vld [vmem:[%s8694_s1 + $0x7f4] sm:$0xf]  ;;  %v2409_v6 = vsel %vm2389_vm3, %v2404_v22, %v2408_v15  ;;  %v2795_v22 = vunpack.c.h.b16 %v7841_v3 }
 0x1f5   : > { %v5313_v56 = vor.u32 %v5722_v42, %v5310_v49  ;;  %v7872_v42 = vor.u32 %v5653_v21, %v5028_v39  ;;  %v5030_v49 = vld [vmem:[%s6069_s23 + $0x28] sm:$0xf0] }
 0x1f6   : > { %2707 = vmatmul.bf16.gmra.mxu3 %v2407_v36  ;;  %v2272_v41 = vpop.f32.mrf.mxu2  ;;  %v2794_v36 = vunpack.c.l.b16 %v7841_v3  ;;  %v7881_v31 = vpack.c.b16 %v2795_v22, %v2793_v8  ;;  %v7883_v29 = vor.u32 %v5652_v45, %v5030_v49  ;;  %v5700_v45 = vld [vmem:[%s8694_s1 + $0x744] sm:$0xf]  ;;  %v5222_v49 = vld [vmem:[%s8694_s1 + $0x748] sm:$0xf0] }
 0x1f7   : > { %v2206_v61 = vpop.f32.mrf.mxu0  ;;  %v2240_v54 = vpop.f32.mrf.mxu1  ;;  %3591 = vmatpush.bf16.msrb.mxu3 %v5313_v56  ;;  %v2827_v20 = vrot.slane %v7872_v42, 2 }
 0x1f8   : > { %v2241_v14 = vadd.f32 %v2240_v54, %v2206_v61  ;;  %v7870_v23 = vpack.c.b16 %v2794_v36, %v2792_v27 }
 0x1f9   : > { %v2306_v48 = vpop.f32.mrf.mxu3 }
 0x1fa   : > { %v2307_v57 = vadd.f32 %v2306_v48, %v2272_v41  ;;  %v7813_v33 = vadd.f32 %v2241_v14, %v7506_v62  ;;  %v5238_v62 = vld [vmem:[%s8694_s1 + $0x768] sm:$0xf0]  ;;  %v5721_v41 = vld [vmem:[%s8694_s1 + $0x7e4] sm:$0xf0] }
 0x1fb   : > { %v5241_v13 = vor.u32 %v5704_v10, %v5238_v62  ;;  %3592 = vmatpush.bf16.msrb.mxu3 %v5305_v38  ;;  %v5702_v10 = vld [vmem:[%s8694_s1 + $0x754] sm:$0xf]  ;;  %v5230_v62 = vld [vmem:[%s8694_s1 + $0x758] sm:$0xf0]  ;;  %v2829_v38 = vrot.slane %v7881_v31, 2 }
 0x1fc   : > { %v7808_v19 = vadd.f32 %v2307_v57, %v7503_v18  ;;  %v5308_v18 = vld [vmem:[%s8694_s1 + $0x7f0] sm:$0xf]  ;;  %v5233_v52 = vor.u32 %v5702_v10, %v5230_v62 }
 0x1fd   : > { %v5309_v11 = vor.u32 %v5723_v59, %v5308_v18  ;;  %3558 = vmatpush.bf16.msrb.mxu2 %v5241_v13  ;;  %v2826_v18 = vrot.slane %v7870_v23, 2 }
 0x1fe   : > { %v2274_v44 = vpop.f32.mrf.mxu2 }
 0x1ff   : > { %3523 = vmatpush.bf16.msrb.mxu1 %v5309_v11  ;;  %v2209_v37 = vpop.f32.mrf.mxu0  ;;  %v2243_v47 = vpop.f32.mrf.mxu1  ;;  %v5718_v11 = vld [vmem:[%s8694_s1 + $0x7d4] sm:$0xf]  ;;  %v2828_v21 = vsel %vm2389_vm3, %v2826_v18, %v2827_v20 }
 0x200   : > { %v2244_v0 = vadd.f32 %v2243_v47, %v2209_v37  ;;  %v5719_v37 = vld [vmem:[%s8694_s1 + $0x7d4] sm:$0xf0] }
 0x201   : > { %v2308_v4 = vpop.f32.mrf.mxu3  ;;  %3559 = vmatpush.bf16.msrb.mxu2 %v5233_v52 }
 0x202   : > { %v2309_v16 = vadd.f32 %v2308_v4, %v2274_v44  ;;  %v7856_v32 = vadd.f32 %v2244_v0, %v7541_v46  ;;  %2610 = vmatmul.bf16.gmra.mxu0 %v2409_v6  ;;  %2644 = vmatmul.bf16.gmra.mxu1 %v2411_v17  ;;  %v5300_v46 = vld [vmem:[%s8694_s1 + $0x7e0] sm:$0xf]  ;;  %v2830_v44 = vrot.slane %v7883_v29, 2 }
 0x203   : > { %2678 = vmatmul.bf16.gmra.mxu2 %v2409_v6  ;;  %v5301_v48 = vor.u32 %v5721_v41, %v5300_v46  ;;  %v5225_v41 = vor.u32 %v5700_v45, %v5222_v49 }
 0x204   : > { %v7851_v12 = vadd.f32 %v2309_v16, %v7538_v2  ;;  %v5705_v2 = vld [vmem:[%s8694_s1 + $0x764] sm:$0xf0]  ;;  %v5292_v16 = vld [vmem:[%s8694_s1 + $0x7d0] sm:$0xf]  ;;  %v2831_v8 = vsel %vm2389_vm3, %v2829_v38, %v2830_v44  ;;  %v5284_v38 = vld [vmem:[%s8694_s1 + $0x7c0] sm:$0xf] }
 0x205   : > { %v5237_v56 = vor.u32 %v5705_v2, %v5236_v51  ;;  %3524 = vmatpush.bf16.msrb.mxu1 %v5301_v48  ;;  %v5293_v47 = vor.u32 %v5719_v37, %v5292_v16  ;;  %v5655_v48 = vld [vmem:[%s6069_s23 + $0x34] sm:$0xf0]  ;;  %3560 = vmatpush.bf16.msrb.mxu2 %v5225_v41  ;;  %v5698_v16 = vld [vmem:[%s8694_s1 + $0x734] sm:$0xf]  ;;  %v5214_v37 = vld [vmem:[%s8694_s1 + $0x738] sm:$0xf0] }
 0x206   : > { %2712 = vmatmul.bf16.gmra.mxu3 %v2411_v17  ;;  %v2277_v57 = vpop.f32.mrf.mxu2 }
 0x207   : > { %3490 = vmatpush.bf16.msrb.mxu0 %v5237_v56  ;;  %v2211_v14 = vpop.f32.mrf.mxu0  ;;  %v2245_v15 = vpop.f32.mrf.mxu1  ;;  %v5716_v56 = vld [vmem:[%s8694_s1 + $0x7c4] sm:$0xf] }
 0x208   : > { %v2246_v34 = vadd.f32 %v2245_v15, %v2211_v14 }
 0x209   : > { %v2311_v61 = vpop.f32.mrf.mxu3  ;;  %3525 = vmatpush.bf16.msrb.mxu1 %v5293_v47 }
 0x20a   : > { %v2312_v54 = vadd.f32 %v2311_v61, %v2277_v57  ;;  %v7900_v13 = vadd.f32 %v2246_v34, %v7573_v1  ;;  %v5229_v1 = vor.u32 %v5703_v43, %v5228_v55  ;;  %v5654_v57 = vld [vmem:[%s6069_s23 + $0x34] sm:$0xf]  ;;  %v5038_v61 = vld [vmem:[%s6069_s23 + $0x38] sm:$0xf0]  ;;  %v5220_v55 = vld [vmem:[%s8694_s1 + $0x740] sm:$0xf] }
 0x20b   : > { %v5701_v43 = vld [vmem:[%s8694_s1 + $0x744] sm:$0xf0] }
 0x20c   : > { %v7888_v59 = vadd.f32 %v2312_v54, %v7561_v26  ;;  %v5294_v26 = vld [vmem:[%s8694_s1 + $0x7d8] sm:$0xf0]  ;;  %3491 = vmatpush.bf16.msrb.mxu0 %v5229_v1  ;;  %v5221_v1 = vor.u32 %v5701_v43, %v5220_v55  ;;  %v5712_v55 = vld [vmem:[%s8694_s1 + $0x7a4] sm:$0xf]  ;;  %v5270_v43 = vld [vmem:[%s8694_s1 + $0x7a8] sm:$0xf0] }
 0x20d   : > { %v5297_v4 = vor.u32 %v5718_v11, %v5294_v26  ;;  %v7949_v11 = vor.u32 %v5654_v57, %v5038_v61  ;;  %v5044_v57 = vld [vmem:[%s6069_s23 + $0x40] sm:$0xf]  ;;  %v5657_v61 = vld [vmem:[%s6069_s23 + $0x44] sm:$0xf0] }
 0x20e   : > { %v2279_v6 = vpop.f32.mrf.mxu2 }
 0x20f   : > { %3593 = vmatpush.bf16.msrb.mxu3 %v5297_v4  ;;  %v2214_v27 = vpop.f32.mrf.mxu0  ;;  %v2248_v39 = vpop.f32.mrf.mxu1 }
 0x210   : > { %v2249_v51 = vadd.f32 %v2248_v39, %v2214_v27  ;;  %v5278_v27 = vld [vmem:[%s8694_s1 + $0x7b8] sm:$0xf0]  ;;  %3492 = vmatpush.bf16.msrb.mxu0 %v5221_v1 }
 0x211   : > { %v2313_v17 = vpop.f32.mrf.mxu3 }
 0x212   : > { %v2314_v0 = vadd.f32 %v2313_v17, %v2279_v6  ;;  %v7929_v46 = vadd.f32 %v2249_v51, %v7601_v25  ;;  %3026 = vmatmul.bf16.vlgmr.msra.gmra.mxu0 %v2828_v21  ;;  %3060 = vmatmul.bf16.vlgmr.msra.gmra.mxu1 %v2831_v8  ;;  %v5286_v25 = vld [vmem:[%s8694_s1 + $0x7c8] sm:$0xf0]  ;;  %v2834_v6 = vrot.slane %v7949_v11, 2 }
 0x213   : > { %3094 = vmatmul.bf16.vlgmr.msra.gmra.mxu2 %v2828_v21  ;;  %v5289_v54 = vor.u32 %v5716_v56, %v5286_v25 }
 0x214   : > { %v7926_v2 = vadd.f32 %v2314_v0, %v7598_v58  ;;  %v5036_v58 = vld [vmem:[%s6069_s23 + $0x30] sm:$0xf]  ;;  %v5714_v0 = vld [vmem:[%s8694_s1 + $0x7b4] sm:$0xf] }
 0x215   : > { %3594 = vmatpush.bf16.msrb.mxu3 %v5289_v54  ;;  %v7947_v62 = vor.u32 %v5655_v48, %v5036_v58  ;;  %v5281_v39 = vor.u32 %v5714_v0, %v5278_v27  ;;  %v2835_v58 = vsel %vm2389_vm3, %v2830_v44, %v2834_v6  ;;  %v5656_v54 = vld [vmem:[%s6069_s23 + $0x44] sm:$0xf]  ;;  %v5699_v44 = vld [vmem:[%s8694_s1 + $0x734] sm:$0xf0] }
 0x216   : > { %3128 = vmatmul.bf16.vlgmr.msra.gmra.mxu3 %v2831_v8  ;;  %v2282_v14 = vpop.f32.mrf.mxu2 }
 0x217   : > { %v2216_v18 = vpop.f32.mrf.mxu0  ;;  %v2250_v10 = vpop.f32.mrf.mxu1  ;;  %v2832_v47 = vrot.slane %v7947_v62, 2 }
 0x218   : > { %v2251_v52 = vadd.f32 %v2250_v10, %v2216_v18  ;;  %v5046_v18 = vld [vmem:[%s6069_s23 + $0x48] sm:$0xf0] }
 0x219   : > { %v2316_v15 = vpop.f32.mrf.mxu3  ;;  %3595 = vmatpush.bf16.msrb.mxu3 %v5281_v39  ;;  %v2833_v56 = vsel %vm2389_vm3, %v2827_v20, %v2832_v47  ;;  %v5212_v20 = vld [vmem:[%s8694_s1 + $0x730] sm:$0xf]  ;;  %v8029_v0 = vor.u32 %v5656_v54, %v5046_v18  ;;  %v5659_v18 = vld [vmem:[%s6069_s23 + $0x54] sm:$0xf0] }
 0x21a   : > { %v2317_v34 = vadd.f32 %v2316_v15, %v2282_v14  ;;  %v7964_v4 = vadd.f32 %v2251_v52, %v7628_v24  ;;  %v5217_v24 = vor.u32 %v5698_v16, %v5214_v37  ;;  %v5715_v14 = vld [vmem:[%s8694_s1 + $0x7b4] sm:$0xf0]  ;;  %v5696_v15 = vld [vmem:[%s8694_s1 + $0x724] sm:$0xf] }
 0x21c   : > { %v7952_v26 = vadd.f32 %v2317_v34, %v7616_v35  ;;  %v5717_v35 = vld [vmem:[%s8694_s1 + $0x7c4] sm:$0xf0]  ;;  %3561 = vmatpush.bf16.msrb.mxu2 %v5217_v24  ;;  %v5206_v34 = vld [vmem:[%s8694_s1 + $0x728] sm:$0xf0]  ;;  %v8027_v24 = vor.u32 %v5657_v61, %v5044_v57 }
 0x21d   : > { %v5285_v17 = vor.u32 %v5717_v35, %v5284_v38  ;;  %v5209_v52 = vor.u32 %v5696_v15, %v5206_v34  ;;  %v5273_v38 = vor.u32 %v5712_v55, %v5270_v43  ;;  %v5694_v15 = vld [vmem:[%s8694_s1 + $0x714] sm:$0xf]  ;;  %v5198_v34 = vld [vmem:[%s8694_s1 + $0x718] sm:$0xf0]  ;;  %v5196_v43 = vld [vmem:[%s8694_s1 + $0x710] sm:$0xf] }
 0x21e   : > { %v2284_v21 = vpop.f32.mrf.mxu2 }
 0x21f   : > { %3526 = vmatpush.bf16.msrb.mxu1 %v5285_v17  ;;  %v2219_v45 = vpop.f32.mrf.mxu0  ;;  %v2253_v49 = vpop.f32.mrf.mxu1  ;;  %3596 = vmatpush.bf16.msrb.mxu3 %v5273_v38  ;;  %v5260_v38 = vld [vmem:[%s8694_s1 + $0x790] sm:$0xf] }
 0x220   : > { %v2254_v41 = vadd.f32 %v2253_v49, %v2219_v45  ;;  %3562 = vmatpush.bf16.msrb.mxu2 %v5209_v52  ;;  %v5268_v45 = vld [vmem:[%s8694_s1 + $0x7a0] sm:$0xf]  ;;  %v2836_v49 = vrot.slane %v8027_v24, 2  ;;  %v5262_v52 = vld [vmem:[%s8694_s1 + $0x798] sm:$0xf0] }
 0x221   : > { %v2318_v8 = vpop.f32.mrf.mxu3 }
 0x222   : > { %v2319_v51 = vadd.f32 %v2318_v8, %v2284_v21  ;;  %v7997_v48 = vadd.f32 %v2254_v41, %v7661_v53  ;;  %3031 = vmatmul.bf16.gmra.mxu0 %v2833_v56  ;;  %3065 = vmatmul.bf16.gmra.mxu1 %v2835_v58  ;;  %v5213_v53 = vor.u32 %v5699_v44, %v5212_v20  ;;  %v5204_v8 = vld [vmem:[%s8694_s1 + $0x720] sm:$0xf] }
 0x223   : > { %3099 = vmatmul.bf16.gmra.mxu2 %v2833_v56  ;;  %v2837_v44 = vsel %vm2389_vm3, %v2832_v47, %v2836_v49  ;;  %v5710_v47 = vld [vmem:[%s8694_s1 + $0x794] sm:$0xf] }
 0x224   : > { %v7994_v25 = vadd.f32 %v2319_v51, %v7658_v9  ;;  %v5276_v9 = vld [vmem:[%s8694_s1 + $0x7b0] sm:$0xf]  ;;  %3493 = vmatpush.bf16.msrb.mxu0 %v5213_v53  ;;  %v5697_v51 = vld [vmem:[%s8694_s1 + $0x724] sm:$0xf0]  ;;  %v5265_v55 = vor.u32 %v5710_v47, %v5262_v52  ;;  %v2748_v52 = vld [vmem:[%s6069_s23 + $0x60] sm:$0x33] }
 0x225   : > { %v5277_v10 = vor.u32 %v5715_v14, %v5276_v9  ;;  %v5205_v56 = vor.u32 %v5697_v51, %v5204_v8  ;;  %v5693_v47 = vld [vmem:[%s8694_s1 + $0x704] sm:$0xf0] }
 0x226   : > { %3133 = vmatmul.bf16.gmra.mxu3 %v2835_v58  ;;  %v2287_v1 = vpop.f32.mrf.mxu2 }
 0x227   : > { %3527 = vmatpush.bf16.msrb.mxu1 %v5277_v10  ;;  %v2221_v37 = vpop.f32.mrf.mxu0  ;;  %v2255_v17 = vpop.f32.mrf.mxu1  ;;  %v5201_v10 = vor.u32 %v5694_v15, %v5198_v34  ;;  %3597 = vmatpush.bf16.msrb.mxu3 %v5265_v55  ;;  %v5188_v34 = vld [vmem:[%s8694_s1 + $0x700] sm:$0xf] }
 0x228   : > { %v2256_v27 = vadd.f32 %v2255_v17, %v2221_v37  ;;  %3494 = vmatpush.bf16.msrb.mxu0 %v5205_v56  ;;  %v5711_v37 = vld [vmem:[%s8694_s1 + $0x794] sm:$0xf0]  ;;  %v5189_v55 = vor.u32 %v5693_v47, %v5188_v34 }
 0x229   : > { %v2321_v35 = vpop.f32.mrf.mxu3  ;;  %3563 = vmatpush.bf16.msrb.mxu2 %v5201_v10  ;;  %v5261_v17 = vor.u32 %v5711_v37, %v5260_v38 }
 0x22a   : > { %v2322_v16 = vadd.f32 %v2321_v35, %v2287_v1  ;;  %v8035_v21 = vadd.f32 %v2256_v27, %v7691_v7  ;;  %v5713_v7 = vld [vmem:[%s8694_s1 + $0x7a4] sm:$0xf0]  ;;  %v5658_v1 = vld [vmem:[%s6069_s23 + $0x54] sm:$0xf]  ;;  %v5054_v35 = vld [vmem:[%s6069_s23 + $0x58] sm:$0xf0] }
 0x22b   : > { %v5269_v58 = vor.u32 %v5713_v7, %v5268_v45 }
 0x22c   : > { %v8032_v39 = vadd.f32 %v2322_v16, %v7688_v28  ;;  %v2838_v28 = vrot.slane %v8029_v0, 2 }
 0x22d   : > { %3528 = vmatpush.bf16.msrb.mxu1 %v5269_v58  ;;  %v8097_v58 = vor.u32 %v5658_v1, %v5054_v35 }
 0x22e   : > { %v2289_v41 = vpop.f32.mrf.mxu2  ;;  %v2839_v9 = vsel %vm2389_vm3, %v2834_v6, %v2838_v28 }
 0x22f   : > { %v2224_v54 = vpop.f32.mrf.mxu0  ;;  %v2258_v20 = vpop.f32.mrf.mxu1 }
 0x230   : > { %v2259_v53 = vadd.f32 %v2258_v20, %v2224_v54  ;;  %v5692_v54 = vld [vmem:[%s8694_s1 + $0x704] sm:$0xf]  ;;  %v5190_v20 = vld [vmem:[%s8694_s1 + $0x708] sm:$0xf0] }
 0x231   : > { %v2323_v57 = vpop.f32.mrf.mxu3  ;;  %3529 = vmatpush.bf16.msrb.mxu1 %v5261_v17 }
 0x232   : > { %v2324_v61 = vadd.f32 %v2323_v57, %v2289_v41  ;;  %v8074_v6 = vadd.f32 %v2259_v53, %v7730_v50  ;;  %3036 = vmatmul.bf16.gmra.mxu0 %v2837_v44  ;;  %3070 = vmatmul.bf16.gmra.mxu1 %v2839_v9  ;;  %v5695_v50 = vld [vmem:[%s8694_s1 + $0x714] sm:$0xf0]  ;;  %v5193_v53 = vor.u32 %v5692_v54, %v5190_v20 }
 0x233   : > { %3104 = vmatmul.bf16.gmra.mxu2 %v2837_v44  ;;  %v5197_v16 = vor.u32 %v5695_v50, %v5196_v43  ;;  %v5708_v44 = vld [vmem:[%s8694_s1 + $0x784] sm:$0xf]  ;;  %v5709_v43 = vld [vmem:[%s8694_s1 + $0x784] sm:$0xf0] }
 0x234   : > { %v8062_v14 = vadd.f32 %v2324_v61, %v7718_v60  ;;  %v5052_v60 = vld [vmem:[%s6069_s23 + $0x50] sm:$0xf]  ;;  %3564 = vmatpush.bf16.msrb.mxu2 %v5193_v53 }
 0x235   : > { %3495 = vmatpush.bf16.msrb.mxu0 %v5197_v16  ;;  %v8095_v7 = vor.u32 %v5659_v18, %v5052_v60  ;;  %v5252_v60 = vld [vmem:[%s8694_s1 + $0x780] sm:$0xf] }
 0x236   : > { %3138 = vmatmul.bf16.gmra.mxu3 %v2839_v9  ;;  %v2292_v27 = vpop.f32.mrf.mxu2  ;;  %v5253_v37 = vor.u32 %v5709_v43, %v5252_v60  ;;  %v5739_v43 = vld [vmem:[%s8694_s1 + $0x874] sm:$0xf0] }
 0x237   : > { %v2226_v45 = vpop.f32.mrf.mxu0  ;;  %v2260_v56 = vpop.f32.mrf.mxu1  ;;  %v2840_v9 = vrot.slane %v8095_v7, 2 }
 0x238   : > { %v2261_v41 = vadd.f32 %v2260_v56, %v2226_v45  ;;  %3530 = vmatpush.bf16.msrb.mxu1 %v5253_v37  ;;  %v5752_v37 = vld [vmem:[%s8694_s1 + $0x8e4] sm:$0xf] }
 0x239   : > { %v2326_v8 = vpop.f32.mrf.mxu3  ;;  %v2841_v35 = vsel %vm2389_vm3, %v2836_v49, %v2840_v9  ;;  %3496 = vmatpush.bf16.msrb.mxu0 %v5189_v55  ;;  %v5738_v49 = vld [vmem:[%s8694_s1 + $0x874] sm:$0xf]  ;;  %v5372_v55 = vld [vmem:[%s8694_s1 + $0x870] sm:$0xf] }
 0x23a   : > { %v2327_v51 = vadd.f32 %v2326_v8, %v2292_v27  ;;  %v8103_v61 = vadd.f32 %v2261_v41, %v7751_v30  ;;  %v5254_v30 = vld [vmem:[%s8694_s1 + $0x788] sm:$0xf0]  ;;  %v2812_v8 = vunpack.c.l.b16 %v2748_v52 }
 0x23b   : > { %v5257_v15 = vor.u32 %v5708_v44, %v5254_v30 }
 0x23c   : > { %v8100_v57 = vadd.f32 %v2327_v51, %v7748_v5  ;;  %v2842_v5 = vrot.slane %v8097_v58, 2  ;;  %v2813_v51 = vunpack.c.h.b16 %v2748_v52  ;;  %v2824_v41 = vpack.c.b16 %v2812_v8, %v2812_v8 }
 0x23d   : > { %3598 = vmatpush.bf16.msrb.mxu3 %v5257_v15 }
 0x23e   : > { %v2294_v18 = vpop.f32.mrf.mxu2  ;;  %v2843_v16 = vsel %vm2389_vm3, %v2838_v28, %v2842_v5  ;;  %v5374_v28 = vld [vmem:[%s8694_s1 + $0x878] sm:$0xf0]  ;;  %v2825_v54 = vpack.c.b16 %v2813_v51, %v2813_v51 }
 0x23f   : > { %v2591_v38 = vpop.f32.mrf.mxu0  ;;  %v2625_v1 = vpop.f32.mrf.mxu1  ;;  %v5377_v56 = vor.u32 %v5738_v49, %v5374_v28 }
 0x240   : > { %v2626_v17 = vadd.f32 %v2625_v1, %v2591_v38  ;;  %v5373_v38 = vor.u32 %v5739_v43, %v5372_v55  ;;  %v5366_v1 = vld [vmem:[%s8694_s1 + $0x868] sm:$0xf0] }
 0x241   : > { %v2328_v10 = vpop.f32.mrf.mxu3  ;;  %3944 = vmatpush.bf16.msra.mxu2 %v5377_v56 }
 0x242   : > { %v2329_v50 = vadd.f32 %v2328_v10, %v2294_v18  ;;  %v8146_v45 = vadd.f32 %v2626_v17, %v7793_v40  ;;  %3041 = vmatmul.bf16.gmra.mxu0 %v2841_v35  ;;  %3075 = vmatmul.bf16.gmra.mxu1 %v2843_v16  ;;  %v5438_v40 = vld [vmem:[%s8694_s1 + $0x8f8] sm:$0xf0]  ;;  %v2844_v18 = vrot.slane %v2824_v41, 2  ;;  %v2846_v10 = vrot.slane %v2825_v54, 2  ;;  %v5430_v17 = vld [vmem:[%s8694_s1 + $0x8e8] sm:$0xf0] }
 0x243   : > { %3109 = vmatmul.bf16.gmra.mxu2 %v2841_v35  ;;  %3876 = vmatpush.bf16.msra.mxu0 %v5373_v38  ;;  %v5433_v8 = vor.u32 %v5752_v37, %v5430_v17 }
 0x244   : > { %v8143_v27 = vadd.f32 %v2329_v50, %v7790_v63  ;;  %v5754_v63 = vld [vmem:[%s8694_s1 + $0x8f4] sm:$0xf]  ;;  %v5436_v50 = vld [vmem:[%s8694_s1 + $0x8f0] sm:$0xf]  ;;  %v2847_v41 = vsel %vm2389_vm3, %v2842_v5, %v2846_v10  ;;  %v3234_v5 = vshll.u32 %v7881_v31, 16 }
 0x245   : > { %v5441_v20 = vor.u32 %v5754_v63, %v5438_v40  ;;  %v2845_v40 = vsel %vm2389_vm3, %v2840_v9, %v2844_v18  ;;  %v5737_v18 = vld [vmem:[%s8694_s1 + $0x864] sm:$0xf0] }
 0x246   : > { %3143 = vmatmul.bf16.gmra.mxu3 %v2843_v16  ;;  %v2659_v44 = vpop.f32.mrf.mxu2 }
 0x247   : > { %v2593_v15 = vpop.f32.mrf.mxu0  ;;  %v2627_v34 = vpop.f32.mrf.mxu1  ;;  %3978 = vmatpush.bf16.msra.mxu3 %v5441_v20  ;;  %v3214_v20 = vshrl.u32 %v7870_v23, 16 }
 0x248   : > { %v2628_v47 = vadd.f32 %v2627_v34, %v2593_v15  ;;  %v3225_v15 = vshll.u32 %v7872_v42, 16  ;;  %v3231_v34 = vshrl.u32 %v7881_v31, 16  ;;  %v5753_v31 = vld [vmem:[%s8694_s1 + $0x8e4] sm:$0xf0] }
 0x249   : > { %v2693_v53 = vpop.f32.mrf.mxu3  ;;  %v3216_v55 = vrot.slane %v3214_v20, 2 }
 0x24a   : > { %v2694_v30 = vadd.f32 %v2693_v53, %v2659_v44  ;;  %v8164_v52 = vadd.f32 %v2628_v47, %v7813_v33  ;;  %v5736_v33 = vld [vmem:[%s8694_s1 + $0x864] sm:$0xf]  ;;  %v3217_v44 = vshll.u32 %v7870_v23, 16  ;;  %v3239_v47 = vshrl.u32 %v7883_v29, 16 }
 0x24b   : > { %v5369_v16 = vor.u32 %v5736_v33, %v5366_v1  ;;  %3979 = vmatpush.bf16.msra.mxu3 %v5433_v8  ;;  %v3242_v23 = vshll.u32 %v7883_v29, 16  ;;  %v3227_v1 = vrot.slane %v3225_v15, 3  ;;  %v3236_v8 = vrot.slane %v3234_v5, 3  ;;  %v5356_v15 = vld [vmem:[%s8694_s1 + $0x850] sm:$0xf] }
 0x24c   : > { %v8161_v60 = vadd.f32 %v2694_v30, %v7808_v19  ;;  %v5755_v19 = vld [vmem:[%s8694_s1 + $0x8f4] sm:$0xf0]  ;;  %v3222_v30 = vshrl.u32 %v7872_v42, 16 }
 0x24d   : > { %v5437_v35 = vor.u32 %v5755_v19, %v5436_v50  ;;  %3945 = vmatpush.bf16.msra.mxu2 %v5369_v16  ;;  %v3219_v19 = vrot.slane %v3217_v44, 3 }
 0x24e   : > { %v2661_v51 = vpop.f32.mrf.mxu2  ;;  %v3224_v33 = vrot.slane %v3222_v30, 2  ;;  %v5422_v30 = vld [vmem:[%s8694_s1 + $0x8d8] sm:$0xf0] }
 0x24f   : > { %3910 = vmatpush.bf16.msra.mxu1 %v5437_v35  ;;  %v2596_v63 = vpop.f32.mrf.mxu0  ;;  %v2630_v56 = vpop.f32.mrf.mxu1  ;;  %v3233_v35 = vrot.slane %v3231_v34, 2  ;;  %v3220_v20 = vor.u32 %v3219_v19, %v3216_v55  ;;  %v5735_v34 = vld [vmem:[%s8694_s1 + $0x854] sm:$0xf0] }
 0x250   : > { %v2631_v54 = vadd.f32 %v2630_v56, %v2596_v63  ;;  %v5734_v56 = vld [vmem:[%s8694_s1 + $0x854] sm:$0xf]  ;;  %v8237_v44 = vor.u32 %v3227_v1, %v3224_v33 }
 0x251   : > { %v2695_v49 = vpop.f32.mrf.mxu3  ;;  %v3237_v5 = vor.u32 %v3236_v8, %v3233_v35  ;;  %v3248_v35 = vshrl.u32 %v7947_v62, 16  ;;  %v3251_v8 = vshll.u32 %v7947_v62, 16 }
 0x252   : > { %v2696_v28 = vadd.f32 %v2695_v49, %v2661_v51  ;;  %v8205_v9 = vadd.f32 %v2631_v54, %v7856_v32  ;;  %3046 = vmatmul.bf16.gmra.mxu0 %v2845_v40  ;;  %3080 = vmatmul.bf16.gmra.mxu1 %v2847_v41  ;;  %v5428_v32 = vld [vmem:[%s8694_s1 + $0x8e0] sm:$0xf]  ;;  %v3241_v51 = vrot.slane %v3239_v47, 2  ;;  %v3244_v49 = vrot.slane %v3242_v23, 3 }
 0x253   : > { %3114 = vmatmul.bf16.gmra.mxu2 %v2845_v40  ;;  %v5429_v43 = vor.u32 %v5753_v31, %v5428_v32  ;;  %v5358_v40 = vld [vmem:[%s8694_s1 + $0x858] sm:$0xf0]  ;;  %v5357_v23 = vor.u32 %v5735_v34, %v5356_v15  ;;  %v3253_v34 = vrot.slane %v3251_v8, 3 }
 0x254   : > { %v8199_v53 = vadd.f32 %v2696_v28, %v7851_v12  ;;  %v5364_v12 = vld [vmem:[%s8694_s1 + $0x860] sm:$0xf]  ;;  %v8248_v47 = vor.u32 %v3244_v49, %v3241_v51  ;;  %v3260_v51 = vshll.u32 %v7949_v11, 16 }
 0x255   : > { %v5365_v10 = vor.u32 %v5737_v18, %v5364_v12  ;;  %3911 = vmatpush.bf16.msra.mxu1 %v5429_v43  ;;  %v5420_v12 = vld [vmem:[%s8694_s1 + $0x8d0] sm:$0xf]  ;;  %v5751_v18 = vld [vmem:[%s8694_s1 + $0x8d4] sm:$0xf0] }
 0x256   : > { %3148 = vmatmul.bf16.gmra.mxu3 %v2847_v41  ;;  %v2664_v50 = vpop.f32.mrf.mxu2  ;;  %v5750_v41 = vld [vmem:[%s8694_s1 + $0x8d4] sm:$0xf]  ;;  %v5421_v32 = vor.u32 %v5751_v18, %v5420_v12  ;;  %v3246_v19 = vsel %vm3212_vm4, %v3237_v5, %v8248_v47  ;;  %v5348_v18 = vld [vmem:[%s8694_s1 + $0x840] sm:$0xf] }
 0x257   : > { %3877 = vmatpush.bf16.msra.mxu0 %v5365_v10  ;;  %v2598_v37 = vpop.f32.mrf.mxu0  ;;  %v2632_v17 = vpop.f32.mrf.mxu1 }
 0x258   : > { %v2633_v28 = vadd.f32 %v2632_v17, %v2598_v37  ;;  %v5732_v37 = vld [vmem:[%s8694_s1 + $0x844] sm:$0xf]  ;;  %v5350_v17 = vld [vmem:[%s8694_s1 + $0x848] sm:$0xf0] }
 0x259   : > { %v2698_v38 = vpop.f32.mrf.mxu3  ;;  %3912 = vmatpush.bf16.msra.mxu1 %v5421_v32  ;;  %v5353_v49 = vor.u32 %v5732_v37, %v5350_v17  ;;  %v5733_v32 = vld [vmem:[%s8694_s1 + $0x844] sm:$0xf0]  ;;  %v5406_v37 = vld [vmem:[%s8694_s1 + $0x8b8] sm:$0xf0] }
 0x25a   : > { %v2699_v16 = vadd.f32 %v2698_v38, %v2664_v50  ;;  %v8235_v54 = vadd.f32 %v2633_v28, %v7900_v13  ;;  %v5425_v13 = vor.u32 %v5750_v41, %v5422_v30  ;;  %v3229_v38 = vsel %vm3212_vm4, %v3220_v20, %v8237_v44  ;;  %v5414_v28 = vld [vmem:[%s8694_s1 + $0x8c8] sm:$0xf0] }
 0x25b   : > { %3878 = vmatpush.bf16.msra.mxu0 %v5357_v23  ;;  %v3250_v20 = vrot.slane %v3248_v35, 2  ;;  %v5746_v35 = vld [vmem:[%s8694_s1 + $0x8b4] sm:$0xf] }
 0x25c   : > { %v8223_v63 = vadd.f32 %v2699_v16, %v7888_v59  ;;  %v5361_v59 = vor.u32 %v5734_v56, %v5358_v40  ;;  %3980 = vmatpush.bf16.msra.mxu3 %v5425_v13  ;;  %v3262_v13 = vrot.slane %v3260_v51, 3  ;;  %v5409_v17 = vor.u32 %v5746_v35, %v5406_v37 }
 0x25e   : > { %3946 = vmatpush.bf16.msra.mxu2 %v5361_v59  ;;  %v2666_v10 = vpop.f32.mrf.mxu2 }
 0x25f   : > { %v2601_v43 = vpop.f32.mrf.mxu0  ;;  %v2635_v50 = vpop.f32.mrf.mxu1 }
 0x260   : > { %v2636_v33 = vadd.f32 %v2635_v50, %v2601_v43  ;;  %v5730_v43 = vld [vmem:[%s8694_s1 + $0x834] sm:$0xf]  ;;  %v5342_v50 = vld [vmem:[%s8694_s1 + $0x838] sm:$0xf0] }
 0x261   : > { %v2700_v31 = vpop.f32.mrf.mxu3 }
 0x262   : > { %v2701_v55 = vadd.f32 %v2700_v31, %v2666_v10  ;;  %v8265_v16 = vadd.f32 %v2636_v33, %v7929_v46  ;;  %3497 = vmatmul.bf16.vlgmr.msrb.gmra.mxu0 %v3229_v38  ;;  %3531 = vmatmul.bf16.vlgmr.msrb.gmra.mxu1 %v3246_v19  ;;  %v3257_v46 = vshrl.u32 %v7949_v11, 16  ;;  %v5412_v10 = vld [vmem:[%s8694_s1 + $0x8c0] sm:$0xf] }
 0x263   : > { %3565 = vmatmul.bf16.vlgmr.msrb.gmra.mxu2 %v3229_v38  ;;  %v8306_v38 = vor.u32 %v3253_v34, %v3250_v20 }
 0x264   : > { %v8261_v1 = vadd.f32 %v2701_v55, %v7926_v2  ;;  %v5748_v2 = vld [vmem:[%s8694_s1 + $0x8c4] sm:$0xf]  ;;  %3947 = vmatpush.bf16.msra.mxu2 %v5353_v49  ;;  %v3259_v5 = vrot.slane %v3257_v46, 2  ;;  %v5349_v55 = vor.u32 %v5733_v32, %v5348_v18 }
 0x265   : > { %v5417_v56 = vor.u32 %v5748_v2, %v5414_v28  ;;  %v3255_v28 = vsel %vm3212_vm4, %v8237_v44, %v8306_v38  ;;  %v5340_v44 = vld [vmem:[%s8694_s1 + $0x830] sm:$0xf] }
 0x266   : > { %3599 = vmatmul.bf16.vlgmr.msrb.gmra.mxu3 %v3246_v19  ;;  %v2669_v40 = vpop.f32.mrf.mxu2  ;;  %v8308_v19 = vor.u32 %v3262_v13, %v3259_v5  ;;  %3879 = vmatpush.bf16.msra.mxu0 %v5349_v55  ;;  %v5728_v13 = vld [vmem:[%s8694_s1 + $0x824] sm:$0xf]  ;;  %v5398_v55 = vld [vmem:[%s8694_s1 + $0x8a8] sm:$0xf0] }
 0x267   : > { %3981 = vmatpush.bf16.msra.mxu3 %v5417_v56  ;;  %v2603_v30 = vpop.f32.mrf.mxu0  ;;  %v2637_v15 = vpop.f32.mrf.mxu1 }
 0x268   : > { %v2638_v23 = vadd.f32 %v2637_v15, %v2603_v30  ;;  %v3264_v56 = vsel %vm3212_vm4, %v8248_v47, %v8308_v19  ;;  %v3275_v30 = vshrl.u32 %v8029_v0, 16  ;;  %v3278_v15 = vshll.u32 %v8029_v0, 16  ;;  %v5404_v47 = vld [vmem:[%s8694_s1 + $0x8b0] sm:$0xf] }
 0x269   : > { %v2703_v41 = vpop.f32.mrf.mxu3 }
 0x26a   : > { %v2704_v59 = vadd.f32 %v2703_v41, %v2669_v40  ;;  %v8295_v31 = vadd.f32 %v2638_v23, %v7964_v4  ;;  %v5345_v4 = vor.u32 %v5730_v43, %v5342_v50  ;;  %v3266_v41 = vshrl.u32 %v8027_v24, 16  ;;  %v5334_v23 = vld [vmem:[%s8694_s1 + $0x828] sm:$0xf0] }
 0x26b   : > { %3982 = vmatpush.bf16.msra.mxu3 %v5409_v17  ;;  %v5337_v32 = vor.u32 %v5728_v13, %v5334_v23 }
 0x26c   : > { %v8283_v12 = vadd.f32 %v2704_v59, %v7952_v26  ;;  %v5749_v26 = vld [vmem:[%s8694_s1 + $0x8c4] sm:$0xf0]  ;;  %3948 = vmatpush.bf16.msra.mxu2 %v5345_v4  ;;  %v3269_v59 = vshll.u32 %v8027_v24, 16 }
 0x26d   : > { %v5413_v33 = vor.u32 %v5749_v26, %v5412_v10  ;;  %v5744_v10 = vld [vmem:[%s8694_s1 + $0x8a4] sm:$0xf] }
 0x26e   : > { %v2671_v2 = vpop.f32.mrf.mxu2  ;;  %v5401_v26 = vor.u32 %v5744_v10, %v5398_v55  ;;  %v3271_v17 = vrot.slane %v3269_v59, 3  ;;  %v5726_v55 = vld [vmem:[%s8694_s1 + $0x814] sm:$0xf] }
 0x26f   : > { %3913 = vmatpush.bf16.msra.mxu1 %v5413_v33  ;;  %v2606_v51 = vpop.f32.mrf.mxu0  ;;  %v2640_v49 = vpop.f32.mrf.mxu1  ;;  %v3268_v33 = vrot.slane %v3266_v41, 2 }
 0x270   : > { %v2641_v40 = vadd.f32 %v2640_v49, %v2606_v51  ;;  %3949 = vmatpush.bf16.msra.mxu2 %v5337_v32  ;;  %3983 = vmatpush.bf16.msra.mxu3 %v5401_v26  ;;  %v3287_v32 = vshll.u32 %v8095_v7, 16 }
 0x271   : > { %v2705_v8 = vpop.f32.mrf.mxu3  ;;  %v8371_v41 = vor.u32 %v3271_v17, %v3268_v33  ;;  %v5390_v33 = vld [vmem:[%s8694_s1 + $0x898] sm:$0xf0] }
 0x272   : > { %v2706_v46 = vadd.f32 %v2705_v8, %v2671_v2  ;;  %v8330_v34 = vadd.f32 %v2641_v40, %v7997_v48  ;;  %3502 = vmatmul.bf16.gmra.mxu0 %v3255_v28  ;;  %3536 = vmatmul.bf16.gmra.mxu1 %v3264_v56  ;;  %v5747_v48 = vld [vmem:[%s8694_s1 + $0x8b4] sm:$0xf0]  ;;  %v3277_v2 = vrot.slane %v3275_v30, 2  ;;  %v3280_v8 = vrot.slane %v3278_v15, 3  ;;  %v5396_v40 = vld [vmem:[%s8694_s1 + $0x8a0] sm:$0xf] }
 0x273   : > { %3570 = vmatmul.bf16.gmra.mxu2 %v3255_v28  ;;  %v5405_v18 = vor.u32 %v5747_v48, %v5404_v47  ;;  %v5332_v28 = vld [vmem:[%s8694_s1 + $0x820] sm:$0xf]  ;;  %v3273_v48 = vsel %vm3212_vm4, %v8306_v38, %v8371_v41  ;;  %v5326_v38 = vld [vmem:[%s8694_s1 + $0x818] sm:$0xf0] }
 0x274   : > { %v8324_v20 = vadd.f32 %v2706_v46, %v7994_v25  ;;  %v5731_v25 = vld [vmem:[%s8694_s1 + $0x834] sm:$0xf0]  ;;  %v8373_v59 = vor.u32 %v3280_v8, %v3277_v2 }
 0x275   : > { %v5341_v5 = vor.u32 %v5731_v25, %v5340_v44  ;;  %3914 = vmatpush.bf16.msra.mxu1 %v5405_v18  ;;  %v3284_v18 = vshrl.u32 %v8095_v7, 16  ;;  %v5743_v2 = vld [vmem:[%s8694_s1 + $0x894] sm:$0xf0] }
 0x276   : > { %3604 = vmatmul.bf16.gmra.mxu3 %v3264_v56  ;;  %v2674_v43 = vpop.f32.mrf.mxu2  ;;  %v5729_v56 = vld [vmem:[%s8694_s1 + $0x824] sm:$0xf0]  ;;  %v3282_v13 = vsel %vm3212_vm4, %v8308_v19, %v8373_v59  ;;  %v5742_v19 = vld [vmem:[%s8694_s1 + $0x894] sm:$0xf] }
 0x277   : > { %3880 = vmatpush.bf16.msra.mxu0 %v5341_v5  ;;  %v2608_v35 = vpop.f32.mrf.mxu0  ;;  %v2642_v37 = vpop.f32.mrf.mxu1 }
 0x278   : > { %v2643_v46 = vadd.f32 %v2642_v37, %v2608_v35  ;;  %v5324_v35 = vld [vmem:[%s8694_s1 + $0x810] sm:$0xf] }
 0x279   : > { %v2708_v50 = vpop.f32.mrf.mxu3  ;;  %v5388_v37 = vld [vmem:[%s8694_s1 + $0x890] sm:$0xf] }
 0x27a   : > { %v2709_v4 = vadd.f32 %v2708_v50, %v2674_v43  ;;  %v8360_v49 = vadd.f32 %v2643_v46, %v8035_v21  ;;  %v5745_v21 = vld [vmem:[%s8694_s1 + $0x8a4] sm:$0xf0]  ;;  %v3296_v43 = vshll.u32 %v8097_v58, 16  ;;  %v5329_v50 = vor.u32 %v5726_v55, %v5326_v38  ;;  %v5740_v55 = vld [vmem:[%s8694_s1 + $0x884] sm:$0xf] }
 0x27b   : > { %v5397_v30 = vor.u32 %v5745_v21, %v5396_v40  ;;  %v5389_v8 = vor.u32 %v5743_v2, %v5388_v37  ;;  %v3289_v40 = vrot.slane %v3287_v32, 3  ;;  %v5318_v32 = vld [vmem:[%s8694_s1 + $0x808] sm:$0xf0]  ;;  %v5741_v2 = vld [vmem:[%s8694_s1 + $0x884] sm:$0xf0] }
 0x27c   : > { %v8357_v51 = vadd.f32 %v2709_v4, %v8032_v39  ;;  %v5333_v39 = vor.u32 %v5729_v56, %v5332_v28  ;;  %v5393_v4 = vor.u32 %v5742_v19, %v5390_v33  ;;  %3950 = vmatpush.bf16.msra.mxu2 %v5329_v50  ;;  %v3286_v56 = vrot.slane %v3284_v18, 2  ;;  %v5724_v18 = vld [vmem:[%s8694_s1 + $0x804] sm:$0xf]  ;;  %v5725_v50 = vld [vmem:[%s8694_s1 + $0x804] sm:$0xf0] }
 0x27d   : > { %3915 = vmatpush.bf16.msra.mxu1 %v5397_v30  ;;  %v5321_v19 = vor.u32 %v5724_v18, %v5318_v32  ;;  %v5380_v33 = vld [vmem:[%s8694_s1 + $0x880] sm:$0xf] }
 0x27e   : > { %3881 = vmatpush.bf16.msra.mxu0 %v5333_v39  ;;  %v2676_v15 = vpop.f32.mrf.mxu2  ;;  %3984 = vmatpush.bf16.msra.mxu3 %v5393_v4 }
 0x27f   : > { %v2611_v47 = vpop.f32.mrf.mxu0  ;;  %v2645_v5 = vpop.f32.mrf.mxu1 }
 0x280   : > { %v2646_v23 = vadd.f32 %v2645_v5, %v2611_v47  ;;  %3951 = vmatpush.bf16.msra.mxu2 %v5321_v19 }
 0x281   : > { %v2710_v44 = vpop.f32.mrf.mxu3  ;;  %3916 = vmatpush.bf16.msra.mxu1 %v5389_v8 }
 0x282   : > { %v2711_v25 = vadd.f32 %v2710_v44, %v2676_v15  ;;  %v8399_v26 = vadd.f32 %v2646_v23, %v8074_v6  ;;  %3507 = vmatmul.bf16.gmra.mxu0 %v3273_v48  ;;  %3541 = vmatmul.bf16.gmra.mxu1 %v3282_v13  ;;  %v5727_v6 = vld [vmem:[%s8694_s1 + $0x814] sm:$0xf0]  ;;  %v3298_v44 = vrot.slane %v3296_v43, 3  ;;  %v5316_v43 = vld [vmem:[%s8694_s1 + $0x800] sm:$0xf] }
 0x283   : > { %3575 = vmatmul.bf16.gmra.mxu2 %v3273_v48  ;;  %v5325_v17 = vor.u32 %v5727_v6, %v5324_v35 }
 0x284   : > { %v8387_v10 = vadd.f32 %v2711_v25, %v8062_v14  ;;  %v3293_v14 = vshrl.u32 %v8097_v58, 16  ;;  %v3174_v25 = vld [vmem:[%s6069_s23 + $0x60] sm:$0x77] }
 0x285   : > { %3882 = vmatpush.bf16.msra.mxu0 %v5325_v17  ;;  %v3208_v23 = vunpack.c.l.b16 %v3174_v25  ;;  %v5317_v17 = vor.u32 %v5725_v50, %v5316_v43 }
 0x286   : > { %3609 = vmatmul.bf16.gmra.mxu3 %v3282_v13  ;;  %v2679_v46 = vpop.f32.mrf.mxu2  ;;  %v3295_v15 = vrot.slane %v3293_v14, 2  ;;  %v3290_v13 = vor.u32 %v3289_v40, %v3286_v56 }
 0x287   : > { %v2613_v21 = vpop.f32.mrf.mxu0  ;;  %v2647_v30 = vpop.f32.mrf.mxu1  ;;  %v8448_v37 = vpack.c.b16 %v3208_v23, %v3208_v23 }
 0x288   : > { %v2648_v47 = vadd.f32 %v2647_v30, %v2613_v21  ;;  %v3299_v38 = vor.u32 %v3298_v44, %v3295_v15  ;;  %v3291_v6 = vsel %vm3212_vm4, %v8371_v41, %v3290_v13 }
 0x289   : > { %v2713_v28 = vpop.f32.mrf.mxu3  ;;  %3883 = vmatpush.bf16.msra.mxu0 %v5317_v17  ;;  %v3302_v15 = vshrl.u32 %v8448_v37, 16 }
 0x28a   : > { %v2714_v39 = vadd.f32 %v2713_v28, %v2679_v46  ;;  %v8423_v48 = vadd.f32 %v2648_v47, %v8103_v61  ;;  %v5382_v61 = vld [vmem:[%s8694_s1 + $0x888] sm:$0xf0]  ;;  %v3300_v56 = vsel %vm3212_vm4, %v8373_v59, %v3299_v38  ;;  %v3305_v59 = vshll.u32 %v8448_v37, 16 }
 0x28b   : > { %v5385_v14 = vor.u32 %v5740_v55, %v5382_v61 }
 0x28c   : > { %v8420_v5 = vadd.f32 %v2714_v39, %v8100_v57  ;;  %v3209_v57 = vunpack.c.h.b16 %v3174_v25  ;;  %v5381_v39 = vor.u32 %v5741_v2, %v5380_v33 }
 0x28d   : > { %3985 = vmatpush.bf16.msra.mxu3 %v5385_v14 }
 0x28e   : > { %v2681_v4 = vpop.f32.mrf.mxu2  ;;  %v8455_v40 = vpack.c.b16 %v3209_v57, %v3209_v57  ;;  %3917 = vmatpush.bf16.msra.mxu1 %v5381_v39 }
 0x28f   : > { %v3027_v46 = vpop.f32.mrf.mxu0  ;;  %v3061_v28 = vpop.f32.mrf.mxu1 }
 0x290   : > { %v3062_v21 = vadd.f32 %v3061_v28, %v3027_v46  ;;  %v3311_v44 = vshrl.u32 %v8455_v40, 16  ;;  %v3314_v25 = vshll.u32 %v8455_v40, 16 }
 0x291   : > { %v2715_v35 = vpop.f32.mrf.mxu3 }
 0x292   : > { %v2716_v8 = vadd.f32 %v2715_v35, %v2681_v4  ;;  %v8461_v30 = vadd.f32 %v3062_v21, %v8146_v45  ;;  %3512 = vmatmul.bf16.gmra.mxu0 %v3291_v6  ;;  %3546 = vmatmul.bf16.gmra.mxu1 %v3300_v56  ;;  %v3307_v45 = vrot.slane %v3305_v59, 3  ;;  %v3313_v57 = vrot.slane %v3311_v44, 2 }
 0x293   : > { %3580 = vmatmul.bf16.gmra.mxu2 %v3291_v6  ;;  %v3316_v19 = vrot.slane %v3314_v25, 3 }
 0x294   : > { %v8458_v41 = vadd.f32 %v2716_v8, %v8143_v27  ;;  %v3304_v27 = vrot.slane %v3302_v15, 2 }
 0x295   : > { %v3317_v33 = vor.u32 %v3316_v19, %v3313_v57 }
 0x296   : > { %3614 = vmatmul.bf16.gmra.mxu3 %v3300_v56  ;;  %v3095_v47 = vpop.f32.mrf.mxu2  ;;  %v3308_v50 = vor.u32 %v3307_v45, %v3304_v27  ;;  %v3645_v56 = vld [vmem:[%s6069_s23 + $0x10] sm:$0x88] }
 0x297   : > { %v3029_v32 = vpop.f32.mrf.mxu0  ;;  %v3063_v55 = vpop.f32.mrf.mxu1  ;;  %v3318_v46 = vsel %vm3212_vm4, %v3299_v38, %v3317_v33  ;;  %v3680_v21 = vunpack.c.h.b16 %v3645_v56 }
 0x298   : > { %v3064_v61 = vadd.f32 %v3063_v55, %v3029_v32  ;;  %v3309_v8 = vsel %vm3212_vm4, %v3290_v13, %v3308_v50  ;;  %v3688_v55 = vrot.slane %v7883_v29, 3 }
 0x299   : > { %v3129_v23 = vpop.f32.mrf.mxu3 }
 0x29a   : > { %v3130_v18 = vadd.f32 %v3129_v23, %v3095_v47  ;;  %v8471_v43 = vadd.f32 %v3064_v61, %v8164_v52  ;;  %v3679_v52 = vunpack.c.l.b16 %v3645_v56 }
 0x29c   : > { %v8468_v14 = vadd.f32 %v3130_v18, %v8161_v60  ;;  %v3681_v38 = vpack.c.b16 %v2794_v36, %v3679_v52  ;;  %v3685_v18 = vrot.slane %v7872_v42, 3 }
 0x29e   : > { %v3097_v4 = vpop.f32.mrf.mxu2  ;;  %v3684_v27 = vrot.slane %v3681_v38, 3 }
 0x29f   : > { %v3032_v17 = vpop.f32.mrf.mxu0  ;;  %v3066_v2 = vpop.f32.mrf.mxu1 }
 0x2a0   : > { %v3067_v28 = vadd.f32 %v3066_v2, %v3032_v17 }
 0x2a1   : > { %v3131_v35 = vpop.f32.mrf.mxu3 }
 0x2a2   : > { %v3132_v6 = vadd.f32 %v3131_v35, %v3097_v4  ;;  %v8480_v60 = vadd.f32 %v3067_v28, %v8205_v9  ;;  %3517 = vmatmul.bf16.gmra.mxu0 %v3309_v8  ;;  %3551 = vmatmul.bf16.gmra.mxu1 %v3318_v46 }
 0x2a3   : > { %3585 = vmatmul.bf16.gmra.mxu2 %v3309_v8 }
 0x2a4   : > { %v8477_v39 = vadd.f32 %v3132_v6, %v8199_v53  ;;  %v3682_v53 = vpack.c.b16 %v2795_v22, %v3680_v21  ;;  %v3686_v22 = vsel %vm3683_vm5, %v3684_v27, %v3685_v18 }
 0x2a6   : > { %3619 = vmatmul.bf16.gmra.mxu3 %v3318_v46  ;;  %v3100_v15 = vpop.f32.mrf.mxu2  ;;  %v3687_v32 = vrot.slane %v3682_v53, 3 }
 0x2a7   : > { %v3034_v13 = vpop.f32.mrf.mxu0  ;;  %v3068_v25 = vpop.f32.mrf.mxu1 }
 0x2a8   : > { %v3069_v47 = vadd.f32 %v3068_v25, %v3034_v13 }
 0x2a9   : > { %v3134_v59 = vpop.f32.mrf.mxu3 }
 0x2aa   : > { %v3135_v44 = vadd.f32 %v3134_v59, %v3100_v15  ;;  %v8490_v23 = vadd.f32 %v3069_v47, %v8235_v54 }
 0x2ac   : > { %v8487_v9 = vadd.f32 %v3135_v44, %v8223_v63  ;;  %v3689_v63 = vsel %vm3683_vm5, %v3687_v32, %v3688_v55 }
 0x2ae   : > { %v3102_v45 = vpop.f32.mrf.mxu2 }
 0x2af   : > { %v3037_v19 = vpop.f32.mrf.mxu0  ;;  %v3071_v3 = vpop.f32.mrf.mxu1 }
 0x2b0   : > { %v3072_v61 = vadd.f32 %v3071_v3, %v3037_v19 }
 0x2b1   : > { %v3136_v57 = vpop.f32.mrf.mxu3 }
 0x2b2   : > { %v3137_v36 = vadd.f32 %v3136_v57, %v3102_v45  ;;  %v8500_v50 = vadd.f32 %v3072_v61, %v8265_v16  ;;  %3884 = vmatmul.bf16.vlgmr.msra.gmra.mxu0 %v3686_v22  ;;  %3918 = vmatmul.bf16.vlgmr.msra.gmra.mxu1 %v3689_v63  ;;  %v3692_v16 = vrot.slane %v7949_v11, 3 }
 0x2b3   : > { %3952 = vmatmul.bf16.vlgmr.msra.gmra.mxu2 %v3686_v22 }
 0x2b4   : > { %v8497_v54 = vadd.f32 %v3137_v36, %v8261_v1  ;;  %v3690_v1 = vrot.slane %v7947_v62, 3  ;;  %v3693_v15 = vsel %vm3683_vm5, %v3688_v55, %v3692_v16 }
 0x2b6   : > { %3986 = vmatmul.bf16.vlgmr.msra.gmra.mxu3 %v3689_v63  ;;  %v3105_v42 = vpop.f32.mrf.mxu2  ;;  %v3691_v21 = vsel %vm3683_vm5, %v3685_v18, %v3690_v1 }
 0x2b7   : > { %v3039_v4 = vpop.f32.mrf.mxu0  ;;  %v3073_v35 = vpop.f32.mrf.mxu1 }
 0x2b8   : > { %v3074_v6 = vadd.f32 %v3073_v35, %v3039_v4 }
 0x2b9   : > { %v3139_v29 = vpop.f32.mrf.mxu3 }
 0x2ba   : > { %v3140_v33 = vadd.f32 %v3139_v29, %v3105_v42  ;;  %v8506_v2 = vadd.f32 %v3074_v6, %v8295_v31 }
 0x2bc   : > { %v8503_v17 = vadd.f32 %v3140_v33, %v8283_v12 }
 0x2be   : > { %v3107_v8 = vpop.f32.mrf.mxu2 }
 0x2bf   : > { %v3042_v56 = vpop.f32.mrf.mxu0  ;;  %v3076_v52 = vpop.f32.mrf.mxu1 }
 0x2c0   : > { %v3077_v59 = vadd.f32 %v3076_v52, %v3042_v56 }
 0x2c1   : > { %v3141_v46 = vpop.f32.mrf.mxu3 }
 0x2c2   : > { %v3142_v28 = vadd.f32 %v3141_v46, %v3107_v8  ;;  %v8516_v31 = vadd.f32 %v3077_v59, %v8330_v34  ;;  %3889 = vmatmul.bf16.gmra.mxu0 %v3691_v21  ;;  %3923 = vmatmul.bf16.gmra.mxu1 %v3693_v15  ;;  %v3696_v34 = vrot.slane %v8029_v0, 3 }
 0x2c3   : > { %3957 = vmatmul.bf16.gmra.mxu2 %v3691_v21 }
 0x2c4   : > { %v8513_v12 = vadd.f32 %v3142_v28, %v8324_v20  ;;  %v3694_v20 = vrot.slane %v8027_v24, 3  ;;  %v3697_v36 = vsel %vm3683_vm5, %v3692_v16, %v3696_v34 }
 0x2c6   : > { %3991 = vmatmul.bf16.gmra.mxu3 %v3693_v15  ;;  %v3110_v62 = vpop.f32.mrf.mxu2  ;;  %v3695_v57 = vsel %vm3683_vm5, %v3690_v1, %v3694_v20 }
 0x2c7   : > { %v3044_v13 = vpop.f32.mrf.mxu0  ;;  %v3078_v25 = vpop.f32.mrf.mxu1 }
 0x2c8   : > { %v3079_v38 = vadd.f32 %v3078_v25, %v3044_v13 }
 0x2c9   : > { %v3144_v11 = vpop.f32.mrf.mxu3 }
 0x2ca   : > { %v3145_v44 = vadd.f32 %v3144_v11, %v3110_v62  ;;  %v8522_v47 = vadd.f32 %v3079_v38, %v8360_v49 }
 0x2cc   : > { %v8519_v53 = vadd.f32 %v3145_v44, %v8357_v51 }
 0x2ce   : > { %v3112_v27 = vpop.f32.mrf.mxu2 }
 0x2cf   : > { %v3047_v55 = vpop.f32.mrf.mxu0  ;;  %v3081_v45 = vpop.f32.mrf.mxu1 }
 0x2d0   : > { %v3082_v19 = vadd.f32 %v3081_v45, %v3047_v55 }
 0x2d1   : > { %v3146_v18 = vpop.f32.mrf.mxu3 }
 0x2d2   : > { %v3147_v32 = vadd.f32 %v3146_v18, %v3112_v27  ;;  %v8532_v49 = vadd.f32 %v3082_v19, %v8399_v26  ;;  %3894 = vmatmul.bf16.gmra.mxu0 %v3695_v57  ;;  %3928 = vmatmul.bf16.gmra.mxu1 %v3697_v36  ;;  %v3700_v26 = vrot.slane %v8097_v58, 3 }
 0x2d3   : > { %3962 = vmatmul.bf16.gmra.mxu2 %v3695_v57 }
 0x2d4   : > { %v8529_v51 = vadd.f32 %v3147_v32, %v8387_v10  ;;  %v3698_v10 = vrot.slane %v8095_v7, 3  ;;  %v3701_v8 = vsel %vm3683_vm5, %v3696_v34, %v3700_v26 }
 0x2d6   : > { %3996 = vmatmul.bf16.gmra.mxu3 %v3697_v36  ;;  %v3115_v24 = vpop.f32.mrf.mxu2  ;;  %v3699_v16 = vsel %vm3683_vm5, %v3694_v20, %v3698_v10 }
 0x2d7   : > { %v3049_v22 = vpop.f32.mrf.mxu0  ;;  %v3083_v63 = vpop.f32.mrf.mxu1 }
 0x2d8   : > { %v3084_v61 = vadd.f32 %v3083_v63, %v3049_v22 }
 0x2d9   : > { %v3149_v0 = vpop.f32.mrf.mxu3 }
 0x2da   : > { %v3150_v3 = vadd.f32 %v3149_v0, %v3115_v24  ;;  %v8538_v29 = vadd.f32 %v3084_v61, %v8423_v48 }
 0x2dc   : > { %v8535_v42 = vadd.f32 %v3150_v3, %v8420_v5 }
 0x2de   : > { %v3117_v33 = vpop.f32.mrf.mxu2 }
 0x2df   : > { %v3498_v6 = vpop.f32.mrf.mxu0  ;;  %v3532_v1 = vpop.f32.mrf.mxu1 }
 0x2e0   : > { %v3533_v46 = vadd.f32 %v3532_v1, %v3498_v6 }
 0x2e1   : > { %v3151_v4 = vpop.f32.mrf.mxu3 }
 0x2e2   : > { %v3152_v35 = vadd.f32 %v3151_v4, %v3117_v33  ;;  %v8548_v48 = vadd.f32 %v3533_v46, %v8461_v30  ;;  %3899 = vmatmul.bf16.gmra.mxu0 %v3699_v16  ;;  %3933 = vmatmul.bf16.gmra.mxu1 %v3701_v8  ;;  %v3704_v30 = vrot.slane %v8455_v40, 3 }
 0x2e3   : > { %3967 = vmatmul.bf16.gmra.mxu2 %v3699_v16 }
 0x2e4   : > { %v8545_v5 = vadd.f32 %v3152_v35, %v8458_v41  ;;  %v3702_v41 = vrot.slane %v8448_v37, 3  ;;  %v3705_v20 = vsel %vm3683_vm5, %v3700_v26, %v3704_v30 }
 0x2e6   : > { %4001 = vmatmul.bf16.gmra.mxu3 %v3701_v8  ;;  %v3566_v7 = vpop.f32.mrf.mxu2  ;;  %v3703_v38 = vsel %vm3683_vm5, %v3698_v10, %v3702_v41 }
 0x2e7   : > { %v3500_v56 = vpop.f32.mrf.mxu0  ;;  %v3534_v52 = vpop.f32.mrf.mxu1 }
 0x2e8   : > { %v3535_v21 = vadd.f32 %v3534_v52, %v3500_v56 }
 0x2e9   : > { %v3600_v58 = vpop.f32.mrf.mxu3 }
 0x2ea   : > { %v3601_v28 = vadd.f32 %v3600_v58, %v3566_v7  ;;  %v8554_v59 = vadd.f32 %v3535_v21, %v8471_v43 }
 0x2ec   : > { %v8551_v15 = vadd.f32 %v3601_v28, %v8468_v14 }
 0x2ee   : > { %v3568_v62 = vpop.f32.mrf.mxu2 }
 0x2ef   : > { %v3503_v13 = vpop.f32.mrf.mxu0  ;;  %v3537_v25 = vpop.f32.mrf.mxu1 }
 0x2f0   : > { %v3538_v34 = vadd.f32 %v3537_v25, %v3503_v13 }
 0x2f1   : > { %v3602_v11 = vpop.f32.mrf.mxu3 }
 0x2f2   : > { %v3603_v44 = vadd.f32 %v3602_v11, %v3568_v62  ;;  %v8564_v43 = vadd.f32 %v3538_v34, %v8480_v60  ;;  %3904 = vmatmul.bf16.gmra.mxu0 %v3703_v38  ;;  %3938 = vmatmul.bf16.gmra.mxu1 %v3705_v20 }
 0x2f3   : > { %3972 = vmatmul.bf16.gmra.mxu2 %v3703_v38 }
 0x2f4   : > { %v8561_v14 = vadd.f32 %v3603_v44, %v8477_v39 }
 0x2f6   : > { %4006 = vmatmul.bf16.gmra.mxu3 %v3705_v20  ;;  %v3571_v37 = vpop.f32.mrf.mxu2 }
 0x2f7   : > { %v3505_v18 = vpop.f32.mrf.mxu0  ;;  %v3539_v32 = vpop.f32.mrf.mxu1 }
 0x2f8   : > { %v3540_v55 = vadd.f32 %v3539_v32, %v3505_v18 }
 0x2f9   : > { %v3605_v40 = vpop.f32.mrf.mxu3 }
 0x2fa   : > { %v3606_v27 = vadd.f32 %v3605_v40, %v3571_v37  ;;  %v8570_v57 = vadd.f32 %v3540_v55, %v8490_v23 }
 0x2fc   : > { %v8567_v45 = vadd.f32 %v3606_v27, %v8487_v9 }
 0x2fe   : > { %v3573_v39 = vpop.f32.mrf.mxu2 }
 0x2ff   : > { %v3508_v19 = vpop.f32.mrf.mxu0  ;;  %v3542_v24 = vpop.f32.mrf.mxu1 }
 0x300   : > { %v3543_v0 = vadd.f32 %v3542_v24, %v3508_v19 }
 0x301   : > { %v3607_v36 = vpop.f32.mrf.mxu3 }
 0x302   : > { %v3608_v60 = vadd.f32 %v3607_v36, %v3573_v39  ;;  %v8576_v22 = vadd.f32 %v3543_v0, %v8500_v50 }
 0x304   : > { %v8573_v3 = vadd.f32 %v3608_v60, %v8497_v54 }
 0x306   : > { %v3576_v63 = vpop.f32.mrf.mxu2 }
 0x307   : > { %v3510_v9 = vpop.f32.mrf.mxu0  ;;  %v3544_v26 = vpop.f32.mrf.mxu1 }
 0x308   : > { %v3545_v33 = vadd.f32 %v3544_v26, %v3510_v9 }
 0x309   : > { %v3610_v61 = vpop.f32.mrf.mxu3 }
 0x30a   : > { %v3611_v10 = vadd.f32 %v3610_v61, %v3576_v63  ;;  %v8582_v4 = vadd.f32 %v3545_v33, %v8506_v2 }
 0x30c   : > { %v8579_v23 = vadd.f32 %v3611_v10, %v8503_v17 }
 0x30e   : > { %v3578_v35 = vpop.f32.mrf.mxu2 }
 0x30f   : > { %v3513_v54 = vpop.f32.mrf.mxu0  ;;  %v3547_v16 = vpop.f32.mrf.mxu1 }
 0x310   : > { %v3548_v8 = vadd.f32 %v3547_v16, %v3513_v54 }
 0x311   : > { %v3612_v6 = vpop.f32.mrf.mxu3 }
 0x312   : > { %v3613_v1 = vadd.f32 %v3612_v6, %v3578_v35  ;;  %v8588_v46 = vadd.f32 %v3548_v8, %v8516_v31 }
 0x314   : > { %v8585_v50 = vadd.f32 %v3613_v1, %v8513_v12 }
 0x316   : > { %v3581_v7 = vpop.f32.mrf.mxu2 }
 0x317   : > { %v3515_v17 = vpop.f32.mrf.mxu0  ;;  %v3549_v56 = vpop.f32.mrf.mxu1 }
 0x318   : > { %v3550_v52 = vadd.f32 %v3549_v56, %v3515_v17 }
 0x319   : > { %v3615_v58 = vpop.f32.mrf.mxu3 }
 0x31a   : > { %v3616_v28 = vadd.f32 %v3615_v58, %v3581_v7  ;;  %v8594_v21 = vadd.f32 %v3550_v52, %v8522_v47 }
 0x31c   : > { %v8591_v2 = vadd.f32 %v3616_v28, %v8519_v53 }
 0x31e   : > { %v3583_v41 = vpop.f32.mrf.mxu2 }
 0x31f   : > { %v3518_v12 = vpop.f32.mrf.mxu0  ;;  %v3552_v11 = vpop.f32.mrf.mxu1 }
 0x320   : > { %v3553_v44 = vadd.f32 %v3552_v11, %v3518_v12 }
 0x321   : > { %v3617_v30 = vpop.f32.mrf.mxu3 }
 0x322   : > { %v3618_v62 = vadd.f32 %v3617_v30, %v3583_v41  ;;  %v8600_v13 = vadd.f32 %v3553_v44, %v8532_v49 }
 0x324   : > { %v8597_v31 = vadd.f32 %v3618_v62, %v8529_v51  ;;  %v235_v51 = vld [vmem:[%s8695_s2] sm:$0x3] }
 0x325   : > { %v8612_v36 = vperm.slane %v235_v51, 0  ;;  %v8625_v63 = vperm.slane %v235_v51, 1 }
 0x326   : > { %v3586_v25 = vpop.f32.mrf.mxu2 }
 0x327   : > { %v3520_v20 = vpop.f32.mrf.mxu0  ;;  %v3554_v34 = vpop.f32.mrf.mxu1 }
 0x328   : > { %v3555_v47 = vadd.f32 %v3554_v34, %v3520_v20 }
 0x329   : > { %v3620_v38 = vpop.f32.mrf.mxu3 }
 0x32a   : > { %v3621_v53 = vadd.f32 %v3620_v38, %v3586_v25  ;;  %v8606_v40 = vadd.f32 %v3555_v47, %v8538_v29 }
 0x32c   : > { %v8603_v37 = vadd.f32 %v3621_v53, %v8535_v42 }
 0x32e   : > { %v3588_v27 = vpop.f32.mrf.mxu2 }
 0x32f   : > { %v3885_v32 = vpop.f32.mrf.mxu0  ;;  %v3919_v55 = vpop.f32.mrf.mxu1 }
 0x330   : > { %v3920_v39 = vadd.f32 %v3919_v55, %v3885_v32 }
 0x331   : > { %v3622_v18 = vpop.f32.mrf.mxu3 }
 0x332   : > { %v3623_v49 = vadd.f32 %v3622_v18, %v3588_v27  ;;  %v4012_v42 = vadd.f32 %v3920_v39, %v8548_v48 }
 0x334   : > { %v8615_v60 = vadd.f32 %v3623_v49, %v8545_v5  ;;  %v4037_v29 = vadd.f32 %v8612_v36, %v4012_v42 }
 0x336   : > { %4057 = vst [vmem:[%s8621_s26] sm:$0xff] %v4037_v29  ;;  %v3953_v19 = vpop.f32.mrf.mxu2 }
 0x337   : > { %v3887_v5 = vpop.f32.mrf.mxu0  ;;  %v3921_v61 = vpop.f32.mrf.mxu1 }
 0x338   : > { %v3922_v10 = vadd.f32 %v3921_v61, %v3887_v5 }
 0x339   : > { %v3987_v24 = vpop.f32.mrf.mxu3 }
 0x33a   : > { %v3988_v0 = vadd.f32 %v3987_v24, %v3953_v19  ;;  %v4014_v9 = vadd.f32 %v3922_v10, %v8554_v59 }
 0x33c   : > { %v4013_v48 = vadd.f32 %v3988_v0, %v8551_v15  ;;  %v4039_v33 = vadd.f32 %v8612_v36, %v4014_v9 }
 0x33e   : > { %v4038_v26 = vadd.f32 %v8625_v63, %v4013_v48  ;;  %4059 = vst [vmem:[%s8621_s26 + $0x10] sm:$0xff] %v4039_v33  ;;  %v3955_v35 = vpop.f32.mrf.mxu2 }
 0x33f   : > { %v3890_v54 = vpop.f32.mrf.mxu0  ;;  %v3924_v16 = vpop.f32.mrf.mxu1 }
 0x340   : > { %4058 = vst [vmem:[%s8621_s26 + $0x8] sm:$0xff] %v4038_v26  ;;  %v3925_v8 = vadd.f32 %v3924_v16, %v3890_v54 }
 0x341   : > { %v3989_v6 = vpop.f32.mrf.mxu3 }
 0x342   : > { %v3990_v1 = vadd.f32 %v3989_v6, %v3955_v35  ;;  %v4016_v15 = vadd.f32 %v3925_v8, %v8564_v43 }
 0x344   : > { %v4015_v7 = vadd.f32 %v3990_v1, %v8561_v14  ;;  %v4041_v58 = vadd.f32 %v8612_v36, %v4016_v15 }
 0x346   : > { %v4040_v59 = vadd.f32 %v8625_v63, %v4015_v7  ;;  %4061 = vst [vmem:[%s8621_s26 + $0x20] sm:$0xff] %v4041_v58  ;;  %v3958_v28 = vpop.f32.mrf.mxu2 }
 0x347   : > { %v3892_v52 = vpop.f32.mrf.mxu0  ;;  %v3926_v41 = vpop.f32.mrf.mxu1 }
 0x348   : > { %4060 = vst [vmem:[%s8621_s26 + $0x18] sm:$0xff] %v4040_v59  ;;  %v3927_v30 = vadd.f32 %v3926_v41, %v3892_v52 }
 0x349   : > { %v3992_v17 = vpop.f32.mrf.mxu3 }
 0x34a   : > { %v3993_v56 = vadd.f32 %v3992_v17, %v3958_v28  ;;  %v4018_v14 = vadd.f32 %v3927_v30, %v8570_v57 }
 0x34c   : > { %v4017_v62 = vadd.f32 %v3993_v56, %v8567_v45  ;;  %v4043_v12 = vadd.f32 %v8612_v36, %v4018_v14 }
 0x34e   : > { %v4042_v43 = vadd.f32 %v8625_v63, %v4017_v62  ;;  %4063 = vst [vmem:[%s8621_s26 + $0x30] sm:$0xff] %v4043_v12  ;;  %v3960_v11 = vpop.f32.mrf.mxu2 }
 0x34f   : > { %v3895_v38 = vpop.f32.mrf.mxu0  ;;  %v3929_v53 = vpop.f32.mrf.mxu1 }
 0x350   : > { %4062 = vst [vmem:[%s8621_s26 + $0x28] sm:$0xff] %v4042_v43  ;;  %v3930_v20 = vadd.f32 %v3929_v53, %v3895_v38 }
 0x351   : > { %v3994_v44 = vpop.f32.mrf.mxu3 }
 0x352   : > { %v3995_v25 = vadd.f32 %v3994_v44, %v3960_v11  ;;  %v4020_v45 = vadd.f32 %v3930_v20, %v8576_v22 }
 0x354   : > { %v4019_v34 = vadd.f32 %v3995_v25, %v8573_v3  ;;  %v4045_v47 = vadd.f32 %v8612_v36, %v4020_v45 }
 0x356   : > { %v4044_v57 = vadd.f32 %v8625_v63, %v4019_v34  ;;  %4065 = vst [vmem:[%s8621_s26 + $0x40] sm:$0xff] %v4045_v47  ;;  %v3963_v51 = vpop.f32.mrf.mxu2 }
 0x357   : > { %v3897_v49 = vpop.f32.mrf.mxu0  ;;  %v3931_v32 = vpop.f32.mrf.mxu1 }
 0x358   : > { %4064 = vst [vmem:[%s8621_s26 + $0x38] sm:$0xff] %v4044_v57  ;;  %v3932_v55 = vadd.f32 %v3931_v32, %v3897_v49 }
 0x359   : > { %v3997_v27 = vpop.f32.mrf.mxu3 }
 0x35a   : > { %v3998_v18 = vadd.f32 %v3997_v27, %v3963_v51  ;;  %v4022_v3 = vadd.f32 %v3932_v55, %v8582_v4 }
 0x35c   : > { %v4021_v39 = vadd.f32 %v3998_v18, %v8579_v23  ;;  %v4047_v42 = vadd.f32 %v8612_v36, %v4022_v3 }
 0x35e   : > { %v4046_v22 = vadd.f32 %v8625_v63, %v4021_v39  ;;  %4067 = vst [vmem:[%s8621_s26 + $0x50] sm:$0xff] %v4047_v42  ;;  %v3965_v29 = vpop.f32.mrf.mxu2 }
 0x35f   : > { %v3900_v0 = vpop.f32.mrf.mxu0  ;;  %v3934_v5 = vpop.f32.mrf.mxu1 }
 0x360   : > { %4066 = vst [vmem:[%s8621_s26 + $0x48] sm:$0xff] %v4046_v22  ;;  %v3935_v61 = vadd.f32 %v3934_v5, %v3900_v0 }
 0x361   : > { %v3999_v19 = vpop.f32.mrf.mxu3 }
 0x362   : > { %v4000_v24 = vadd.f32 %v3999_v19, %v3965_v29  ;;  %v4024_v23 = vadd.f32 %v3935_v61, %v8588_v46 }
 0x364   : > { %v4023_v10 = vadd.f32 %v4000_v24, %v8585_v50  ;;  %v4049_v48 = vadd.f32 %v8612_v36, %v4024_v23 }
 0x366   : > { %v4048_v4 = vadd.f32 %v8625_v63, %v4023_v10  ;;  %4069 = vst [vmem:[%s8621_s26 + $0x60] sm:$0xff] %v4049_v48  ;;  %v3968_v9 = vpop.f32.mrf.mxu2 }
 0x367   : > { %v3902_v35 = vpop.f32.mrf.mxu0  ;;  %v3936_v6 = vpop.f32.mrf.mxu1 }
 0x368   : > { %4068 = vst [vmem:[%s8621_s26 + $0x58] sm:$0xff] %v4048_v4  ;;  %v3937_v1 = vadd.f32 %v3936_v6, %v3902_v35 }
 0x369   : > { %v4002_v26 = vpop.f32.mrf.mxu3 }
 0x36a   : > { %v4003_v33 = vadd.f32 %v4002_v26, %v3968_v9  ;;  %v4026_v50 = vadd.f32 %v3937_v1, %v8594_v21 }
 0x36c   : > { %v4025_v54 = vadd.f32 %v4003_v33, %v8591_v2  ;;  %v4051_v16 = vadd.f32 %v8612_v36, %v4026_v50 }
 0x36e   : > { %v4050_v46 = vadd.f32 %v8625_v63, %v4025_v54  ;;  %4071 = vst [vmem:[%s8621_s26 + $0x70] sm:$0xff] %v4051_v16  ;;  %v3970_v8 = vpop.f32.mrf.mxu2 }
 0x36f   : > { %v3905_v59 = vpop.f32.mrf.mxu0  ;;  %v3939_v58 = vpop.f32.mrf.mxu1 }
 0x370   : > { %4070 = vst [vmem:[%s8621_s26 + $0x68] sm:$0xff] %v4050_v46  ;;  %v3940_v28 = vadd.f32 %v3939_v58, %v3905_v59 }
 0x371   : > { %v4004_v7 = vpop.f32.mrf.mxu3 }
 0x372   : > { %v4005_v15 = vadd.f32 %v4004_v7, %v3970_v8  ;;  %v4028_v2 = vadd.f32 %v3940_v28, %v8600_v13 }
 0x374   : > { %v4027_v17 = vadd.f32 %v4005_v15, %v8597_v31  ;;  %v4053_v56 = vadd.f32 %v8612_v36, %v4028_v2 }
 0x376   : > { %v4052_v21 = vadd.f32 %v8625_v63, %v4027_v17  ;;  %4073 = vst [vmem:[%s8621_s26 + $0x80] sm:$0xff] %v4053_v56  ;;  %v3973_v52 = vpop.f32.mrf.mxu2 }
 0x377   : > { %v3907_v62 = vpop.f32.mrf.mxu0  ;;  %v3941_v14 = vpop.f32.mrf.mxu1 }
 0x378   : > { %4072 = vst [vmem:[%s8621_s26 + $0x78] sm:$0xff] %v4052_v21  ;;  %v3942_v43 = vadd.f32 %v3941_v14, %v3907_v62 }
 0x379   : > { %v4007_v41 = vpop.f32.mrf.mxu3 }
 0x37a   : > { %v4008_v30 = vadd.f32 %v4007_v41, %v3973_v52  ;;  %v4030_v31 = vadd.f32 %v3942_v43, %v8606_v40 }
 0x37c   : > { %v4029_v12 = vadd.f32 %v4008_v30, %v8603_v37  ;;  %v4055_v11 = vadd.f32 %v8612_v36, %v4030_v31 }
 0x37e   : > { %v4054_v13 = vadd.f32 %v8625_v63, %v4029_v12  ;;  %4075 = vst [vmem:[%s8621_s26 + $0x90] sm:$0xff] %v4055_v11  ;;  %v3975_v44 = vpop.f32.mrf.mxu2 }
 0x380   : > { %4074 = vst [vmem:[%s8621_s26 + $0x88] sm:$0xff] %v4054_v13 }
 0x381   : > { %v4009_v25 = vpop.f32.mrf.mxu3 }
 0x382   : > { %v4010_v38 = vadd.f32 %v4009_v25, %v3975_v44 }
 0x384   : > { %v4031_v53 = vadd.f32 %v4010_v38, %v8615_v60 }
 0x386   : > { %v4056_v20 = vadd.f32 %v8625_v63, %v4031_v53 }
 0x388   : > { %4076 = vst [vmem:[%s8621_s26 + $0x98] sm:$0xff] %v4056_v20 }
 0x389 PF: > { %s13_s14 = sadd.s32 1, %s5804_s14   ;;  %s8697_s12 = smov %s5800_s13 }
 0x38a   : > { %p10_p5 = scmp.ge.s32.totalorder %s13_s14, 4   ;;  %s8698_s13 = smov %s8700_s15 }
 0x38c   :  { %12 = sbr.rel (!%p10_p5) target bundleno = 2 (0x2), region = 68 }

</bundles_post_ra>
